<compile_context>
chip_gen: v6e
topology: v6e:2x2x1
jax: 0.10.0
libtpu: 0.0.40
codegen_flags: <defaults>
</compile_context>

<pallas_src>
import functools

import jax
import jax.numpy as jnp
from jax import lax
from jax.experimental import pallas as pl
from jax.experimental.pallas import tpu as pltpu

EXPANSION = 4            # Bottleneck expansion
BN_EPS = 1e-5
MM_DTYPE = jnp.bfloat16  # inter-layer activation / weight dtype (MXU inputs)


# ---------------------------------------------------------------------------
# Pallas kernels: fused 1x1-conv (channel matmul) + bias
#   (+ residual add | + fused downsample matmul) (+ ReLU)
# Inputs arrive bf16; accumulate and do the epilogue in f32.
# ---------------------------------------------------------------------------
def _mm_bias_kernel(x_ref, w_ref, b_ref, o_ref, *, relu):
    y = jnp.dot(x_ref[...], w_ref[...], preferred_element_type=jnp.float32)
    y = y + b_ref[...]
    if relu:
        y = jnp.maximum(y, 0.0)
    o_ref[...] = y.astype(o_ref.dtype)


def _mm_bias_res_kernel(x_ref, w_ref, b_ref, id_ref, o_ref, *, relu):
    y = jnp.dot(x_ref[...], w_ref[...], preferred_element_type=jnp.float32)
    y = y + b_ref[...] + id_ref[...].astype(jnp.float32)   # bf16 residual, one upcast
    if relu:
        y = jnp.maximum(y, 0.0)
    o_ref[...] = y.astype(o_ref.dtype)


def _mm_bias_ds_kernel(x_ref, w_ref, b_ref, xs_ref, wd_ref, o_ref, *, relu):
    # conv3 matmul + fused downsample-branch matmul (identity never hits HBM).
    y = jnp.dot(x_ref[...], w_ref[...], preferred_element_type=jnp.float32)
    y = y + jnp.dot(xs_ref[...], wd_ref[...], preferred_element_type=jnp.float32)
    y = y + b_ref[...]
    if relu:
        y = jnp.maximum(y, 0.0)
    o_ref[...] = y.astype(o_ref.dtype)


def _round_up(x, m):
    return ((x + m - 1) // m) * m


@functools.lru_cache(maxsize=None)
def _vmem_limit_bytes():
    # Derive per-generation; conservative fallback that is safe on v7x too.
    try:
        cap = int(pltpu.get_tpu_info().vmem_capacity_bytes)
    except Exception:
        cap = 64 * 1024 * 1024
    return max(32 * 1024 * 1024, min(int(cap * 0.75), 96 * 1024 * 1024))


def _pick_tm(m, cap):
    """Largest divisor of m that is <= cap and a multiple of 8 (or m itself)."""
    if m <= cap:
        return m
    for d in range(cap, 7, -1):
        if m % d == 0 and d % 8 == 0:
            return d
    return None


def matmul_bias_act(x2d, wt, bias_row, *, relu, residual=None,
                    ds_x=None, ds_w=None, out_dtype=MM_DTYPE):
    """(M, Cin) @ (Cin, Cout) + bias [+ residual | + ds_x @ ds_w] [+ ReLU]."""
    m_orig, cin = x2d.shape
    cout = wt.shape[1]
    cin_ds = 0 if ds_x is None else ds_x.shape[1]

    x2d = x2d.astype(MM_DTYPE)                      # no-op in the normal path
    if residual is not None:
        residual = residual.astype(MM_DTYPE)
    if ds_x is not None:
        ds_x = ds_x.astype(MM_DTYPE)

    # --- row tile: a divisor of M whenever possible (no pad/slice copies) ---
    cap = 1024 if max(cin, cin_ds) <= 1024 else 512
    m = m_orig
    tm = _pick_tm(m, cap)
    pad_rows = 0
    if tm is None:                                  # rare ragged fallback
        tm = min(cap, _round_up(m, 8))
        m = _round_up(m_orig, tm)
        pad_rows = m - m_orig
        x2d = jnp.pad(x2d, ((0, pad_rows), (0, 0)))
        if residual is not None:
            residual = jnp.pad(residual, ((0, pad_rows), (0, 0)))
        if ds_x is not None:
            ds_x = jnp.pad(ds_x, ((0, pad_rows), (0, 0)))

    # --- cout tile: lane-dense (multiple of 128) whenever cout allows -------
    if cout % 128 != 0:
        tn = cout           # small/odd channel count (e.g. 64): full extent
    elif cout <= 512:
        tn = cout
    elif cout % 512 == 0:
        tn = 512
    elif cout % 256 == 0:
        tn = 256
    else:
        tn = 128

    gm, gn = m // tm, cout // tn
    # Megacore: guarantee >=2 parallel blocks when the shape allows it.
    if gm * gn < 2:
        if cout % 128 == 0 and cout >= 256:
            tn = 128
        elif tm % 16 == 0 and tm >= 16:
            tm = tm // 2
        gm, gn = m // tm, cout // tn

    # --- grid order: minimise redundant weight / activation re-DMA ----------
    w_bytes_total = (cin + cin_ds) * cout * 2
    x_bytes_total = m * (cin + cin_ds) * 2
    swap = (gn - 1) * x_bytes_total < (gm - 1) * w_bytes_total
    if swap:
        grid = (gn, gm)
        row = lambda a, b: b
        col = lambda a, b: a
    else:
        grid = (gm, gn)
        row = lambda a, b: a
        col = lambda a, b: b

    in_specs = [
        pl.BlockSpec((tm, cin), lambda a, b: (row(a, b), 0)),   # activations bf16
        pl.BlockSpec((cin, tn), lambda a, b: (0, col(a, b))),   # folded weight bf16
        pl.BlockSpec((1, tn), lambda a, b: (0, col(a, b))),     # folded bias f32
    ]
    args = [x2d, wt, bias_row]

    flops = 2 * m * cin * cout
    bytes_accessed = (m * cin + cin * cout) * 2 + cout * 4 \
        + m * cout * jnp.dtype(out_dtype).itemsize

    if ds_x is not None:
        in_specs += [
            pl.BlockSpec((tm, cin_ds), lambda a, b: (row(a, b), 0)),
            pl.BlockSpec((cin_ds, tn), lambda a, b: (0, col(a, b))),
        ]
        args += [ds_x, ds_w]
        kernel = functools.partial(_mm_bias_ds_kernel, relu=relu)
        flops += 2 * m * cin_ds * cout
        bytes_accessed += (m * cin_ds + cin_ds * cout) * 2
    elif residual is not None:
        in_specs.append(
            pl.BlockSpec((tm, tn), lambda a, b: (row(a, b), col(a, b))))
        args.append(residual)
        kernel = functools.partial(_mm_bias_res_kernel, relu=relu)
        bytes_accessed += m * cout * 2
    else:
        kernel = functools.partial(_mm_bias_kernel, relu=relu)

    out = pl.pallas_call(
        kernel,
        out_shape=jax.ShapeDtypeStruct((m, cout), out_dtype),
        grid_spec=pltpu.PrefetchScalarGridSpec(
            num_scalar_prefetch=0,
            grid=grid,
            in_specs=in_specs,
            out_specs=pl.BlockSpec((tm, tn),
                                   lambda a, b: (row(a, b), col(a, b))),
        ),
        compiler_params=pltpu.CompilerParams(
            dimension_semantics=("parallel", "parallel"),
            vmem_limit_bytes=_vmem_limit_bytes()),
        cost_estimate=pl.CostEstimate(
            flops=int(flops), transcendentals=0,
            bytes_accessed=int(bytes_accessed)),
    )(*args)

    if pad_rows:
        out = out[:m_orig]
    return out


def conv1x1(x_nhwc, wt, bias_row, *, relu, residual=None,
            ds_input=None, ds_weight=None, out_dtype=MM_DTYPE):
    """1x1 conv (+folded BN) (+residual | +fused downsample) (+ReLU), NHWC."""
    n, h, w, cin = x_nhwc.shape
    cout = wt.shape[1]
    x2d = x_nhwc.reshape(n * h * w, cin)                  # free in NHWC layout
    res2d = None if residual is None else residual.reshape(n * h * w, cout)
    ds2d = None if ds_input is None else \
        ds_input.reshape(n * h * w, ds_input.shape[-1])
    out2d = matmul_bias_act(x2d, wt, bias_row, relu=relu, residual=res2d,
                            ds_x=ds2d, ds_w=ds_weight, out_dtype=out_dtype)
    return out2d.reshape(n, h, w, cout)


# ---------------------------------------------------------------------------
# Plain-JAX glue for the spatial (non-1x1) ops of the backbone (NHWC, bf16)
# ---------------------------------------------------------------------------
def conv2d_nhwc(x, w_hwio, stride=1, padding=0):
    return lax.conv_general_dilated(
        x, w_hwio, (stride, stride), [(padding, padding)] * 2,
        dimension_numbers=("NHWC", "HWIO", "NHWC"),
        preferred_element_type=jnp.float32)


def maxpool2d_nhwc(x, k=3, s=2, p=1):
    return lax.reduce_window(x, jnp.asarray(-jnp.inf, x.dtype), lax.max,
                             (1, k, k, 1), (1, s, s, 1),
                             [(0, 0), (p, p), (p, p), (0, 0)])


# ---------------------------------------------------------------------------
# Parameter init (matches the module's __init__ loop: Conv2d.weight ~ N(0,0.01),
# BN weight=1, bias=0, running stats 0/1) with BN folded at init time.
# ---------------------------------------------------------------------------
def conv_w(key, cout, cin, k):
    return jax.random.normal(key, (cout, cin, k, k), jnp.float32) * 0.01


def bn_params(c):
    return dict(gamma=jnp.ones((c,), jnp.float32),
                beta=jnp.zeros((c,), jnp.float32),
                mean=jnp.zeros((c,), jnp.float32),
                var=jnp.ones((c,), jnp.float32))


def _bn_scale_shift(bn, eps=BN_EPS):
    scale = bn["gamma"] * lax.rsqrt(bn["var"] + eps)
    shift = bn["beta"] - bn["mean"] * scale
    return scale, shift


def fold_1x1(w_oihw, bn, bias=None):
    """1x1 OIHW conv + eval BN -> (Cin, Cout) bf16 weight, (1, Cout) f32 bias."""
    cout, cin = w_oihw.shape[:2]
    scale, shift = _bn_scale_shift(bn)
    w = w_oihw.reshape(cout, cin) * scale[:, None]
    b = shift if bias is None else shift + bias * scale
    return w.T.astype(MM_DTYPE), b.reshape(1, cout).astype(jnp.float32)


def fold_spatial(w_oihw, bn, bias=None):
    """kxk OIHW conv + eval BN -> HWIO bf16 weight, (Cout,) f32 bias."""
    scale, shift = _bn_scale_shift(bn)
    w = w_oihw * scale[:, None, None, None]
    b = shift if bias is None else shift + bias * scale
    return jnp.transpose(w, (2, 3, 1, 0)).astype(MM_DTYPE), b.astype(jnp.float32)


def init_bottleneck(key, cin, planes, stride):
    k = jax.random.split(key, 4)
    w1, b1 = fold_1x1(conv_w(k[0], planes, cin, 1), bn_params(planes))
    w2, b2 = fold_spatial(conv_w(k[1], planes, planes, 3), bn_params(planes))
    w3, b3 = fold_1x1(conv_w(k[2], planes * EXPANSION, planes, 1),
                      bn_params(planes * EXPANSION))
    p = dict(w1=w1, b1=b1, w2=w2, b2=b2, w3=w3, b3=b3,
             stride=stride, downsample=None)
    if stride != 1 or cin != planes * EXPANSION:
        wd, bd = fold_1x1(conv_w(k[3], planes * EXPANSION, cin, 1),
                          bn_params(planes * EXPANSION))
        p["downsample"] = dict(w=wd)
        p["b3"] = b3 + bd          # conv3 BN bias + downsample BN bias, fused
    return p


def init_backbone(key, input_channels, num_blocks):
    keys = jax.random.split(key, 5)
    w_stem, b_stem = fold_spatial(conv_w(keys[0], 64, input_channels, 7),
                                  bn_params(64))
    params = dict(w_stem=w_stem, b_stem=b_stem, layers=[])
    cin = 64
    for li, (planes, nb, s) in enumerate(
            zip((64, 128, 256, 512), num_blocks, (1, 2, 2, 2))):
        blocks = []
        for bi in range(nb):
            stride = s if bi == 0 else 1
            blocks.append(init_bottleneck(
                jax.random.fold_in(keys[1 + li], bi), cin, planes, stride))
            cin = planes * EXPANSION
        params["layers"].append(blocks)
    return params


def init_depth_encoder(key, output_channels, num_blocks):
    k_bb, k_head = jax.random.split(key)
    w_head, b_head = fold_1x1(conv_w(k_head, output_channels, 2048, 1),
                              bn_params(output_channels),
                              bias=jnp.zeros((output_channels,), jnp.float32))
    return dict(backbone=init_backbone(k_bb, 1, num_blocks),
                w_head=w_head, b_head=b_head)


# ---------------------------------------------------------------------------
# Forward pass (NHWC / bf16 internally; NCHW f32 in/out like PyTorch)
# ---------------------------------------------------------------------------
def bottleneck_forward(p, x):
    stride = p["stride"]

    # conv1 1x1 + BN + ReLU  (Pallas, fused, bf16 I/O)
    out = conv1x1(x, p["w1"], p["b1"], relu=True)
    # conv2 3x3 (stride) + BN + ReLU  (XLA conv, bf16 in / f32 acc)
    out = conv2d_nhwc(out, p["w2"], stride=stride, padding=1)
    out = jnp.maximum(out + p["b2"].reshape(1, 1, 1, -1), 0.0).astype(MM_DTYPE)

    if p["downsample"] is not None:
        # conv3 + BN + downsample(1x1+BN) + residual add + ReLU: ONE Pallas call
        xs = x[:, ::stride, ::stride, :] if stride > 1 else x
        return conv1x1(out, p["w3"], p["b3"], relu=True,
                       ds_input=xs, ds_weight=p["downsample"]["w"])
    # conv3 + BN + identity residual add + ReLU, fused in one Pallas call
    return conv1x1(out, p["w3"], p["b3"], relu=True, residual=x)


def backbone_forward(params, x_nhwc):
    x = conv2d_nhwc(x_nhwc, params["w_stem"], stride=2, padding=3)
    x = jnp.maximum(x + params["b_stem"].reshape(1, 1, 1, -1), 0.0).astype(MM_DTYPE)
    x = maxpool2d_nhwc(x)
    for blocks in params["layers"]:
        for bp in blocks:
            x = bottleneck_forward(bp, x)
    return x                                  # (N, H/32, W/32, 2048) bf16


def depth_encoder_forward(params, x_nchw):
    x = jnp.transpose(x_nchw, (0, 2, 3, 1)).astype(MM_DTYPE)  # NCHW->NHWC, once
    feats = backbone_forward(params["backbone"], x)
    # encoder head: 1x1 conv -> BN -> ReLU, fused; emit f32 like the reference
    out = conv1x1(feats, params["w_head"], params["b_head"], relu=True,
                  out_dtype=jnp.float32)
    return jnp.transpose(out, (0, 3, 1, 2))   # NHWC -> NCHW, once


# ---------------------------------------------------------------------------
if __name__ == "__main__":
    key = jax.random.PRNGKey(0)
    k_params, k_x = jax.random.split(key)

    output_channels = 256
    num_blocks_of_layers = (1, 1, 1, 1)       # small Bottleneck config

    params = init_depth_encoder(k_params, output_channels, num_blocks_of_layers)
    x = jax.random.normal(k_x, (2, 1, 64, 64), jnp.float32)   # NCHW depth input

    fwd = jax.jit(functools.partial(depth_encoder_forward, params))
    out = jax.block_until_ready(fwd(x))

    assert out.shape == (2, output_channels, 2, 2), out.shape
    assert out.dtype == jnp.float32
    assert bool(jnp.all(out >= 0.0))          # ReLU output
    print("KERNEL_OK")
</pallas_src>

<mosaic_0001>
module attributes {stable_mosaic.version = 11 : i64} {
  func.func @_mm_bias_kernel(%arg0: i32, %arg1: i32, %arg2: memref<256x64xbf16, #tpu.memory_space<vmem>>, %arg3: memref<64x64xbf16, #tpu.memory_space<vmem>>, %arg4: memref<1x64xf32, #tpu.memory_space<vmem>>, %arg5: memref<256x64xbf16, #tpu.memory_space<vmem>>) attributes {dimension_semantics = [#tpu.dimension_semantics<parallel>, #tpu.dimension_semantics<parallel>], iteration_bounds = array<i64: 1, 2>, scalar_prefetch = 0 : i64, scratch_operands = 0 : i64, tpu.core_type = #tpu.core_type<tc>, window_params = [{transform_indices = @transform_0, window_bounds = array<i64: 256, 64>}, {transform_indices = @transform_1, window_bounds = array<i64: 64, 64>}, {transform_indices = @transform_2, window_bounds = array<i64: 1, 64>}, {transform_indices = @transform_3, window_bounds = array<i64: 256, 64>}]} {
    %c0 = arith.constant 0 : index
    %c0_0 = arith.constant 0 : index
    %0 = vector.load %arg2[%c0, %c0_0] : memref<256x64xbf16, #tpu.memory_space<vmem>>, vector<256x64xbf16>
    %c0_1 = arith.constant 0 : index
    %c0_2 = arith.constant 0 : index
    %1 = vector.load %arg3[%c0_1, %c0_2] : memref<64x64xbf16, #tpu.memory_space<vmem>>, vector<64x64xbf16>
    %cst = arith.constant dense<0.000000e+00> : vector<256x64xf32>
    %2 = tpu.matmul %0, %1, %cst {dimension_numbers = #tpu.dot_dimension_numbers<[1], [0], [0], [1], [0, 0, 1, 1], [], []>} : vector<256x64xbf16>, vector<64x64xbf16>, vector<256x64xf32> -> vector<256x64xf32>
    %c0_3 = arith.constant 0 : index
    %c0_4 = arith.constant 0 : index
    %3 = vector.load %arg4[%c0_3, %c0_4] : memref<1x64xf32, #tpu.memory_space<vmem>>, vector<1x64xf32>
    %4 = vector.broadcast %3 : vector<1x64xf32> to vector<256x64xf32>
    %5 = arith.addf %2, %4 : vector<256x64xf32>
    %cst_5 = arith.constant 0.000000e+00 : f32
    %6 = vector.broadcast %cst_5 : f32 to vector<256x64xf32>
    %7 = arith.maximumf %5, %6 : vector<256x64xf32>
    %8 = arith.truncf %7 : vector<256x64xf32> to vector<256x64xbf16>
    %c0_6 = arith.constant 0 : index
    %c0_7 = arith.constant 0 : index
    %9 = vector.load %arg5[%c0_6, %c0_7] : memref<256x64xbf16, #tpu.memory_space<vmem>>, vector<256x64xbf16>
    tpu.vector_store %arg5[%c0_6, %c0_7], %8 {strides = array<i32>} : memref<256x64xbf16, #tpu.memory_space<vmem>>, vector<256x64xbf16>,
    return
  }
  func.func @transform_0(%arg0: i32, %arg1: i32) -> (i32, i32) {
    %c0_i32 = arith.constant 0 : i32
    %c0_i32_0 = arith.constant 0 : i32
    return %arg1, %c0_i32 : i32, i32
  }
  func.func @transform_1(%arg0: i32, %arg1: i32) -> (i32, i32) {
    %c0_i32 = arith.constant 0 : i32
    %c0_i32_0 = arith.constant 0 : i32
    return %c0_i32, %arg0 : i32, i32
  }
  func.func @transform_2(%arg0: i32, %arg1: i32) -> (i32, i32) {
    %c0_i32 = arith.constant 0 : i32
    %c0_i32_0 = arith.constant 0 : i32
    return %c0_i32, %arg0 : i32, i32
  }
  func.func @transform_3(%arg0: i32, %arg1: i32) -> (i32, i32) {
    %c0_i32 = arith.constant 0 : i32
    return %arg1, %arg0 : i32, i32
  }
}

module attributes {stable_mosaic.version = 11 : i64} {
  func.func @_mm_bias_ds_kernel(%arg0: i32, %arg1: i32, %arg2: memref<512x64xbf16, #tpu.memory_space<vmem>>, %arg3: memref<64x128xbf16, #tpu.memory_space<vmem>>, %arg4: memref<1x128xf32, #tpu.memory_space<vmem>>, %arg5: memref<512x64xbf16, #tpu.memory_space<vmem>>, %arg6: memref<64x128xbf16, #tpu.memory_space<vmem>>, %arg7: memref<512x128xbf16, #tpu.memory_space<vmem>>) attributes {dimension_semantics = [#tpu.dimension_semantics<parallel>, #tpu.dimension_semantics<parallel>], iteration_bounds = array<i64: 1, 2>, scalar_prefetch = 0 : i64, scratch_operands = 0 : i64, tpu.core_type = #tpu.core_type<tc>, window_params = [{transform_indices = @transform_0, window_bounds = array<i64: 512, 64>}, {transform_indices = @transform_1, window_bounds = array<i64: 64, 128>}, {transform_indices = @transform_2, window_bounds = array<i64: 1, 128>}, {transform_indices = @transform_3, window_bounds = array<i64: 512, 64>}, {transform_indices = @transform_4, window_bounds = array<i64: 64, 128>}, {transform_indices = @transform_5, window_bounds = array<i64: 512, 128>}]} {
    %c0 = arith.constant 0 : index
    %c0_0 = arith.constant 0 : index
    %0 = vector.load %arg2[%c0, %c0_0] : memref<512x64xbf16, #tpu.memory_space<vmem>>, vector<512x64xbf16>
    %c0_1 = arith.constant 0 : index
    %c0_2 = arith.constant 0 : index
    %1 = vector.load %arg3[%c0_1, %c0_2] : memref<64x128xbf16, #tpu.memory_space<vmem>>, vector<64x128xbf16>
    %cst = arith.constant dense<0.000000e+00> : vector<512x128xf32>
    %2 = tpu.matmul %0, %1, %cst {dimension_numbers = #tpu.dot_dimension_numbers<[1], [0], [0], [1], [0, 0, 1, 1], [], []>} : vector<512x64xbf16>, vector<64x128xbf16>, vector<512x128xf32> -> vector<512x128xf32>
    %c0_3 = arith.constant 0 : index
    %c0_4 = arith.constant 0 : index
    %3 = vector.load %arg5[%c0_3, %c0_4] : memref<512x64xbf16, #tpu.memory_space<vmem>>, vector<512x64xbf16>
    %c0_5 = arith.constant 0 : index
    %c0_6 = arith.constant 0 : index
    %4 = vector.load %arg6[%c0_5, %c0_6] : memref<64x128xbf16, #tpu.memory_space<vmem>>, vector<64x128xbf16>
    %cst_7 = arith.constant dense<0.000000e+00> : vector<512x128xf32>
    %5 = tpu.matmul %3, %4, %cst_7 {dimension_numbers = #tpu.dot_dimension_numbers<[1], [0], [0], [1], [0, 0, 1, 1], [], []>} : vector<512x64xbf16>, vector<64x128xbf16>, vector<512x128xf32> -> vector<512x128xf32>
    %6 = arith.addf %2, %5 : vector<512x128xf32>
    %c0_8 = arith.constant 0 : index
    %c0_9 = arith.constant 0 : index
    %7 = vector.load %arg4[%c0_8, %c0_9] : memref<1x128xf32, #tpu.memory_space<vmem>>, vector<1x128xf32>
    %8 = vector.broadcast %7 : vector<1x128xf32> to vector<512x128xf32>
    %9 = arith.addf %6, %8 : vector<512x128xf32>
    %cst_10 = arith.constant 0.000000e+00 : f32
    %10 = vector.broadcast %cst_10 : f32 to vector<512x128xf32>
    %11 = arith.maximumf %9, %10 : vector<512x128xf32>
    %12 = arith.truncf %11 : vector<512x128xf32> to vector<512x128xbf16>
    %c0_11 = arith.constant 0 : index
    %c0_12 = arith.constant 0 : index
    %13 = vector.load %arg7[%c0_11, %c0_12] : memref<512x128xbf16, #tpu.memory_space<vmem>>, vector<512x128xbf16>
    tpu.vector_store %arg7[%c0_11, %c0_12], %12 {strides = array<i32>} : memref<512x128xbf16, #tpu.memory_space<vmem>>, vector<512x128xbf16>,
    return
  }
  func.func @transform_0(%arg0: i32, %arg1: i32) -> (i32, i32) {
    %c0_i32 = arith.constant 0 : i32
    %c0_i32_0 = arith.constant 0 : i32
    return %arg0, %c0_i32 : i32, i32
  }
  func.func @transform_1(%arg0: i32, %arg1: i32) -> (i32, i32) {
    %c0_i32 = arith.constant 0 : i32
    %c0_i32_0 = arith.constant 0 : i32
    return %c0_i32, %arg1 : i32, i32
  }
  func.func @transform_2(%arg0: i32, %arg1: i32) -> (i32, i32) {
    %c0_i32 = arith.constant 0 : i32
    %c0_i32_0 = arith.constant 0 : i32
    return %c0_i32, %arg1 : i32, i32
  }
  func.func @transform_3(%arg0: i32, %arg1: i32) -> (i32, i32) {
    %c0_i32 = arith.constant 0 : i32
    %c0_i32_0 = arith.constant 0 : i32
    return %arg0, %c0_i32 : i32, i32
  }
  func.func @transform_4(%arg0: i32, %arg1: i32) -> (i32, i32) {
    %c0_i32 = arith.constant 0 : i32
    %c0_i32_0 = arith.constant 0 : i32
    return %c0_i32, %arg1 : i32, i32
  }
  func.func @transform_5(%arg0: i32, %arg1: i32) -> (i32, i32) {
    %c0_i32 = arith.constant 0 : i32
    return %arg0, %arg1 : i32, i32
  }
}

module attributes {stable_mosaic.version = 11 : i64} {
  func.func @_mm_bias_kernel(%arg0: i32, %arg1: i32, %arg2: memref<256x256xbf16, #tpu.memory_space<vmem>>, %arg3: memref<256x128xbf16, #tpu.memory_space<vmem>>, %arg4: memref<1x128xf32, #tpu.memory_space<vmem>>, %arg5: memref<256x128xbf16, #tpu.memory_space<vmem>>) attributes {dimension_semantics = [#tpu.dimension_semantics<parallel>, #tpu.dimension_semantics<parallel>], iteration_bounds = array<i64: 1, 2>, scalar_prefetch = 0 : i64, scratch_operands = 0 : i64, tpu.core_type = #tpu.core_type<tc>, window_params = [{transform_indices = @transform_0, window_bounds = array<i64: 256, 256>}, {transform_indices = @transform_1, window_bounds = array<i64: 256, 128>}, {transform_indices = @transform_2, window_bounds = array<i64: 1, 128>}, {transform_indices = @transform_3, window_bounds = array<i64: 256, 128>}]} {
    %c0 = arith.constant 0 : index
    %c0_0 = arith.constant 0 : index
    %0 = vector.load %arg2[%c0, %c0_0] : memref<256x256xbf16, #tpu.memory_space<vmem>>, vector<256x256xbf16>
    %c0_1 = arith.constant 0 : index
    %c0_2 = arith.constant 0 : index
    %1 = vector.load %arg3[%c0_1, %c0_2] : memref<256x128xbf16, #tpu.memory_space<vmem>>, vector<256x128xbf16>
    %cst = arith.constant dense<0.000000e+00> : vector<256x128xf32>
    %2 = tpu.matmul %0, %1, %cst {dimension_numbers = #tpu.dot_dimension_numbers<[1], [0], [0], [1], [0, 0, 1, 1], [], []>} : vector<256x256xbf16>, vector<256x128xbf16>, vector<256x128xf32> -> vector<256x128xf32>
    %c0_3 = arith.constant 0 : index
    %c0_4 = arith.constant 0 : index
    %3 = vector.load %arg4[%c0_3, %c0_4] : memref<1x128xf32, #tpu.memory_space<vmem>>, vector<1x128xf32>
    %4 = vector.broadcast %3 : vector<1x128xf32> to vector<256x128xf32>
    %5 = arith.addf %2, %4 : vector<256x128xf32>
    %cst_5 = arith.constant 0.000000e+00 : f32
    %6 = vector.broadcast %cst_5 : f32 to vector<256x128xf32>
    %7 = arith.maximumf %5, %6 : vector<256x128xf32>
    %8 = arith.truncf %7 : vector<256x128xf32> to vector<256x128xbf16>
    %c0_6 = arith.constant 0 : index
    %c0_7 = arith.constant 0 : index
    %9 = vector.load %arg5[%c0_6, %c0_7] : memref<256x128xbf16, #tpu.memory_space<vmem>>, vector<256x128xbf16>
    tpu.vector_store %arg5[%c0_6, %c0_7], %8 {strides = array<i32>} : memref<256x128xbf16, #tpu.memory_space<vmem>>, vector<256x128xbf16>,
    return
  }
  func.func @transform_0(%arg0: i32, %arg1: i32) -> (i32, i32) {
    %c0_i32 = arith.constant 0 : i32
    %c0_i32_0 = arith.constant 0 : i32
    return %arg1, %c0_i32 : i32, i32
  }
  func.func @transform_1(%arg0: i32, %arg1: i32) -> (i32, i32) {
    %c0_i32 = arith.constant 0 : i32
    %c0_i32_0 = arith.constant 0 : i32
    return %c0_i32, %arg0 : i32, i32
  }
  func.func @transform_2(%arg0: i32, %arg1: i32) -> (i32, i32) {
    %c0_i32 = arith.constant 0 : i32
    %c0_i32_0 = arith.constant 0 : i32
    return %c0_i32, %arg0 : i32, i32
  }
  func.func @transform_3(%arg0: i32, %arg1: i32) -> (i32, i32) {
    %c0_i32 = arith.constant 0 : i32
    return %arg1, %arg0 : i32, i32
  }
}

module attributes {stable_mosaic.version = 11 : i64} {
  func.func @_mm_bias_ds_kernel(%arg0: i32, %arg1: i32, %arg2: memref<128x128xbf16, #tpu.memory_space<vmem>>, %arg3: memref<128x128xbf16, #tpu.memory_space<vmem>>, %arg4: memref<1x128xf32, #tpu.memory_space<vmem>>, %arg5: memref<128x256xbf16, #tpu.memory_space<vmem>>, %arg6: memref<256x128xbf16, #tpu.memory_space<vmem>>, %arg7: memref<128x128xbf16, #tpu.memory_space<vmem>>) attributes {dimension_semantics = [#tpu.dimension_semantics<parallel>, #tpu.dimension_semantics<parallel>], iteration_bounds = array<i64: 1, 4>, scalar_prefetch = 0 : i64, scratch_operands = 0 : i64, tpu.core_type = #tpu.core_type<tc>, window_params = [{transform_indices = @transform_0, window_bounds = array<i64: 128, 128>}, {transform_indices = @transform_1, window_bounds = array<i64: 128, 128>}, {transform_indices = @transform_2, window_bounds = array<i64: 1, 128>}, {transform_indices = @transform_3, window_bounds = array<i64: 128, 256>}, {transform_indices = @transform_4, window_bounds = array<i64: 256, 128>}, {transform_indices = @transform_5, window_bounds = array<i64: 128, 128>}]} {
    %c0 = arith.constant 0 : index
    %c0_0 = arith.constant 0 : index
    %0 = vector.load %arg2[%c0, %c0_0] : memref<128x128xbf16, #tpu.memory_space<vmem>>, vector<128x128xbf16>
    %c0_1 = arith.constant 0 : index
    %c0_2 = arith.constant 0 : index
    %1 = vector.load %arg3[%c0_1, %c0_2] : memref<128x128xbf16, #tpu.memory_space<vmem>>, vector<128x128xbf16>
    %cst = arith.constant dense<0.000000e+00> : vector<128x128xf32>
    %2 = tpu.matmul %0, %1, %cst {dimension_numbers = #tpu.dot_dimension_numbers<[1], [0], [0], [1], [0, 0, 1, 1], [], []>} : vector<128x128xbf16>, vector<128x128xbf16>, vector<128x128xf32> -> vector<128x128xf32>
    %c0_3 = arith.constant 0 : index
    %c0_4 = arith.constant 0 : index
    %3 = vector.load %arg5[%c0_3, %c0_4] : memref<128x256xbf16, #tpu.memory_space<vmem>>, vector<128x256xbf16>
    %c0_5 = arith.constant 0 : index
    %c0_6 = arith.constant 0 : index
    %4 = vector.load %arg6[%c0_5, %c0_6] : memref<256x128xbf16, #tpu.memory_space<vmem>>, vector<256x128xbf16>
    %cst_7 = arith.constant dense<0.000000e+00> : vector<128x128xf32>
    %5 = tpu.matmul %3, %4, %cst_7 {dimension_numbers = #tpu.dot_dimension_numbers<[1], [0], [0], [1], [0, 0, 1, 1], [], []>} : vector<128x256xbf16>, vector<256x128xbf16>, vector<128x128xf32> -> vector<128x128xf32>
    %6 = arith.addf %2, %5 : vector<128x128xf32>
    %c0_8 = arith.constant 0 : index
    %c0_9 = arith.constant 0 : index
    %7 = vector.load %arg4[%c0_8, %c0_9] : memref<1x128xf32, #tpu.memory_space<vmem>>, vector<1x128xf32>
    %8 = vector.broadcast %7 : vector<1x128xf32> to vector<128x128xf32>
    %9 = arith.addf %6, %8 : vector<128x128xf32>
    %cst_10 = arith.constant 0.000000e+00 : f32
    %10 = vector.broadcast %cst_10 : f32 to vector<128x128xf32>
    %11 = arith.maximumf %9, %10 : vector<128x128xf32>
    %12 = arith.truncf %11 : vector<128x128xf32> to vector<128x128xbf16>
    %c0_11 = arith.constant 0 : index
    %c0_12 = arith.constant 0 : index
    %13 = vector.load %arg7[%c0_11, %c0_12] : memref<128x128xbf16, #tpu.memory_space<vmem>>, vector<128x128xbf16>
    tpu.vector_store %arg7[%c0_11, %c0_12], %12 {strides = array<i32>} : memref<128x128xbf16, #tpu.memory_space<vmem>>, vector<128x128xbf16>,
    return
  }
  func.func @transform_0(%arg0: i32, %arg1: i32) -> (i32, i32) {
    %c0_i32 = arith.constant 0 : i32
    %c0_i32_0 = arith.constant 0 : i32
    return %arg0, %c0_i32 : i32, i32
  }
  func.func @transform_1(%arg0: i32, %arg1: i32) -> (i32, i32) {
    %c0_i32 = arith.constant 0 : i32
    %c0_i32_0 = arith.constant 0 : i32
    return %c0_i32, %arg1 : i32, i32
  }
  func.func @transform_2(%arg0: i32, %arg1: i32) -> (i32, i32) {
    %c0_i32 = arith.constant 0 : i32
    %c0_i32_0 = arith.constant 0 : i32
    return %c0_i32, %arg1 : i32, i32
  }
  func.func @transform_3(%arg0: i32, %arg1: i32) -> (i32, i32) {
    %c0_i32 = arith.constant 0 : i32
    %c0_i32_0 = arith.constant 0 : i32
    return %arg0, %c0_i32 : i32, i32
  }
  func.func @transform_4(%arg0: i32, %arg1: i32) -> (i32, i32) {
    %c0_i32 = arith.constant 0 : i32
    %c0_i32_0 = arith.constant 0 : i32
    return %c0_i32, %arg1 : i32, i32
  }
  func.func @transform_5(%arg0: i32, %arg1: i32) -> (i32, i32) {
    %c0_i32 = arith.constant 0 : i32
    return %arg0, %arg1 : i32, i32
  }
}

module attributes {stable_mosaic.version = 11 : i64} {
  func.func @_mm_bias_kernel(%arg0: i32, %arg1: i32, %arg2: memref<128x512xbf16, #tpu.memory_space<vmem>>, %arg3: memref<512x128xbf16, #tpu.memory_space<vmem>>, %arg4: memref<1x128xf32, #tpu.memory_space<vmem>>, %arg5: memref<128x128xbf16, #tpu.memory_space<vmem>>) attributes {dimension_semantics = [#tpu.dimension_semantics<parallel>, #tpu.dimension_semantics<parallel>], iteration_bounds = array<i64: 1, 2>, scalar_prefetch = 0 : i64, scratch_operands = 0 : i64, tpu.core_type = #tpu.core_type<tc>, window_params = [{transform_indices = @transform_0, window_bounds = array<i64: 128, 512>}, {transform_indices = @transform_1, window_bounds = array<i64: 512, 128>}, {transform_indices = @transform_2, window_bounds = array<i64: 1, 128>}, {transform_indices = @transform_3, window_bounds = array<i64: 128, 128>}]} {
    %c0 = arith.constant 0 : index
    %c0_0 = arith.constant 0 : index
    %0 = vector.load %arg2[%c0, %c0_0] : memref<128x512xbf16, #tpu.memory_space<vmem>>, vector<128x512xbf16>
    %c0_1 = arith.constant 0 : index
    %c0_2 = arith.constant 0 : index
    %1 = vector.load %arg3[%c0_1, %c0_2] : memref<512x128xbf16, #tpu.memory_space<vmem>>, vector<512x128xbf16>
    %cst = arith.constant dense<0.000000e+00> : vector<128x128xf32>
    %2 = tpu.matmul %0, %1, %cst {dimension_numbers = #tpu.dot_dimension_numbers<[1], [0], [0], [1], [0, 0, 1, 1], [], []>} : vector<128x512xbf16>, vector<512x128xbf16>, vector<128x128xf32> -> vector<128x128xf32>
    %c0_3 = arith.constant 0 : index
    %c0_4 = arith.constant 0 : index
    %3 = vector.load %arg4[%c0_3, %c0_4] : memref<1x128xf32, #tpu.memory_space<vmem>>, vector<1x128xf32>
    %4 = vector.broadcast %3 : vector<1x128xf32> to vector<128x128xf32>
    %5 = arith.addf %2, %4 : vector<128x128xf32>
    %cst_5 = arith.constant 0.000000e+00 : f32
    %6 = vector.broadcast %cst_5 : f32 to vector<128x128xf32>
    %7 = arith.maximumf %5, %6 : vector<128x128xf32>
    %8 = arith.truncf %7 : vector<128x128xf32> to vector<128x128xbf16>
    %c0_6 = arith.constant 0 : index
    %c0_7 = arith.constant 0 : index
    %9 = vector.load %arg5[%c0_6, %c0_7] : memref<128x128xbf16, #tpu.memory_space<vmem>>, vector<128x128xbf16>
    tpu.vector_store %arg5[%c0_6, %c0_7], %8 {strides = array<i32>} : memref<128x128xbf16, #tpu.memory_space<vmem>>, vector<128x128xbf16>,
    return
  }
  func.func @transform_0(%arg0: i32, %arg1: i32) -> (i32, i32) {
    %c0_i32 = arith.constant 0 : i32
    %c0_i32_0 = arith.constant 0 : i32
    return %arg0, %c0_i32 : i32, i32
  }
  func.func @transform_1(%arg0: i32, %arg1: i32) -> (i32, i32) {
    %c0_i32 = arith.constant 0 : i32
    %c0_i32_0 = arith.constant 0 : i32
    return %c0_i32, %arg1 : i32, i32
  }
  func.func @transform_2(%arg0: i32, %arg1: i32) -> (i32, i32) {
    %c0_i32 = arith.constant 0 : i32
    %c0_i32_0 = arith.constant 0 : i32
    return %c0_i32, %arg1 : i32, i32
  }
  func.func @transform_3(%arg0: i32, %arg1: i32) -> (i32, i32) {
    %c0_i32 = arith.constant 0 : i32
    return %arg0, %arg1 : i32, i32
  }
}

module attributes {stable_mosaic.version = 11 : i64} {
  func.func @_mm_bias_kernel(%arg0: i32, %arg1: i32, %arg2: memref<32x1024xbf16, #tpu.memory_space<vmem>>, %arg3: memref<1024x128xbf16, #tpu.memory_space<vmem>>, %arg4: memref<1x128xf32, #tpu.memory_space<vmem>>, %arg5: memref<32x128xbf16, #tpu.memory_space<vmem>>) attributes {dimension_semantics = [#tpu.dimension_semantics<parallel>, #tpu.dimension_semantics<parallel>], iteration_bounds = array<i64: 1, 4>, scalar_prefetch = 0 : i64, scratch_operands = 0 : i64, tpu.core_type = #tpu.core_type<tc>, window_params = [{transform_indices = @transform_0, window_bounds = array<i64: 32, 1024>}, {transform_indices = @transform_1, window_bounds = array<i64: 1024, 128>}, {transform_indices = @transform_2, window_bounds = array<i64: 1, 128>}, {transform_indices = @transform_3, window_bounds = array<i64: 32, 128>}]} {
    %c0 = arith.constant 0 : index
    %c0_0 = arith.constant 0 : index
    %0 = vector.load %arg2[%c0, %c0_0] : memref<32x1024xbf16, #tpu.memory_space<vmem>>, vector<32x1024xbf16>
    %c0_1 = arith.constant 0 : index
    %c0_2 = arith.constant 0 : index
    %1 = vector.load %arg3[%c0_1, %c0_2] : memref<1024x128xbf16, #tpu.memory_space<vmem>>, vector<1024x128xbf16>
    %cst = arith.constant dense<0.000000e+00> : vector<32x128xf32>
    %2 = tpu.matmul %0, %1, %cst {dimension_numbers = #tpu.dot_dimension_numbers<[1], [0], [0], [1], [0, 0, 1, 1], [], []>} : vector<32x1024xbf16>, vector<1024x128xbf16>, vector<32x128xf32> -> vector<32x128xf32>
    %c0_3 = arith.constant 0 : index
    %c0_4 = arith.constant 0 : index
    %3 = vector.load %arg4[%c0_3, %c0_4] : memref<1x128xf32, #tpu.memory_space<vmem>>, vector<1x128xf32>
    %4 = vector.broadcast %3 : vector<1x128xf32> to vector<32x128xf32>
    %5 = arith.addf %2, %4 : vector<32x128xf32>
    %cst_5 = arith.constant 0.000000e+00 : f32
    %6 = vector.broadcast %cst_5 : f32 to vector<32x128xf32>
    %7 = arith.maximumf %5, %6 : vector<32x128xf32>
    %8 = arith.truncf %7 : vector<32x128xf32> to vector<32x128xbf16>
    %c0_6 = arith.constant 0 : index
    %c0_7 = arith.constant 0 : index
    %9 = vector.load %arg5[%c0_6, %c0_7] : memref<32x128xbf16, #tpu.memory_space<vmem>>, vector<32x128xbf16>
    tpu.vector_store %arg5[%c0_6, %c0_7], %8 {strides = array<i32>} : memref<32x128xbf16, #tpu.memory_space<vmem>>, vector<32x128xbf16>,
    return
  }
  func.func @transform_0(%arg0: i32, %arg1: i32) -> (i32, i32) {
    %c0_i32 = arith.constant 0 : i32
    %c0_i32_0 = arith.constant 0 : i32
    return %arg0, %c0_i32 : i32, i32
  }
  func.func @transform_1(%arg0: i32, %arg1: i32) -> (i32, i32) {
    %c0_i32 = arith.constant 0 : i32
    %c0_i32_0 = arith.constant 0 : i32
    return %c0_i32, %arg1 : i32, i32
  }
  func.func @transform_2(%arg0: i32, %arg1: i32) -> (i32, i32) {
    %c0_i32 = arith.constant 0 : i32
    %c0_i32_0 = arith.constant 0 : i32
    return %c0_i32, %arg1 : i32, i32
  }
  func.func @transform_3(%arg0: i32, %arg1: i32) -> (i32, i32) {
    %c0_i32 = arith.constant 0 : i32
    return %arg0, %arg1 : i32, i32
  }
}

module attributes {stable_mosaic.version = 11 : i64} {
  func.func @_mm_bias_ds_kernel(%arg0: i32, %arg1: i32, %arg2: memref<32x256xbf16, #tpu.memory_space<vmem>>, %arg3: memref<256x512xbf16, #tpu.memory_space<vmem>>, %arg4: memref<1x512xf32, #tpu.memory_space<vmem>>, %arg5: memref<32x512xbf16, #tpu.memory_space<vmem>>, %arg6: memref<512x512xbf16, #tpu.memory_space<vmem>>, %arg7: memref<32x512xbf16, #tpu.memory_space<vmem>>) attributes {dimension_semantics = [#tpu.dimension_semantics<parallel>, #tpu.dimension_semantics<parallel>], iteration_bounds = array<i64: 1, 2>, scalar_prefetch = 0 : i64, scratch_operands = 0 : i64, tpu.core_type = #tpu.core_type<tc>, window_params = [{transform_indices = @transform_0, window_bounds = array<i64: 32, 256>}, {transform_indices = @transform_1, window_bounds = array<i64: 256, 512>}, {transform_indices = @transform_2, window_bounds = array<i64: 1, 512>}, {transform_indices = @transform_3, window_bounds = array<i64: 32, 512>}, {transform_indices = @transform_4, window_bounds = array<i64: 512, 512>}, {transform_indices = @transform_5, window_bounds = array<i64: 32, 512>}]} {
    %c0 = arith.constant 0 : index
    %c0_0 = arith.constant 0 : index
    %0 = vector.load %arg2[%c0, %c0_0] : memref<32x256xbf16, #tpu.memory_space<vmem>>, vector<32x256xbf16>
    %c0_1 = arith.constant 0 : index
    %c0_2 = arith.constant 0 : index
    %1 = vector.load %arg3[%c0_1, %c0_2] : memref<256x512xbf16, #tpu.memory_space<vmem>>, vector<256x512xbf16>
    %cst = arith.constant dense<0.000000e+00> : vector<32x512xf32>
    %2 = tpu.matmul %0, %1, %cst {dimension_numbers = #tpu.dot_dimension_numbers<[1], [0], [0], [1], [0, 0, 1, 1], [], []>} : vector<32x256xbf16>, vector<256x512xbf16>, vector<32x512xf32> -> vector<32x512xf32>
    %c0_3 = arith.constant 0 : index
    %c0_4 = arith.constant 0 : index
    %3 = vector.load %arg5[%c0_3, %c0_4] : memref<32x512xbf16, #tpu.memory_space<vmem>>, vector<32x512xbf16>
    %c0_5 = arith.constant 0 : index
    %c0_6 = arith.constant 0 : index
    %4 = vector.load %arg6[%c0_5, %c0_6] : memref<512x512xbf16, #tpu.memory_space<vmem>>, vector<512x512xbf16>
    %cst_7 = arith.constant dense<0.000000e+00> : vector<32x512xf32>
    %5 = tpu.matmul %3, %4, %cst_7 {dimension_numbers = #tpu.dot_dimension_numbers<[1], [0], [0], [1], [0, 0, 1, 1], [], []>} : vector<32x512xbf16>, vector<512x512xbf16>, vector<32x512xf32> -> vector<32x512xf32>
    %6 = arith.addf %2, %5 : vector<32x512xf32>
    %c0_8 = arith.constant 0 : index
    %c0_9 = arith.constant 0 : index
    %7 = vector.load %arg4[%c0_8, %c0_9] : memref<1x512xf32, #tpu.memory_space<vmem>>, vector<1x512xf32>
    %8 = vector.broadcast %7 : vector<1x512xf32> to vector<32x512xf32>
    %9 = arith.addf %6, %8 : vector<32x512xf32>
    %cst_10 = arith.constant 0.000000e+00 : f32
    %10 = vector.broadcast %cst_10 : f32 to vector<32x512xf32>
    %11 = arith.maximumf %9, %10 : vector<32x512xf32>
    %12 = arith.truncf %11 : vector<32x512xf32> to vector<32x512xbf16>
    %c0_11 = arith.constant 0 : index
    %c0_12 = arith.constant 0 : index
    %13 = vector.load %arg7[%c0_11, %c0_12] : memref<32x512xbf16, #tpu.memory_space<vmem>>, vector<32x512xbf16>
    tpu.vector_store %arg7[%c0_11, %c0_12], %12 {strides = array<i32>} : memref<32x512xbf16, #tpu.memory_space<vmem>>, vector<32x512xbf16>,
    return
  }
  func.func @transform_0(%arg0: i32, %arg1: i32) -> (i32, i32) {
    %c0_i32 = arith.constant 0 : i32
    %c0_i32_0 = arith.constant 0 : i32
    return %arg0, %c0_i32 : i32, i32
  }
  func.func @transform_1(%arg0: i32, %arg1: i32) -> (i32, i32) {
    %c0_i32 = arith.constant 0 : i32
    %c0_i32_0 = arith.constant 0 : i32
    return %c0_i32, %arg1 : i32, i32
  }
  func.func @transform_2(%arg0: i32, %arg1: i32) -> (i32, i32) {
    %c0_i32 = arith.constant 0 : i32
    %c0_i32_0 = arith.constant 0 : i32
    return %c0_i32, %arg1 : i32, i32
  }
  func.func @transform_3(%arg0: i32, %arg1: i32) -> (i32, i32) {
    %c0_i32 = arith.constant 0 : i32
    %c0_i32_0 = arith.constant 0 : i32
    return %arg0, %c0_i32 : i32, i32
  }
  func.func @transform_4(%arg0: i32, %arg1: i32) -> (i32, i32) {
    %c0_i32 = arith.constant 0 : i32
    %c0_i32_0 = arith.constant 0 : i32
    return %c0_i32, %arg1 : i32, i32
  }
  func.func @transform_5(%arg0: i32, %arg1: i32) -> (i32, i32) {
    %c0_i32 = arith.constant 0 : i32
    return %arg0, %arg1 : i32, i32
  }
}

module attributes {stable_mosaic.version = 11 : i64} {
  func.func @_mm_bias_ds_kernel(%arg0: i32, %arg1: i32, %arg2: memref<8x512xbf16, #tpu.memory_space<vmem>>, %arg3: memref<512x512xbf16, #tpu.memory_space<vmem>>, %arg4: memref<1x512xf32, #tpu.memory_space<vmem>>, %arg5: memref<8x1024xbf16, #tpu.memory_space<vmem>>, %arg6: memref<1024x512xbf16, #tpu.memory_space<vmem>>, %arg7: memref<8x512xbf16, #tpu.memory_space<vmem>>) attributes {dimension_semantics = [#tpu.dimension_semantics<parallel>, #tpu.dimension_semantics<parallel>], iteration_bounds = array<i64: 1, 4>, scalar_prefetch = 0 : i64, scratch_operands = 0 : i64, tpu.core_type = #tpu.core_type<tc>, window_params = [{transform_indices = @transform_0, window_bounds = array<i64: 8, 512>}, {transform_indices = @transform_1, window_bounds = array<i64: 512, 512>}, {transform_indices = @transform_2, window_bounds = array<i64: 1, 512>}, {transform_indices = @transform_3, window_bounds = array<i64: 8, 1024>}, {transform_indices = @transform_4, window_bounds = array<i64: 1024, 512>}, {transform_indices = @transform_5, window_bounds = array<i64: 8, 512>}]} {
    %c0 = arith.constant 0 : index
    %c0_0 = arith.constant 0 : index
    %0 = vector.load %arg2[%c0, %c0_0] : memref<8x512xbf16, #tpu.memory_space<vmem>>, vector<8x512xbf16>
    %c0_1 = arith.constant 0 : index
    %c0_2 = arith.constant 0 : index
    %1 = vector.load %arg3[%c0_1, %c0_2] : memref<512x512xbf16, #tpu.memory_space<vmem>>, vector<512x512xbf16>
    %cst = arith.constant dense<0.000000e+00> : vector<8x512xf32>
    %2 = tpu.matmul %0, %1, %cst {dimension_numbers = #tpu.dot_dimension_numbers<[1], [0], [0], [1], [0, 0, 1, 1], [], []>} : vector<8x512xbf16>, vector<512x512xbf16>, vector<8x512xf32> -> vector<8x512xf32>
    %c0_3 = arith.constant 0 : index
    %c0_4 = arith.constant 0 : index
    %3 = vector.load %arg5[%c0_3, %c0_4] : memref<8x1024xbf16, #tpu.memory_space<vmem>>, vector<8x1024xbf16>
    %c0_5 = arith.constant 0 : index
    %c0_6 = arith.constant 0 : index
    %4 = vector.load %arg6[%c0_5, %c0_6] : memref<1024x512xbf16, #tpu.memory_space<vmem>>, vector<1024x512xbf16>
    %cst_7 = arith.constant dense<0.000000e+00> : vector<8x512xf32>
    %5 = tpu.matmul %3, %4, %cst_7 {dimension_numbers = #tpu.dot_dimension_numbers<[1], [0], [0], [1], [0, 0, 1, 1], [], []>} : vector<8x1024xbf16>, vector<1024x512xbf16>, vector<8x512xf32> -> vector<8x512xf32>
    %6 = arith.addf %2, %5 : vector<8x512xf32>
    %c0_8 = arith.constant 0 : index
    %c0_9 = arith.constant 0 : index
    %7 = vector.load %arg4[%c0_8, %c0_9] : memref<1x512xf32, #tpu.memory_space<vmem>>, vector<1x512xf32>
    %8 = vector.broadcast %7 : vector<1x512xf32> to vector<8x512xf32>
    %9 = arith.addf %6, %8 : vector<8x512xf32>
    %cst_10 = arith.constant 0.000000e+00 : f32
    %10 = vector.broadcast %cst_10 : f32 to vector<8x512xf32>
    %11 = arith.maximumf %9, %10 : vector<8x512xf32>
    %12 = arith.truncf %11 : vector<8x512xf32> to vector<8x512xbf16>
    %c0_11 = arith.constant 0 : index
    %c0_12 = arith.constant 0 : index
    %13 = vector.load %arg7[%c0_11, %c0_12] : memref<8x512xbf16, #tpu.memory_space<vmem>>, vector<8x512xbf16>
    tpu.vector_store %arg7[%c0_11, %c0_12], %12 {strides = array<i32>} : memref<8x512xbf16, #tpu.memory_space<vmem>>, vector<8x512xbf16>,
    return
  }
  func.func @transform_0(%arg0: i32, %arg1: i32) -> (i32, i32) {
    %c0_i32 = arith.constant 0 : i32
    %c0_i32_0 = arith.constant 0 : i32
    return %arg0, %c0_i32 : i32, i32
  }
  func.func @transform_1(%arg0: i32, %arg1: i32) -> (i32, i32) {
    %c0_i32 = arith.constant 0 : i32
    %c0_i32_0 = arith.constant 0 : i32
    return %c0_i32, %arg1 : i32, i32
  }
  func.func @transform_2(%arg0: i32, %arg1: i32) -> (i32, i32) {
    %c0_i32 = arith.constant 0 : i32
    %c0_i32_0 = arith.constant 0 : i32
    return %c0_i32, %arg1 : i32, i32
  }
  func.func @transform_3(%arg0: i32, %arg1: i32) -> (i32, i32) {
    %c0_i32 = arith.constant 0 : i32
    %c0_i32_0 = arith.constant 0 : i32
    return %arg0, %c0_i32 : i32, i32
  }
  func.func @transform_4(%arg0: i32, %arg1: i32) -> (i32, i32) {
    %c0_i32 = arith.constant 0 : i32
    %c0_i32_0 = arith.constant 0 : i32
    return %c0_i32, %arg1 : i32, i32
  }
  func.func @transform_5(%arg0: i32, %arg1: i32) -> (i32, i32) {
    %c0_i32 = arith.constant 0 : i32
    return %arg0, %arg1 : i32, i32
  }
}

module attributes {stable_mosaic.version = 11 : i64} {
  func.func @_mm_bias_kernel(%arg0: i32, %arg1: i32, %arg2: memref<8x2048xbf16, #tpu.memory_space<vmem>>, %arg3: memref<2048x128xbf16, #tpu.memory_space<vmem>>, %arg4: memref<1x128xf32, #tpu.memory_space<vmem>>, %arg5: memref<8x128xf32, #tpu.memory_space<vmem>>) attributes {dimension_semantics = [#tpu.dimension_semantics<parallel>, #tpu.dimension_semantics<parallel>], iteration_bounds = array<i64: 1, 2>, scalar_prefetch = 0 : i64, scratch_operands = 0 : i64, tpu.core_type = #tpu.core_type<tc>, window_params = [{transform_indices = @transform_0, window_bounds = array<i64: 8, 2048>}, {transform_indices = @transform_1, window_bounds = array<i64: 2048, 128>}, {transform_indices = @transform_2, window_bounds = array<i64: 1, 128>}, {transform_indices = @transform_3, window_bounds = array<i64: 8, 128>}]} {
    %c0 = arith.constant 0 : index
    %c0_0 = arith.constant 0 : index
    %0 = vector.load %arg2[%c0, %c0_0] : memref<8x2048xbf16, #tpu.memory_space<vmem>>, vector<8x2048xbf16>
    %c0_1 = arith.constant 0 : index
    %c0_2 = arith.constant 0 : index
    %1 = vector.load %arg3[%c0_1, %c0_2] : memref<2048x128xbf16, #tpu.memory_space<vmem>>, vector<2048x128xbf16>
    %cst = arith.constant dense<0.000000e+00> : vector<8x128xf32>
    %2 = tpu.matmul %0, %1, %cst {dimension_numbers = #tpu.dot_dimension_numbers<[1], [0], [0], [1], [0, 0, 1, 1], [], []>} : vector<8x2048xbf16>, vector<2048x128xbf16>, vector<8x128xf32> -> vector<8x128xf32>
    %c0_3 = arith.constant 0 : index
    %c0_4 = arith.constant 0 : index
    %3 = vector.load %arg4[%c0_3, %c0_4] : memref<1x128xf32, #tpu.memory_space<vmem>>, vector<1x128xf32>
    %4 = vector.broadcast %3 : vector<1x128xf32> to vector<8x128xf32>
    %5 = arith.addf %2, %4 : vector<8x128xf32>
    %cst_5 = arith.constant 0.000000e+00 : f32
    %6 = vector.broadcast %cst_5 : f32 to vector<8x128xf32>
    %7 = arith.maximumf %5, %6 : vector<8x128xf32>
    %c0_6 = arith.constant 0 : index
    %c0_7 = arith.constant 0 : index
    %8 = vector.load %arg5[%c0_6, %c0_7] : memref<8x128xf32, #tpu.memory_space<vmem>>, vector<8x128xf32>
    tpu.vector_store %arg5[%c0_6, %c0_7], %7 {strides = array<i32>} : memref<8x128xf32, #tpu.memory_space<vmem>>, vector<8x128xf32>,
    return
  }
  func.func @transform_0(%arg0: i32, %arg1: i32) -> (i32, i32) {
    %c0_i32 = arith.constant 0 : i32
    %c0_i32_0 = arith.constant 0 : i32
    return %arg0, %c0_i32 : i32, i32
  }
  func.func @transform_1(%arg0: i32, %arg1: i32) -> (i32, i32) {
    %c0_i32 = arith.constant 0 : i32
    %c0_i32_0 = arith.constant 0 : i32
    return %c0_i32, %arg1 : i32, i32
  }
  func.func @transform_2(%arg0: i32, %arg1: i32) -> (i32, i32) {
    %c0_i32 = arith.constant 0 : i32
    %c0_i32_0 = arith.constant 0 : i32
    return %c0_i32, %arg1 : i32, i32
  }
  func.func @transform_3(%arg0: i32, %arg1: i32) -> (i32, i32) {
    %c0_i32 = arith.constant 0 : i32
    return %arg0, %arg1 : i32, i32
  }
}

</mosaic_0001>

<bundles_post_ra>
// kernel: depth_encoder_forward.9
= control target key start
LH: loop header
LB: loop body
LE: loop exit
PB: predicated region body
PF: predicated region fallthrough
CT: control target
= control target key end

     0   :  { %s1152_s12 = smov 0   ;;  %s1154_s13 = smov 0   ;;  %s1341_s0 = inlined_call_operand.vmem [shape: bf16[512,64], index: 0, kind: input, shape index: {}]   ;;  %s1342_s1 = inlined_call_operand.vmem [shape: bf16[64,64], index: 1, kind: input, shape index: {}]   ;;  %s1343_s2 = inlined_call_operand.vmem [shape: f32[1,64], index: 2, kind: input, shape index: {}]   ;;  %s1344_s3 = inlined_call_operand.vmem [shape: bf16[512,64], index: 3, kind: output, shape index: {}]  }
   0x1   :  { %s1156_s14 = smov 0  }
   0x2 LB: > { %s22_s15 = sadd.s32 1, %s1126_s13  ;;  %p888_p0 = scmp.ge.s32.totalorder %s1130_s14, 1  ;;  %s1130_s14 = sphi %s1156_s14, %s13_s14   ;;  %s1126_s13 = sphi %s1154_s13, %s1346_s13   ;;  %s1122_s12 = sphi %s1152_s12, %s1345_s12  }
   0x3   : > { %p23_p1 = scmp.ge.s32.totalorder %s22_s15, 2  ;;  %p169_p2 = scmp.lt.s32.totalorder %s1130_s14, 3 }
   0x5   : > { %s1348_s15 = smov (%p23_p1, %s22_s15), 0  ;;  %p170_p3 = pnand %p888_p0, %p169_p2 }
   0x6   : > { %s889_s18 = sshll.u32 (!%p170_p3), %s1122_s12, 5 }
   0x7   : > { %173 = sbr.rel (%p170_p3) target bundleno = 260 (0x104), region = 32  ;;  %p204_p4 = scmp.lt.s32.totalorder (!%p170_p3), %s889_s18, 63 }
   0xc   : > { %v1088_v0 = vld [vmem:[%s1342_s1 + $0x18] sm:$0xff]   ;;  %v1089_v1 = vld [vmem:[%s1342_s1 + $0x10] sm:$0xff]   ;;  %s1350_s18 = smov (!%p204_p4, %s889_s18), 63  ;;  %v1090_v2 = vld [vmem:[%s1342_s1 + $0x8] sm:$0xff]   ;;  %vm377_vm0 = vcmask 523264   ;;  %vm747_vm1 = vcmask 519168  }
   0xd   : > { %1016 = vmatprep.subr.bf16.mxu0 %v1088_v0  ;;  %1056 = vmatprep.subr.bf16.mxu1 %v1088_v0  ;;  %s890_s23 = sshll.u32 %s1350_s18, 2  ;;  %v1091_v3 = vld [vmem:[%s1342_s1] sm:$0xff]  }
   0xe   : > { %1017 = vmatpush3.bf16.msra.mxu0 %v1088_v0  ;;  %1060 = vmatpush3.bf16.msra.mxu1 %v1088_v0  ;;  %s1190_s28 = scalar_lea.vmem %s1341_s0, %s890_s23  ;;  %v1227_v20 = vld [vmem:[%s1343_s2] ss:$0 sm:$0xff]  ;;  %s1238_s6 = scalar_lea.vmem %s1344_s3, %s890_s23 }
   0xf   : > { %1018 = vmatprep.subr.bf16.mxu0 %v1089_v1  ;;  %1057 = vmatprep.subr.bf16.mxu1 %v1089_v1  ;;  %v1092_v4 = vld [vmem:[%s1190_s28] sm:$0xff]   ;;  %v1094_v6 = vld [vmem:[%s1190_s28 + $0x8] sm:$0xff]   ;;  %v1096_v8 = vld [vmem:[%s1190_s28 + $0x10] sm:$0xff]  }
  0x10   : > { %v1093_v5 = vld [vmem:[%s1190_s28 + $0x40] sm:$0xff]   ;;  %1024 = vmatprep.mubr.msk.bf16.mxu0 %vm377_vm0, %v1092_v4  ;;  %v1095_v7 = vld [vmem:[%s1190_s28 + $0x48] sm:$0xff]   ;;  %v1097_v9 = vld [vmem:[%s1190_s28 + $0x50] sm:$0xff]  }
  0x11   : > { %1040 = vmatprep.mubr.msk.bf16.mxu1 %vm377_vm0, %v1093_v5  ;;  %v1098_v10 = vld [vmem:[%s1190_s28 + $0x18] sm:$0xff]   ;;  %v1100_v12 = vld [vmem:[%s1190_s28 + $0x20] sm:$0xff]   ;;  %v1102_v14 = vld [vmem:[%s1190_s28 + $0x28] sm:$0xff]  }
  0x12   : > { %1019 = vmatpush3.bf16.msra.mxu0 %v1089_v1  ;;  %1061 = vmatpush3.bf16.msra.mxu1 %v1089_v1  ;;  %v1099_v11 = vld [vmem:[%s1190_s28 + $0x58] sm:$0xff]   ;;  %v1101_v13 = vld [vmem:[%s1190_s28 + $0x60] sm:$0xff]   ;;  %v1103_v15 = vld [vmem:[%s1190_s28 + $0x68] sm:$0xff]  }
  0x13   : > { %1020 = vmatprep.subr.bf16.mxu0 %v1090_v2  ;;  %1058 = vmatprep.subr.bf16.mxu1 %v1090_v2  ;;  %v1104_v16 = vld [vmem:[%s1190_s28 + $0x30] sm:$0xff]   ;;  %v1106_v18 = vld [vmem:[%s1190_s28 + $0x38] sm:$0xff]  }
  0x14   : > { %v1105_v17 = vld [vmem:[%s1190_s28 + $0x70] sm:$0xff]   ;;  %v1107_v19 = vld [vmem:[%s1190_s28 + $0x78] sm:$0xff]  }
  0x16   : > { %1021 = vmatpush3.bf16.msra.mxu0 %v1090_v2  ;;  %1062 = vmatpush3.bf16.msra.mxu1 %v1090_v2 }
  0x17   : > { %1022 = vmatprep.subr.bf16.mxu0 %v1091_v3  ;;  %1059 = vmatprep.subr.bf16.mxu1 %v1091_v3 }
  0x1a   : > { %1023 = vmatpush3.bf16.msra.mxu0 %v1091_v3  ;;  %1063 = vmatpush3.bf16.msra.mxu1 %v1091_v3 }
  0x1d   : > { %1025 = vmatmul.mubr.msk.bf16.vlgmr.msra.gmra.mxu0 %vm377_vm0, %v1094_v6  ;;  %1041 = vmatmul.mubr.msk.bf16.vlgmr.msra.gmra.mxu1 %vm377_vm0, %v1095_v7 }
  0x1e   : > { %1028 = vmatprep.mubr.msk.bf16.mxu0 %vm377_vm0, %v1096_v8  ;;  %1044 = vmatprep.mubr.msk.bf16.mxu1 %vm377_vm0, %v1097_v9 }
  0x25   : > { %1029 = vmatmul.mubr.msk.bf16.gmra.mxu0 %vm377_vm0, %v1098_v10  ;;  %1045 = vmatmul.mubr.msk.bf16.gmra.mxu1 %vm377_vm0, %v1099_v11 }
  0x26   : > { %1032 = vmatprep.mubr.msk.bf16.mxu0 %vm377_vm0, %v1100_v12  ;;  %1048 = vmatprep.mubr.msk.bf16.mxu1 %vm377_vm0, %v1101_v13 }
  0x2d   : > { %1033 = vmatmul.mubr.msk.bf16.gmra.mxu0 %vm377_vm0, %v1102_v14  ;;  %1049 = vmatmul.mubr.msk.bf16.gmra.mxu1 %vm377_vm0, %v1103_v15 }
  0x2e   : > { %1036 = vmatprep.mubr.msk.bf16.mxu0 %vm377_vm0, %v1104_v16  ;;  %1052 = vmatprep.mubr.msk.bf16.mxu1 %vm377_vm0, %v1105_v17 }
  0x35   : > { %1037 = vmatmul.mubr.msk.bf16.gmra.mxu0 %vm377_vm0, %v1106_v18  ;;  %1053 = vmatmul.mubr.msk.bf16.gmra.mxu1 %vm377_vm0, %v1107_v19 }
  0xdd   : > { %v1026_v21 = vpop.f32.mrf.mxu0  ;;  %v1042_v22 = vpop.f32.mrf.mxu1 }
  0xde   : > { %v469_v23 = vadd.f32 %v1026_v21, %v1227_v20  ;;  %v533_v24 = vadd.f32 %v1042_v22, %v1227_v20 }
  0xdf   : > { %v460_v25 = vpop.f32.mrf.mxu0  ;;  %v524_v26 = vpop.f32.mrf.mxu1 }
  0xe0   : > { %v589_v27 = vmax.f32 %v469_v23, 0.0  ;;  %v605_v28 = vmax.f32 %v533_v24, 0.0  ;;  %v461_v29 = vadd.f32 %v1227_v20, %v460_v25  ;;  %v525_v30 = vadd.f32 %v1227_v20, %v524_v26 }
  0xe1   : > { %v1027_v31 = vpop.f32.mrf.mxu0  ;;  %v1043_v32 = vpop.f32.mrf.mxu1 }
  0xe2   : > { %v966_v33 = vpack.c.bf16 %v589_v27, %v589_v27  ;;  %v982_v34 = vpack.c.bf16 %v605_v28, %v605_v28  ;;  %v587_v35 = vmax.f32 %v461_v29, 0.0  ;;  %v603_v36 = vmax.f32 %v525_v30, 0.0 }
  0xe3   : > { %v472_v37 = vadd.f32 %v1027_v31, %v1227_v20  ;;  %v536_v38 = vadd.f32 %v1043_v32, %v1227_v20  ;;  %v463_v39 = vpop.f32.mrf.mxu0  ;;  %v527_v40 = vpop.f32.mrf.mxu1 }
  0xe4   : > { %750 = vst.msk [vmem:[%s1238_s6 + $0x8] sm:$0xf] %vm747_vm1, %v966_v33  ;;  %766 = vst.msk [vmem:[%s1238_s6 + $0x48] sm:$0xf] %vm747_vm1, %v982_v34  ;;  %v964_v41 = vpack.c.bf16 %v587_v35, %v587_v35  ;;  %v980_v42 = vpack.c.bf16 %v603_v36, %v603_v36  ;;  %v464_v43 = vadd.f32 %v1227_v20, %v463_v39 }
  0xe5   : > { %v528_v44 = vadd.f32 %v1227_v20, %v527_v40  ;;  %v590_v45 = vmax.f32 %v472_v37, 0.0  ;;  %v606_v46 = vmax.f32 %v536_v38, 0.0  ;;  %v1030_v47 = vpop.f32.mrf.mxu0  ;;  %v1046_v48 = vpop.f32.mrf.mxu1 }
  0xe6   : > { %748 = vst.msk [vmem:[%s1238_s6] sm:$0xf] %vm747_vm1, %v964_v41  ;;  %764 = vst.msk [vmem:[%s1238_s6 + $0x40] sm:$0xf] %vm747_vm1, %v980_v42  ;;  %v588_v49 = vmax.f32 %v464_v43, 0.0  ;;  %v485_v51 = vadd.f32 %v1030_v47, %v1227_v20  ;;  %v549_v52 = vadd.f32 %v1046_v48, %v1227_v20 }
  0xe7   : > { %v604_v50 = vmax.f32 %v528_v44, 0.0  ;;  %v967_v53 = vpack.c.bf16 %v590_v45, %v590_v45  ;;  %v983_v54 = vpack.c.bf16 %v606_v46, %v606_v46  ;;  %v476_v55 = vpop.f32.mrf.mxu0  ;;  %v540_v56 = vpop.f32.mrf.mxu1 }
  0xe8   : > { %v965_v57 = vpack.c.bf16 %v588_v49, %v588_v49  ;;  %v593_v59 = vmax.f32 %v485_v51, 0.0  ;;  %v609_v60 = vmax.f32 %v549_v52, 0.0  ;;  %v477_v61 = vadd.f32 %v1227_v20, %v476_v55 }
  0xe9   : > { %v981_v58 = vpack.c.bf16 %v604_v50, %v604_v50  ;;  %751 = vst.msk [vmem:[%s1238_s6 + $0xc] sm:$0xf] %vm747_vm1, %v967_v53  ;;  %767 = vst.msk [vmem:[%s1238_s6 + $0x4c] sm:$0xf] %vm747_vm1, %v983_v54  ;;  %v541_v62 = vadd.f32 %v1227_v20, %v540_v56  ;;  %v1031_v63 = vpop.f32.mrf.mxu0  ;;  %v1047_v0 = vpop.f32.mrf.mxu1 }
  0xea   : > { %749 = vst.msk [vmem:[%s1238_s6 + $0x4] sm:$0xf] %vm747_vm1, %v965_v57  ;;  %v970_v1 = vpack.c.bf16 %v593_v59, %v593_v59  ;;  %v986_v2 = vpack.c.bf16 %v609_v60, %v609_v60  ;;  %v488_v3 = vadd.f32 %v1031_v63, %v1227_v20  ;;  %v552_v4 = vadd.f32 %v1047_v0, %v1227_v20 }
  0xeb   : > { %765 = vst.msk [vmem:[%s1238_s6 + $0x44] sm:$0xf] %vm747_vm1, %v981_v58  ;;  %v591_v5 = vmax.f32 %v477_v61, 0.0  ;;  %v607_v6 = vmax.f32 %v541_v62, 0.0  ;;  %v479_v7 = vpop.f32.mrf.mxu0  ;;  %v543_v8 = vpop.f32.mrf.mxu1 }
  0xec   : > { %754 = vst.msk [vmem:[%s1238_s6 + $0x18] sm:$0xf] %vm747_vm1, %v970_v1  ;;  %770 = vst.msk [vmem:[%s1238_s6 + $0x58] sm:$0xf] %vm747_vm1, %v986_v2  ;;  %v594_v9 = vmax.f32 %v488_v3, 0.0  ;;  %v610_v10 = vmax.f32 %v552_v4, 0.0  ;;  %v480_v11 = vadd.f32 %v1227_v20, %v479_v7  ;;  %v544_v12 = vadd.f32 %v1227_v20, %v543_v8 }
  0xed   : > { %v968_v13 = vpack.c.bf16 %v591_v5, %v591_v5  ;;  %v984_v14 = vpack.c.bf16 %v607_v6, %v607_v6  ;;  %v1034_v15 = vpop.f32.mrf.mxu0  ;;  %v1050_v16 = vpop.f32.mrf.mxu1 }
  0xee   : > { %v971_v17 = vpack.c.bf16 %v594_v9, %v594_v9  ;;  %v987_v18 = vpack.c.bf16 %v610_v10, %v610_v10  ;;  %v592_v19 = vmax.f32 %v480_v11, 0.0  ;;  %v608_v21 = vmax.f32 %v544_v12, 0.0 }
  0xef   : > { %752 = vst.msk [vmem:[%s1238_s6 + $0x10] sm:$0xf] %vm747_vm1, %v968_v13  ;;  %768 = vst.msk [vmem:[%s1238_s6 + $0x50] sm:$0xf] %vm747_vm1, %v984_v14  ;;  %v501_v22 = vadd.f32 %v1034_v15, %v1227_v20  ;;  %v565_v23 = vadd.f32 %v1050_v16, %v1227_v20  ;;  %v492_v24 = vpop.f32.mrf.mxu0  ;;  %v556_v25 = vpop.f32.mrf.mxu1 }
  0xf0   : > { %755 = vst.msk [vmem:[%s1238_s6 + $0x1c] sm:$0xf] %vm747_vm1, %v971_v17  ;;  %771 = vst.msk [vmem:[%s1238_s6 + $0x5c] sm:$0xf] %vm747_vm1, %v987_v18  ;;  %v969_v26 = vpack.c.bf16 %v592_v19, %v592_v19  ;;  %v985_v27 = vpack.c.bf16 %v608_v21, %v608_v21  ;;  %v493_v28 = vadd.f32 %v1227_v20, %v492_v24 }
  0xf1   : > { %v557_v29 = vadd.f32 %v1227_v20, %v556_v25  ;;  %v597_v30 = vmax.f32 %v501_v22, 0.0  ;;  %v613_v31 = vmax.f32 %v565_v23, 0.0  ;;  %v1035_v32 = vpop.f32.mrf.mxu0  ;;  %v1051_v33 = vpop.f32.mrf.mxu1 }
  0xf2   : > { %753 = vst.msk [vmem:[%s1238_s6 + $0x14] sm:$0xf] %vm747_vm1, %v969_v26  ;;  %769 = vst.msk [vmem:[%s1238_s6 + $0x54] sm:$0xf] %vm747_vm1, %v985_v27  ;;  %v595_v34 = vmax.f32 %v493_v28, 0.0  ;;  %v504_v36 = vadd.f32 %v1035_v32, %v1227_v20  ;;  %v568_v37 = vadd.f32 %v1051_v33, %v1227_v20 }
  0xf3   : > { %v611_v35 = vmax.f32 %v557_v29, 0.0  ;;  %v974_v38 = vpack.c.bf16 %v597_v30, %v597_v30  ;;  %v990_v39 = vpack.c.bf16 %v613_v31, %v613_v31  ;;  %v495_v40 = vpop.f32.mrf.mxu0  ;;  %v559_v41 = vpop.f32.mrf.mxu1 }
  0xf4   : > { %v972_v42 = vpack.c.bf16 %v595_v34, %v595_v34  ;;  %v598_v44 = vmax.f32 %v504_v36, 0.0  ;;  %v614_v45 = vmax.f32 %v568_v37, 0.0  ;;  %v496_v46 = vadd.f32 %v1227_v20, %v495_v40 }
  0xf5   : > { %v988_v43 = vpack.c.bf16 %v611_v35, %v611_v35  ;;  %758 = vst.msk [vmem:[%s1238_s6 + $0x28] sm:$0xf] %vm747_vm1, %v974_v38  ;;  %774 = vst.msk [vmem:[%s1238_s6 + $0x68] sm:$0xf] %vm747_vm1, %v990_v39  ;;  %v560_v47 = vadd.f32 %v1227_v20, %v559_v41  ;;  %v1038_v48 = vpop.f32.mrf.mxu0  ;;  %v1054_v49 = vpop.f32.mrf.mxu1 }
  0xf6   : > { %756 = vst.msk [vmem:[%s1238_s6 + $0x20] sm:$0xf] %vm747_vm1, %v972_v42  ;;  %v975_v50 = vpack.c.bf16 %v598_v44, %v598_v44  ;;  %v991_v51 = vpack.c.bf16 %v614_v45, %v614_v45  ;;  %v517_v52 = vadd.f32 %v1038_v48, %v1227_v20  ;;  %v581_v53 = vadd.f32 %v1054_v49, %v1227_v20 }
  0xf7   : > { %772 = vst.msk [vmem:[%s1238_s6 + $0x60] sm:$0xf] %vm747_vm1, %v988_v43  ;;  %v596_v54 = vmax.f32 %v496_v46, 0.0  ;;  %v612_v55 = vmax.f32 %v560_v47, 0.0  ;;  %v508_v56 = vpop.f32.mrf.mxu0  ;;  %v572_v57 = vpop.f32.mrf.mxu1 }
  0xf8   : > { %759 = vst.msk [vmem:[%s1238_s6 + $0x2c] sm:$0xf] %vm747_vm1, %v975_v50  ;;  %775 = vst.msk [vmem:[%s1238_s6 + $0x6c] sm:$0xf] %vm747_vm1, %v991_v51  ;;  %v601_v58 = vmax.f32 %v517_v52, 0.0  ;;  %v617_v59 = vmax.f32 %v581_v53, 0.0  ;;  %v509_v60 = vadd.f32 %v1227_v20, %v508_v56  ;;  %v573_v61 = vadd.f32 %v1227_v20, %v572_v57 }
  0xf9   : > { %v973_v62 = vpack.c.bf16 %v596_v54, %v596_v54  ;;  %v989_v63 = vpack.c.bf16 %v612_v55, %v612_v55  ;;  %v1039_v0 = vpop.f32.mrf.mxu0  ;;  %v1055_v1 = vpop.f32.mrf.mxu1 }
  0xfa   : > { %v978_v2 = vpack.c.bf16 %v601_v58, %v601_v58  ;;  %v994_v3 = vpack.c.bf16 %v617_v59, %v617_v59  ;;  %v599_v4 = vmax.f32 %v509_v60, 0.0  ;;  %v615_v5 = vmax.f32 %v573_v61, 0.0 }
  0xfb   : > { %757 = vst.msk [vmem:[%s1238_s6 + $0x24] sm:$0xf] %vm747_vm1, %v973_v62  ;;  %773 = vst.msk [vmem:[%s1238_s6 + $0x64] sm:$0xf] %vm747_vm1, %v989_v63  ;;  %v520_v6 = vadd.f32 %v1039_v0, %v1227_v20  ;;  %v584_v7 = vadd.f32 %v1055_v1, %v1227_v20  ;;  %v511_v8 = vpop.f32.mrf.mxu0  ;;  %v575_v9 = vpop.f32.mrf.mxu1 }
  0xfc   : > { %762 = vst.msk [vmem:[%s1238_s6 + $0x38] sm:$0xf] %vm747_vm1, %v978_v2  ;;  %778 = vst.msk [vmem:[%s1238_s6 + $0x78] sm:$0xf] %vm747_vm1, %v994_v3  ;;  %v976_v10 = vpack.c.bf16 %v599_v4, %v599_v4  ;;  %v992_v11 = vpack.c.bf16 %v615_v5, %v615_v5  ;;  %v512_v12 = vadd.f32 %v1227_v20, %v511_v8 }
  0xfd   : > { %v576_v13 = vadd.f32 %v1227_v20, %v575_v9  ;;  %v602_v14 = vmax.f32 %v520_v6, 0.0  ;;  %v618_v15 = vmax.f32 %v584_v7, 0.0 }
  0xfe   : > { %760 = vst.msk [vmem:[%s1238_s6 + $0x30] sm:$0xf] %vm747_vm1, %v976_v10  ;;  %776 = vst.msk [vmem:[%s1238_s6 + $0x70] sm:$0xf] %vm747_vm1, %v992_v11  ;;  %v600_v16 = vmax.f32 %v512_v12, 0.0 }
  0xff   : > { %v616_v17 = vmax.f32 %v576_v13, 0.0  ;;  %v979_v18 = vpack.c.bf16 %v602_v14, %v602_v14  ;;  %v995_v19 = vpack.c.bf16 %v618_v15, %v618_v15 }
 0x100   : > { %v977_v21 = vpack.c.bf16 %v600_v16, %v600_v16 }
 0x101   : > { %v993_v22 = vpack.c.bf16 %v616_v17, %v616_v17  ;;  %763 = vst.msk [vmem:[%s1238_s6 + $0x3c] sm:$0xf] %vm747_vm1, %v979_v18  ;;  %779 = vst.msk [vmem:[%s1238_s6 + $0x7c] sm:$0xf] %vm747_vm1, %v995_v19 }
 0x102   : > { %761 = vst.msk [vmem:[%s1238_s6 + $0x34] sm:$0xf] %vm747_vm1, %v977_v21 }
 0x103   : > { %777 = vst.msk [vmem:[%s1238_s6 + $0x74] sm:$0xf] %vm747_vm1, %v993_v22 }
 0x104 PF: > { %s13_s14 = sadd.s32 1, %s1130_s14   ;;  %s1345_s12 = smov %s1126_s13 }
 0x105   : > { %p10_p5 = scmp.ge.s32.totalorder %s13_s14, 4   ;;  %s1346_s13 = smov %s1348_s15 }
 0x107   :  { %12 = sbr.rel (!%p10_p5) target bundleno = 2 (0x2), region = 68 }

// kernel: depth_encoder_forward.10
= control target key start
LH: loop header
LB: loop body
LE: loop exit
PB: predicated region body
PF: predicated region fallthrough
CT: control target
= control target key end

     0   :  { %s3494_s18 = smov 0   ;;  %s3496_s19 = smov 0   ;;  %s4074_s0 = inlined_call_operand.vmem [shape: bf16[512,64], index: 0, kind: input, shape index: {}]   ;;  %s4075_s1 = inlined_call_operand.vmem [shape: bf16[64,256], index: 1, kind: input, shape index: {}]   ;;  %s4076_s2 = inlined_call_operand.vmem [shape: f32[1,256], index: 2, kind: input, shape index: {}]   ;;  %s4077_s3 = inlined_call_operand.vmem [shape: bf16[512,64], index: 3, kind: input, shape index: {}]   ;;  %s4078_s4 = inlined_call_operand.vmem [shape: bf16[64,256], index: 4, kind: input, shape index: {}]   ;;  %s4079_s5 = inlined_call_operand.vmem [shape: bf16[512,256], index: 5, kind: output, shape index: {}]  }
   0x1   :  { %s3498_s20 = smov 0   ;;  %s3500_s21 = smov 0  }
   0x2   :  { %s3502_s22 = smov 0  }
   0x3 LB: > { %s24_s23 = sadd.s32 1, %s3458_s21  ;;  %s2622_s24 = sadd.s32 4294967295, %s3462_s22   ;;  %s3462_s22 = sphi %s3502_s22, %s15_s22   ;;  %s3458_s21 = sphi %s3500_s21, %s4085_s21   ;;  %s3454_s20 = sphi %s3498_s20, %s4084_s20   ;;  %s3450_s19 = sphi %s3496_s19, %s4083_s19   ;;  %s3446_s18 = sphi %s3494_s18, %s4082_s18  }
   0x4   : > { %p25_p0 = scmp.ge.s32.totalorder %s24_s23, 2  ;;  %p67_p1 = scmp.ne.s32.totalorder %s3450_s19, %s3446_s18 }
   0x5   : > { %p68_p2 = scmp.eq.s32.totalorder %s3462_s22, 0  ;;  %p177_p4 = scmp.eq.s32.totalorder %s2622_s24, 1 }
   0x6   : > { %s4087_s23 = smov (%p25_p0, %s24_s23), 0  ;;  %s60_s27 = sadd.s32 1, %s3450_s19 }
   0x7   : > { %p3526_p3 = por %p68_p2, %p67_p1  ;;  %s57_s26 = ssub.s32 %s3458_s21, %s4087_s23 }
   0x8   : > { %p58_p5 = scmp.eq.s32.totalorder %s57_s26, 0  ;;  %p3533_p6 = por %p177_p4, %p67_p1 }
   0x9   : > { %p2627_p7 = scmp.ge.s32.totalorder %s3462_s22, 2 }
   0xa   : > { %s3538_s29 = scalar_select %p58_p5, %s3450_s19, %s60_s27  }
   0xb   : > { %217 = sbr.rel (%p2627_p7) target bundleno = 34 (0x22), region = 24 }
  0x10   : > { %220 = sbr.rel (!%p3526_p3) target bundleno = 25 (0x19), region = 28  ;;  %s222_s30 = sand.u32 (%p3526_p3), 1, %s3450_s19  }
  0x11   : > { %s2629_s6 = sshll.u32 (%p3526_p3), %s3458_s21, 2  ;;  %s2628_s7 = sshll.u32 (%p3526_p3), %s222_s30, 5 }
  0x12   : > { %s226_s10 = scalar_lea.vmem (%p3526_p3), %s4075_s1, %s2629_s6  ;;  %s224_s11 = scalar_lea.vmem (%p3526_p3), [#allocation2], %s2628_s7 }
  0x13   : > { %v243_v0 = vld [vmem:[%s226_s10] sm:$0xf] (%p3526_p3)  ;;  %v245_v1 = vld [vmem:[%s226_s10 + $0x8] sm:$0xf] (%p3526_p3)  ;;  %v247_v2 = vld [vmem:[%s226_s10 + $0x10] sm:$0xf] (%p3526_p3) }
  0x14   : > { %244 = vst [vmem:[%s224_s11] sm:$0xf] (%p3526_p3), %v243_v0  ;;  %246 = vst [vmem:[%s224_s11 + $0x4] sm:$0xf] (%p3526_p3), %v245_v1  ;;  %v249_v3 = vld [vmem:[%s226_s10 + $0x18] sm:$0xf] (%p3526_p3) }
  0x15   : > { %v251_v4 = vld [vmem:[%s226_s10 + $0x20] sm:$0xf]  ;;  %248 = vst [vmem:[%s224_s11 + $0x8] sm:$0xf] %v247_v2  ;;  %250 = vst [vmem:[%s224_s11 + $0xc] sm:$0xf] %v249_v3 }
  0x16   : > { %252 = vst [vmem:[%s224_s11 + $0x10] sm:$0xf] %v251_v4  ;;  %v253_v5 = vld [vmem:[%s226_s10 + $0x28] sm:$0xf]  ;;  %v255_v6 = vld [vmem:[%s226_s10 + $0x30] sm:$0xf] }
  0x17   : > { %v257_v7 = vld [vmem:[%s226_s10 + $0x38] sm:$0xf]  ;;  %254 = vst [vmem:[%s224_s11 + $0x14] sm:$0xf] %v253_v5  ;;  %256 = vst [vmem:[%s224_s11 + $0x18] sm:$0xf] %v255_v6 }
  0x18   : > { %258 = vst [vmem:[%s224_s11 + $0x1c] sm:$0xf] %v257_v7 }
  0x19 PF: > { %304 = sbr.rel (!%p3526_p3) target bundleno = 34 (0x22), region = 73  ;;  %s306_s12 = sand.u32 (%p3526_p3), 1, %s3450_s19  }
  0x1a   : > { %s2631_s13 = sshll.u32 (%p3526_p3), %s3458_s21, 2  ;;  %s2630_s14 = sshll.u32 (%p3526_p3), %s306_s12, 5 }
  0x1b   : > { %s310_s17 = scalar_lea.vmem (%p3526_p3), %s4078_s4, %s2631_s13  ;;  %s308_s24 = scalar_lea.vmem (%p3526_p3), [#allocation3], %s2630_s14 }
  0x1c   : > { %v327_v8 = vld [vmem:[%s310_s17] sm:$0xf] (%p3526_p3)  ;;  %v329_v9 = vld [vmem:[%s310_s17 + $0x8] sm:$0xf] (%p3526_p3)  ;;  %v331_v10 = vld [vmem:[%s310_s17 + $0x10] sm:$0xf] (%p3526_p3) }
  0x1d   : > { %328 = vst [vmem:[%s308_s24] sm:$0xf] (%p3526_p3), %v327_v8  ;;  %330 = vst [vmem:[%s308_s24 + $0x4] sm:$0xf] (%p3526_p3), %v329_v9  ;;  %v333_v11 = vld [vmem:[%s310_s17 + $0x18] sm:$0xf] (%p3526_p3) }
  0x1e   : > { %v335_v12 = vld [vmem:[%s310_s17 + $0x20] sm:$0xf]  ;;  %332 = vst [vmem:[%s308_s24 + $0x8] sm:$0xf] %v331_v10  ;;  %334 = vst [vmem:[%s308_s24 + $0xc] sm:$0xf] %v333_v11 }
  0x1f   : > { %336 = vst [vmem:[%s308_s24 + $0x10] sm:$0xf] %v335_v12  ;;  %v337_v13 = vld [vmem:[%s310_s17 + $0x28] sm:$0xf]  ;;  %v339_v14 = vld [vmem:[%s310_s17 + $0x30] sm:$0xf] }
  0x20   : > { %v341_v15 = vld [vmem:[%s310_s17 + $0x38] sm:$0xf]  ;;  %338 = vst [vmem:[%s308_s24 + $0x14] sm:$0xf] %v337_v13  ;;  %340 = vst [vmem:[%s308_s24 + $0x18] sm:$0xf] %v339_v14 }
  0x21   : > { %342 = vst [vmem:[%s308_s24 + $0x1c] sm:$0xf] %v341_v15 }
  0x22 PF: > { %p2632_p8 = scmp.ge.s32.totalorder %s3462_s22, 1  ;;  %p381_p9 = scmp.lt.s32.totalorder %s3462_s22, 3 }
  0x24   : > { %p382_p10 = pnand %p2632_p8, %p381_p9 }
  0x25   : > { %s388_s25 = sand.u32 (!%p382_p10), 1, %s3446_s18   ;;  %p444_p11 = scmp.lt.s32.totalorder (!%p382_p10), %s3454_s20, 1 }
  0x26   : > { %385 = sbr.rel (%p382_p10) target bundleno = 410 (0x19a), region = 114  ;;  %s2633_s30 = sshll.u32 (!%p382_p10), %s388_s25, 5 }
  0x27   : > { %s397_s8 = scalar_lea.vmem (!%p382_p10), [#allocation3], %s2633_s30  ;;  %s390_s9 = scalar_lea.vmem (!%p382_p10), [#allocation2], %s2633_s30 }
  0x28   : > { %s2635_s10 = sshll.u32 (!%p382_p10), %s388_s25, 8 }
  0x29   : > { %s3829_s18 = scalar_lea.vmem (!%p382_p10), [#allocation4], %s2635_s10 }
  0x2b   : > { %v3360_v16 = vld [vmem:[%s4077_s3] sm:$0xff]   ;;  %vm783_vm0 = vcmask 523264   ;;  %v3352_v18 = vld [vmem:[%s397_s8 + $0x18] sm:$0xff]   ;;  %v3354_v20 = vld [vmem:[%s397_s8 + $0x10] sm:$0xff]   ;;  %s445_s6 = scalar_select %p444_p11, %s3454_s20, 1 }
  0x2c   : > { %v3361_v17 = vld [vmem:[%s4074_s0] sm:$0xff]   ;;  %3176 = vmatprep.mubr.msk.bf16.mxu0 %vm783_vm0, %v3360_v16  ;;  %v3353_v19 = vld [vmem:[%s390_s9 + $0x18] sm:$0xff]   ;;  %3168 = vmatprep.subr.bf16.mxu0 %v3352_v18  ;;  %v3355_v21 = vld [vmem:[%s390_s9 + $0x10] sm:$0xff]   ;;  %s2838_s25 = sshll.u32 (%p3533_p6), %s3454_s20, 2 }
  0x2d   : > { %3248 = vmatprep.mubr.msk.bf16.mxu1 %vm783_vm0, %v3361_v17  ;;  %3240 = vmatprep.subr.bf16.mxu1 %v3353_v19  ;;  %v3356_v22 = vld [vmem:[%s397_s8 + $0x8] sm:$0xff]   ;;  %v3358_v24 = vld [vmem:[%s397_s8] sm:$0xff]   ;;  %v3364_v28 = vld [vmem:[%s4077_s3 + $0x10] sm:$0xff]   ;;  %s3931_s13 = scalar_lea.vmem (%p3533_p6), %s4079_s5, %s2838_s25 }
  0x2e   : > { %3169 = vmatpush3.bf16.msra.mxu0 %v3352_v18  ;;  %3241 = vmatpush3.bf16.msra.mxu1 %v3353_v19  ;;  %v3357_v23 = vld [vmem:[%s390_s9 + $0x8] sm:$0xff]   ;;  %v3359_v25 = vld [vmem:[%s390_s9] sm:$0xff]   ;;  %v3365_v29 = vld [vmem:[%s4074_s0 + $0x10] sm:$0xff]   ;;  %s446_s9 = scalar_lea.vmem %s4076_s2, %s445_s6 }
  0x2f   : > { %3170 = vmatprep.subr.bf16.mxu0 %v3354_v20  ;;  %3242 = vmatprep.subr.bf16.mxu1 %v3355_v21  ;;  %v3362_v26 = vld [vmem:[%s4077_s3 + $0x8] sm:$0xff]   ;;  %v3366_v30 = vld [vmem:[%s4077_s3 + $0x18] sm:$0xff]   ;;  %v3368_v32 = vld [vmem:[%s4077_s3 + $0x20] sm:$0xff]  }
  0x30   : > { %v3363_v27 = vld [vmem:[%s4074_s0 + $0x8] sm:$0xff]   ;;  %v3367_v31 = vld [vmem:[%s4074_s0 + $0x18] sm:$0xff]   ;;  %v3369_v33 = vld [vmem:[%s4074_s0 + $0x20] sm:$0xff]  }
  0x31   : > { %v3370_v34 = vld [vmem:[%s4077_s3 + $0x28] sm:$0xff]   ;;  %v3372_v36 = vld [vmem:[%s4077_s3 + $0x30] sm:$0xff]   ;;  %v3374_v38 = vld [vmem:[%s4077_s3 + $0x38] sm:$0xff]  }
  0x32   : > { %3171 = vmatpush3.bf16.msra.mxu0 %v3354_v20  ;;  %3243 = vmatpush3.bf16.msra.mxu1 %v3355_v21  ;;  %v3371_v35 = vld [vmem:[%s4074_s0 + $0x28] sm:$0xff]   ;;  %v3373_v37 = vld [vmem:[%s4074_s0 + $0x30] sm:$0xff]   ;;  %v3375_v39 = vld [vmem:[%s4074_s0 + $0x38] sm:$0xff]  }
  0x33   : > { %3172 = vmatprep.subr.bf16.mxu0 %v3356_v22  ;;  %3244 = vmatprep.subr.bf16.mxu1 %v3357_v23  ;;  %v3376_v40 = vld [vmem:[%s4077_s3 + $0x40] sm:$0xff]   ;;  %v3378_v42 = vld [vmem:[%s4077_s3 + $0x48] sm:$0xff]   ;;  %v3380_v44 = vld [vmem:[%s4077_s3 + $0x50] sm:$0xff]  }
  0x34   : > { %v3377_v41 = vld [vmem:[%s4074_s0 + $0x40] sm:$0xff]   ;;  %v3379_v43 = vld [vmem:[%s4074_s0 + $0x48] sm:$0xff]   ;;  %v3381_v45 = vld [vmem:[%s4074_s0 + $0x50] sm:$0xff]  }
  0x35   : > { %v3382_v46 = vld [vmem:[%s4077_s3 + $0x58] sm:$0xff]   ;;  %v3384_v48 = vld [vmem:[%s4077_s3 + $0x60] sm:$0xff]   ;;  %v3386_v50 = vld [vmem:[%s4077_s3 + $0x68] sm:$0xff]  }
  0x36   : > { %3173 = vmatpush3.bf16.msra.mxu0 %v3356_v22  ;;  %3245 = vmatpush3.bf16.msra.mxu1 %v3357_v23  ;;  %v3383_v47 = vld [vmem:[%s4074_s0 + $0x58] sm:$0xff]   ;;  %v3385_v49 = vld [vmem:[%s4074_s0 + $0x60] sm:$0xff]   ;;  %v3387_v51 = vld [vmem:[%s4074_s0 + $0x68] sm:$0xff]  }
  0x37   : > { %3174 = vmatprep.subr.bf16.mxu0 %v3358_v24  ;;  %3246 = vmatprep.subr.bf16.mxu1 %v3359_v25  ;;  %v3388_v52 = vld [vmem:[%s4077_s3 + $0x70] sm:$0xff]   ;;  %v3390_v54 = vld [vmem:[%s4077_s3 + $0x78] sm:$0xff]   ;;  %v3392_v56 = vld [vmem:[%s4077_s3 + $0x80] sm:$0xff]  }
  0x38   : > { %v3389_v53 = vld [vmem:[%s4074_s0 + $0x70] sm:$0xff]   ;;  %v3391_v55 = vld [vmem:[%s4074_s0 + $0x78] sm:$0xff]   ;;  %v3393_v57 = vld [vmem:[%s4074_s0 + $0x80] sm:$0xff]  }
  0x39   : > { %v3394_v58 = vld [vmem:[%s4077_s3 + $0x88] sm:$0xff]   ;;  %v3396_v60 = vld [vmem:[%s4077_s3 + $0x90] sm:$0xff]   ;;  %v3398_v62 = vld [vmem:[%s4077_s3 + $0x98] sm:$0xff]  }
  0x3a   : > { %3175 = vmatpush3.bf16.msra.mxu0 %v3358_v24  ;;  %3247 = vmatpush3.bf16.msra.mxu1 %v3359_v25  ;;  %v3395_v59 = vld [vmem:[%s4074_s0 + $0x88] sm:$0xff]   ;;  %v3397_v61 = vld [vmem:[%s4074_s0 + $0x90] sm:$0xff]   ;;  %v3399_v63 = vld [vmem:[%s4074_s0 + $0x98] sm:$0xff]  }
  0x3b   : > { %v3400_v0 = vld [vmem:[%s4077_s3 + $0xa0] sm:$0xff]   ;;  %v3402_v2 = vld [vmem:[%s4077_s3 + $0xa8] sm:$0xff]   ;;  %v3404_v4 = vld [vmem:[%s4077_s3 + $0xb0] sm:$0xff]  }
  0x3c   : > { %v3401_v1 = vld [vmem:[%s4074_s0 + $0xa0] sm:$0xff]   ;;  %v3403_v3 = vld [vmem:[%s4074_s0 + $0xa8] sm:$0xff]   ;;  %v3405_v5 = vld [vmem:[%s4074_s0 + $0xb0] sm:$0xff]  }
  0x3d   : > { %3177 = vmatmul.mubr.msk.bf16.vlgmr.msra.gmra.mxu0 %vm783_vm0, %v3362_v26  ;;  %3249 = vmatmul.mubr.msk.bf16.vlgmr.msra.gmra.mxu1 %vm783_vm0, %v3363_v27  ;;  %v3406_v6 = vld [vmem:[%s4077_s3 + $0xb8] sm:$0xff]   ;;  %v3408_v8 = vld [vmem:[%s4077_s3 + $0xc0] sm:$0xff]   ;;  %v3410_v10 = vld [vmem:[%s4077_s3 + $0xc8] sm:$0xff]  }
  0x3e   : > { %3180 = vmatprep.mubr.msk.bf16.mxu0 %vm783_vm0, %v3364_v28  ;;  %3252 = vmatprep.mubr.msk.bf16.mxu1 %vm783_vm0, %v3365_v29  ;;  %v3407_v7 = vld [vmem:[%s4074_s0 + $0xb8] sm:$0xff]   ;;  %v3409_v9 = vld [vmem:[%s4074_s0 + $0xc0] sm:$0xff]   ;;  %v3411_v11 = vld [vmem:[%s4074_s0 + $0xc8] sm:$0xff]  }
  0x3f   : > { %v3412_v12 = vld [vmem:[%s4077_s3 + $0xd0] sm:$0xff]   ;;  %v3414_v14 = vld [vmem:[%s4077_s3 + $0xd8] sm:$0xff]   ;;  %v3416_v16 = vld [vmem:[%s4077_s3 + $0xe0] sm:$0xff]  }
  0x40   : > { %v3413_v13 = vld [vmem:[%s4074_s0 + $0xd0] sm:$0xff]   ;;  %v3415_v15 = vld [vmem:[%s4074_s0 + $0xd8] sm:$0xff]   ;;  %v3417_v17 = vld [vmem:[%s4074_s0 + $0xe0] sm:$0xff]  }
  0x41   : > { %v3418_v18 = vld [vmem:[%s4077_s3 + $0xe8] sm:$0xff]   ;;  %v3420_v20 = vld [vmem:[%s4077_s3 + $0xf0] sm:$0xff]   ;;  %v3422_v22 = vld [vmem:[%s4077_s3 + $0xf8] sm:$0xff]  }
  0x42   : > { %v3419_v19 = vld [vmem:[%s4074_s0 + $0xe8] sm:$0xff]   ;;  %v3421_v21 = vld [vmem:[%s4074_s0 + $0xf0] sm:$0xff]   ;;  %v3423_v23 = vld [vmem:[%s4074_s0 + $0xf8] sm:$0xff]  }
  0x43   : > { %v3821_v28 = vld [vmem:[%s446_s9] ss:$0 sm:$0xff] }
  0x45   : > { %3181 = vmatmul.mubr.msk.bf16.gmra.mxu0 %vm783_vm0, %v3366_v30  ;;  %3253 = vmatmul.mubr.msk.bf16.gmra.mxu1 %vm783_vm0, %v3367_v31 }
  0x46   : > { %3184 = vmatprep.mubr.msk.bf16.mxu0 %vm783_vm0, %v3368_v32  ;;  %3256 = vmatprep.mubr.msk.bf16.mxu1 %vm783_vm0, %v3369_v33 }
  0x4d   : > { %3185 = vmatmul.mubr.msk.bf16.gmra.mxu0 %vm783_vm0, %v3370_v34  ;;  %3257 = vmatmul.mubr.msk.bf16.gmra.mxu1 %vm783_vm0, %v3371_v35 }
  0x4e   : > { %3188 = vmatprep.mubr.msk.bf16.mxu0 %vm783_vm0, %v3372_v36  ;;  %3260 = vmatprep.mubr.msk.bf16.mxu1 %vm783_vm0, %v3373_v37 }
  0x55   : > { %3189 = vmatmul.mubr.msk.bf16.gmra.mxu0 %vm783_vm0, %v3374_v38  ;;  %3261 = vmatmul.mubr.msk.bf16.gmra.mxu1 %vm783_vm0, %v3375_v39 }
  0x56   : > { %3192 = vmatprep.mubr.msk.bf16.mxu0 %vm783_vm0, %v3376_v40  ;;  %3264 = vmatprep.mubr.msk.bf16.mxu1 %vm783_vm0, %v3377_v41 }
  0x5d   : > { %3193 = vmatmul.mubr.msk.bf16.gmra.mxu0 %vm783_vm0, %v3378_v42  ;;  %3265 = vmatmul.mubr.msk.bf16.gmra.mxu1 %vm783_vm0, %v3379_v43 }
  0x5e   : > { %3196 = vmatprep.mubr.msk.bf16.mxu0 %vm783_vm0, %v3380_v44  ;;  %3268 = vmatprep.mubr.msk.bf16.mxu1 %vm783_vm0, %v3381_v45 }
  0x65   : > { %3197 = vmatmul.mubr.msk.bf16.gmra.mxu0 %vm783_vm0, %v3382_v46  ;;  %3269 = vmatmul.mubr.msk.bf16.gmra.mxu1 %vm783_vm0, %v3383_v47 }
  0x66   : > { %3200 = vmatprep.mubr.msk.bf16.mxu0 %vm783_vm0, %v3384_v48  ;;  %3272 = vmatprep.mubr.msk.bf16.mxu1 %vm783_vm0, %v3385_v49 }
  0x6d   : > { %3201 = vmatmul.mubr.msk.bf16.gmra.mxu0 %vm783_vm0, %v3386_v50  ;;  %3273 = vmatmul.mubr.msk.bf16.gmra.mxu1 %vm783_vm0, %v3387_v51 }
  0x6e   : > { %3204 = vmatprep.mubr.msk.bf16.mxu0 %vm783_vm0, %v3388_v52  ;;  %3276 = vmatprep.mubr.msk.bf16.mxu1 %vm783_vm0, %v3389_v53 }
  0x75   : > { %3205 = vmatmul.mubr.msk.bf16.gmra.mxu0 %vm783_vm0, %v3390_v54  ;;  %3277 = vmatmul.mubr.msk.bf16.gmra.mxu1 %vm783_vm0, %v3391_v55 }
  0x76   : > { %3208 = vmatprep.mubr.msk.bf16.mxu0 %vm783_vm0, %v3392_v56  ;;  %3280 = vmatprep.mubr.msk.bf16.mxu1 %vm783_vm0, %v3393_v57 }
  0x7d   : > { %3209 = vmatmul.mubr.msk.bf16.gmra.mxu0 %vm783_vm0, %v3394_v58  ;;  %3281 = vmatmul.mubr.msk.bf16.gmra.mxu1 %vm783_vm0, %v3395_v59 }
  0x7e   : > { %3212 = vmatprep.mubr.msk.bf16.mxu0 %vm783_vm0, %v3396_v60  ;;  %3284 = vmatprep.mubr.msk.bf16.mxu1 %vm783_vm0, %v3397_v61 }
  0x85   : > { %3213 = vmatmul.mubr.msk.bf16.gmra.mxu0 %vm783_vm0, %v3398_v62  ;;  %3285 = vmatmul.mubr.msk.bf16.gmra.mxu1 %vm783_vm0, %v3399_v63 }
  0x86   : > { %3216 = vmatprep.mubr.msk.bf16.mxu0 %vm783_vm0, %v3400_v0  ;;  %3288 = vmatprep.mubr.msk.bf16.mxu1 %vm783_vm0, %v3401_v1 }
  0x8d   : > { %3217 = vmatmul.mubr.msk.bf16.gmra.mxu0 %vm783_vm0, %v3402_v2  ;;  %3289 = vmatmul.mubr.msk.bf16.gmra.mxu1 %vm783_vm0, %v3403_v3 }
  0x8e   : > { %3220 = vmatprep.mubr.msk.bf16.mxu0 %vm783_vm0, %v3404_v4  ;;  %3292 = vmatprep.mubr.msk.bf16.mxu1 %vm783_vm0, %v3405_v5 }
  0x95   : > { %3221 = vmatmul.mubr.msk.bf16.gmra.mxu0 %vm783_vm0, %v3406_v6  ;;  %3293 = vmatmul.mubr.msk.bf16.gmra.mxu1 %vm783_vm0, %v3407_v7 }
  0x96   : > { %3224 = vmatprep.mubr.msk.bf16.mxu0 %vm783_vm0, %v3408_v8  ;;  %3296 = vmatprep.mubr.msk.bf16.mxu1 %vm783_vm0, %v3409_v9 }
  0x9d   : > { %3225 = vmatmul.mubr.msk.bf16.gmra.mxu0 %vm783_vm0, %v3410_v10  ;;  %3297 = vmatmul.mubr.msk.bf16.gmra.mxu1 %vm783_vm0, %v3411_v11 }
  0x9e   : > { %3228 = vmatprep.mubr.msk.bf16.mxu0 %vm783_vm0, %v3412_v12  ;;  %3300 = vmatprep.mubr.msk.bf16.mxu1 %vm783_vm0, %v3413_v13 }
  0xa5   : > { %3229 = vmatmul.mubr.msk.bf16.gmra.mxu0 %vm783_vm0, %v3414_v14  ;;  %3301 = vmatmul.mubr.msk.bf16.gmra.mxu1 %vm783_vm0, %v3415_v15 }
  0xa6   : > { %3232 = vmatprep.mubr.msk.bf16.mxu0 %vm783_vm0, %v3416_v16  ;;  %3304 = vmatprep.mubr.msk.bf16.mxu1 %vm783_vm0, %v3417_v17 }
  0xad   : > { %3233 = vmatmul.mubr.msk.bf16.gmra.mxu0 %vm783_vm0, %v3418_v18  ;;  %3305 = vmatmul.mubr.msk.bf16.gmra.mxu1 %vm783_vm0, %v3419_v19 }
  0xae   : > { %3236 = vmatprep.mubr.msk.bf16.mxu0 %vm783_vm0, %v3420_v20  ;;  %3308 = vmatprep.mubr.msk.bf16.mxu1 %vm783_vm0, %v3421_v21 }
  0xb5   : > { %3237 = vmatmul.mubr.msk.bf16.gmra.mxu0 %vm783_vm0, %v3422_v22  ;;  %3309 = vmatmul.mubr.msk.bf16.gmra.mxu1 %vm783_vm0, %v3423_v23 }
  0xfd   : > { %v3178_v24 = vpop.f32.mrf.mxu0  ;;  %v3250_v25 = vpop.f32.mrf.mxu1 }
  0xfe   : > { %v1492_v26 = vadd.f32 %v3250_v25, %v3178_v24 }
  0xff   : > { %v914_v27 = vpop.f32.mrf.mxu0  ;;  %v1483_v29 = vpop.f32.mrf.mxu1 }
 0x100   : > { %v1484_v30 = vadd.f32 %v1483_v29, %v914_v27  ;;  %v1747_v33 = vadd.f32 %v3821_v28, %v1492_v26 }
 0x101   : > { %v3179_v31 = vpop.f32.mrf.mxu0  ;;  %v3251_v32 = vpop.f32.mrf.mxu1 }
 0x102   : > { %v1495_v34 = vadd.f32 %v3251_v32, %v3179_v31  ;;  %v1745_v37 = vadd.f32 %v3821_v28, %v1484_v30  ;;  %v1811_v42 = vmax.f32 %v1747_v33, 0.0 }
 0x103   : > { %v917_v35 = vpop.f32.mrf.mxu0  ;;  %v1486_v36 = vpop.f32.mrf.mxu1 }
 0x104   : > { %v1748_v38 = vadd.f32 %v3821_v28, %v1495_v34  ;;  %v1487_v39 = vadd.f32 %v1486_v36, %v917_v35  ;;  %v1809_v48 = vmax.f32 %v1745_v37, 0.0 }
 0x105   : > { %v3182_v40 = vpop.f32.mrf.mxu0  ;;  %v3254_v41 = vpop.f32.mrf.mxu1 }
 0x106   : > { %v1812_v43 = vmax.f32 %v1748_v38, 0.0  ;;  %v1746_v44 = vadd.f32 %v3821_v28, %v1487_v39  ;;  %v1508_v45 = vadd.f32 %v3254_v41, %v3182_v40 }
 0x107   : > { %v930_v46 = vpop.f32.mrf.mxu0  ;;  %v1499_v47 = vpop.f32.mrf.mxu1 }
 0x108   : > { %v2913_v49 = vpack.c.bf16 %v1812_v43, %v1811_v42  ;;  %v1810_v50 = vmax.f32 %v1746_v44, 0.0  ;;  %v1500_v51 = vadd.f32 %v1499_v47, %v930_v46  ;;  %v1751_v55 = vadd.f32 %v3821_v28, %v1508_v45 }
 0x109   : > { %v3183_v52 = vpop.f32.mrf.mxu0  ;;  %v3255_v53 = vpop.f32.mrf.mxu1 }
 0x10a   : > { %3065 = vst [vmem:[%s3829_s18 + $0x8] sm:$0xff] %v2913_v49   ;;  %v2908_v54 = vpack.c.bf16 %v1810_v50, %v1809_v48  ;;  %v1511_v56 = vadd.f32 %v3255_v53, %v3183_v52  ;;  %v1749_v59 = vadd.f32 %v3821_v28, %v1500_v51  ;;  %v1815_v0 = vmax.f32 %v1751_v55, 0.0 }
 0x10b   : > { %v933_v57 = vpop.f32.mrf.mxu0  ;;  %v1502_v58 = vpop.f32.mrf.mxu1 }
 0x10c   : > { %2909 = vst [vmem:[%s3829_s18] sm:$0xff] %v2908_v54   ;;  %v1752_v60 = vadd.f32 %v3821_v28, %v1511_v56  ;;  %v1503_v61 = vadd.f32 %v1502_v58, %v933_v57  ;;  %v1813_v6 = vmax.f32 %v1749_v59, 0.0 }
 0x10d   : > { %v3186_v62 = vpop.f32.mrf.mxu0  ;;  %v3258_v63 = vpop.f32.mrf.mxu1 }
 0x10e   : > { %v1816_v1 = vmax.f32 %v1752_v60, 0.0  ;;  %v1750_v2 = vadd.f32 %v3821_v28, %v1503_v61  ;;  %v1524_v3 = vadd.f32 %v3258_v63, %v3186_v62 }
 0x10f   : > { %v946_v4 = vpop.f32.mrf.mxu0  ;;  %v1515_v5 = vpop.f32.mrf.mxu1 }
 0x110   : > { %v2923_v7 = vpack.c.bf16 %v1816_v1, %v1815_v0  ;;  %v1814_v8 = vmax.f32 %v1750_v2, 0.0  ;;  %v1516_v9 = vadd.f32 %v1515_v5, %v946_v4  ;;  %v1755_v13 = vadd.f32 %v3821_v28, %v1524_v3 }
 0x111   : > { %v3187_v10 = vpop.f32.mrf.mxu0  ;;  %v3259_v11 = vpop.f32.mrf.mxu1 }
 0x112   : > { %3067 = vst [vmem:[%s3829_s18 + $0x18] sm:$0xff] %v2923_v7   ;;  %v2918_v12 = vpack.c.bf16 %v1814_v8, %v1813_v6  ;;  %v1527_v14 = vadd.f32 %v3259_v11, %v3187_v10  ;;  %v1753_v17 = vadd.f32 %v3821_v28, %v1516_v9  ;;  %v1819_v22 = vmax.f32 %v1755_v13, 0.0 }
 0x113   : > { %v949_v15 = vpop.f32.mrf.mxu0  ;;  %v1518_v16 = vpop.f32.mrf.mxu1 }
 0x114   : > { %3066 = vst [vmem:[%s3829_s18 + $0x10] sm:$0xff] %v2918_v12   ;;  %v1756_v18 = vadd.f32 %v3821_v28, %v1527_v14  ;;  %v1519_v19 = vadd.f32 %v1518_v16, %v949_v15  ;;  %v1817_v29 = vmax.f32 %v1753_v17, 0.0 }
 0x115   : > { %v3190_v20 = vpop.f32.mrf.mxu0  ;;  %v3262_v21 = vpop.f32.mrf.mxu1 }
 0x116   : > { %v1820_v23 = vmax.f32 %v1756_v18, 0.0  ;;  %v1754_v24 = vadd.f32 %v3821_v28, %v1519_v19  ;;  %v1540_v25 = vadd.f32 %v3262_v21, %v3190_v20 }
 0x117   : > { %v962_v26 = vpop.f32.mrf.mxu0  ;;  %v1531_v27 = vpop.f32.mrf.mxu1 }
 0x118   : > { %v2933_v30 = vpack.c.bf16 %v1820_v23, %v1819_v22  ;;  %v1818_v31 = vmax.f32 %v1754_v24, 0.0  ;;  %v1532_v32 = vadd.f32 %v1531_v27, %v962_v26  ;;  %v1759_v36 = vadd.f32 %v3821_v28, %v1540_v25 }
 0x119   : > { %v3191_v33 = vpop.f32.mrf.mxu0  ;;  %v3263_v34 = vpop.f32.mrf.mxu1 }
 0x11a   : > { %3069 = vst [vmem:[%s3829_s18 + $0x28] sm:$0xff] %v2933_v30   ;;  %v2928_v35 = vpack.c.bf16 %v1818_v31, %v1817_v29  ;;  %v1543_v37 = vadd.f32 %v3263_v34, %v3191_v33  ;;  %v1757_v40 = vadd.f32 %v3821_v28, %v1532_v32  ;;  %v1823_v45 = vmax.f32 %v1759_v36, 0.0 }
 0x11b   : > { %v965_v38 = vpop.f32.mrf.mxu0  ;;  %v1534_v39 = vpop.f32.mrf.mxu1 }
 0x11c   : > { %3068 = vst [vmem:[%s3829_s18 + $0x20] sm:$0xff] %v2928_v35   ;;  %v1760_v41 = vadd.f32 %v3821_v28, %v1543_v37  ;;  %v1535_v42 = vadd.f32 %v1534_v39, %v965_v38  ;;  %v1821_v51 = vmax.f32 %v1757_v40, 0.0 }
 0x11d   : > { %v3194_v43 = vpop.f32.mrf.mxu0  ;;  %v3266_v44 = vpop.f32.mrf.mxu1 }
 0x11e   : > { %v1824_v46 = vmax.f32 %v1760_v41, 0.0  ;;  %v1758_v47 = vadd.f32 %v3821_v28, %v1535_v42  ;;  %v1556_v48 = vadd.f32 %v3266_v44, %v3194_v43 }
 0x11f   : > { %v978_v49 = vpop.f32.mrf.mxu0  ;;  %v1547_v50 = vpop.f32.mrf.mxu1 }
 0x120   : > { %v2943_v52 = vpack.c.bf16 %v1824_v46, %v1823_v45  ;;  %v1822_v53 = vmax.f32 %v1758_v47, 0.0  ;;  %v1548_v54 = vadd.f32 %v1547_v50, %v978_v49  ;;  %v1763_v58 = vadd.f32 %v3821_v28, %v1556_v48 }
 0x121   : > { %v3195_v55 = vpop.f32.mrf.mxu0  ;;  %v3267_v56 = vpop.f32.mrf.mxu1 }
 0x122   : > { %3071 = vst [vmem:[%s3829_s18 + $0x38] sm:$0xff] %v2943_v52   ;;  %v2938_v57 = vpack.c.bf16 %v1822_v53, %v1821_v51  ;;  %v1559_v59 = vadd.f32 %v3267_v56, %v3195_v55  ;;  %v1761_v62 = vadd.f32 %v3821_v28, %v1548_v54  ;;  %v1827_v3 = vmax.f32 %v1763_v58, 0.0 }
 0x123   : > { %v981_v60 = vpop.f32.mrf.mxu0  ;;  %v1550_v61 = vpop.f32.mrf.mxu1 }
 0x124   : > { %3070 = vst [vmem:[%s3829_s18 + $0x30] sm:$0xff] %v2938_v57   ;;  %v1764_v63 = vadd.f32 %v3821_v28, %v1559_v59  ;;  %v1551_v0 = vadd.f32 %v1550_v61, %v981_v60  ;;  %v1825_v9 = vmax.f32 %v1761_v62, 0.0 }
 0x125   : > { %v3198_v1 = vpop.f32.mrf.mxu0  ;;  %v3270_v2 = vpop.f32.mrf.mxu1 }
 0x126   : > { %v1828_v4 = vmax.f32 %v1764_v63, 0.0  ;;  %v1762_v5 = vadd.f32 %v3821_v28, %v1551_v0  ;;  %v1572_v6 = vadd.f32 %v3270_v2, %v3198_v1 }
 0x127   : > { %v994_v7 = vpop.f32.mrf.mxu0  ;;  %v1563_v8 = vpop.f32.mrf.mxu1 }
 0x128   : > { %v2953_v10 = vpack.c.bf16 %v1828_v4, %v1827_v3  ;;  %v1826_v11 = vmax.f32 %v1762_v5, 0.0  ;;  %v1564_v12 = vadd.f32 %v1563_v8, %v994_v7  ;;  %v1767_v16 = vadd.f32 %v3821_v28, %v1572_v6 }
 0x129   : > { %v3199_v13 = vpop.f32.mrf.mxu0  ;;  %v3271_v14 = vpop.f32.mrf.mxu1 }
 0x12a   : > { %3073 = vst [vmem:[%s3829_s18 + $0x48] sm:$0xff] %v2953_v10   ;;  %v2948_v15 = vpack.c.bf16 %v1826_v11, %v1825_v9  ;;  %v1575_v17 = vadd.f32 %v3271_v14, %v3199_v13  ;;  %v1765_v20 = vadd.f32 %v3821_v28, %v1564_v12  ;;  %v1831_v25 = vmax.f32 %v1767_v16, 0.0 }
 0x12b   : > { %v997_v18 = vpop.f32.mrf.mxu0  ;;  %v1566_v19 = vpop.f32.mrf.mxu1 }
 0x12c   : > { %3072 = vst [vmem:[%s3829_s18 + $0x40] sm:$0xff] %v2948_v15   ;;  %v1768_v21 = vadd.f32 %v3821_v28, %v1575_v17  ;;  %v1567_v22 = vadd.f32 %v1566_v19, %v997_v18  ;;  %v1829_v32 = vmax.f32 %v1765_v20, 0.0 }
 0x12d   : > { %v3202_v23 = vpop.f32.mrf.mxu0  ;;  %v3274_v24 = vpop.f32.mrf.mxu1 }
 0x12e   : > { %v1832_v26 = vmax.f32 %v1768_v21, 0.0  ;;  %v1766_v27 = vadd.f32 %v3821_v28, %v1567_v22  ;;  %v1588_v29 = vadd.f32 %v3274_v24, %v3202_v23 }
 0x12f   : > { %v1010_v30 = vpop.f32.mrf.mxu0  ;;  %v1579_v31 = vpop.f32.mrf.mxu1 }
 0x130   : > { %v2963_v33 = vpack.c.bf16 %v1832_v26, %v1831_v25  ;;  %v1830_v34 = vmax.f32 %v1766_v27, 0.0  ;;  %v1580_v35 = vadd.f32 %v1579_v31, %v1010_v30  ;;  %v1771_v39 = vadd.f32 %v3821_v28, %v1588_v29 }
 0x131   : > { %v3203_v36 = vpop.f32.mrf.mxu0  ;;  %v3275_v37 = vpop.f32.mrf.mxu1 }
 0x132   : > { %3075 = vst [vmem:[%s3829_s18 + $0x58] sm:$0xff] %v2963_v33   ;;  %v2958_v38 = vpack.c.bf16 %v1830_v34, %v1829_v32  ;;  %v1591_v40 = vadd.f32 %v3275_v37, %v3203_v36  ;;  %v1769_v43 = vadd.f32 %v3821_v28, %v1580_v35  ;;  %v1835_v48 = vmax.f32 %v1771_v39, 0.0 }
 0x133   : > { %v1013_v41 = vpop.f32.mrf.mxu0  ;;  %v1582_v42 = vpop.f32.mrf.mxu1 }
 0x134   : > { %3074 = vst [vmem:[%s3829_s18 + $0x50] sm:$0xff] %v2958_v38   ;;  %v1772_v44 = vadd.f32 %v3821_v28, %v1591_v40  ;;  %v1583_v45 = vadd.f32 %v1582_v42, %v1013_v41  ;;  %v1833_v54 = vmax.f32 %v1769_v43, 0.0 }
 0x135   : > { %v3206_v46 = vpop.f32.mrf.mxu0  ;;  %v3278_v47 = vpop.f32.mrf.mxu1 }
 0x136   : > { %v1836_v49 = vmax.f32 %v1772_v44, 0.0  ;;  %v1770_v50 = vadd.f32 %v3821_v28, %v1583_v45  ;;  %v1604_v51 = vadd.f32 %v3278_v47, %v3206_v46 }
 0x137   : > { %v1026_v52 = vpop.f32.mrf.mxu0  ;;  %v1595_v53 = vpop.f32.mrf.mxu1 }
 0x138   : > { %v2973_v55 = vpack.c.bf16 %v1836_v49, %v1835_v48  ;;  %v1834_v56 = vmax.f32 %v1770_v50, 0.0  ;;  %v1596_v57 = vadd.f32 %v1595_v53, %v1026_v52  ;;  %v1775_v61 = vadd.f32 %v3821_v28, %v1604_v51 }
 0x139   : > { %v3207_v58 = vpop.f32.mrf.mxu0  ;;  %v3279_v59 = vpop.f32.mrf.mxu1 }
 0x13a   : > { %3077 = vst [vmem:[%s3829_s18 + $0x68] sm:$0xff] %v2973_v55   ;;  %v2968_v60 = vpack.c.bf16 %v1834_v56, %v1833_v54  ;;  %v1607_v62 = vadd.f32 %v3279_v59, %v3207_v58  ;;  %v1773_v1 = vadd.f32 %v3821_v28, %v1596_v57  ;;  %v1839_v6 = vmax.f32 %v1775_v61, 0.0 }
 0x13b   : > { %v1029_v63 = vpop.f32.mrf.mxu0  ;;  %v1598_v0 = vpop.f32.mrf.mxu1 }
 0x13c   : > { %3076 = vst [vmem:[%s3829_s18 + $0x60] sm:$0xff] %v2968_v60   ;;  %v1776_v2 = vadd.f32 %v3821_v28, %v1607_v62  ;;  %v1599_v3 = vadd.f32 %v1598_v0, %v1029_v63  ;;  %v1837_v12 = vmax.f32 %v1773_v1, 0.0 }
 0x13d   : > { %v3210_v4 = vpop.f32.mrf.mxu0  ;;  %v3282_v5 = vpop.f32.mrf.mxu1 }
 0x13e   : > { %v1840_v7 = vmax.f32 %v1776_v2, 0.0  ;;  %v1774_v8 = vadd.f32 %v3821_v28, %v1599_v3  ;;  %v1620_v9 = vadd.f32 %v3282_v5, %v3210_v4 }
 0x13f   : > { %v1042_v10 = vpop.f32.mrf.mxu0  ;;  %v1611_v11 = vpop.f32.mrf.mxu1 }
 0x140   : > { %v2983_v13 = vpack.c.bf16 %v1840_v7, %v1839_v6  ;;  %v1838_v14 = vmax.f32 %v1774_v8, 0.0  ;;  %v1612_v15 = vadd.f32 %v1611_v11, %v1042_v10  ;;  %v1779_v19 = vadd.f32 %v3821_v28, %v1620_v9 }
 0x141   : > { %v3211_v16 = vpop.f32.mrf.mxu0  ;;  %v3283_v17 = vpop.f32.mrf.mxu1 }
 0x142   : > { %3079 = vst [vmem:[%s3829_s18 + $0x78] sm:$0xff] %v2983_v13   ;;  %v2978_v18 = vpack.c.bf16 %v1838_v14, %v1837_v12  ;;  %v1623_v20 = vadd.f32 %v3283_v17, %v3211_v16  ;;  %v1777_v23 = vadd.f32 %v3821_v28, %v1612_v15  ;;  %v1843_v29 = vmax.f32 %v1779_v19, 0.0 }
 0x143   : > { %v1045_v21 = vpop.f32.mrf.mxu0  ;;  %v1614_v22 = vpop.f32.mrf.mxu1 }
 0x144   : > { %3078 = vst [vmem:[%s3829_s18 + $0x70] sm:$0xff] %v2978_v18   ;;  %v1780_v24 = vadd.f32 %v3821_v28, %v1623_v20  ;;  %v1615_v25 = vadd.f32 %v1614_v22, %v1045_v21  ;;  %v1841_v35 = vmax.f32 %v1777_v23, 0.0 }
 0x145   : > { %v3214_v26 = vpop.f32.mrf.mxu0  ;;  %v3286_v27 = vpop.f32.mrf.mxu1 }
 0x146   : > { %v1844_v30 = vmax.f32 %v1780_v24, 0.0  ;;  %v1778_v31 = vadd.f32 %v3821_v28, %v1615_v25  ;;  %v1636_v32 = vadd.f32 %v3286_v27, %v3214_v26 }
 0x147   : > { %v1058_v33 = vpop.f32.mrf.mxu0  ;;  %v1627_v34 = vpop.f32.mrf.mxu1 }
 0x148   : > { %v2993_v36 = vpack.c.bf16 %v1844_v30, %v1843_v29  ;;  %v1842_v37 = vmax.f32 %v1778_v31, 0.0  ;;  %v1628_v38 = vadd.f32 %v1627_v34, %v1058_v33  ;;  %v1783_v42 = vadd.f32 %v3821_v28, %v1636_v32 }
 0x149   : > { %v3215_v39 = vpop.f32.mrf.mxu0  ;;  %v3287_v40 = vpop.f32.mrf.mxu1 }
 0x14a   : > { %3081 = vst [vmem:[%s3829_s18 + $0x88] sm:$0xff] %v2993_v36   ;;  %v2988_v41 = vpack.c.bf16 %v1842_v37, %v1841_v35  ;;  %v1639_v43 = vadd.f32 %v3287_v40, %v3215_v39  ;;  %v1781_v46 = vadd.f32 %v3821_v28, %v1628_v38  ;;  %v1847_v51 = vmax.f32 %v1783_v42, 0.0 }
 0x14b   : > { %v1061_v44 = vpop.f32.mrf.mxu0  ;;  %v1630_v45 = vpop.f32.mrf.mxu1 }
 0x14c   : > { %3080 = vst [vmem:[%s3829_s18 + $0x80] sm:$0xff] %v2988_v41   ;;  %v1784_v47 = vadd.f32 %v3821_v28, %v1639_v43  ;;  %v1631_v48 = vadd.f32 %v1630_v45, %v1061_v44  ;;  %v1845_v57 = vmax.f32 %v1781_v46, 0.0 }
 0x14d   : > { %v3218_v49 = vpop.f32.mrf.mxu0  ;;  %v3290_v50 = vpop.f32.mrf.mxu1 }
 0x14e   : > { %v1848_v52 = vmax.f32 %v1784_v47, 0.0  ;;  %v1782_v53 = vadd.f32 %v3821_v28, %v1631_v48  ;;  %v1652_v54 = vadd.f32 %v3290_v50, %v3218_v49 }
 0x14f   : > { %v1074_v55 = vpop.f32.mrf.mxu0  ;;  %v1643_v56 = vpop.f32.mrf.mxu1 }
 0x150   : > { %v3003_v58 = vpack.c.bf16 %v1848_v52, %v1847_v51  ;;  %v1846_v59 = vmax.f32 %v1782_v53, 0.0  ;;  %v1644_v60 = vadd.f32 %v1643_v56, %v1074_v55  ;;  %v1787_v0 = vadd.f32 %v3821_v28, %v1652_v54 }
 0x151   : > { %v3219_v61 = vpop.f32.mrf.mxu0  ;;  %v3291_v62 = vpop.f32.mrf.mxu1 }
 0x152   : > { %3083 = vst [vmem:[%s3829_s18 + $0x98] sm:$0xff] %v3003_v58   ;;  %v2998_v63 = vpack.c.bf16 %v1846_v59, %v1845_v57  ;;  %v1655_v1 = vadd.f32 %v3291_v62, %v3219_v61  ;;  %v1785_v4 = vadd.f32 %v3821_v28, %v1644_v60  ;;  %v1851_v9 = vmax.f32 %v1787_v0, 0.0 }
 0x153   : > { %v1077_v2 = vpop.f32.mrf.mxu0  ;;  %v1646_v3 = vpop.f32.mrf.mxu1 }
 0x154   : > { %3082 = vst [vmem:[%s3829_s18 + $0x90] sm:$0xff] %v2998_v63   ;;  %v1788_v5 = vadd.f32 %v3821_v28, %v1655_v1  ;;  %v1647_v6 = vadd.f32 %v1646_v3, %v1077_v2  ;;  %v1849_v15 = vmax.f32 %v1785_v4, 0.0 }
 0x155   : > { %v3222_v7 = vpop.f32.mrf.mxu0  ;;  %v3294_v8 = vpop.f32.mrf.mxu1 }
 0x156   : > { %v1852_v10 = vmax.f32 %v1788_v5, 0.0  ;;  %v1786_v11 = vadd.f32 %v3821_v28, %v1647_v6  ;;  %v1668_v12 = vadd.f32 %v3294_v8, %v3222_v7 }
 0x157   : > { %v1090_v13 = vpop.f32.mrf.mxu0  ;;  %v1659_v14 = vpop.f32.mrf.mxu1 }
 0x158   : > { %v3013_v16 = vpack.c.bf16 %v1852_v10, %v1851_v9  ;;  %v1850_v17 = vmax.f32 %v1786_v11, 0.0  ;;  %v1660_v18 = vadd.f32 %v1659_v14, %v1090_v13  ;;  %v1791_v22 = vadd.f32 %v3821_v28, %v1668_v12 }
 0x159   : > { %v3223_v19 = vpop.f32.mrf.mxu0  ;;  %v3295_v20 = vpop.f32.mrf.mxu1 }
 0x15a   : > { %3085 = vst [vmem:[%s3829_s18 + $0xa8] sm:$0xff] %v3013_v16   ;;  %v3008_v21 = vpack.c.bf16 %v1850_v17, %v1849_v15  ;;  %v1671_v23 = vadd.f32 %v3295_v20, %v3223_v19  ;;  %v1789_v26 = vadd.f32 %v3821_v28, %v1660_v18  ;;  %v1855_v32 = vmax.f32 %v1791_v22, 0.0 }
 0x15b   : > { %v1093_v24 = vpop.f32.mrf.mxu0  ;;  %v1662_v25 = vpop.f32.mrf.mxu1 }
 0x15c   : > { %3084 = vst [vmem:[%s3829_s18 + $0xa0] sm:$0xff] %v3008_v21   ;;  %v1792_v27 = vadd.f32 %v3821_v28, %v1671_v23  ;;  %v1663_v29 = vadd.f32 %v1662_v25, %v1093_v24  ;;  %v1853_v38 = vmax.f32 %v1789_v26, 0.0 }
 0x15d   : > { %v3226_v30 = vpop.f32.mrf.mxu0  ;;  %v3298_v31 = vpop.f32.mrf.mxu1 }
 0x15e   : > { %v1856_v33 = vmax.f32 %v1792_v27, 0.0  ;;  %v1790_v34 = vadd.f32 %v3821_v28, %v1663_v29  ;;  %v1684_v35 = vadd.f32 %v3298_v31, %v3226_v30 }
 0x15f   : > { %v1106_v36 = vpop.f32.mrf.mxu0  ;;  %v1675_v37 = vpop.f32.mrf.mxu1 }
 0x160   : > { %v3023_v39 = vpack.c.bf16 %v1856_v33, %v1855_v32  ;;  %v1854_v40 = vmax.f32 %v1790_v34, 0.0  ;;  %v1676_v41 = vadd.f32 %v1675_v37, %v1106_v36  ;;  %v1795_v45 = vadd.f32 %v3821_v28, %v1684_v35 }
 0x161   : > { %v3227_v42 = vpop.f32.mrf.mxu0  ;;  %v3299_v43 = vpop.f32.mrf.mxu1 }
 0x162   : > { %3087 = vst [vmem:[%s3829_s18 + $0xb8] sm:$0xff] %v3023_v39   ;;  %v3018_v44 = vpack.c.bf16 %v1854_v40, %v1853_v38  ;;  %v1687_v46 = vadd.f32 %v3299_v43, %v3227_v42  ;;  %v1793_v49 = vadd.f32 %v3821_v28, %v1676_v41  ;;  %v1859_v54 = vmax.f32 %v1795_v45, 0.0 }
 0x163   : > { %v1109_v47 = vpop.f32.mrf.mxu0  ;;  %v1678_v48 = vpop.f32.mrf.mxu1 }
 0x164   : > { %3086 = vst [vmem:[%s3829_s18 + $0xb0] sm:$0xff] %v3018_v44   ;;  %v1796_v50 = vadd.f32 %v3821_v28, %v1687_v46  ;;  %v1679_v51 = vadd.f32 %v1678_v48, %v1109_v47  ;;  %v1857_v60 = vmax.f32 %v1793_v49, 0.0 }
 0x165   : > { %v3230_v52 = vpop.f32.mrf.mxu0  ;;  %v3302_v53 = vpop.f32.mrf.mxu1 }
 0x166   : > { %v1860_v55 = vmax.f32 %v1796_v50, 0.0  ;;  %v1794_v56 = vadd.f32 %v3821_v28, %v1679_v51  ;;  %v1700_v57 = vadd.f32 %v3302_v53, %v3230_v52 }
 0x167   : > { %v1122_v58 = vpop.f32.mrf.mxu0  ;;  %v1691_v59 = vpop.f32.mrf.mxu1 }
 0x168   : > { %v3033_v61 = vpack.c.bf16 %v1860_v55, %v1859_v54  ;;  %v1858_v62 = vmax.f32 %v1794_v56, 0.0  ;;  %v1692_v63 = vadd.f32 %v1691_v59, %v1122_v58  ;;  %v1799_v3 = vadd.f32 %v3821_v28, %v1700_v57 }
 0x169   : > { %v3231_v0 = vpop.f32.mrf.mxu0  ;;  %v3303_v1 = vpop.f32.mrf.mxu1 }
 0x16a   : > { %3089 = vst [vmem:[%s3829_s18 + $0xc8] sm:$0xff] %v3033_v61   ;;  %v3028_v2 = vpack.c.bf16 %v1858_v62, %v1857_v60  ;;  %v1703_v4 = vadd.f32 %v3303_v1, %v3231_v0  ;;  %v1797_v7 = vadd.f32 %v3821_v28, %v1692_v63  ;;  %v1863_v12 = vmax.f32 %v1799_v3, 0.0  ;;  %v2223_v62 = vld [vmem:[%s3829_s18 + $0x4] sm:$0xf] (%p3533_p6)  ;;  %v2225_v63 = vld [vmem:[%s3829_s18 + $0x8] sm:$0xf] (%p3533_p6) }
 0x16b   : > { %v1125_v5 = vpop.f32.mrf.mxu0  ;;  %v1694_v6 = vpop.f32.mrf.mxu1  ;;  %v2227_v0 = vld [vmem:[%s3829_s18 + $0xc] sm:$0xf] (%p3533_p6)  ;;  %v2229_v1 = vld [vmem:[%s3829_s18 + $0x10] sm:$0xf] (%p3533_p6)  ;;  %2224 = vst [vmem:[%s3931_s13 + $0x8] sm:$0xf] (%p3533_p6), %v2223_v62 }
 0x16c   : > { %3088 = vst [vmem:[%s3829_s18 + $0xc0] sm:$0xff] %v3028_v2   ;;  %v1800_v8 = vadd.f32 %v3821_v28, %v1703_v4  ;;  %v1695_v9 = vadd.f32 %v1694_v6, %v1125_v5  ;;  %v1861_v18 = vmax.f32 %v1797_v7, 0.0  ;;  %2226 = vst [vmem:[%s3931_s13 + $0x10] sm:$0xf] (%p3533_p6), %v2225_v63  ;;  %v2231_v2 = vld [vmem:[%s3829_s18 + $0x14] sm:$0xf] (%p3533_p6) }
 0x16d   : > { %v3234_v10 = vpop.f32.mrf.mxu0  ;;  %v3306_v11 = vpop.f32.mrf.mxu1  ;;  %2228 = vst [vmem:[%s3931_s13 + $0x18] sm:$0xf] (%p3533_p6), %v2227_v0  ;;  %2230 = vst [vmem:[%s3931_s13 + $0x20] sm:$0xf] (%p3533_p6), %v2229_v1  ;;  %v2233_v3 = vld [vmem:[%s3829_s18 + $0x18] sm:$0xf] (%p3533_p6) }
 0x16e   : > { %v1864_v13 = vmax.f32 %v1800_v8, 0.0  ;;  %v1798_v14 = vadd.f32 %v3821_v28, %v1695_v9  ;;  %v1716_v15 = vadd.f32 %v3306_v11, %v3234_v10  ;;  %v2235_v4 = vld [vmem:[%s3829_s18 + $0x1c] sm:$0xf] (%p3533_p6)  ;;  %2232 = vst [vmem:[%s3931_s13 + $0x28] sm:$0xf] (%p3533_p6), %v2231_v2 }
 0x16f   : > { %v1138_v16 = vpop.f32.mrf.mxu0  ;;  %v1707_v17 = vpop.f32.mrf.mxu1  ;;  %2234 = vst [vmem:[%s3931_s13 + $0x30] sm:$0xf] (%p3533_p6), %v2233_v3  ;;  %2236 = vst [vmem:[%s3931_s13 + $0x38] sm:$0xf] (%p3533_p6), %v2235_v4  ;;  %v2237_v5 = vld [vmem:[%s3829_s18 + $0x20] sm:$0xf] (%p3533_p6) }
 0x170   : > { %v3043_v19 = vpack.c.bf16 %v1864_v13, %v1863_v12  ;;  %v1862_v20 = vmax.f32 %v1798_v14, 0.0  ;;  %v1708_v21 = vadd.f32 %v1707_v17, %v1138_v16  ;;  %v1803_v25 = vadd.f32 %v3821_v28, %v1716_v15  ;;  %v2239_v6 = vld [vmem:[%s3829_s18 + $0x24] sm:$0xf] (%p3533_p6)  ;;  %v2241_v7 = vld [vmem:[%s3829_s18 + $0x28] sm:$0xf] (%p3533_p6) }
 0x171   : > { %v3235_v22 = vpop.f32.mrf.mxu0  ;;  %v3307_v23 = vpop.f32.mrf.mxu1  ;;  %2238 = vst [vmem:[%s3931_s13 + $0x40] sm:$0xf] (%p3533_p6), %v2237_v5  ;;  %2240 = vst [vmem:[%s3931_s13 + $0x48] sm:$0xf] (%p3533_p6), %v2239_v6  ;;  %v2243_v8 = vld [vmem:[%s3829_s18 + $0x2c] sm:$0xf] (%p3533_p6) }
 0x172   : > { %3091 = vst [vmem:[%s3829_s18 + $0xd8] sm:$0xff] %v3043_v19   ;;  %v3038_v24 = vpack.c.bf16 %v1862_v20, %v1861_v18  ;;  %v1719_v26 = vadd.f32 %v3307_v23, %v3235_v22  ;;  %v1801_v30 = vadd.f32 %v3821_v28, %v1708_v21  ;;  %v1867_v35 = vmax.f32 %v1803_v25, 0.0  ;;  %2242 = vst [vmem:[%s3931_s13 + $0x50] sm:$0xf] (%p3533_p6), %v2241_v7  ;;  %v2245_v9 = vld [vmem:[%s3829_s18 + $0x30] sm:$0xf] (%p3533_p6) }
 0x173   : > { %v1141_v27 = vpop.f32.mrf.mxu0  ;;  %v1710_v29 = vpop.f32.mrf.mxu1  ;;  %v2247_v10 = vld [vmem:[%s3829_s18 + $0x34] sm:$0xf] (%p3533_p6)  ;;  %2244 = vst [vmem:[%s3931_s13 + $0x58] sm:$0xf] (%p3533_p6), %v2243_v8  ;;  %2246 = vst [vmem:[%s3931_s13 + $0x60] sm:$0xf] (%p3533_p6), %v2245_v9 }
 0x174   : > { %3090 = vst [vmem:[%s3829_s18 + $0xd0] sm:$0xff] %v3038_v24   ;;  %v1804_v31 = vadd.f32 %v3821_v28, %v1719_v26  ;;  %v1711_v32 = vadd.f32 %v1710_v29, %v1141_v27  ;;  %v1865_v41 = vmax.f32 %v1801_v30, 0.0  ;;  %2248 = vst [vmem:[%s3931_s13 + $0x68] sm:$0xf] (%p3533_p6), %v2247_v10  ;;  %v2249_v11 = vld [vmem:[%s3829_s18 + $0x38] sm:$0xf] (%p3533_p6) }
 0x175   : > { %v3238_v33 = vpop.f32.mrf.mxu0  ;;  %v3310_v34 = vpop.f32.mrf.mxu1  ;;  %v2251_v12 = vld [vmem:[%s3829_s18 + $0x3c] sm:$0xf] (%p3533_p6)  ;;  %v2253_v13 = vld [vmem:[%s3829_s18 + $0x40] sm:$0xf] (%p3533_p6)  ;;  %2250 = vst [vmem:[%s3931_s13 + $0x70] sm:$0xf] (%p3533_p6), %v2249_v11 }
 0x176   : > { %v1868_v36 = vmax.f32 %v1804_v31, 0.0  ;;  %v1802_v37 = vadd.f32 %v3821_v28, %v1711_v32  ;;  %v1732_v38 = vadd.f32 %v3310_v34, %v3238_v33  ;;  %2252 = vst [vmem:[%s3931_s13 + $0x78] sm:$0xf] (%p3533_p6), %v2251_v12  ;;  %2254 = vst [vmem:[%s3931_s13 + $0x80] sm:$0xf] (%p3533_p6), %v2253_v13 }
 0x177   : > { %v1154_v39 = vpop.f32.mrf.mxu0  ;;  %v1723_v40 = vpop.f32.mrf.mxu1  ;;  %v2255_v14 = vld [vmem:[%s3829_s18 + $0x44] sm:$0xf] (%p3533_p6)  ;;  %v2257_v15 = vld [vmem:[%s3829_s18 + $0x48] sm:$0xf] (%p3533_p6)  ;;  %v2259_v16 = vld [vmem:[%s3829_s18 + $0x4c] sm:$0xf] (%p3533_p6) }
 0x178   : > { %v3053_v42 = vpack.c.bf16 %v1868_v36, %v1867_v35  ;;  %v1866_v43 = vmax.f32 %v1802_v37, 0.0  ;;  %v1724_v44 = vadd.f32 %v1723_v40, %v1154_v39  ;;  %v1807_v48 = vadd.f32 %v3821_v28, %v1732_v38  ;;  %2256 = vst [vmem:[%s3931_s13 + $0x88] sm:$0xf] (%p3533_p6), %v2255_v14  ;;  %2258 = vst [vmem:[%s3931_s13 + $0x90] sm:$0xf] (%p3533_p6), %v2257_v15 }
 0x179   : > { %v3239_v45 = vpop.f32.mrf.mxu0  ;;  %v3311_v46 = vpop.f32.mrf.mxu1  ;;  %2260 = vst [vmem:[%s3931_s13 + $0x98] sm:$0xf] (%p3533_p6), %v2259_v16  ;;  %v2261_v17 = vld [vmem:[%s3829_s18 + $0x50] sm:$0xf] (%p3533_p6)  ;;  %v2263_v18 = vld [vmem:[%s3829_s18 + $0x54] sm:$0xf] (%p3533_p6) }
 0x17a   : > { %3093 = vst [vmem:[%s3829_s18 + $0xe8] sm:$0xff] %v3053_v42   ;;  %v3048_v47 = vpack.c.bf16 %v1866_v43, %v1865_v41  ;;  %v1735_v49 = vadd.f32 %v3311_v46, %v3239_v45  ;;  %v1805_v52 = vadd.f32 %v3821_v28, %v1724_v44  ;;  %v1871_v55 = vmax.f32 %v1807_v48, 0.0  ;;  %v2265_v19 = vld [vmem:[%s3829_s18 + $0x58] sm:$0xf] (%p3533_p6)  ;;  %2262 = vst [vmem:[%s3931_s13 + $0xa0] sm:$0xf] (%p3533_p6), %v2261_v17 }
 0x17b   : > { %v1157_v50 = vpop.f32.mrf.mxu0  ;;  %v1726_v51 = vpop.f32.mrf.mxu1  ;;  %2264 = vst [vmem:[%s3931_s13 + $0xa8] sm:$0xf] (%p3533_p6), %v2263_v18  ;;  %2266 = vst [vmem:[%s3931_s13 + $0xb0] sm:$0xf] (%p3533_p6), %v2265_v19  ;;  %v2267_v20 = vld [vmem:[%s3829_s18 + $0x5c] sm:$0xf] (%p3533_p6) }
 0x17c   : > { %3092 = vst [vmem:[%s3829_s18 + $0xe0] sm:$0xff] %v3048_v47   ;;  %v1808_v53 = vadd.f32 %v3821_v28, %v1735_v49  ;;  %v1727_v54 = vadd.f32 %v1726_v51, %v1157_v50  ;;  %v1869_v58 = vmax.f32 %v1805_v52, 0.0  ;;  %v2269_v21 = vld [vmem:[%s3829_s18 + $0x60] sm:$0xf] (%p3533_p6)  ;;  %v2271_v22 = vld [vmem:[%s3829_s18 + $0x64] sm:$0xf] (%p3533_p6) }
 0x17d   : > { %2268 = vst [vmem:[%s3931_s13 + $0xb8] sm:$0xf] (%p3533_p6), %v2267_v20  ;;  %2270 = vst [vmem:[%s3931_s13 + $0xc0] sm:$0xf] (%p3533_p6), %v2269_v21  ;;  %v2273_v23 = vld [vmem:[%s3829_s18 + $0x68] sm:$0xf] (%p3533_p6) }
 0x17e   : > { %v1872_v56 = vmax.f32 %v1808_v53, 0.0  ;;  %v1806_v57 = vadd.f32 %v3821_v28, %v1727_v54  ;;  %v2221_v28 = vld [vmem:[%s3829_s18] sm:$0xf] (%p3533_p6)  ;;  %2272 = vst [vmem:[%s3931_s13 + $0xc8] sm:$0xf] (%p3533_p6), %v2271_v22 }
 0x17f   : > { %2222 = vst [vmem:[%s3931_s13] sm:$0xf] (%p3533_p6), %v2221_v28  ;;  %v2275_v24 = vld [vmem:[%s3829_s18 + $0x6c] sm:$0xf] (%p3533_p6)  ;;  %v2277_v25 = vld [vmem:[%s3829_s18 + $0x70] sm:$0xf] (%p3533_p6) }
 0x180   : > { %v3063_v59 = vpack.c.bf16 %v1872_v56, %v1871_v55  ;;  %v1870_v60 = vmax.f32 %v1806_v57, 0.0  ;;  %2199 = sbr.rel (!%p3533_p6) target bundleno = 410 (0x19a), region = 126  ;;  %2274 = vst [vmem:[%s3931_s13 + $0xd0] sm:$0xf] (%p3533_p6), %v2273_v23  ;;  %2276 = vst [vmem:[%s3931_s13 + $0xd8] sm:$0xf] (%p3533_p6), %v2275_v24 }
 0x181   : > { %2278 = vst [vmem:[%s3931_s13 + $0xe0] sm:$0xf] (%p3533_p6), %v2277_v25  ;;  %v2279_v26 = vld [vmem:[%s3829_s18 + $0x74] sm:$0xf] (%p3533_p6)  ;;  %v2281_v27 = vld [vmem:[%s3829_s18 + $0x78] sm:$0xf] (%p3533_p6) }
 0x182   : > { %3095 = vst [vmem:[%s3829_s18 + $0xf8] sm:$0xff] %v3063_v59   ;;  %v3058_v61 = vpack.c.bf16 %v1870_v60, %v1869_v58  ;;  %v2283_v29 = vld [vmem:[%s3829_s18 + $0x7c] sm:$0xf] (%p3533_p6)  ;;  %2280 = vst [vmem:[%s3931_s13 + $0xe8] sm:$0xf] (%p3533_p6), %v2279_v26 }
 0x183   : > { %2282 = vst [vmem:[%s3931_s13 + $0xf0] sm:$0xf] (%p3533_p6), %v2281_v27  ;;  %2284 = vst [vmem:[%s3931_s13 + $0xf8] sm:$0xf] (%p3533_p6), %v2283_v29  ;;  %v2285_v30 = vld [vmem:[%s3829_s18 + $0x80] sm:$0xf] (%p3533_p6) }
 0x184   : > { %3094 = vst [vmem:[%s3829_s18 + $0xf0] sm:$0xff] %v3058_v61   ;;  %v2287_v31 = vld [vmem:[%s3829_s18 + $0x84] sm:$0xf] (%p3533_p6)  ;;  %v2289_v32 = vld [vmem:[%s3829_s18 + $0x88] sm:$0xf] (%p3533_p6) }
 0x185   : > { %2286 = vst [vmem:[%s3931_s13 + $0x100] sm:$0xf] %v2285_v30  ;;  %2288 = vst [vmem:[%s3931_s13 + $0x108] sm:$0xf] %v2287_v31  ;;  %v2291_v33 = vld [vmem:[%s3829_s18 + $0x8c] sm:$0xf] }
 0x186   : > { %2290 = vst [vmem:[%s3931_s13 + $0x110] sm:$0xf] %v2289_v32  ;;  %v2293_v34 = vld [vmem:[%s3829_s18 + $0x90] sm:$0xf]  ;;  %v2295_v35 = vld [vmem:[%s3829_s18 + $0x94] sm:$0xf] }
 0x187   : > { %2292 = vst [vmem:[%s3931_s13 + $0x118] sm:$0xf] %v2291_v33  ;;  %2294 = vst [vmem:[%s3931_s13 + $0x120] sm:$0xf] %v2293_v34  ;;  %v2297_v36 = vld [vmem:[%s3829_s18 + $0x98] sm:$0xf] }
 0x188   : > { %2296 = vst [vmem:[%s3931_s13 + $0x128] sm:$0xf] %v2295_v35  ;;  %v2299_v37 = vld [vmem:[%s3829_s18 + $0x9c] sm:$0xf]  ;;  %v2301_v38 = vld [vmem:[%s3829_s18 + $0xa0] sm:$0xf] }
 0x189   : > { %2298 = vst [vmem:[%s3931_s13 + $0x130] sm:$0xf] %v2297_v36  ;;  %2300 = vst [vmem:[%s3931_s13 + $0x138] sm:$0xf] %v2299_v37  ;;  %v2303_v39 = vld [vmem:[%s3829_s18 + $0xa4] sm:$0xf] }
 0x18a   : > { %2302 = vst [vmem:[%s3931_s13 + $0x140] sm:$0xf] %v2301_v38  ;;  %v2305_v40 = vld [vmem:[%s3829_s18 + $0xa8] sm:$0xf]  ;;  %v2307_v41 = vld [vmem:[%s3829_s18 + $0xac] sm:$0xf] }
 0x18b   : > { %2304 = vst [vmem:[%s3931_s13 + $0x148] sm:$0xf] %v2303_v39  ;;  %2306 = vst [vmem:[%s3931_s13 + $0x150] sm:$0xf] %v2305_v40  ;;  %v2309_v42 = vld [vmem:[%s3829_s18 + $0xb0] sm:$0xf] }
 0x18c   : > { %2308 = vst [vmem:[%s3931_s13 + $0x158] sm:$0xf] %v2307_v41  ;;  %v2311_v43 = vld [vmem:[%s3829_s18 + $0xb4] sm:$0xf]  ;;  %v2313_v44 = vld [vmem:[%s3829_s18 + $0xb8] sm:$0xf] }
 0x18d   : > { %2310 = vst [vmem:[%s3931_s13 + $0x160] sm:$0xf] %v2309_v42  ;;  %2312 = vst [vmem:[%s3931_s13 + $0x168] sm:$0xf] %v2311_v43  ;;  %v2315_v45 = vld [vmem:[%s3829_s18 + $0xbc] sm:$0xf] }
 0x18e   : > { %2314 = vst [vmem:[%s3931_s13 + $0x170] sm:$0xf] %v2313_v44  ;;  %v2317_v46 = vld [vmem:[%s3829_s18 + $0xc0] sm:$0xf]  ;;  %v2319_v47 = vld [vmem:[%s3829_s18 + $0xc4] sm:$0xf] }
 0x18f   : > { %2316 = vst [vmem:[%s3931_s13 + $0x178] sm:$0xf] %v2315_v45  ;;  %2318 = vst [vmem:[%s3931_s13 + $0x180] sm:$0xf] %v2317_v46  ;;  %v2321_v48 = vld [vmem:[%s3829_s18 + $0xc8] sm:$0xf] }
 0x190   : > { %2320 = vst [vmem:[%s3931_s13 + $0x188] sm:$0xf] %v2319_v47  ;;  %v2323_v49 = vld [vmem:[%s3829_s18 + $0xcc] sm:$0xf]  ;;  %v2325_v50 = vld [vmem:[%s3829_s18 + $0xd0] sm:$0xf] }
 0x191   : > { %2322 = vst [vmem:[%s3931_s13 + $0x190] sm:$0xf] %v2321_v48  ;;  %2324 = vst [vmem:[%s3931_s13 + $0x198] sm:$0xf] %v2323_v49  ;;  %v2327_v51 = vld [vmem:[%s3829_s18 + $0xd4] sm:$0xf] }
 0x192   : > { %2326 = vst [vmem:[%s3931_s13 + $0x1a0] sm:$0xf] %v2325_v50  ;;  %v2329_v52 = vld [vmem:[%s3829_s18 + $0xd8] sm:$0xf]  ;;  %v2331_v53 = vld [vmem:[%s3829_s18 + $0xdc] sm:$0xf] }
 0x193   : > { %2328 = vst [vmem:[%s3931_s13 + $0x1a8] sm:$0xf] %v2327_v51  ;;  %2330 = vst [vmem:[%s3931_s13 + $0x1b0] sm:$0xf] %v2329_v52  ;;  %v2333_v54 = vld [vmem:[%s3829_s18 + $0xe0] sm:$0xf] }
 0x194   : > { %2332 = vst [vmem:[%s3931_s13 + $0x1b8] sm:$0xf] %v2331_v53  ;;  %v2335_v55 = vld [vmem:[%s3829_s18 + $0xe4] sm:$0xf]  ;;  %v2337_v56 = vld [vmem:[%s3829_s18 + $0xe8] sm:$0xf] }
 0x195   : > { %2334 = vst [vmem:[%s3931_s13 + $0x1c0] sm:$0xf] %v2333_v54  ;;  %2336 = vst [vmem:[%s3931_s13 + $0x1c8] sm:$0xf] %v2335_v55  ;;  %v2339_v57 = vld [vmem:[%s3829_s18 + $0xec] sm:$0xf] }
 0x196   : > { %2338 = vst [vmem:[%s3931_s13 + $0x1d0] sm:$0xf] %v2337_v56  ;;  %v2341_v58 = vld [vmem:[%s3829_s18 + $0xf0] sm:$0xf]  ;;  %v2343_v59 = vld [vmem:[%s3829_s18 + $0xf4] sm:$0xf] }
 0x197   : > { %2340 = vst [vmem:[%s3931_s13 + $0x1d8] sm:$0xf] %v2339_v57  ;;  %2342 = vst [vmem:[%s3931_s13 + $0x1e0] sm:$0xf] %v2341_v58  ;;  %v2345_v60 = vld [vmem:[%s3829_s18 + $0xf8] sm:$0xf] }
 0x198   : > { %2344 = vst [vmem:[%s3931_s13 + $0x1e8] sm:$0xf] %v2343_v59  ;;  %v2347_v61 = vld [vmem:[%s3829_s18 + $0xfc] sm:$0xf]  ;;  %2346 = vst [vmem:[%s3931_s13 + $0x1f0] sm:$0xf] %v2345_v60 }
 0x199   : > { %2348 = vst [vmem:[%s3931_s13 + $0x1f8] sm:$0xf] %v2347_v61 }
 0x19a PF: > { %s15_s22 = sadd.s32 1, %s3462_s22   ;;  %s4082_s18 = smov %s3450_s19 }
 0x19b   : > { %p12_p12 = scmp.ge.s32.totalorder %s15_s22, 4   ;;  %s4083_s19 = smov %s3538_s29 }
 0x19c   : > { %s4084_s20 = smov %s3458_s21  ;;  %s4085_s21 = smov %s4087_s23 }
 0x19d   :  { %14 = sbr.rel (!%p12_p12) target bundleno = 3 (0x3), region = 215 }

// kernel: depth_encoder_forward.11
= control target key start
LH: loop header
LB: loop body
LE: loop exit
PB: predicated region body
PF: predicated region fallthrough
CT: control target
= control target key end

     0   :  { %s1494_s12 = smov 0   ;;  %s1496_s13 = smov 0   ;;  %s1668_s0 = inlined_call_operand.vmem [shape: bf16[512,256], index: 0, kind: input, shape index: {}]   ;;  %s1669_s1 = inlined_call_operand.vmem [shape: bf16[256,128], index: 1, kind: input, shape index: {}]   ;;  %s1670_s2 = inlined_call_operand.vmem [shape: f32[1,128], index: 2, kind: input, shape index: {}]   ;;  %s1671_s3 = inlined_call_operand.vmem [shape: bf16[512,128], index: 3, kind: output, shape index: {}]  }
   0x1   :  { %s1498_s14 = smov 0  }
   0x2 LB: > { %s22_s15 = sadd.s32 1, %s1468_s13  ;;  %p1017_p0 = scmp.ge.s32.totalorder %s1472_s14, 1  ;;  %s1472_s14 = sphi %s1498_s14, %s13_s14   ;;  %s1468_s13 = sphi %s1496_s13, %s1673_s13   ;;  %s1464_s12 = sphi %s1494_s12, %s1672_s12  }
   0x3   : > { %p23_p1 = scmp.ge.s32.totalorder %s22_s15, 2  ;;  %p170_p2 = scmp.lt.s32.totalorder %s1472_s14, 3 }
   0x5   : > { %s1675_s15 = smov (%p23_p1, %s22_s15), 0  ;;  %p171_p3 = pnand %p1017_p0, %p170_p2 }
   0x6   : > { %s1018_s18 = sshll.u32 (!%p171_p3), %s1464_s12, 5 }
   0x7   : > { %174 = sbr.rel (%p171_p3) target bundleno = 309 (0x135), region = 32  ;;  %p206_p4 = scmp.lt.s32.totalorder (!%p171_p3), %s1018_s18, 63 }
   0xc   : > { %v1386_v0 = vld [vmem:[%s1669_s1 + $0x78] sm:$0xff]   ;;  %v1388_v2 = vld [vmem:[%s1669_s1 + $0x70] sm:$0xff]   ;;  %v1390_v4 = vld [vmem:[%s1669_s1 + $0x68] sm:$0xff]   ;;  %s1677_s18 = smov (!%p206_p4, %s1018_s18), 63 }
   0xd   : > { %v1387_v1 = vld [vmem:[%s1669_s1 + $0x38] sm:$0xff]   ;;  %1234 = vmatprep.subr.bf16.mxu0 %v1386_v0  ;;  %1346 = vmatprep.subr.bf16.mxu1 %v1386_v0  ;;  %v1389_v3 = vld [vmem:[%s1669_s1 + $0x30] sm:$0xff]   ;;  %v1391_v5 = vld [vmem:[%s1669_s1 + $0x28] sm:$0xff]   ;;  %s1106_s6 = sshll.u32 %s1677_s18, 3  ;;  %s1022_s5 = sshll.u32 %s1677_s18, 2 }
   0xe   : > { %1235 = vmatpush3.bf16.msra.mxu0 %v1387_v1  ;;  %1354 = vmatpush3.bf16.msra.mxu1 %v1387_v1  ;;  %v1392_v6 = vld [vmem:[%s1669_s1 + $0x60] sm:$0xff]   ;;  %v1394_v8 = vld [vmem:[%s1669_s1 + $0x58] sm:$0xff]   ;;  %s1545_s11 = scalar_lea.vmem %s1668_s0, %s1106_s6  ;;  %v1396_v10 = vld [vmem:[%s1669_s1 + $0x50] sm:$0xff]   ;;  %s1613_s8 = scalar_lea.vmem %s1671_s3, %s1022_s5 }
   0xf   : > { %1236 = vmatprep.subr.bf16.mxu0 %v1388_v2  ;;  %1347 = vmatprep.subr.bf16.mxu1 %v1388_v2  ;;  %v1393_v7 = vld [vmem:[%s1669_s1 + $0x20] sm:$0xff]   ;;  %v1395_v9 = vld [vmem:[%s1669_s1 + $0x18] sm:$0xff]   ;;  %v1397_v13 = vld [vmem:[%s1669_s1 + $0x10] sm:$0xff]  }
  0x10   : > { %v1404_v11 = vld [vmem:[%s1545_s11 + $0x4] ss:$8 sps:$4 sm:$0xff]   ;;  %v1402_v18 = vld [vmem:[%s1545_s11] ss:$8 sps:$4 sm:$0xff]   ;;  %v1408_v20 = vld [vmem:[%s1545_s11 + $0x14] ss:$8 sps:$4 sm:$0xff]  }
  0x11   : > { %v1407_v12 = vld [vmem:[%s1545_s11 + $0x84] ss:$8 sps:$4 sm:$0xff]   ;;  %588 = vmatprep.mubr.bf16.mxu0 %v1404_v11  ;;  %v1405_v19 = vld [vmem:[%s1545_s11 + $0x80] ss:$8 sps:$4 sm:$0xff]   ;;  %v1410_v21 = vld [vmem:[%s1545_s11 + $0x94] ss:$8 sps:$4 sm:$0xff]  }
  0x12   : > { %1237 = vmatpush3.bf16.msra.mxu0 %v1389_v3  ;;  %1355 = vmatpush3.bf16.msra.mxu1 %v1389_v3  ;;  %v1398_v14 = vld [vmem:[%s1669_s1 + $0x48] sm:$0xff]   ;;  %v1400_v16 = vld [vmem:[%s1669_s1 + $0x40] sm:$0xff]   ;;  %v1412_v22 = vld [vmem:[%s1545_s11 + $0x10] ss:$8 sps:$4 sm:$0xff]  }
  0x13   : > { %1238 = vmatprep.subr.bf16.mxu0 %v1390_v4  ;;  %1348 = vmatprep.subr.bf16.mxu1 %v1390_v4  ;;  %v1399_v15 = vld [vmem:[%s1669_s1 + $0x8] sm:$0xff]   ;;  %v1401_v17 = vld [vmem:[%s1669_s1] sm:$0xff]   ;;  %v1413_v23 = vld [vmem:[%s1545_s11 + $0x90] ss:$8 sps:$4 sm:$0xff]  }
  0x14   : > { %652 = vmatprep.mubr.bf16.mxu1 %v1407_v12  ;;  %v1414_v24 = vld [vmem:[%s1545_s11 + $0x24] ss:$8 sps:$4 sm:$0xff]   ;;  %v1418_v26 = vld [vmem:[%s1545_s11 + $0x20] ss:$8 sps:$4 sm:$0xff]   ;;  %v1420_v28 = vld [vmem:[%s1545_s11 + $0x34] ss:$8 sps:$4 sm:$0xff]  }
  0x15   : > { %v1416_v25 = vld [vmem:[%s1545_s11 + $0xa4] ss:$8 sps:$4 sm:$0xff]   ;;  %v1419_v27 = vld [vmem:[%s1545_s11 + $0xa0] ss:$8 sps:$4 sm:$0xff]   ;;  %v1422_v29 = vld [vmem:[%s1545_s11 + $0xb4] ss:$8 sps:$4 sm:$0xff]  }
  0x16   : > { %1239 = vmatpush3.bf16.msra.mxu0 %v1391_v5  ;;  %1356 = vmatpush3.bf16.msra.mxu1 %v1391_v5  ;;  %v1424_v30 = vld [vmem:[%s1545_s11 + $0x30] ss:$8 sps:$4 sm:$0xff]   ;;  %v1426_v32 = vld [vmem:[%s1545_s11 + $0x44] ss:$8 sps:$4 sm:$0xff]   ;;  %v1430_v34 = vld [vmem:[%s1545_s11 + $0x40] ss:$8 sps:$4 sm:$0xff]  }
  0x17   : > { %1240 = vmatprep.subr.bf16.mxu0 %v1392_v6  ;;  %1349 = vmatprep.subr.bf16.mxu1 %v1392_v6  ;;  %v1425_v31 = vld [vmem:[%s1545_s11 + $0xb0] ss:$8 sps:$4 sm:$0xff]   ;;  %v1428_v33 = vld [vmem:[%s1545_s11 + $0xc4] ss:$8 sps:$4 sm:$0xff]   ;;  %v1431_v35 = vld [vmem:[%s1545_s11 + $0xc0] ss:$8 sps:$4 sm:$0xff]  }
  0x18   : > { %v1432_v36 = vld [vmem:[%s1545_s11 + $0x54] ss:$8 sps:$4 sm:$0xff]   ;;  %v1436_v38 = vld [vmem:[%s1545_s11 + $0x50] ss:$8 sps:$4 sm:$0xff]   ;;  %v1438_v40 = vld [vmem:[%s1545_s11 + $0x64] ss:$8 sps:$4 sm:$0xff]  }
  0x19   : > { %v1434_v37 = vld [vmem:[%s1545_s11 + $0xd4] ss:$8 sps:$4 sm:$0xff]   ;;  %v1437_v39 = vld [vmem:[%s1545_s11 + $0xd0] ss:$8 sps:$4 sm:$0xff]   ;;  %v1440_v41 = vld [vmem:[%s1545_s11 + $0xe4] ss:$8 sps:$4 sm:$0xff]  }
  0x1a   : > { %1241 = vmatpush3.bf16.msra.mxu0 %v1393_v7  ;;  %1357 = vmatpush3.bf16.msra.mxu1 %v1393_v7  ;;  %v1442_v42 = vld [vmem:[%s1545_s11 + $0x60] ss:$8 sps:$4 sm:$0xff]   ;;  %v1444_v44 = vld [vmem:[%s1545_s11 + $0x74] ss:$8 sps:$4 sm:$0xff]   ;;  %v1448_v46 = vld [vmem:[%s1545_s11 + $0x70] ss:$8 sps:$4 sm:$0xff]  }
  0x1b   : > { %1242 = vmatprep.subr.bf16.mxu0 %v1394_v8  ;;  %1350 = vmatprep.subr.bf16.mxu1 %v1394_v8  ;;  %v1443_v43 = vld [vmem:[%s1545_s11 + $0xe0] ss:$8 sps:$4 sm:$0xff]   ;;  %v1446_v45 = vld [vmem:[%s1545_s11 + $0xf4] ss:$8 sps:$4 sm:$0xff]   ;;  %v1449_v47 = vld [vmem:[%s1545_s11 + $0xf0] ss:$8 sps:$4 sm:$0xff]  }
  0x1c   : > { %v1603_v52 = vld [vmem:[%s1670_s2] ss:$0 sm:$0xff] }
  0x1e   : > { %1243 = vmatpush3.bf16.msra.mxu0 %v1395_v9  ;;  %1358 = vmatpush3.bf16.msra.mxu1 %v1395_v9 }
  0x1f   : > { %1244 = vmatprep.subr.bf16.mxu0 %v1396_v10  ;;  %1351 = vmatprep.subr.bf16.mxu1 %v1396_v10 }
  0x22   : > { %1245 = vmatpush3.bf16.msra.mxu0 %v1397_v13  ;;  %1359 = vmatpush3.bf16.msra.mxu1 %v1397_v13 }
  0x23   : > { %1246 = vmatprep.subr.bf16.mxu0 %v1398_v14  ;;  %1352 = vmatprep.subr.bf16.mxu1 %v1398_v14 }
  0x26   : > { %1247 = vmatpush3.bf16.msra.mxu0 %v1399_v15  ;;  %1360 = vmatpush3.bf16.msra.mxu1 %v1399_v15 }
  0x27   : > { %1248 = vmatprep.subr.bf16.mxu0 %v1400_v16  ;;  %1353 = vmatprep.subr.bf16.mxu1 %v1400_v16 }
  0x2a   : > { %1249 = vmatpush3.bf16.msra.mxu0 %v1401_v17  ;;  %1361 = vmatpush3.bf16.msra.mxu1 %v1401_v17 }
  0x2d   : > { %589 = vmatmul.mubr.bf16.vlgmr.msra.gmra.mxu0 %v1402_v18  ;;  %653 = vmatmul.mubr.bf16.vlgmr.msra.gmra.mxu1 %v1405_v19 }
  0x2e   : > { %596 = vmatprep.mubr.bf16.mxu0 %v1408_v20  ;;  %660 = vmatprep.mubr.bf16.mxu1 %v1410_v21 }
  0x35   : > { %597 = vmatmul.mubr.bf16.gmra.mxu0 %v1412_v22  ;;  %661 = vmatmul.mubr.bf16.gmra.mxu1 %v1413_v23 }
  0x36   : > { %604 = vmatprep.mubr.bf16.mxu0 %v1414_v24  ;;  %668 = vmatprep.mubr.bf16.mxu1 %v1416_v25 }
  0x3d   : > { %605 = vmatmul.mubr.bf16.gmra.mxu0 %v1418_v26  ;;  %669 = vmatmul.mubr.bf16.gmra.mxu1 %v1419_v27 }
  0x3e   : > { %612 = vmatprep.mubr.bf16.mxu0 %v1420_v28  ;;  %676 = vmatprep.mubr.bf16.mxu1 %v1422_v29 }
  0x45   : > { %613 = vmatmul.mubr.bf16.gmra.mxu0 %v1424_v30  ;;  %677 = vmatmul.mubr.bf16.gmra.mxu1 %v1425_v31 }
  0x46   : > { %620 = vmatprep.mubr.bf16.mxu0 %v1426_v32  ;;  %684 = vmatprep.mubr.bf16.mxu1 %v1428_v33 }
  0x4d   : > { %621 = vmatmul.mubr.bf16.gmra.mxu0 %v1430_v34  ;;  %685 = vmatmul.mubr.bf16.gmra.mxu1 %v1431_v35 }
  0x4e   : > { %628 = vmatprep.mubr.bf16.mxu0 %v1432_v36  ;;  %692 = vmatprep.mubr.bf16.mxu1 %v1434_v37 }
  0x55   : > { %629 = vmatmul.mubr.bf16.gmra.mxu0 %v1436_v38  ;;  %693 = vmatmul.mubr.bf16.gmra.mxu1 %v1437_v39 }
  0x56   : > { %636 = vmatprep.mubr.bf16.mxu0 %v1438_v40  ;;  %700 = vmatprep.mubr.bf16.mxu1 %v1440_v41 }
  0x5d   : > { %637 = vmatmul.mubr.bf16.gmra.mxu0 %v1442_v42  ;;  %701 = vmatmul.mubr.bf16.gmra.mxu1 %v1443_v43 }
  0x5e   : > { %644 = vmatprep.mubr.bf16.mxu0 %v1444_v44  ;;  %708 = vmatprep.mubr.bf16.mxu1 %v1446_v45 }
  0x65   : > { %645 = vmatmul.mubr.bf16.gmra.mxu0 %v1448_v46  ;;  %709 = vmatmul.mubr.bf16.gmra.mxu1 %v1449_v47 }
  0xed   : > { %v1250_v48 = vpop.f32.mrf.mxu0  ;;  %v1298_v49 = vpop.f32.mrf.mxu1 }
  0xef   : > { %v1251_v50 = vpop.f32.mrf.mxu0  ;;  %v1299_v51 = vpop.f32.mrf.mxu1 }
  0xf0   : > { %v1252_v53 = vadd.f32 %v1251_v50, %v1250_v48  ;;  %v1300_v54 = vadd.f32 %v1299_v51, %v1298_v49 }
  0xf1   : > { %v1253_v55 = vpop.f32.mrf.mxu0  ;;  %v1301_v56 = vpop.f32.mrf.mxu1 }
  0xf2   : > { %v591_v57 = vadd.f32 %v1252_v53, %v1603_v52  ;;  %v655_v58 = vadd.f32 %v1300_v54, %v1603_v52 }
  0xf3   : > { %v1254_v59 = vpop.f32.mrf.mxu0  ;;  %v1302_v60 = vpop.f32.mrf.mxu1 }
  0xf4   : > { %v1255_v61 = vadd.f32 %v1254_v59, %v1253_v55  ;;  %v1303_v62 = vadd.f32 %v1302_v60, %v1301_v56  ;;  %v717_v3 = vmax.f32 %v591_v57, 0.0  ;;  %v733_v4 = vmax.f32 %v655_v58, 0.0 }
  0xf5   : > { %v1256_v63 = vpop.f32.mrf.mxu0  ;;  %v1304_v0 = vpop.f32.mrf.mxu1 }
  0xf6   : > { %v594_v1 = vadd.f32 %v1255_v61, %v1603_v52  ;;  %v658_v2 = vadd.f32 %v1303_v62, %v1603_v52 }
  0xf7   : > { %v1257_v5 = vpop.f32.mrf.mxu0  ;;  %v1305_v6 = vpop.f32.mrf.mxu1 }
  0xf8   : > { %v718_v7 = vmax.f32 %v594_v1, 0.0  ;;  %v734_v8 = vmax.f32 %v658_v2, 0.0  ;;  %v1258_v9 = vadd.f32 %v1257_v5, %v1256_v63  ;;  %v1306_v10 = vadd.f32 %v1305_v6, %v1304_v0 }
  0xf9   : > { %v1259_v11 = vpop.f32.mrf.mxu0  ;;  %v1307_v12 = vpop.f32.mrf.mxu1 }
  0xfa   : > { %v1142_v13 = vpack.c.bf16 %v718_v7, %v717_v3  ;;  %v1182_v14 = vpack.c.bf16 %v734_v8, %v733_v4  ;;  %v599_v15 = vadd.f32 %v1258_v9, %v1603_v52  ;;  %v663_v16 = vadd.f32 %v1306_v10, %v1603_v52 }
  0xfb   : > { %v1260_v17 = vpop.f32.mrf.mxu0  ;;  %v1308_v18 = vpop.f32.mrf.mxu1 }
  0xfc   : > { %1143 = vst [vmem:[%s1613_s8] sm:$0xff] %v1142_v13   ;;  %1226 = vst [vmem:[%s1613_s8 + $0x40] sm:$0xff] %v1182_v14   ;;  %v1261_v19 = vadd.f32 %v1260_v17, %v1259_v11  ;;  %v1309_v20 = vadd.f32 %v1308_v18, %v1307_v12  ;;  %v719_v25 = vmax.f32 %v599_v15, 0.0  ;;  %v735_v26 = vmax.f32 %v663_v16, 0.0 }
  0xfd   : > { %v1262_v21 = vpop.f32.mrf.mxu0  ;;  %v1310_v22 = vpop.f32.mrf.mxu1 }
  0xfe   : > { %v602_v23 = vadd.f32 %v1261_v19, %v1603_v52  ;;  %v666_v24 = vadd.f32 %v1309_v20, %v1603_v52 }
  0xff   : > { %v1263_v27 = vpop.f32.mrf.mxu0  ;;  %v1311_v28 = vpop.f32.mrf.mxu1 }
 0x100   : > { %v720_v29 = vmax.f32 %v602_v23, 0.0  ;;  %v736_v30 = vmax.f32 %v666_v24, 0.0  ;;  %v1264_v31 = vadd.f32 %v1263_v27, %v1262_v21  ;;  %v1312_v32 = vadd.f32 %v1311_v28, %v1310_v22 }
 0x101   : > { %v1265_v33 = vpop.f32.mrf.mxu0  ;;  %v1313_v34 = vpop.f32.mrf.mxu1 }
 0x102   : > { %v1147_v35 = vpack.c.bf16 %v720_v29, %v719_v25  ;;  %v1187_v36 = vpack.c.bf16 %v736_v30, %v735_v26  ;;  %v607_v37 = vadd.f32 %v1264_v31, %v1603_v52  ;;  %v671_v38 = vadd.f32 %v1312_v32, %v1603_v52 }
 0x103   : > { %v1266_v39 = vpop.f32.mrf.mxu0  ;;  %v1314_v40 = vpop.f32.mrf.mxu1 }
 0x104   : > { %1219 = vst [vmem:[%s1613_s8 + $0x8] sm:$0xff] %v1147_v35   ;;  %1227 = vst [vmem:[%s1613_s8 + $0x48] sm:$0xff] %v1187_v36   ;;  %v1267_v41 = vadd.f32 %v1266_v39, %v1265_v33  ;;  %v1315_v42 = vadd.f32 %v1314_v40, %v1313_v34  ;;  %v721_v47 = vmax.f32 %v607_v37, 0.0  ;;  %v737_v48 = vmax.f32 %v671_v38, 0.0 }
 0x105   : > { %v1268_v43 = vpop.f32.mrf.mxu0  ;;  %v1316_v44 = vpop.f32.mrf.mxu1 }
 0x106   : > { %v610_v45 = vadd.f32 %v1267_v41, %v1603_v52  ;;  %v674_v46 = vadd.f32 %v1315_v42, %v1603_v52 }
 0x107   : > { %v1269_v49 = vpop.f32.mrf.mxu0  ;;  %v1317_v50 = vpop.f32.mrf.mxu1 }
 0x108   : > { %v722_v51 = vmax.f32 %v610_v45, 0.0  ;;  %v738_v53 = vmax.f32 %v674_v46, 0.0  ;;  %v1270_v54 = vadd.f32 %v1269_v49, %v1268_v43  ;;  %v1318_v55 = vadd.f32 %v1317_v50, %v1316_v44 }
 0x109   : > { %v1271_v56 = vpop.f32.mrf.mxu0  ;;  %v1319_v57 = vpop.f32.mrf.mxu1 }
 0x10a   : > { %v1152_v58 = vpack.c.bf16 %v722_v51, %v721_v47  ;;  %v1192_v59 = vpack.c.bf16 %v738_v53, %v737_v48  ;;  %v615_v60 = vadd.f32 %v1270_v54, %v1603_v52  ;;  %v679_v61 = vadd.f32 %v1318_v55, %v1603_v52 }
 0x10b   : > { %v1272_v62 = vpop.f32.mrf.mxu0  ;;  %v1320_v63 = vpop.f32.mrf.mxu1 }
 0x10c   : > { %1220 = vst [vmem:[%s1613_s8 + $0x10] sm:$0xff] %v1152_v58   ;;  %1228 = vst [vmem:[%s1613_s8 + $0x50] sm:$0xff] %v1192_v59   ;;  %v1273_v0 = vadd.f32 %v1272_v62, %v1271_v56  ;;  %v1321_v1 = vadd.f32 %v1320_v63, %v1319_v57  ;;  %v723_v6 = vmax.f32 %v615_v60, 0.0  ;;  %v739_v7 = vmax.f32 %v679_v61, 0.0 }
 0x10d   : > { %v1274_v2 = vpop.f32.mrf.mxu0  ;;  %v1322_v3 = vpop.f32.mrf.mxu1 }
 0x10e   : > { %v618_v4 = vadd.f32 %v1273_v0, %v1603_v52  ;;  %v682_v5 = vadd.f32 %v1321_v1, %v1603_v52 }
 0x10f   : > { %v1275_v8 = vpop.f32.mrf.mxu0  ;;  %v1323_v9 = vpop.f32.mrf.mxu1 }
 0x110   : > { %v724_v10 = vmax.f32 %v618_v4, 0.0  ;;  %v740_v11 = vmax.f32 %v682_v5, 0.0  ;;  %v1276_v12 = vadd.f32 %v1275_v8, %v1274_v2  ;;  %v1324_v13 = vadd.f32 %v1323_v9, %v1322_v3 }
 0x111   : > { %v1277_v14 = vpop.f32.mrf.mxu0  ;;  %v1325_v15 = vpop.f32.mrf.mxu1 }
 0x112   : > { %v1157_v16 = vpack.c.bf16 %v724_v10, %v723_v6  ;;  %v1197_v17 = vpack.c.bf16 %v740_v11, %v739_v7  ;;  %v623_v18 = vadd.f32 %v1276_v12, %v1603_v52  ;;  %v687_v19 = vadd.f32 %v1324_v13, %v1603_v52 }
 0x113   : > { %v1278_v20 = vpop.f32.mrf.mxu0  ;;  %v1326_v21 = vpop.f32.mrf.mxu1 }
 0x114   : > { %1221 = vst [vmem:[%s1613_s8 + $0x18] sm:$0xff] %v1157_v16   ;;  %1229 = vst [vmem:[%s1613_s8 + $0x58] sm:$0xff] %v1197_v17   ;;  %v1279_v22 = vadd.f32 %v1278_v20, %v1277_v14  ;;  %v1327_v23 = vadd.f32 %v1326_v21, %v1325_v15  ;;  %v725_v28 = vmax.f32 %v623_v18, 0.0  ;;  %v741_v29 = vmax.f32 %v687_v19, 0.0 }
 0x115   : > { %v1280_v24 = vpop.f32.mrf.mxu0  ;;  %v1328_v25 = vpop.f32.mrf.mxu1 }
 0x116   : > { %v626_v26 = vadd.f32 %v1279_v22, %v1603_v52  ;;  %v690_v27 = vadd.f32 %v1327_v23, %v1603_v52 }
 0x117   : > { %v1281_v30 = vpop.f32.mrf.mxu0  ;;  %v1329_v31 = vpop.f32.mrf.mxu1 }
 0x118   : > { %v726_v32 = vmax.f32 %v626_v26, 0.0  ;;  %v742_v33 = vmax.f32 %v690_v27, 0.0  ;;  %v1282_v34 = vadd.f32 %v1281_v30, %v1280_v24  ;;  %v1330_v35 = vadd.f32 %v1329_v31, %v1328_v25 }
 0x119   : > { %v1283_v36 = vpop.f32.mrf.mxu0  ;;  %v1331_v37 = vpop.f32.mrf.mxu1 }
 0x11a   : > { %v1162_v38 = vpack.c.bf16 %v726_v32, %v725_v28  ;;  %v1202_v39 = vpack.c.bf16 %v742_v33, %v741_v29  ;;  %v631_v40 = vadd.f32 %v1282_v34, %v1603_v52  ;;  %v695_v41 = vadd.f32 %v1330_v35, %v1603_v52 }
 0x11b   : > { %v1284_v42 = vpop.f32.mrf.mxu0  ;;  %v1332_v43 = vpop.f32.mrf.mxu1 }
 0x11c   : > { %1222 = vst [vmem:[%s1613_s8 + $0x20] sm:$0xff] %v1162_v38   ;;  %1230 = vst [vmem:[%s1613_s8 + $0x60] sm:$0xff] %v1202_v39   ;;  %v1285_v44 = vadd.f32 %v1284_v42, %v1283_v36  ;;  %v1333_v45 = vadd.f32 %v1332_v43, %v1331_v37  ;;  %v727_v50 = vmax.f32 %v631_v40, 0.0  ;;  %v743_v51 = vmax.f32 %v695_v41, 0.0 }
 0x11d   : > { %v1286_v46 = vpop.f32.mrf.mxu0  ;;  %v1334_v47 = vpop.f32.mrf.mxu1 }
 0x11e   : > { %v634_v48 = vadd.f32 %v1285_v44, %v1603_v52  ;;  %v698_v49 = vadd.f32 %v1333_v45, %v1603_v52 }
 0x11f   : > { %v1287_v53 = vpop.f32.mrf.mxu0  ;;  %v1335_v54 = vpop.f32.mrf.mxu1 }
 0x120   : > { %v728_v55 = vmax.f32 %v634_v48, 0.0  ;;  %v744_v56 = vmax.f32 %v698_v49, 0.0  ;;  %v1288_v57 = vadd.f32 %v1287_v53, %v1286_v46  ;;  %v1336_v58 = vadd.f32 %v1335_v54, %v1334_v47 }
 0x121   : > { %v1289_v59 = vpop.f32.mrf.mxu0  ;;  %v1337_v60 = vpop.f32.mrf.mxu1 }
 0x122   : > { %v1167_v61 = vpack.c.bf16 %v728_v55, %v727_v50  ;;  %v1207_v62 = vpack.c.bf16 %v744_v56, %v743_v51  ;;  %v639_v63 = vadd.f32 %v1288_v57, %v1603_v52  ;;  %v703_v0 = vadd.f32 %v1336_v58, %v1603_v52 }
 0x123   : > { %v1290_v1 = vpop.f32.mrf.mxu0  ;;  %v1338_v2 = vpop.f32.mrf.mxu1 }
 0x124   : > { %1223 = vst [vmem:[%s1613_s8 + $0x28] sm:$0xff] %v1167_v61   ;;  %1231 = vst [vmem:[%s1613_s8 + $0x68] sm:$0xff] %v1207_v62   ;;  %v1291_v3 = vadd.f32 %v1290_v1, %v1289_v59  ;;  %v1339_v4 = vadd.f32 %v1338_v2, %v1337_v60  ;;  %v729_v9 = vmax.f32 %v639_v63, 0.0  ;;  %v745_v10 = vmax.f32 %v703_v0, 0.0 }
 0x125   : > { %v1292_v5 = vpop.f32.mrf.mxu0  ;;  %v1340_v6 = vpop.f32.mrf.mxu1 }
 0x126   : > { %v642_v7 = vadd.f32 %v1291_v3, %v1603_v52  ;;  %v706_v8 = vadd.f32 %v1339_v4, %v1603_v52 }
 0x127   : > { %v1293_v11 = vpop.f32.mrf.mxu0  ;;  %v1341_v12 = vpop.f32.mrf.mxu1 }
 0x128   : > { %v730_v13 = vmax.f32 %v642_v7, 0.0  ;;  %v746_v14 = vmax.f32 %v706_v8, 0.0  ;;  %v1294_v15 = vadd.f32 %v1293_v11, %v1292_v5  ;;  %v1342_v16 = vadd.f32 %v1341_v12, %v1340_v6 }
 0x129   : > { %v1295_v17 = vpop.f32.mrf.mxu0  ;;  %v1343_v18 = vpop.f32.mrf.mxu1 }
 0x12a   : > { %v1172_v19 = vpack.c.bf16 %v730_v13, %v729_v9  ;;  %v1212_v20 = vpack.c.bf16 %v746_v14, %v745_v10  ;;  %v647_v23 = vadd.f32 %v1294_v15, %v1603_v52  ;;  %v711_v24 = vadd.f32 %v1342_v16, %v1603_v52 }
 0x12b   : > { %v1296_v21 = vpop.f32.mrf.mxu0  ;;  %v1344_v22 = vpop.f32.mrf.mxu1 }
 0x12c   : > { %1224 = vst [vmem:[%s1613_s8 + $0x30] sm:$0xff] %v1172_v19   ;;  %1232 = vst [vmem:[%s1613_s8 + $0x70] sm:$0xff] %v1212_v20   ;;  %v1297_v25 = vadd.f32 %v1296_v21, %v1295_v17  ;;  %v1345_v26 = vadd.f32 %v1344_v22, %v1343_v18  ;;  %v731_v29 = vmax.f32 %v647_v23, 0.0  ;;  %v747_v30 = vmax.f32 %v711_v24, 0.0 }
 0x12e   : > { %v650_v27 = vadd.f32 %v1297_v25, %v1603_v52  ;;  %v714_v28 = vadd.f32 %v1345_v26, %v1603_v52 }
 0x130   : > { %v732_v31 = vmax.f32 %v650_v27, 0.0  ;;  %v748_v32 = vmax.f32 %v714_v28, 0.0 }
 0x132   : > { %v1177_v33 = vpack.c.bf16 %v732_v31, %v731_v29  ;;  %v1217_v34 = vpack.c.bf16 %v748_v32, %v747_v30 }
 0x134   : > { %1225 = vst [vmem:[%s1613_s8 + $0x38] sm:$0xff] %v1177_v33   ;;  %1233 = vst [vmem:[%s1613_s8 + $0x78] sm:$0xff] %v1217_v34  }
 0x135 PF: > { %s13_s14 = sadd.s32 1, %s1472_s14   ;;  %s1672_s12 = smov %s1468_s13 }
 0x136   : > { %p10_p5 = scmp.ge.s32.totalorder %s13_s14, 4   ;;  %s1673_s13 = smov %s1675_s15 }
 0x138   :  { %12 = sbr.rel (!%p10_p5) target bundleno = 2 (0x2), region = 68 }

// kernel: depth_encoder_forward.12
= control target key start
LH: loop header
LB: loop body
LE: loop exit
PB: predicated region body
PF: predicated region fallthrough
CT: control target
= control target key end

     0   :  { %s1912_s18 = smov 0   ;;  %s1914_s19 = smov 0   ;;  %s2236_s0 = inlined_call_operand.vmem [shape: bf16[128,128], index: 0, kind: input, shape index: {}]   ;;  %s2237_s1 = inlined_call_operand.vmem [shape: bf16[128,512], index: 1, kind: input, shape index: {}]   ;;  %s2238_s2 = inlined_call_operand.vmem [shape: f32[1,512], index: 2, kind: input, shape index: {}]   ;;  %s2239_s3 = inlined_call_operand.vmem [shape: bf16[128,256], index: 3, kind: input, shape index: {}]   ;;  %s2240_s4 = inlined_call_operand.vmem [shape: bf16[256,512], index: 4, kind: input, shape index: {}]   ;;  %s2241_s5 = inlined_call_operand.vmem [shape: bf16[128,512], index: 5, kind: output, shape index: {}]  }
   0x1   :  { %s1916_s20 = smov 0   ;;  %s1918_s21 = smov 0  }
   0x2   :  { %s1920_s22 = smov 0  }
   0x3 LB: > { %s24_s23 = sadd.s32 1, %s1876_s21  ;;  %s1488_s24 = sadd.s32 4294967295, %s1880_s22   ;;  %s1880_s22 = sphi %s1920_s22, %s15_s22   ;;  %s1876_s21 = sphi %s1918_s21, %s2247_s21   ;;  %s1872_s20 = sphi %s1916_s20, %s2246_s20   ;;  %s1868_s19 = sphi %s1914_s19, %s2245_s19   ;;  %s1864_s18 = sphi %s1912_s18, %s2244_s18  }
   0x4   : > { %p25_p0 = scmp.ge.s32.totalorder %s24_s23, 4  ;;  %p67_p1 = scmp.ne.s32.totalorder %s1868_s19, %s1864_s18 }
   0x5   : > { %p68_p2 = scmp.eq.s32.totalorder %s1880_s22, 0  ;;  %p177_p4 = scmp.eq.s32.totalorder %s1488_s24, 3 }
   0x6   : > { %s2249_s23 = smov (%p25_p0, %s24_s23), 0  ;;  %s60_s27 = sadd.s32 1, %s1868_s19 }
   0x7   : > { %p1944_p3 = por %p68_p2, %p67_p1  ;;  %s57_s26 = ssub.s32 %s1876_s21, %s2249_s23 }
   0x8   : > { %p58_p5 = scmp.eq.s32.totalorder %s57_s26, 0  ;;  %p1951_p6 = por %p177_p4, %p67_p1 }
   0x9   : > { %p1493_p7 = scmp.ge.s32.totalorder %s1880_s22, 4 }
   0xa   : > { %s1956_s29 = scalar_select %p58_p5, %s1868_s19, %s60_s27  }
   0xb   : > { %218 = sbr.rel (%p1493_p7) target bundleno = 56 (0x38), region = 24 }
  0x10   : > { %221 = sbr.rel (!%p1944_p3) target bundleno = 31 (0x1f), region = 28  ;;  %s223_s30 = sand.u32 (%p1944_p3), 1, %s1868_s19  }
  0x11   : > { %s1495_s6 = sshll.u32 (%p1944_p3), %s1876_s21, 2  ;;  %s1494_s7 = sshll.u32 (%p1944_p3), %s223_s30, 6 }
  0x12   : > { %s1966_s10 = scalar_lea.vmem (%p1944_p3), %s2237_s1, %s1495_s6  ;;  %s225_s11 = scalar_lea.vmem (%p1944_p3), [#allocation2], %s1494_s7 }
  0x13   : > { %v244_v0 = vld [vmem:[%s1966_s10] sm:$0xf] (%p1944_p3)  ;;  %v246_v1 = vld [vmem:[%s1966_s10 + $0x10] sm:$0xf] (%p1944_p3) }
  0x14   : > { %245 = vst [vmem:[%s225_s11] sm:$0xf] (%p1944_p3), %v244_v0  ;;  %247 = vst [vmem:[%s225_s11 + $0x4] sm:$0xf] (%p1944_p3), %v246_v1  ;;  %v248_v2 = vld [vmem:[%s1966_s10 + $0x20] sm:$0xf] (%p1944_p3) }
  0x15   : > { %v250_v3 = vld [vmem:[%s1966_s10 + $0x30] sm:$0xf]  ;;  %v252_v4 = vld [vmem:[%s1966_s10 + $0x40] sm:$0xf]  ;;  %249 = vst [vmem:[%s225_s11 + $0x8] sm:$0xf] %v248_v2 }
  0x16   : > { %251 = vst [vmem:[%s225_s11 + $0xc] sm:$0xf] %v250_v3  ;;  %253 = vst [vmem:[%s225_s11 + $0x10] sm:$0xf] %v252_v4  ;;  %v254_v5 = vld [vmem:[%s1966_s10 + $0x50] sm:$0xf] }
  0x17   : > { %v256_v6 = vld [vmem:[%s1966_s10 + $0x60] sm:$0xf]  ;;  %v258_v7 = vld [vmem:[%s1966_s10 + $0x70] sm:$0xf]  ;;  %255 = vst [vmem:[%s225_s11 + $0x14] sm:$0xf] %v254_v5 }
  0x18   : > { %257 = vst [vmem:[%s225_s11 + $0x18] sm:$0xf] %v256_v6  ;;  %259 = vst [vmem:[%s225_s11 + $0x1c] sm:$0xf] %v258_v7  ;;  %v260_v8 = vld [vmem:[%s1966_s10 + $0x80] sm:$0xf] }
  0x19   : > { %v262_v9 = vld [vmem:[%s1966_s10 + $0x90] sm:$0xf]  ;;  %v264_v10 = vld [vmem:[%s1966_s10 + $0xa0] sm:$0xf]  ;;  %261 = vst [vmem:[%s225_s11 + $0x20] sm:$0xf] %v260_v8 }
  0x1a   : > { %263 = vst [vmem:[%s225_s11 + $0x24] sm:$0xf] %v262_v9  ;;  %265 = vst [vmem:[%s225_s11 + $0x28] sm:$0xf] %v264_v10  ;;  %v266_v11 = vld [vmem:[%s1966_s10 + $0xb0] sm:$0xf] }
  0x1b   : > { %v268_v12 = vld [vmem:[%s1966_s10 + $0xc0] sm:$0xf]  ;;  %v270_v13 = vld [vmem:[%s1966_s10 + $0xd0] sm:$0xf]  ;;  %267 = vst [vmem:[%s225_s11 + $0x2c] sm:$0xf] %v266_v11 }
  0x1c   : > { %269 = vst [vmem:[%s225_s11 + $0x30] sm:$0xf] %v268_v12  ;;  %271 = vst [vmem:[%s225_s11 + $0x34] sm:$0xf] %v270_v13  ;;  %v272_v14 = vld [vmem:[%s1966_s10 + $0xe0] sm:$0xf] }
  0x1d   : > { %v274_v15 = vld [vmem:[%s1966_s10 + $0xf0] sm:$0xf]  ;;  %273 = vst [vmem:[%s225_s11 + $0x38] sm:$0xf] %v272_v14 }
  0x1e   : > { %275 = vst [vmem:[%s225_s11 + $0x3c] sm:$0xf] %v274_v15 }
  0x1f PF: > { %337 = sbr.rel (!%p1944_p3) target bundleno = 56 (0x38), region = 73  ;;  %s339_s12 = sand.u32 (%p1944_p3), 1, %s1868_s19  }
  0x20   : > { %s1497_s13 = sshll.u32 (%p1944_p3), %s1876_s21, 2  ;;  %s1496_s14 = sshll.u32 (%p1944_p3), %s339_s12, 7 }
  0x21   : > { %s1991_s17 = scalar_lea.vmem (%p1944_p3), %s2240_s4, %s1497_s13  ;;  %s1995_s24 = scalar_lea.vmem (%p1944_p3), [#allocation3], %s1496_s14 }
  0x22   : > { %v360_v16 = vld [vmem:[%s1991_s17] sm:$0xf] (%p1944_p3)  ;;  %v362_v17 = vld [vmem:[%s1991_s17 + $0x10] sm:$0xf] (%p1944_p3) }
  0x23   : > { %361 = vst [vmem:[%s1995_s24] sm:$0xf] (%p1944_p3), %v360_v16  ;;  %363 = vst [vmem:[%s1995_s24 + $0x4] sm:$0xf] (%p1944_p3), %v362_v17  ;;  %v364_v18 = vld [vmem:[%s1991_s17 + $0x20] sm:$0xf] (%p1944_p3) }
  0x24   : > { %v366_v19 = vld [vmem:[%s1991_s17 + $0x30] sm:$0xf]  ;;  %v368_v20 = vld [vmem:[%s1991_s17 + $0x40] sm:$0xf]  ;;  %365 = vst [vmem:[%s1995_s24 + $0x8] sm:$0xf] %v364_v18 }
  0x25   : > { %367 = vst [vmem:[%s1995_s24 + $0xc] sm:$0xf] %v366_v19  ;;  %369 = vst [vmem:[%s1995_s24 + $0x10] sm:$0xf] %v368_v20  ;;  %v370_v21 = vld [vmem:[%s1991_s17 + $0x50] sm:$0xf] }
  0x26   : > { %v372_v22 = vld [vmem:[%s1991_s17 + $0x60] sm:$0xf]  ;;  %v374_v23 = vld [vmem:[%s1991_s17 + $0x70] sm:$0xf]  ;;  %371 = vst [vmem:[%s1995_s24 + $0x14] sm:$0xf] %v370_v21 }
  0x27   : > { %373 = vst [vmem:[%s1995_s24 + $0x18] sm:$0xf] %v372_v22  ;;  %375 = vst [vmem:[%s1995_s24 + $0x1c] sm:$0xf] %v374_v23  ;;  %v376_v24 = vld [vmem:[%s1991_s17 + $0x80] sm:$0xf] }
  0x28   : > { %v378_v25 = vld [vmem:[%s1991_s17 + $0x90] sm:$0xf]  ;;  %v380_v26 = vld [vmem:[%s1991_s17 + $0xa0] sm:$0xf]  ;;  %377 = vst [vmem:[%s1995_s24 + $0x20] sm:$0xf] %v376_v24 }
  0x29   : > { %379 = vst [vmem:[%s1995_s24 + $0x24] sm:$0xf] %v378_v25  ;;  %381 = vst [vmem:[%s1995_s24 + $0x28] sm:$0xf] %v380_v26  ;;  %v382_v27 = vld [vmem:[%s1991_s17 + $0xb0] sm:$0xf] }
  0x2a   : > { %v384_v28 = vld [vmem:[%s1991_s17 + $0xc0] sm:$0xf]  ;;  %v386_v29 = vld [vmem:[%s1991_s17 + $0xd0] sm:$0xf]  ;;  %383 = vst [vmem:[%s1995_s24 + $0x2c] sm:$0xf] %v382_v27 }
  0x2b   : > { %385 = vst [vmem:[%s1995_s24 + $0x30] sm:$0xf] %v384_v28  ;;  %387 = vst [vmem:[%s1995_s24 + $0x34] sm:$0xf] %v386_v29  ;;  %v388_v30 = vld [vmem:[%s1991_s17 + $0xe0] sm:$0xf] }
  0x2c   : > { %v390_v31 = vld [vmem:[%s1991_s17 + $0xf0] sm:$0xf]  ;;  %v392_v32 = vld [vmem:[%s1991_s17 + $0x100] sm:$0xf]  ;;  %389 = vst [vmem:[%s1995_s24 + $0x38] sm:$0xf] %v388_v30 }
  0x2d   : > { %391 = vst [vmem:[%s1995_s24 + $0x3c] sm:$0xf] %v390_v31  ;;  %393 = vst [vmem:[%s1995_s24 + $0x40] sm:$0xf] %v392_v32  ;;  %v394_v33 = vld [vmem:[%s1991_s17 + $0x110] sm:$0xf] }
  0x2e   : > { %v396_v34 = vld [vmem:[%s1991_s17 + $0x120] sm:$0xf]  ;;  %v398_v35 = vld [vmem:[%s1991_s17 + $0x130] sm:$0xf]  ;;  %395 = vst [vmem:[%s1995_s24 + $0x44] sm:$0xf] %v394_v33 }
  0x2f   : > { %397 = vst [vmem:[%s1995_s24 + $0x48] sm:$0xf] %v396_v34  ;;  %399 = vst [vmem:[%s1995_s24 + $0x4c] sm:$0xf] %v398_v35  ;;  %v400_v36 = vld [vmem:[%s1991_s17 + $0x140] sm:$0xf] }
  0x30   : > { %v402_v37 = vld [vmem:[%s1991_s17 + $0x150] sm:$0xf]  ;;  %v404_v38 = vld [vmem:[%s1991_s17 + $0x160] sm:$0xf]  ;;  %401 = vst [vmem:[%s1995_s24 + $0x50] sm:$0xf] %v400_v36 }
  0x31   : > { %403 = vst [vmem:[%s1995_s24 + $0x54] sm:$0xf] %v402_v37  ;;  %405 = vst [vmem:[%s1995_s24 + $0x58] sm:$0xf] %v404_v38  ;;  %v406_v39 = vld [vmem:[%s1991_s17 + $0x170] sm:$0xf] }
  0x32   : > { %v408_v40 = vld [vmem:[%s1991_s17 + $0x180] sm:$0xf]  ;;  %v410_v41 = vld [vmem:[%s1991_s17 + $0x190] sm:$0xf]  ;;  %407 = vst [vmem:[%s1995_s24 + $0x5c] sm:$0xf] %v406_v39 }
  0x33   : > { %409 = vst [vmem:[%s1995_s24 + $0x60] sm:$0xf] %v408_v40  ;;  %411 = vst [vmem:[%s1995_s24 + $0x64] sm:$0xf] %v410_v41  ;;  %v412_v42 = vld [vmem:[%s1991_s17 + $0x1a0] sm:$0xf] }
  0x34   : > { %v414_v43 = vld [vmem:[%s1991_s17 + $0x1b0] sm:$0xf]  ;;  %v416_v44 = vld [vmem:[%s1991_s17 + $0x1c0] sm:$0xf]  ;;  %413 = vst [vmem:[%s1995_s24 + $0x68] sm:$0xf] %v412_v42 }
  0x35   : > { %415 = vst [vmem:[%s1995_s24 + $0x6c] sm:$0xf] %v414_v43  ;;  %417 = vst [vmem:[%s1995_s24 + $0x70] sm:$0xf] %v416_v44  ;;  %v418_v45 = vld [vmem:[%s1991_s17 + $0x1d0] sm:$0xf] }
  0x36   : > { %v420_v46 = vld [vmem:[%s1991_s17 + $0x1e0] sm:$0xf]  ;;  %v422_v47 = vld [vmem:[%s1991_s17 + $0x1f0] sm:$0xf]  ;;  %419 = vst [vmem:[%s1995_s24 + $0x74] sm:$0xf] %v418_v45 }
  0x37   : > { %421 = vst [vmem:[%s1995_s24 + $0x78] sm:$0xf] %v420_v46  ;;  %423 = vst [vmem:[%s1995_s24 + $0x7c] sm:$0xf] %v422_v47 }
  0x38 PF: > { %p1498_p8 = scmp.ge.s32.totalorder %s1880_s22, 1  ;;  %p510_p9 = scmp.lt.s32.totalorder %s1880_s22, 5 }
  0x3a   : > { %p511_p10 = pnand %p1498_p8, %p510_p9 }
  0x3b   : > { %s517_s25 = sand.u32 (!%p511_p10), 1, %s1864_s18   ;;  %p574_p11 = scmp.lt.s32.totalorder (!%p511_p10), %s1872_s20, 3 }
  0x3c   : > { %514 = sbr.rel (%p511_p10) target bundleno = 372 (0x174), region = 114  ;;  %s1500_s26 = sshll.u32 (!%p511_p10), %s517_s25, 7 }
  0x3d   : > { %s2062_s27 = sshll.u32 (!%p511_p10), %s517_s25, 6  ;;  %s2070_s9 = scalar_lea.vmem (!%p511_p10), [#allocation3], %s1500_s26 }
  0x3e   : > { %s2075_s18 = scalar_lea.vmem (!%p511_p10), [#allocation2], %s2062_s27  ;;  %s2175_s8 = scalar_lea.vmem (!%p511_p10), [#allocation4], %s2062_s27 }
  0x41   : > { %v1812_v48 = vld [vmem:[%s2239_s3 + $0x4] ss:$8 sps:$4 sm:$0xff]   ;;  %v1786_v50 = vld [vmem:[%s2070_s9 + $0x78] sm:$0xff]   ;;  %v1789_v53 = vld [vmem:[%s2070_s9 + $0x70] sm:$0xff]   ;;  %s575_s26 = scalar_select %p574_p11, %s1872_s20, 3 }
  0x42   : > { %v1813_v49 = vld [vmem:[%s2236_s0] sm:$0xff]   ;;  %874 = vmatprep.mubr.bf16.mxu0 %v1812_v48  ;;  %v1787_v51 = vld [vmem:[%s2070_s9 + $0x38] sm:$0xff]   ;;  %1634 = vmatprep.subr.bf16.mxu0 %v1786_v50  ;;  %v1790_v54 = vld [vmem:[%s2070_s9 + $0x30] sm:$0xff]   ;;  %s1568_s27 = sshll.u32 (%p1951_p6), %s1872_s20, 2 }
  0x43   : > { %1730 = vmatprep.mubr.bf16.mxu1 %v1813_v49  ;;  %v1788_v52 = vld [vmem:[%s2075_s18 + $0x38] sm:$0xff]   ;;  %1635 = vmatpush3.bf16.msra.mxu0 %v1787_v51  ;;  %v1791_v55 = vld [vmem:[%s2075_s18 + $0x30] sm:$0xff]   ;;  %v1792_v56 = vld [vmem:[%s2070_s9 + $0x68] sm:$0xff]   ;;  %s576_s7 = scalar_lea.vmem %s2238_s2, %s575_s26  ;;  %s1262_s10 = scalar_lea.vmem (%p1951_p6), %s2241_s5, %s1568_s27 }
  0x44   : > { %1714 = vmatprep.subr.bf16.mxu1 %v1788_v52  ;;  %1636 = vmatprep.subr.bf16.mxu0 %v1789_v53  ;;  %v1793_v57 = vld [vmem:[%s2070_s9 + $0x28] sm:$0xff]   ;;  %v1795_v59 = vld [vmem:[%s2070_s9 + $0x60] sm:$0xff]   ;;  %v1798_v62 = vld [vmem:[%s2070_s9 + $0x58] sm:$0xff]  }
  0x45   : > { %1715 = vmatpush3.bf16.msra.mxu1 %v1788_v52  ;;  %v1794_v58 = vld [vmem:[%s2075_s18 + $0x28] sm:$0xff]   ;;  %v1796_v60 = vld [vmem:[%s2070_s9 + $0x20] sm:$0xff]   ;;  %v1800_v63 = vld [vmem:[%s2075_s18 + $0x18] sm:$0xff]  }
  0x46   : > { %1716 = vmatprep.subr.bf16.mxu1 %v1791_v55  ;;  %v1797_v61 = vld [vmem:[%s2075_s18 + $0x20] sm:$0xff]   ;;  %v1799_v0 = vld [vmem:[%s2070_s9 + $0x18] sm:$0xff]   ;;  %v1801_v1 = vld [vmem:[%s2070_s9 + $0x50] sm:$0xff]  }
  0x47   : > { %1637 = vmatpush3.bf16.msra.mxu0 %v1790_v54  ;;  %v1803_v2 = vld [vmem:[%s2075_s18 + $0x10] sm:$0xff]   ;;  %v1804_v4 = vld [vmem:[%s2070_s9 + $0x48] sm:$0xff]   ;;  %v1807_v7 = vld [vmem:[%s2070_s9 + $0x40] sm:$0xff]  }
  0x48   : > { %1638 = vmatprep.subr.bf16.mxu0 %v1792_v56  ;;  %v1802_v3 = vld [vmem:[%s2070_s9 + $0x10] sm:$0xff]   ;;  %v1805_v5 = vld [vmem:[%s2070_s9 + $0x8] sm:$0xff]   ;;  %v1809_v8 = vld [vmem:[%s2075_s18] sm:$0xff]  }
  0x49   : > { %1717 = vmatpush3.bf16.msra.mxu1 %v1791_v55  ;;  %v1806_v6 = vld [vmem:[%s2075_s18 + $0x8] sm:$0xff]   ;;  %v1808_v9 = vld [vmem:[%s2070_s9] sm:$0xff]   ;;  %v1815_v11 = vld [vmem:[%s2239_s3 + $0x14] ss:$8 sps:$4 sm:$0xff]  }
  0x4a   : > { %1718 = vmatprep.subr.bf16.mxu1 %v1794_v58  ;;  %v1810_v10 = vld [vmem:[%s2239_s3] ss:$8 sps:$4 sm:$0xff]   ;;  %v1821_v13 = vld [vmem:[%s2236_s0 + $0x10] sm:$0xff]   ;;  %v1818_v15 = vld [vmem:[%s2239_s3 + $0x24] ss:$8 sps:$4 sm:$0xff]  }
  0x4b   : > { %1639 = vmatpush3.bf16.msra.mxu0 %v1793_v57  ;;  %v1814_v12 = vld [vmem:[%s2236_s0 + $0x8] sm:$0xff]   ;;  %v1817_v14 = vld [vmem:[%s2239_s3 + $0x10] ss:$8 sps:$4 sm:$0xff]   ;;  %v1829_v17 = vld [vmem:[%s2236_s0 + $0x20] sm:$0xff]  }
  0x4c   : > { %1640 = vmatprep.subr.bf16.mxu0 %v1795_v59  ;;  %v1822_v16 = vld [vmem:[%s2236_s0 + $0x18] sm:$0xff]   ;;  %v1820_v18 = vld [vmem:[%s2239_s3 + $0x20] ss:$8 sps:$4 sm:$0xff]   ;;  %v1837_v21 = vld [vmem:[%s2236_s0 + $0x30] sm:$0xff]  }
  0x4d   : > { %1719 = vmatpush3.bf16.msra.mxu1 %v1794_v58  ;;  %v1823_v19 = vld [vmem:[%s2239_s3 + $0x34] ss:$8 sps:$4 sm:$0xff]   ;;  %v1830_v20 = vld [vmem:[%s2236_s0 + $0x28] sm:$0xff]   ;;  %v1825_v22 = vld [vmem:[%s2239_s3 + $0x30] ss:$8 sps:$4 sm:$0xff]  }
  0x4e   : > { %1720 = vmatprep.subr.bf16.mxu1 %v1797_v61  ;;  %v1826_v23 = vld [vmem:[%s2239_s3 + $0x44] ss:$8 sps:$4 sm:$0xff]   ;;  %v1838_v24 = vld [vmem:[%s2236_s0 + $0x38] sm:$0xff]   ;;  %v1828_v25 = vld [vmem:[%s2239_s3 + $0x40] ss:$8 sps:$4 sm:$0xff]  }
  0x4f   : > { %1641 = vmatpush3.bf16.msra.mxu0 %v1796_v60  ;;  %v1831_v26 = vld [vmem:[%s2239_s3 + $0x54] ss:$8 sps:$4 sm:$0xff]   ;;  %v1833_v27 = vld [vmem:[%s2239_s3 + $0x50] ss:$8 sps:$4 sm:$0xff]   ;;  %v1834_v28 = vld [vmem:[%s2239_s3 + $0x64] ss:$8 sps:$4 sm:$0xff]  }
  0x50   : > { %1642 = vmatprep.subr.bf16.mxu0 %v1798_v62  ;;  %v1836_v29 = vld [vmem:[%s2239_s3 + $0x60] ss:$8 sps:$4 sm:$0xff]   ;;  %v1839_v30 = vld [vmem:[%s2239_s3 + $0x74] ss:$8 sps:$4 sm:$0xff]   ;;  %v1841_v31 = vld [vmem:[%s2239_s3 + $0x70] ss:$8 sps:$4 sm:$0xff]  }
  0x51   : > { %1721 = vmatpush3.bf16.msra.mxu1 %v1797_v61  ;;  %v2170_v39 = vld [vmem:[%s576_s7] ss:$0 sm:$0xff] }
  0x52   : > { %1722 = vmatprep.subr.bf16.mxu1 %v1800_v63 }
  0x53   : > { %1643 = vmatpush3.bf16.msra.mxu0 %v1799_v0 }
  0x54   : > { %1644 = vmatprep.subr.bf16.mxu0 %v1801_v1 }
  0x55   : > { %1723 = vmatpush3.bf16.msra.mxu1 %v1800_v63 }
  0x56   : > { %1724 = vmatprep.subr.bf16.mxu1 %v1803_v2 }
  0x57   : > { %1645 = vmatpush3.bf16.msra.mxu0 %v1802_v3 }
  0x58   : > { %1646 = vmatprep.subr.bf16.mxu0 %v1804_v4 }
  0x59   : > { %1725 = vmatpush3.bf16.msra.mxu1 %v1803_v2 }
  0x5a   : > { %1726 = vmatprep.subr.bf16.mxu1 %v1806_v6 }
  0x5b   : > { %1647 = vmatpush3.bf16.msra.mxu0 %v1805_v5 }
  0x5c   : > { %1648 = vmatprep.subr.bf16.mxu0 %v1807_v7 }
  0x5d   : > { %1727 = vmatpush3.bf16.msra.mxu1 %v1806_v6 }
  0x5e   : > { %1728 = vmatprep.subr.bf16.mxu1 %v1809_v8 }
  0x5f   : > { %1649 = vmatpush3.bf16.msra.mxu0 %v1808_v9 }
  0x61   : > { %1729 = vmatpush3.bf16.msra.mxu1 %v1809_v8 }
  0x62   : > { %875 = vmatmul.mubr.bf16.vlgmr.msra.gmra.mxu0 %v1810_v10 }
  0x63   : > { %882 = vmatprep.mubr.bf16.mxu0 %v1815_v11 }
  0x64   : > { %1731 = vmatmul.mubr.bf16.vlgmr.msra.gmra.mxu1 %v1814_v12 }
  0x65   : > { %1734 = vmatprep.mubr.bf16.mxu1 %v1821_v13 }
  0x6a   : > { %883 = vmatmul.mubr.bf16.gmra.mxu0 %v1817_v14 }
  0x6b   : > { %890 = vmatprep.mubr.bf16.mxu0 %v1818_v15 }
  0x6c   : > { %1735 = vmatmul.mubr.bf16.gmra.mxu1 %v1822_v16 }
  0x6d   : > { %1738 = vmatprep.mubr.bf16.mxu1 %v1829_v17 }
  0x72   : > { %891 = vmatmul.mubr.bf16.gmra.mxu0 %v1820_v18 }
  0x73   : > { %898 = vmatprep.mubr.bf16.mxu0 %v1823_v19 }
  0x74   : > { %1739 = vmatmul.mubr.bf16.gmra.mxu1 %v1830_v20 }
  0x75   : > { %1742 = vmatprep.mubr.bf16.mxu1 %v1837_v21 }
  0x7a   : > { %899 = vmatmul.mubr.bf16.gmra.mxu0 %v1825_v22 }
  0x7b   : > { %906 = vmatprep.mubr.bf16.mxu0 %v1826_v23 }
  0x7c   : > { %1743 = vmatmul.mubr.bf16.gmra.mxu1 %v1838_v24 }
  0x82   : > { %907 = vmatmul.mubr.bf16.gmra.mxu0 %v1828_v25 }
  0x83   : > { %914 = vmatprep.mubr.bf16.mxu0 %v1831_v26 }
  0x8a   : > { %915 = vmatmul.mubr.bf16.gmra.mxu0 %v1833_v27 }
  0x8b   : > { %922 = vmatprep.mubr.bf16.mxu0 %v1834_v28 }
  0x92   : > { %923 = vmatmul.mubr.bf16.gmra.mxu0 %v1836_v29 }
  0x93   : > { %930 = vmatprep.mubr.bf16.mxu0 %v1839_v30 }
  0x9a   : > { %931 = vmatmul.mubr.bf16.gmra.mxu0 %v1841_v31 }
 0x122   : > { %v1650_v32 = vpop.f32.mrf.mxu0 }
 0x124   : > { %v1651_v33 = vpop.f32.mrf.mxu0  ;;  %v1732_v34 = vpop.f32.mrf.mxu1 }
 0x125   : > { %v1652_v35 = vadd.f32 %v1651_v33, %v1650_v32 }
 0x126   : > { %v1653_v36 = vpop.f32.mrf.mxu0  ;;  %v1069_v37 = vpop.f32.mrf.mxu1 }
 0x127   : > { %v1070_v38 = vadd.f32 %v1652_v35, %v1069_v37 }
 0x128   : > { %v1654_v40 = vpop.f32.mrf.mxu0  ;;  %v1733_v41 = vpop.f32.mrf.mxu1 }
 0x129   : > { %v1655_v42 = vadd.f32 %v1654_v40, %v1653_v36  ;;  %v1139_v45 = vadd.f32 %v2170_v39, %v1070_v38 }
 0x12a   : > { %v1656_v43 = vpop.f32.mrf.mxu0  ;;  %v1072_v44 = vpop.f32.mrf.mxu1 }
 0x12b   : > { %v1073_v46 = vadd.f32 %v1655_v42, %v1072_v44  ;;  %v1155_v52 = vmax.f32 %v1139_v45, 0.0 }
 0x12c   : > { %v1657_v47 = vpop.f32.mrf.mxu0  ;;  %v1736_v48 = vpop.f32.mrf.mxu1 }
 0x12d   : > { %v1140_v49 = vadd.f32 %v2170_v39, %v1073_v46  ;;  %v1658_v50 = vadd.f32 %v1657_v47, %v1656_v43 }
 0x12e   : > { %v1659_v51 = vpop.f32.mrf.mxu0  ;;  %v1085_v56 = vpop.f32.mrf.mxu1 }
 0x12f   : > { %v1156_v53 = vmax.f32 %v1140_v49, 0.0  ;;  %v1078_v54 = vadd.f32 %v1732_v34, %v1658_v50 }
 0x130   : > { %v1660_v55 = vpop.f32.mrf.mxu0  ;;  %v1737_v63 = vpop.f32.mrf.mxu1 }
 0x131   : > { %v1590_v57 = vpack.c.bf16 %v1156_v53, %v1155_v52  ;;  %v1661_v58 = vadd.f32 %v1660_v55, %v1659_v51  ;;  %v1141_v60 = vadd.f32 %v2170_v39, %v1078_v54 }
 0x132   : > { %v1662_v59 = vpop.f32.mrf.mxu0  ;;  %v1088_v7 = vpop.f32.mrf.mxu1 }
 0x133   : > { %1591 = vst [vmem:[%s2175_s8] sm:$0xff] %v1590_v57   ;;  %v1081_v61 = vadd.f32 %v1733_v41, %v1661_v58  ;;  %v1157_v3 = vmax.f32 %v1141_v60, 0.0 }
 0x134   : > { %v1663_v62 = vpop.f32.mrf.mxu0  ;;  %v1740_v14 = vpop.f32.mrf.mxu1 }
 0x135   : > { %v1142_v0 = vadd.f32 %v2170_v39, %v1081_v61  ;;  %v1664_v1 = vadd.f32 %v1663_v62, %v1662_v59 }
 0x136   : > { %v1665_v2 = vpop.f32.mrf.mxu0  ;;  %v1101_v22 = vpop.f32.mrf.mxu1 }
 0x137   : > { %v1158_v4 = vmax.f32 %v1142_v0, 0.0  ;;  %v1086_v5 = vadd.f32 %v1664_v1, %v1085_v56 }
 0x138   : > { %v1666_v6 = vpop.f32.mrf.mxu0  ;;  %v1741_v29 = vpop.f32.mrf.mxu1 }
 0x139   : > { %v1595_v8 = vpack.c.bf16 %v1158_v4, %v1157_v3  ;;  %v1667_v9 = vadd.f32 %v1666_v6, %v1665_v2  ;;  %v1143_v11 = vadd.f32 %v2170_v39, %v1086_v5 }
 0x13a   : > { %v1668_v10 = vpop.f32.mrf.mxu0  ;;  %v1104_v37 = vpop.f32.mrf.mxu1 }
 0x13b   : > { %1627 = vst [vmem:[%s2175_s8 + $0x8] sm:$0xff] %v1595_v8   ;;  %v1089_v12 = vadd.f32 %v1667_v9, %v1088_v7  ;;  %v1159_v18 = vmax.f32 %v1143_v11, 0.0 }
 0x13c   : > { %v1669_v13 = vpop.f32.mrf.mxu0  ;;  %v1744_v45 = vpop.f32.mrf.mxu1 }
 0x13d   : > { %v1144_v15 = vadd.f32 %v2170_v39, %v1089_v12  ;;  %v1670_v16 = vadd.f32 %v1669_v13, %v1668_v10 }
 0x13e   : > { %v1671_v17 = vpop.f32.mrf.mxu0  ;;  %v1117_v53 = vpop.f32.mrf.mxu1 }
 0x13f   : > { %v1160_v19 = vmax.f32 %v1144_v15, 0.0  ;;  %v1094_v20 = vadd.f32 %v1736_v48, %v1670_v16 }
 0x140   : > { %v1672_v21 = vpop.f32.mrf.mxu0  ;;  %v1745_v60 = vpop.f32.mrf.mxu1 }
 0x141   : > { %v1600_v23 = vpack.c.bf16 %v1160_v19, %v1159_v18  ;;  %v1673_v24 = vadd.f32 %v1672_v21, %v1671_v17  ;;  %v1145_v26 = vadd.f32 %v2170_v39, %v1094_v20 }
 0x142   : > { %v1674_v25 = vpop.f32.mrf.mxu0  ;;  %v1120_v4 = vpop.f32.mrf.mxu1 }
 0x143   : > { %1628 = vst [vmem:[%s2175_s8 + $0x10] sm:$0xff] %v1600_v23   ;;  %v1097_v27 = vadd.f32 %v1737_v63, %v1673_v24  ;;  %v1161_v33 = vmax.f32 %v1145_v26, 0.0  ;;  %v1279_v26 = vld [vmem:[%s2175_s8] sm:$0xf] (%p1951_p6) }
 0x144   : > { %v1675_v28 = vpop.f32.mrf.mxu0  ;;  %1280 = vst [vmem:[%s1262_s10] sm:$0xf] (%p1951_p6), %v1279_v26 }
 0x145   : > { %v1146_v30 = vadd.f32 %v2170_v39, %v1097_v27  ;;  %v1676_v31 = vadd.f32 %v1675_v28, %v1674_v25  ;;  %v1281_v27 = vld [vmem:[%s2175_s8 + $0x4] sm:$0xf] (%p1951_p6)  ;;  %v1285_v28 = vld [vmem:[%s2175_s8 + $0xc] sm:$0xf] (%p1951_p6) }
 0x146   : > { %v1677_v32 = vpop.f32.mrf.mxu0  ;;  %1282 = vst [vmem:[%s1262_s10 + $0x10] sm:$0xf] (%p1951_p6), %v1281_v27  ;;  %1286 = vst [vmem:[%s1262_s10 + $0x30] sm:$0xf] (%p1951_p6), %v1285_v28 }
 0x147   : > { %v1162_v34 = vmax.f32 %v1146_v30, 0.0  ;;  %v1102_v35 = vadd.f32 %v1676_v31, %v1101_v22 }
 0x148   : > { %v1678_v36 = vpop.f32.mrf.mxu0 }
 0x149   : > { %v1605_v38 = vpack.c.bf16 %v1162_v34, %v1161_v33  ;;  %v1679_v40 = vadd.f32 %v1678_v36, %v1677_v32  ;;  %v1147_v42 = vadd.f32 %v2170_v39, %v1102_v35 }
 0x14a   : > { %v1680_v41 = vpop.f32.mrf.mxu0  ;;  %v1289_v30 = vld [vmem:[%s2175_s8 + $0x14] sm:$0xf] (%p1951_p6) }
 0x14b   : > { %1629 = vst [vmem:[%s2175_s8 + $0x18] sm:$0xff] %v1605_v38   ;;  %v1105_v43 = vadd.f32 %v1679_v40, %v1104_v37  ;;  %v1163_v49 = vmax.f32 %v1147_v42, 0.0  ;;  %1290 = vst [vmem:[%s1262_s10 + $0x50] sm:$0xf] (%p1951_p6), %v1289_v30 }
 0x14c   : > { %v1681_v44 = vpop.f32.mrf.mxu0 }
 0x14d   : > { %v1148_v46 = vadd.f32 %v2170_v39, %v1105_v43  ;;  %v1682_v47 = vadd.f32 %v1681_v44, %v1680_v41 }
 0x14e   : > { %v1683_v48 = vpop.f32.mrf.mxu0 }
 0x14f   : > { %v1164_v50 = vmax.f32 %v1148_v46, 0.0  ;;  %v1110_v51 = vadd.f32 %v1740_v14, %v1682_v47 }
 0x150   : > { %v1684_v52 = vpop.f32.mrf.mxu0 }
 0x151   : > { %v1610_v54 = vpack.c.bf16 %v1164_v50, %v1163_v49  ;;  %v1685_v55 = vadd.f32 %v1684_v52, %v1683_v48  ;;  %v1149_v57 = vadd.f32 %v2170_v39, %v1110_v51 }
 0x152   : > { %v1686_v56 = vpop.f32.mrf.mxu0  ;;  %v1291_v31 = vld [vmem:[%s2175_s8 + $0x18] sm:$0xf] (%p1951_p6)  ;;  %v1293_v32 = vld [vmem:[%s2175_s8 + $0x1c] sm:$0xf] (%p1951_p6) }
 0x153   : > { %1630 = vst [vmem:[%s2175_s8 + $0x20] sm:$0xff] %v1610_v54   ;;  %v1113_v58 = vadd.f32 %v1741_v29, %v1685_v55  ;;  %v1165_v0 = vmax.f32 %v1149_v57, 0.0  ;;  %v1287_v29 = vld [vmem:[%s2175_s8 + $0x10] sm:$0xf] (%p1951_p6)  ;;  %1292 = vst [vmem:[%s1262_s10 + $0x60] sm:$0xf] (%p1951_p6), %v1291_v31 }
 0x154   : > { %v1687_v59 = vpop.f32.mrf.mxu0  ;;  %1288 = vst [vmem:[%s1262_s10 + $0x40] sm:$0xf] (%p1951_p6), %v1287_v29  ;;  %1294 = vst [vmem:[%s1262_s10 + $0x70] sm:$0xf] (%p1951_p6), %v1293_v32 }
 0x155   : > { %v1150_v61 = vadd.f32 %v2170_v39, %v1113_v58  ;;  %v1688_v62 = vadd.f32 %v1687_v59, %v1686_v56 }
 0x156   : > { %v1689_v63 = vpop.f32.mrf.mxu0 }
 0x157   : > { %v1166_v1 = vmax.f32 %v1150_v61, 0.0  ;;  %v1118_v2 = vadd.f32 %v1688_v62, %v1117_v53 }
 0x158   : > { %v1690_v3 = vpop.f32.mrf.mxu0 }
 0x159   : > { %v1615_v5 = vpack.c.bf16 %v1166_v1, %v1165_v0  ;;  %v1691_v6 = vadd.f32 %v1690_v3, %v1689_v63  ;;  %v1151_v8 = vadd.f32 %v2170_v39, %v1118_v2 }
 0x15a   : > { %v1692_v7 = vpop.f32.mrf.mxu0  ;;  %v1295_v33 = vld [vmem:[%s2175_s8 + $0x20] sm:$0xf] (%p1951_p6)  ;;  %v1297_v34 = vld [vmem:[%s2175_s8 + $0x24] sm:$0xf] (%p1951_p6) }
 0x15b   : > { %1631 = vst [vmem:[%s2175_s8 + $0x28] sm:$0xff] %v1615_v5   ;;  %v1121_v9 = vadd.f32 %v1691_v6, %v1120_v4  ;;  %v1167_v14 = vmax.f32 %v1151_v8, 0.0  ;;  %1296 = vst [vmem:[%s1262_s10 + $0x80] sm:$0xf] (%p1951_p6), %v1295_v33 }
 0x15c   : > { %v1693_v10 = vpop.f32.mrf.mxu0  ;;  %1298 = vst [vmem:[%s1262_s10 + $0x90] sm:$0xf] (%p1951_p6), %v1297_v34 }
 0x15d   : > { %v1152_v11 = vadd.f32 %v2170_v39, %v1121_v9  ;;  %v1694_v12 = vadd.f32 %v1693_v10, %v1692_v7 }
 0x15e   : > { %v1695_v13 = vpop.f32.mrf.mxu0 }
 0x15f   : > { %v1168_v15 = vmax.f32 %v1152_v11, 0.0  ;;  %v1126_v16 = vadd.f32 %v1744_v45, %v1694_v12 }
 0x160   : > { %v1696_v17 = vpop.f32.mrf.mxu0 }
 0x161   : > { %v1620_v18 = vpack.c.bf16 %v1168_v15, %v1167_v14  ;;  %v1697_v19 = vadd.f32 %v1696_v17, %v1695_v13  ;;  %v1153_v20 = vadd.f32 %v2170_v39, %v1126_v16 }
 0x162   : > { %v1299_v35 = vld [vmem:[%s2175_s8 + $0x28] sm:$0xf] (%p1951_p6)  ;;  %v1301_v36 = vld [vmem:[%s2175_s8 + $0x2c] sm:$0xf] (%p1951_p6) }
 0x163   : > { %1632 = vst [vmem:[%s2175_s8 + $0x30] sm:$0xff] %v1620_v18   ;;  %v1129_v21 = vadd.f32 %v1745_v60, %v1697_v19  ;;  %v1169_v23 = vmax.f32 %v1153_v20, 0.0  ;;  %1300 = vst [vmem:[%s1262_s10 + $0xa0] sm:$0xf] (%p1951_p6), %v1299_v35 }
 0x164   : > { %1302 = vst [vmem:[%s1262_s10 + $0xb0] sm:$0xf] (%p1951_p6), %v1301_v36 }
 0x165   : > { %v1154_v22 = vadd.f32 %v2170_v39, %v1129_v21  ;;  %v1283_v39 = vld [vmem:[%s2175_s8 + $0x8] sm:$0xf] (%p1951_p6) }
 0x166   : > { %1284 = vst [vmem:[%s1262_s10 + $0x20] sm:$0xf] (%p1951_p6), %v1283_v39 }
 0x167   : > { %v1170_v24 = vmax.f32 %v1154_v22, 0.0  ;;  %1257 = sbr.rel (!%p1951_p6) target bundleno = 372 (0x174), region = 126 }
 0x169   : > { %v1625_v25 = vpack.c.bf16 %v1170_v24, %v1169_v23 }
 0x16a   : > { %v1303_v37 = vld [vmem:[%s2175_s8 + $0x30] sm:$0xf] (%p1951_p6)  ;;  %v1305_v38 = vld [vmem:[%s2175_s8 + $0x34] sm:$0xf] (%p1951_p6) }
 0x16b   : > { %1633 = vst [vmem:[%s2175_s8 + $0x38] sm:$0xff] %v1625_v25   ;;  %1304 = vst [vmem:[%s1262_s10 + $0xc0] sm:$0xf] (%p1951_p6), %v1303_v37 }
 0x16c   : > { %1306 = vst [vmem:[%s1262_s10 + $0xd0] sm:$0xf] %v1305_v38 }
 0x172   : > { %v1307_v40 = vld [vmem:[%s2175_s8 + $0x38] sm:$0xf]  ;;  %v1309_v41 = vld [vmem:[%s2175_s8 + $0x3c] sm:$0xf] }
 0x173   : > { %1308 = vst [vmem:[%s1262_s10 + $0xe0] sm:$0xf] %v1307_v40  ;;  %1310 = vst [vmem:[%s1262_s10 + $0xf0] sm:$0xf] %v1309_v41 }
 0x174 PF: > { %s15_s22 = sadd.s32 1, %s1880_s22   ;;  %s2244_s18 = smov %s1868_s19 }
 0x175   : > { %p12_p12 = scmp.ge.s32.totalorder %s15_s22, 6   ;;  %s2245_s19 = smov %s1956_s29 }
 0x176   : > { %s2246_s20 = smov %s1876_s21  ;;  %s2247_s21 = smov %s2249_s23 }
 0x177   :  { %14 = sbr.rel (!%p12_p12) target bundleno = 3 (0x3), region = 215 }

// kernel: depth_encoder_forward.13
= control target key start
LH: loop header
LB: loop body
LE: loop exit
PB: predicated region body
PF: predicated region fallthrough
CT: control target
= control target key end

     0   :  { %s1930_s12 = smov 0   ;;  %s1932_s13 = smov 0   ;;  %s2317_s0 = inlined_call_operand.vmem [shape: bf16[128,512], index: 0, kind: input, shape index: {}]   ;;  %s2318_s1 = inlined_call_operand.vmem [shape: bf16[512,256], index: 1, kind: input, shape index: {}]   ;;  %s2319_s2 = inlined_call_operand.vmem [shape: f32[1,256], index: 2, kind: input, shape index: {}]   ;;  %s2320_s3 = inlined_call_operand.vmem [shape: bf16[128,256], index: 3, kind: output, shape index: {}]  }
   0x1   :  { %s1934_s14 = smov 0   ;;  %s1936_s15 = smov 0  }
   0x2   :  { %s1938_s16 = smov 0  }
   0x3 LB: > { %s22_s17 = sadd.s32 1, %s1904_s15  ;;  %s1464_s18 = sadd.s32 4294967295, %s1908_s16   ;;  %s1908_s16 = sphi %s1938_s16, %s13_s16   ;;  %s1904_s15 = sphi %s1936_s15, %s2325_s15   ;;  %s1900_s14 = sphi %s1934_s14, %s2324_s14   ;;  %s1896_s13 = sphi %s1932_s13, %s2323_s13   ;;  %s1892_s12 = sphi %s1930_s12, %s2322_s12  }
   0x4   : > { %p23_p0 = scmp.ge.s32.totalorder %s22_s17, 2  ;;  %p65_p1 = scmp.ne.s32.totalorder %s1896_s13, %s1892_s12 }
   0x5   : > { %p66_p2 = scmp.eq.s32.totalorder %s1908_s16, 0  ;;  %p123_p4 = scmp.eq.s32.totalorder %s1464_s18, 1 }
   0x6   : > { %s2327_s17 = smov (%p23_p0, %s22_s17), 0  ;;  %s58_s20 = sadd.s32 1, %s1896_s13 }
   0x7   : > { %p67_p3 = por %p66_p2, %p65_p1  ;;  %s55_s19 = ssub.s32 %s1904_s15, %s2327_s17 }
   0x8   : > { %p56_p5 = scmp.eq.s32.totalorder %s55_s19, 0  ;;  %p1965_p6 = por %p123_p4, %p65_p1 }
   0x9   : > { %p1468_p7 = scmp.ge.s32.totalorder %s1908_s16, 2 }
   0xa   : > { %s1970_s22 = scalar_select %p56_p5, %s1896_s13, %s58_s20  }
   0xb   : > { %155 = sbr.rel (%p1468_p7) target bundleno = 62 (0x3e), region = 20 }
  0x10   : > { %158 = sbr.rel (!%p67_p3) target bundleno = 62 (0x3e), region = 24  ;;  %s160_s23 = sand.u32 (%p67_p3), 1, %s1896_s13  }
  0x11   : > { %s1470_s24 = sshll.u32 (%p67_p3), %s1904_s15, 2  ;;  %s1469_s25 = sshll.u32 (%p67_p3), %s160_s23, 8 }
  0x12   : > { %s1978_s28 = scalar_lea.vmem (%p67_p3), %s2318_s1, %s1470_s24  ;;  %s1982_s29 = scalar_lea.vmem (%p67_p3), [#allocation2], %s1469_s25 }
  0x13   : > { %v181_v0 = vld [vmem:[%s1978_s28] sm:$0xf] (%p67_p3)  ;;  %v183_v1 = vld [vmem:[%s1978_s28 + $0x8] sm:$0xf] (%p67_p3)  ;;  %v185_v2 = vld [vmem:[%s1978_s28 + $0x10] sm:$0xf] (%p67_p3) }
  0x14   : > { %182 = vst [vmem:[%s1982_s29] sm:$0xf] (%p67_p3), %v181_v0  ;;  %184 = vst [vmem:[%s1982_s29 + $0x4] sm:$0xf] (%p67_p3), %v183_v1  ;;  %v187_v3 = vld [vmem:[%s1978_s28 + $0x18] sm:$0xf] (%p67_p3) }
  0x15   : > { %v189_v4 = vld [vmem:[%s1978_s28 + $0x20] sm:$0xf]  ;;  %186 = vst [vmem:[%s1982_s29 + $0x8] sm:$0xf] %v185_v2  ;;  %188 = vst [vmem:[%s1982_s29 + $0xc] sm:$0xf] %v187_v3 }
  0x16   : > { %190 = vst [vmem:[%s1982_s29 + $0x10] sm:$0xf] %v189_v4  ;;  %v191_v5 = vld [vmem:[%s1978_s28 + $0x28] sm:$0xf]  ;;  %v193_v6 = vld [vmem:[%s1978_s28 + $0x30] sm:$0xf] }
  0x17   : > { %v195_v7 = vld [vmem:[%s1978_s28 + $0x38] sm:$0xf]  ;;  %192 = vst [vmem:[%s1982_s29 + $0x14] sm:$0xf] %v191_v5  ;;  %194 = vst [vmem:[%s1982_s29 + $0x18] sm:$0xf] %v193_v6 }
  0x18   : > { %196 = vst [vmem:[%s1982_s29 + $0x1c] sm:$0xf] %v195_v7  ;;  %v197_v8 = vld [vmem:[%s1978_s28 + $0x40] sm:$0xf]  ;;  %v199_v9 = vld [vmem:[%s1978_s28 + $0x48] sm:$0xf] }
  0x19   : > { %v201_v10 = vld [vmem:[%s1978_s28 + $0x50] sm:$0xf]  ;;  %198 = vst [vmem:[%s1982_s29 + $0x20] sm:$0xf] %v197_v8  ;;  %200 = vst [vmem:[%s1982_s29 + $0x24] sm:$0xf] %v199_v9 }
  0x1a   : > { %202 = vst [vmem:[%s1982_s29 + $0x28] sm:$0xf] %v201_v10  ;;  %v203_v11 = vld [vmem:[%s1978_s28 + $0x58] sm:$0xf]  ;;  %v205_v12 = vld [vmem:[%s1978_s28 + $0x60] sm:$0xf] }
  0x1b   : > { %v207_v13 = vld [vmem:[%s1978_s28 + $0x68] sm:$0xf]  ;;  %204 = vst [vmem:[%s1982_s29 + $0x2c] sm:$0xf] %v203_v11  ;;  %206 = vst [vmem:[%s1982_s29 + $0x30] sm:$0xf] %v205_v12 }
  0x1c   : > { %208 = vst [vmem:[%s1982_s29 + $0x34] sm:$0xf] %v207_v13  ;;  %v209_v14 = vld [vmem:[%s1978_s28 + $0x70] sm:$0xf]  ;;  %v211_v15 = vld [vmem:[%s1978_s28 + $0x78] sm:$0xf] }
  0x1d   : > { %v213_v16 = vld [vmem:[%s1978_s28 + $0x80] sm:$0xf]  ;;  %210 = vst [vmem:[%s1982_s29 + $0x38] sm:$0xf] %v209_v14  ;;  %212 = vst [vmem:[%s1982_s29 + $0x3c] sm:$0xf] %v211_v15 }
  0x1e   : > { %214 = vst [vmem:[%s1982_s29 + $0x40] sm:$0xf] %v213_v16  ;;  %v215_v17 = vld [vmem:[%s1978_s28 + $0x88] sm:$0xf]  ;;  %v217_v18 = vld [vmem:[%s1978_s28 + $0x90] sm:$0xf] }
  0x1f   : > { %v219_v19 = vld [vmem:[%s1978_s28 + $0x98] sm:$0xf]  ;;  %216 = vst [vmem:[%s1982_s29 + $0x44] sm:$0xf] %v215_v17  ;;  %218 = vst [vmem:[%s1982_s29 + $0x48] sm:$0xf] %v217_v18 }
  0x20   : > { %220 = vst [vmem:[%s1982_s29 + $0x4c] sm:$0xf] %v219_v19  ;;  %v221_v20 = vld [vmem:[%s1978_s28 + $0xa0] sm:$0xf]  ;;  %v223_v21 = vld [vmem:[%s1978_s28 + $0xa8] sm:$0xf] }
  0x21   : > { %v225_v22 = vld [vmem:[%s1978_s28 + $0xb0] sm:$0xf]  ;;  %222 = vst [vmem:[%s1982_s29 + $0x50] sm:$0xf] %v221_v20  ;;  %224 = vst [vmem:[%s1982_s29 + $0x54] sm:$0xf] %v223_v21 }
  0x22   : > { %226 = vst [vmem:[%s1982_s29 + $0x58] sm:$0xf] %v225_v22  ;;  %v227_v23 = vld [vmem:[%s1978_s28 + $0xb8] sm:$0xf]  ;;  %v229_v24 = vld [vmem:[%s1978_s28 + $0xc0] sm:$0xf] }
  0x23   : > { %v231_v25 = vld [vmem:[%s1978_s28 + $0xc8] sm:$0xf]  ;;  %228 = vst [vmem:[%s1982_s29 + $0x5c] sm:$0xf] %v227_v23  ;;  %230 = vst [vmem:[%s1982_s29 + $0x60] sm:$0xf] %v229_v24 }
  0x24   : > { %232 = vst [vmem:[%s1982_s29 + $0x64] sm:$0xf] %v231_v25  ;;  %v233_v26 = vld [vmem:[%s1978_s28 + $0xd0] sm:$0xf]  ;;  %v235_v27 = vld [vmem:[%s1978_s28 + $0xd8] sm:$0xf] }
  0x25   : > { %v237_v28 = vld [vmem:[%s1978_s28 + $0xe0] sm:$0xf]  ;;  %234 = vst [vmem:[%s1982_s29 + $0x68] sm:$0xf] %v233_v26  ;;  %236 = vst [vmem:[%s1982_s29 + $0x6c] sm:$0xf] %v235_v27 }
  0x26   : > { %238 = vst [vmem:[%s1982_s29 + $0x70] sm:$0xf] %v237_v28  ;;  %v239_v29 = vld [vmem:[%s1978_s28 + $0xe8] sm:$0xf]  ;;  %v241_v30 = vld [vmem:[%s1978_s28 + $0xf0] sm:$0xf] }
  0x27   : > { %v243_v31 = vld [vmem:[%s1978_s28 + $0xf8] sm:$0xf]  ;;  %240 = vst [vmem:[%s1982_s29 + $0x74] sm:$0xf] %v239_v29  ;;  %242 = vst [vmem:[%s1982_s29 + $0x78] sm:$0xf] %v241_v30 }
  0x28   : > { %244 = vst [vmem:[%s1982_s29 + $0x7c] sm:$0xf] %v243_v31  ;;  %v245_v32 = vld [vmem:[%s1978_s28 + $0x100] sm:$0xf]  ;;  %v247_v33 = vld [vmem:[%s1978_s28 + $0x108] sm:$0xf] }
  0x29   : > { %v249_v34 = vld [vmem:[%s1978_s28 + $0x110] sm:$0xf]  ;;  %246 = vst [vmem:[%s1982_s29 + $0x80] sm:$0xf] %v245_v32  ;;  %248 = vst [vmem:[%s1982_s29 + $0x84] sm:$0xf] %v247_v33 }
  0x2a   : > { %250 = vst [vmem:[%s1982_s29 + $0x88] sm:$0xf] %v249_v34  ;;  %v251_v35 = vld [vmem:[%s1978_s28 + $0x118] sm:$0xf]  ;;  %v253_v36 = vld [vmem:[%s1978_s28 + $0x120] sm:$0xf] }
  0x2b   : > { %v255_v37 = vld [vmem:[%s1978_s28 + $0x128] sm:$0xf]  ;;  %252 = vst [vmem:[%s1982_s29 + $0x8c] sm:$0xf] %v251_v35  ;;  %254 = vst [vmem:[%s1982_s29 + $0x90] sm:$0xf] %v253_v36 }
  0x2c   : > { %256 = vst [vmem:[%s1982_s29 + $0x94] sm:$0xf] %v255_v37  ;;  %v257_v38 = vld [vmem:[%s1978_s28 + $0x130] sm:$0xf]  ;;  %v259_v39 = vld [vmem:[%s1978_s28 + $0x138] sm:$0xf] }
  0x2d   : > { %v261_v40 = vld [vmem:[%s1978_s28 + $0x140] sm:$0xf]  ;;  %258 = vst [vmem:[%s1982_s29 + $0x98] sm:$0xf] %v257_v38  ;;  %260 = vst [vmem:[%s1982_s29 + $0x9c] sm:$0xf] %v259_v39 }
  0x2e   : > { %262 = vst [vmem:[%s1982_s29 + $0xa0] sm:$0xf] %v261_v40  ;;  %v263_v41 = vld [vmem:[%s1978_s28 + $0x148] sm:$0xf]  ;;  %v265_v42 = vld [vmem:[%s1978_s28 + $0x150] sm:$0xf] }
  0x2f   : > { %v267_v43 = vld [vmem:[%s1978_s28 + $0x158] sm:$0xf]  ;;  %264 = vst [vmem:[%s1982_s29 + $0xa4] sm:$0xf] %v263_v41  ;;  %266 = vst [vmem:[%s1982_s29 + $0xa8] sm:$0xf] %v265_v42 }
  0x30   : > { %268 = vst [vmem:[%s1982_s29 + $0xac] sm:$0xf] %v267_v43  ;;  %v269_v44 = vld [vmem:[%s1978_s28 + $0x160] sm:$0xf]  ;;  %v271_v45 = vld [vmem:[%s1978_s28 + $0x168] sm:$0xf] }
  0x31   : > { %v273_v46 = vld [vmem:[%s1978_s28 + $0x170] sm:$0xf]  ;;  %270 = vst [vmem:[%s1982_s29 + $0xb0] sm:$0xf] %v269_v44  ;;  %272 = vst [vmem:[%s1982_s29 + $0xb4] sm:$0xf] %v271_v45 }
  0x32   : > { %274 = vst [vmem:[%s1982_s29 + $0xb8] sm:$0xf] %v273_v46  ;;  %v275_v47 = vld [vmem:[%s1978_s28 + $0x178] sm:$0xf]  ;;  %v277_v48 = vld [vmem:[%s1978_s28 + $0x180] sm:$0xf] }
  0x33   : > { %v279_v49 = vld [vmem:[%s1978_s28 + $0x188] sm:$0xf]  ;;  %276 = vst [vmem:[%s1982_s29 + $0xbc] sm:$0xf] %v275_v47  ;;  %278 = vst [vmem:[%s1982_s29 + $0xc0] sm:$0xf] %v277_v48 }
  0x34   : > { %280 = vst [vmem:[%s1982_s29 + $0xc4] sm:$0xf] %v279_v49  ;;  %v281_v50 = vld [vmem:[%s1978_s28 + $0x190] sm:$0xf]  ;;  %v283_v51 = vld [vmem:[%s1978_s28 + $0x198] sm:$0xf] }
  0x35   : > { %v285_v52 = vld [vmem:[%s1978_s28 + $0x1a0] sm:$0xf]  ;;  %282 = vst [vmem:[%s1982_s29 + $0xc8] sm:$0xf] %v281_v50  ;;  %284 = vst [vmem:[%s1982_s29 + $0xcc] sm:$0xf] %v283_v51 }
  0x36   : > { %286 = vst [vmem:[%s1982_s29 + $0xd0] sm:$0xf] %v285_v52  ;;  %v287_v53 = vld [vmem:[%s1978_s28 + $0x1a8] sm:$0xf]  ;;  %v289_v54 = vld [vmem:[%s1978_s28 + $0x1b0] sm:$0xf] }
  0x37   : > { %v291_v55 = vld [vmem:[%s1978_s28 + $0x1b8] sm:$0xf]  ;;  %288 = vst [vmem:[%s1982_s29 + $0xd4] sm:$0xf] %v287_v53  ;;  %290 = vst [vmem:[%s1982_s29 + $0xd8] sm:$0xf] %v289_v54 }
  0x38   : > { %292 = vst [vmem:[%s1982_s29 + $0xdc] sm:$0xf] %v291_v55  ;;  %v293_v56 = vld [vmem:[%s1978_s28 + $0x1c0] sm:$0xf]  ;;  %v295_v57 = vld [vmem:[%s1978_s28 + $0x1c8] sm:$0xf] }
  0x39   : > { %v297_v58 = vld [vmem:[%s1978_s28 + $0x1d0] sm:$0xf]  ;;  %294 = vst [vmem:[%s1982_s29 + $0xe0] sm:$0xf] %v293_v56  ;;  %296 = vst [vmem:[%s1982_s29 + $0xe4] sm:$0xf] %v295_v57 }
  0x3a   : > { %298 = vst [vmem:[%s1982_s29 + $0xe8] sm:$0xf] %v297_v58  ;;  %v299_v59 = vld [vmem:[%s1978_s28 + $0x1d8] sm:$0xf]  ;;  %v301_v60 = vld [vmem:[%s1978_s28 + $0x1e0] sm:$0xf] }
  0x3b   : > { %v303_v61 = vld [vmem:[%s1978_s28 + $0x1e8] sm:$0xf]  ;;  %300 = vst [vmem:[%s1982_s29 + $0xec] sm:$0xf] %v299_v59  ;;  %302 = vst [vmem:[%s1982_s29 + $0xf0] sm:$0xf] %v301_v60 }
  0x3c   : > { %304 = vst [vmem:[%s1982_s29 + $0xf4] sm:$0xf] %v303_v61  ;;  %v305_v62 = vld [vmem:[%s1978_s28 + $0x1f0] sm:$0xf]  ;;  %v307_v63 = vld [vmem:[%s1978_s28 + $0x1f8] sm:$0xf] }
  0x3d   : > { %306 = vst [vmem:[%s1982_s29 + $0xf8] sm:$0xf] %v305_v62  ;;  %308 = vst [vmem:[%s1982_s29 + $0xfc] sm:$0xf] %v307_v63 }
  0x3e PF: > { %p1471_p8 = scmp.ge.s32.totalorder %s1908_s16, 1  ;;  %p465_p9 = scmp.lt.s32.totalorder %s1908_s16, 3 }
  0x40   : > { %p466_p10 = pnand %p1471_p8, %p465_p9 }
  0x41   : > { %s472_s30 = sand.u32 (!%p466_p10), 1, %s1892_s12   ;;  %p510_p11 = scmp.lt.s32.totalorder (!%p466_p10), %s1900_s14, 1 }
  0x42   : > { %469 = sbr.rel (%p466_p10) target bundleno = 380 (0x17c), region = 69  ;;  %s1472_s4 = sshll.u32 (!%p466_p10), %s472_s30, 8 }
  0x43   : > { %s2121_s9 = scalar_lea.vmem (!%p466_p10), [#allocation2], %s1472_s4  ;;  %s1473_s28 = sshll.u32 (!%p466_p10), %s472_s30, 6 }
  0x44   : > { %s2257_s29 = scalar_lea.vmem (!%p466_p10), [#allocation3], %s1473_s28 }
  0x47   : > { %v1824_v0 = vld [vmem:[%s2317_s0 + $0x4] ss:$16 sps:$4 sm:$0xff]   ;;  %v1827_v1 = vld [vmem:[%s2317_s0 + $0xc] ss:$16 sps:$4 sm:$0xff]   ;;  %v1822_v32 = vld [vmem:[%s2317_s0] ss:$16 sps:$4 sm:$0xff]  }
  0x48   : > { %v1790_v2 = vld [vmem:[%s2121_s9 + $0x78] sm:$0xff]   ;;  %1002 = vmatprep.mubr.bf16.mxu0 %v1824_v0  ;;  %1099 = vmatprep.mubr.bf16.mxu1 %v1827_v1  ;;  %v1794_v6 = vld [vmem:[%s2121_s9 + $0x70] sm:$0xff]   ;;  %v1798_v10 = vld [vmem:[%s2121_s9 + $0x68] sm:$0xff]   ;;  %s511_s24 = scalar_select %p510_p11, %s1900_s14, 1 }
  0x49   : > { %v1791_v3 = vld [vmem:[%s2121_s9 + $0xf8] sm:$0xff]   ;;  %1622 = vmatprep.subr.bf16.mxu0 %v1790_v2  ;;  %v1795_v7 = vld [vmem:[%s2121_s9 + $0xf0] sm:$0xff]   ;;  %v1799_v11 = vld [vmem:[%s2121_s9 + $0xe8] sm:$0xff]   ;;  %s1556_s12 = sshll.u32 (%p1965_p6), %s1900_s14, 2 }
  0x4a   : > { %v1792_v4 = vld [vmem:[%s2121_s9 + $0x38] sm:$0xff]   ;;  %1686 = vmatprep.subr.bf16.mxu1 %v1791_v3  ;;  %v1796_v8 = vld [vmem:[%s2121_s9 + $0x30] sm:$0xff]   ;;  %v1800_v12 = vld [vmem:[%s2121_s9 + $0x28] sm:$0xff]   ;;  %s512_s27 = scalar_lea.vmem %s2319_s2, %s511_s24  ;;  %s1271_s5 = scalar_lea.vmem (%p1965_p6), %s2320_s3, %s1556_s12 }
  0x4b   : > { %v1793_v5 = vld [vmem:[%s2121_s9 + $0xb8] sm:$0xff]   ;;  %1623 = vmatpush3.bf16.msra.mxu0 %v1792_v4  ;;  %v1797_v9 = vld [vmem:[%s2121_s9 + $0xb0] sm:$0xff]   ;;  %v1801_v13 = vld [vmem:[%s2121_s9 + $0xa8] sm:$0xff]  }
  0x4c   : > { %1687 = vmatpush3.bf16.msra.mxu1 %v1793_v5  ;;  %1624 = vmatprep.subr.bf16.mxu0 %v1794_v6  ;;  %v1802_v14 = vld [vmem:[%s2121_s9 + $0x60] sm:$0xff]   ;;  %v1806_v18 = vld [vmem:[%s2121_s9 + $0x58] sm:$0xff]   ;;  %v1810_v22 = vld [vmem:[%s2121_s9 + $0x50] sm:$0xff]  }
  0x4d   : > { %1688 = vmatprep.subr.bf16.mxu1 %v1795_v7  ;;  %v1803_v15 = vld [vmem:[%s2121_s9 + $0xe0] sm:$0xff]   ;;  %v1807_v19 = vld [vmem:[%s2121_s9 + $0xd8] sm:$0xff]   ;;  %v1811_v23 = vld [vmem:[%s2121_s9 + $0xd0] sm:$0xff]  }
  0x4e   : > { %v1804_v16 = vld [vmem:[%s2121_s9 + $0x20] sm:$0xff]   ;;  %v1808_v20 = vld [vmem:[%s2121_s9 + $0x18] sm:$0xff]   ;;  %v1812_v24 = vld [vmem:[%s2121_s9 + $0x10] sm:$0xff]  }
  0x4f   : > { %1625 = vmatpush3.bf16.msra.mxu0 %v1796_v8  ;;  %v1805_v17 = vld [vmem:[%s2121_s9 + $0xa0] sm:$0xff]   ;;  %v1809_v21 = vld [vmem:[%s2121_s9 + $0x98] sm:$0xff]   ;;  %v1813_v25 = vld [vmem:[%s2121_s9 + $0x90] sm:$0xff]  }
  0x50   : > { %1689 = vmatpush3.bf16.msra.mxu1 %v1797_v9  ;;  %1626 = vmatprep.subr.bf16.mxu0 %v1798_v10  ;;  %v1814_v26 = vld [vmem:[%s2121_s9 + $0x48] sm:$0xff]   ;;  %v1818_v30 = vld [vmem:[%s2121_s9 + $0x40] sm:$0xff]  }
  0x51   : > { %1690 = vmatprep.subr.bf16.mxu1 %v1799_v11  ;;  %v1815_v27 = vld [vmem:[%s2121_s9 + $0xc8] sm:$0xff]   ;;  %v1819_v31 = vld [vmem:[%s2121_s9 + $0xc0] sm:$0xff]  }
  0x52   : > { %v1816_v28 = vld [vmem:[%s2121_s9 + $0x8] sm:$0xff]   ;;  %v1820_v33 = vld [vmem:[%s2121_s9] sm:$0xff]  }
  0x53   : > { %1627 = vmatpush3.bf16.msra.mxu0 %v1800_v12  ;;  %v1817_v29 = vld [vmem:[%s2121_s9 + $0x88] sm:$0xff]   ;;  %v1821_v35 = vld [vmem:[%s2121_s9 + $0x80] sm:$0xff]  }
  0x54   : > { %1691 = vmatpush3.bf16.msra.mxu1 %v1801_v13  ;;  %1628 = vmatprep.subr.bf16.mxu0 %v1802_v14  ;;  %v1825_v34 = vld [vmem:[%s2317_s0 + $0x8] ss:$16 sps:$4 sm:$0xff]   ;;  %v1828_v36 = vld [vmem:[%s2317_s0 + $0x24] ss:$16 sps:$4 sm:$0xff]   ;;  %v1830_v37 = vld [vmem:[%s2317_s0 + $0x2c] ss:$16 sps:$4 sm:$0xff]  }
  0x55   : > { %1692 = vmatprep.subr.bf16.mxu1 %v1803_v15  ;;  %v1832_v38 = vld [vmem:[%s2317_s0 + $0x20] ss:$16 sps:$4 sm:$0xff]   ;;  %v1833_v39 = vld [vmem:[%s2317_s0 + $0x28] ss:$16 sps:$4 sm:$0xff]   ;;  %v1834_v40 = vld [vmem:[%s2317_s0 + $0x44] ss:$16 sps:$4 sm:$0xff]  }
  0x56   : > { %v1836_v41 = vld [vmem:[%s2317_s0 + $0x4c] ss:$16 sps:$4 sm:$0xff]   ;;  %v1838_v42 = vld [vmem:[%s2317_s0 + $0x40] ss:$16 sps:$4 sm:$0xff]   ;;  %v1839_v43 = vld [vmem:[%s2317_s0 + $0x48] ss:$16 sps:$4 sm:$0xff]  }
  0x57   : > { %1629 = vmatpush3.bf16.msra.mxu0 %v1804_v16  ;;  %v1840_v44 = vld [vmem:[%s2317_s0 + $0x64] ss:$16 sps:$4 sm:$0xff]   ;;  %v1842_v45 = vld [vmem:[%s2317_s0 + $0x6c] ss:$16 sps:$4 sm:$0xff]   ;;  %v1844_v46 = vld [vmem:[%s2317_s0 + $0x60] ss:$16 sps:$4 sm:$0xff]  }
  0x58   : > { %1693 = vmatpush3.bf16.msra.mxu1 %v1805_v17  ;;  %1630 = vmatprep.subr.bf16.mxu0 %v1806_v18  ;;  %v1845_v47 = vld [vmem:[%s2317_s0 + $0x68] ss:$16 sps:$4 sm:$0xff]   ;;  %v1846_v48 = vld [vmem:[%s2317_s0 + $0x84] ss:$16 sps:$4 sm:$0xff]   ;;  %v1848_v49 = vld [vmem:[%s2317_s0 + $0x8c] ss:$16 sps:$4 sm:$0xff]  }
  0x59   : > { %1694 = vmatprep.subr.bf16.mxu1 %v1807_v19  ;;  %v1850_v50 = vld [vmem:[%s2317_s0 + $0x80] ss:$16 sps:$4 sm:$0xff]   ;;  %v1851_v51 = vld [vmem:[%s2317_s0 + $0x88] ss:$16 sps:$4 sm:$0xff]   ;;  %v1852_v52 = vld [vmem:[%s2317_s0 + $0xa4] ss:$16 sps:$4 sm:$0xff]  }
  0x5a   : > { %v1854_v53 = vld [vmem:[%s2317_s0 + $0xac] ss:$16 sps:$4 sm:$0xff]   ;;  %v1856_v54 = vld [vmem:[%s2317_s0 + $0xa0] ss:$16 sps:$4 sm:$0xff]   ;;  %v1857_v55 = vld [vmem:[%s2317_s0 + $0xa8] ss:$16 sps:$4 sm:$0xff]  }
  0x5b   : > { %1631 = vmatpush3.bf16.msra.mxu0 %v1808_v20  ;;  %v1858_v56 = vld [vmem:[%s2317_s0 + $0xc4] ss:$16 sps:$4 sm:$0xff]   ;;  %v1860_v57 = vld [vmem:[%s2317_s0 + $0xcc] ss:$16 sps:$4 sm:$0xff]   ;;  %v1862_v58 = vld [vmem:[%s2317_s0 + $0xc0] ss:$16 sps:$4 sm:$0xff]  }
  0x5c   : > { %1695 = vmatpush3.bf16.msra.mxu1 %v1809_v21  ;;  %1632 = vmatprep.subr.bf16.mxu0 %v1810_v22  ;;  %v1863_v59 = vld [vmem:[%s2317_s0 + $0xc8] ss:$16 sps:$4 sm:$0xff]   ;;  %v1864_v60 = vld [vmem:[%s2317_s0 + $0xe4] ss:$16 sps:$4 sm:$0xff]   ;;  %v1866_v61 = vld [vmem:[%s2317_s0 + $0xec] ss:$16 sps:$4 sm:$0xff]  }
  0x5d   : > { %1696 = vmatprep.subr.bf16.mxu1 %v1811_v23  ;;  %v1868_v62 = vld [vmem:[%s2317_s0 + $0xe0] ss:$16 sps:$4 sm:$0xff]   ;;  %v1869_v63 = vld [vmem:[%s2317_s0 + $0xe8] ss:$16 sps:$4 sm:$0xff]  }
  0x5e   : > { %v2250_v2 = vld [vmem:[%s512_s27] ss:$0 sm:$0xff] }
  0x5f   : > { %1633 = vmatpush3.bf16.msra.mxu0 %v1812_v24 }
  0x60   : > { %1697 = vmatpush3.bf16.msra.mxu1 %v1813_v25  ;;  %1634 = vmatprep.subr.bf16.mxu0 %v1814_v26 }
  0x61   : > { %1698 = vmatprep.subr.bf16.mxu1 %v1815_v27 }
  0x63   : > { %1635 = vmatpush3.bf16.msra.mxu0 %v1816_v28 }
  0x64   : > { %1699 = vmatpush3.bf16.msra.mxu1 %v1817_v29  ;;  %1636 = vmatprep.subr.bf16.mxu0 %v1818_v30 }
  0x65   : > { %1700 = vmatprep.subr.bf16.mxu1 %v1819_v31 }
  0x67   : > { %1637 = vmatpush3.bf16.msra.mxu0 %v1820_v33 }
  0x68   : > { %1701 = vmatpush3.bf16.msra.mxu1 %v1821_v35 }
  0x6a   : > { %1003 = vmatmul.mubr.bf16.vlgmr.msra.gmra.mxu0 %v1822_v32 }
  0x6b   : > { %1100 = vmatmul.mubr.bf16.vlgmr.msra.gmra.mxu1 %v1825_v34  ;;  %1010 = vmatprep.mubr.bf16.mxu0 %v1828_v36 }
  0x6c   : > { %1107 = vmatprep.mubr.bf16.mxu1 %v1830_v37 }
  0x72   : > { %1011 = vmatmul.mubr.bf16.gmra.mxu0 %v1832_v38 }
  0x73   : > { %1108 = vmatmul.mubr.bf16.gmra.mxu1 %v1833_v39  ;;  %1018 = vmatprep.mubr.bf16.mxu0 %v1834_v40 }
  0x74   : > { %1115 = vmatprep.mubr.bf16.mxu1 %v1836_v41 }
  0x7a   : > { %1019 = vmatmul.mubr.bf16.gmra.mxu0 %v1838_v42 }
  0x7b   : > { %1116 = vmatmul.mubr.bf16.gmra.mxu1 %v1839_v43  ;;  %1026 = vmatprep.mubr.bf16.mxu0 %v1840_v44 }
  0x7c   : > { %1123 = vmatprep.mubr.bf16.mxu1 %v1842_v45 }
  0x82   : > { %1027 = vmatmul.mubr.bf16.gmra.mxu0 %v1844_v46 }
  0x83   : > { %1124 = vmatmul.mubr.bf16.gmra.mxu1 %v1845_v47  ;;  %1034 = vmatprep.mubr.bf16.mxu0 %v1846_v48 }
  0x84   : > { %1131 = vmatprep.mubr.bf16.mxu1 %v1848_v49 }
  0x8a   : > { %1035 = vmatmul.mubr.bf16.gmra.mxu0 %v1850_v50 }
  0x8b   : > { %1132 = vmatmul.mubr.bf16.gmra.mxu1 %v1851_v51  ;;  %1042 = vmatprep.mubr.bf16.mxu0 %v1852_v52 }
  0x8c   : > { %1139 = vmatprep.mubr.bf16.mxu1 %v1854_v53 }
  0x92   : > { %1043 = vmatmul.mubr.bf16.gmra.mxu0 %v1856_v54 }
  0x93   : > { %1140 = vmatmul.mubr.bf16.gmra.mxu1 %v1857_v55  ;;  %1050 = vmatprep.mubr.bf16.mxu0 %v1858_v56 }
  0x94   : > { %1147 = vmatprep.mubr.bf16.mxu1 %v1860_v57 }
  0x9a   : > { %1051 = vmatmul.mubr.bf16.gmra.mxu0 %v1862_v58 }
  0x9b   : > { %1148 = vmatmul.mubr.bf16.gmra.mxu1 %v1863_v59  ;;  %1058 = vmatprep.mubr.bf16.mxu0 %v1864_v60 }
  0x9c   : > { %1155 = vmatprep.mubr.bf16.mxu1 %v1866_v61 }
  0xa2   : > { %1059 = vmatmul.mubr.bf16.gmra.mxu0 %v1868_v62 }
  0xa3   : > { %1156 = vmatmul.mubr.bf16.gmra.mxu1 %v1869_v63 }
 0x12a   : > { %v1638_v0 = vpop.f32.mrf.mxu0 }
 0x12b   : > { %v1702_v1 = vpop.f32.mrf.mxu1 }
 0x12c   : > { %v1639_v3 = vpop.f32.mrf.mxu0 }
 0x12d   : > { %v1640_v4 = vadd.f32 %v1639_v3, %v1638_v0  ;;  %v1703_v5 = vpop.f32.mrf.mxu1 }
 0x12e   : > { %v1641_v6 = vpop.f32.mrf.mxu0  ;;  %v1704_v10 = vadd.f32 %v1703_v5, %v1702_v1 }
 0x12f   : > { %v1005_v7 = vadd.f32 %v1640_v4, %v2250_v2  ;;  %v1705_v8 = vpop.f32.mrf.mxu1 }
 0x130   : > { %v1642_v9 = vpop.f32.mrf.mxu0 }
 0x131   : > { %v1643_v11 = vadd.f32 %v1642_v9, %v1641_v6  ;;  %v1706_v12 = vpop.f32.mrf.mxu1  ;;  %v1102_v14 = vadd.f32 %v1704_v10, %v1005_v7 }
 0x132   : > { %v1644_v13 = vpop.f32.mrf.mxu0  ;;  %v1707_v16 = vadd.f32 %v1706_v12, %v1705_v8 }
 0x133   : > { %v1008_v15 = vadd.f32 %v1643_v11, %v2250_v2  ;;  %v1708_v17 = vpop.f32.mrf.mxu1  ;;  %v1164_v23 = vmax.f32 %v1102_v14, 0.0 }
 0x134   : > { %v1645_v18 = vpop.f32.mrf.mxu0 }
 0x135   : > { %v1105_v19 = vadd.f32 %v1707_v16, %v1008_v15  ;;  %v1646_v20 = vadd.f32 %v1645_v18, %v1644_v13  ;;  %v1709_v21 = vpop.f32.mrf.mxu1 }
 0x136   : > { %v1647_v22 = vpop.f32.mrf.mxu0  ;;  %v1710_v29 = vadd.f32 %v1709_v21, %v1708_v17 }
 0x137   : > { %v1165_v24 = vmax.f32 %v1105_v19, 0.0  ;;  %v1013_v25 = vadd.f32 %v1646_v20, %v2250_v2  ;;  %v1711_v26 = vpop.f32.mrf.mxu1 }
 0x138   : > { %v1648_v27 = vpop.f32.mrf.mxu0 }
 0x139   : > { %v1578_v28 = vpack.c.bf16 %v1165_v24, %v1164_v23  ;;  %v1649_v30 = vadd.f32 %v1648_v27, %v1647_v22  ;;  %v1712_v31 = vpop.f32.mrf.mxu1  ;;  %v1110_v33 = vadd.f32 %v1710_v29, %v1013_v25 }
 0x13a   : > { %v1650_v32 = vpop.f32.mrf.mxu0  ;;  %v1713_v35 = vadd.f32 %v1712_v31, %v1711_v26 }
 0x13b   : > { %1579 = vst [vmem:[%s2257_s29] sm:$0xff] %v1578_v28   ;;  %v1016_v34 = vadd.f32 %v1649_v30, %v2250_v2  ;;  %v1714_v36 = vpop.f32.mrf.mxu1  ;;  %v1166_v42 = vmax.f32 %v1110_v33, 0.0 }
 0x13c   : > { %v1651_v37 = vpop.f32.mrf.mxu0 }
 0x13d   : > { %v1113_v38 = vadd.f32 %v1713_v35, %v1016_v34  ;;  %v1652_v39 = vadd.f32 %v1651_v37, %v1650_v32  ;;  %v1715_v40 = vpop.f32.mrf.mxu1 }
 0x13e   : > { %v1653_v41 = vpop.f32.mrf.mxu0  ;;  %v1716_v48 = vadd.f32 %v1715_v40, %v1714_v36 }
 0x13f   : > { %v1167_v43 = vmax.f32 %v1113_v38, 0.0  ;;  %v1021_v44 = vadd.f32 %v1652_v39, %v2250_v2  ;;  %v1717_v45 = vpop.f32.mrf.mxu1 }
 0x140   : > { %v1654_v46 = vpop.f32.mrf.mxu0 }
 0x141   : > { %v1583_v47 = vpack.c.bf16 %v1167_v43, %v1166_v42  ;;  %v1655_v49 = vadd.f32 %v1654_v46, %v1653_v41  ;;  %v1718_v50 = vpop.f32.mrf.mxu1  ;;  %v1118_v52 = vadd.f32 %v1716_v48, %v1021_v44 }
 0x142   : > { %v1656_v51 = vpop.f32.mrf.mxu0  ;;  %v1719_v54 = vadd.f32 %v1718_v50, %v1717_v45 }
 0x143   : > { %1615 = vst [vmem:[%s2257_s29 + $0x8] sm:$0xff] %v1583_v47   ;;  %v1024_v53 = vadd.f32 %v1655_v49, %v2250_v2  ;;  %v1720_v55 = vpop.f32.mrf.mxu1  ;;  %v1168_v61 = vmax.f32 %v1118_v52, 0.0 }
 0x144   : > { %v1657_v56 = vpop.f32.mrf.mxu0 }
 0x145   : > { %v1121_v57 = vadd.f32 %v1719_v54, %v1024_v53  ;;  %v1658_v58 = vadd.f32 %v1657_v56, %v1656_v51  ;;  %v1721_v59 = vpop.f32.mrf.mxu1 }
 0x146   : > { %v1659_v60 = vpop.f32.mrf.mxu0  ;;  %v1722_v4 = vadd.f32 %v1721_v59, %v1720_v55 }
 0x147   : > { %v1169_v62 = vmax.f32 %v1121_v57, 0.0  ;;  %v1029_v63 = vadd.f32 %v1658_v58, %v2250_v2  ;;  %v1723_v0 = vpop.f32.mrf.mxu1 }
 0x148   : > { %v1660_v1 = vpop.f32.mrf.mxu0 }
 0x149   : > { %v1588_v3 = vpack.c.bf16 %v1169_v62, %v1168_v61  ;;  %v1661_v5 = vadd.f32 %v1660_v1, %v1659_v60  ;;  %v1724_v6 = vpop.f32.mrf.mxu1  ;;  %v1126_v8 = vadd.f32 %v1722_v4, %v1029_v63 }
 0x14a   : > { %v1662_v7 = vpop.f32.mrf.mxu0  ;;  %v1725_v10 = vadd.f32 %v1724_v6, %v1723_v0 }
 0x14b   : > { %1616 = vst [vmem:[%s2257_s29 + $0x10] sm:$0xff] %v1588_v3   ;;  %v1032_v9 = vadd.f32 %v1661_v5, %v2250_v2  ;;  %v1726_v11 = vpop.f32.mrf.mxu1  ;;  %v1170_v17 = vmax.f32 %v1126_v8, 0.0 }
 0x14c   : > { %v1663_v12 = vpop.f32.mrf.mxu0 }
 0x14d   : > { %v1129_v13 = vadd.f32 %v1725_v10, %v1032_v9  ;;  %v1664_v14 = vadd.f32 %v1663_v12, %v1662_v7  ;;  %v1727_v15 = vpop.f32.mrf.mxu1 }
 0x14e   : > { %v1665_v16 = vpop.f32.mrf.mxu0  ;;  %v1728_v23 = vadd.f32 %v1727_v15, %v1726_v11 }
 0x14f   : > { %v1171_v18 = vmax.f32 %v1129_v13, 0.0  ;;  %v1037_v19 = vadd.f32 %v1664_v14, %v2250_v2  ;;  %v1729_v20 = vpop.f32.mrf.mxu1 }
 0x150   : > { %v1666_v21 = vpop.f32.mrf.mxu0 }
 0x151   : > { %v1593_v22 = vpack.c.bf16 %v1171_v18, %v1170_v17  ;;  %v1667_v24 = vadd.f32 %v1666_v21, %v1665_v16  ;;  %v1730_v25 = vpop.f32.mrf.mxu1  ;;  %v1134_v27 = vadd.f32 %v1728_v23, %v1037_v19 }
 0x152   : > { %v1668_v26 = vpop.f32.mrf.mxu0  ;;  %v1731_v29 = vadd.f32 %v1730_v25, %v1729_v20 }
 0x153   : > { %1617 = vst [vmem:[%s2257_s29 + $0x18] sm:$0xff] %v1593_v22   ;;  %v1040_v28 = vadd.f32 %v1667_v24, %v2250_v2  ;;  %v1732_v30 = vpop.f32.mrf.mxu1  ;;  %v1172_v36 = vmax.f32 %v1134_v27, 0.0  ;;  %v1290_v27 = vld [vmem:[%s2257_s29 + $0x4] sm:$0xf] (%p1965_p6) }
 0x154   : > { %v1669_v31 = vpop.f32.mrf.mxu0  ;;  %1291 = vst [vmem:[%s1271_s5 + $0x8] sm:$0xf] (%p1965_p6), %v1290_v27 }
 0x155   : > { %v1137_v32 = vadd.f32 %v1731_v29, %v1040_v28  ;;  %v1670_v33 = vadd.f32 %v1669_v31, %v1668_v26  ;;  %v1733_v34 = vpop.f32.mrf.mxu1  ;;  %v1292_v28 = vld [vmem:[%s2257_s29 + $0x8] sm:$0xf] (%p1965_p6)  ;;  %v1294_v29 = vld [vmem:[%s2257_s29 + $0xc] sm:$0xf] (%p1965_p6)  ;;  %v1298_v31 = vld [vmem:[%s2257_s29 + $0x14] sm:$0xf] (%p1965_p6) }
 0x156   : > { %v1671_v35 = vpop.f32.mrf.mxu0  ;;  %v1734_v42 = vadd.f32 %v1733_v34, %v1732_v30  ;;  %v1296_v30 = vld [vmem:[%s2257_s29 + $0x10] sm:$0xf] (%p1965_p6)  ;;  %1293 = vst [vmem:[%s1271_s5 + $0x10] sm:$0xf] (%p1965_p6), %v1292_v28  ;;  %1295 = vst [vmem:[%s1271_s5 + $0x18] sm:$0xf] (%p1965_p6), %v1294_v29 }
 0x157   : > { %v1173_v37 = vmax.f32 %v1137_v32, 0.0  ;;  %v1045_v38 = vadd.f32 %v1670_v33, %v2250_v2  ;;  %v1735_v39 = vpop.f32.mrf.mxu1  ;;  %1297 = vst [vmem:[%s1271_s5 + $0x20] sm:$0xf] (%p1965_p6), %v1296_v30  ;;  %1299 = vst [vmem:[%s1271_s5 + $0x28] sm:$0xf] (%p1965_p6), %v1298_v31 }
 0x158   : > { %v1672_v40 = vpop.f32.mrf.mxu0 }
 0x159   : > { %v1598_v41 = vpack.c.bf16 %v1173_v37, %v1172_v36  ;;  %v1673_v43 = vadd.f32 %v1672_v40, %v1671_v35  ;;  %v1736_v44 = vpop.f32.mrf.mxu1  ;;  %v1142_v46 = vadd.f32 %v1734_v42, %v1045_v38 }
 0x15a   : > { %v1674_v45 = vpop.f32.mrf.mxu0  ;;  %v1737_v48 = vadd.f32 %v1736_v44, %v1735_v39  ;;  %v1300_v32 = vld [vmem:[%s2257_s29 + $0x18] sm:$0xf] (%p1965_p6)  ;;  %v1302_v33 = vld [vmem:[%s2257_s29 + $0x1c] sm:$0xf] (%p1965_p6) }
 0x15b   : > { %1618 = vst [vmem:[%s2257_s29 + $0x20] sm:$0xff] %v1598_v41   ;;  %v1048_v47 = vadd.f32 %v1673_v43, %v2250_v2  ;;  %v1738_v49 = vpop.f32.mrf.mxu1  ;;  %v1174_v55 = vmax.f32 %v1142_v46, 0.0  ;;  %1301 = vst [vmem:[%s1271_s5 + $0x30] sm:$0xf] (%p1965_p6), %v1300_v32 }
 0x15c   : > { %v1675_v50 = vpop.f32.mrf.mxu0  ;;  %1303 = vst [vmem:[%s1271_s5 + $0x38] sm:$0xf] (%p1965_p6), %v1302_v33 }
 0x15d   : > { %v1145_v51 = vadd.f32 %v1737_v48, %v1048_v47  ;;  %v1676_v52 = vadd.f32 %v1675_v50, %v1674_v45  ;;  %v1739_v53 = vpop.f32.mrf.mxu1 }
 0x15e   : > { %v1677_v54 = vpop.f32.mrf.mxu0  ;;  %v1740_v61 = vadd.f32 %v1739_v53, %v1738_v49 }
 0x15f   : > { %v1175_v56 = vmax.f32 %v1145_v51, 0.0  ;;  %v1053_v57 = vadd.f32 %v1676_v52, %v2250_v2  ;;  %v1741_v58 = vpop.f32.mrf.mxu1 }
 0x160   : > { %v1678_v59 = vpop.f32.mrf.mxu0 }
 0x161   : > { %v1603_v60 = vpack.c.bf16 %v1175_v56, %v1174_v55  ;;  %v1679_v62 = vadd.f32 %v1678_v59, %v1677_v54  ;;  %v1742_v63 = vpop.f32.mrf.mxu1  ;;  %v1150_v1 = vadd.f32 %v1740_v61, %v1053_v57 }
 0x162   : > { %v1680_v0 = vpop.f32.mrf.mxu0  ;;  %v1743_v4 = vadd.f32 %v1742_v63, %v1741_v58  ;;  %v1304_v34 = vld [vmem:[%s2257_s29 + $0x20] sm:$0xf] (%p1965_p6)  ;;  %v1306_v35 = vld [vmem:[%s2257_s29 + $0x24] sm:$0xf] (%p1965_p6) }
 0x163   : > { %1619 = vst [vmem:[%s2257_s29 + $0x28] sm:$0xff] %v1603_v60   ;;  %v1056_v3 = vadd.f32 %v1679_v62, %v2250_v2  ;;  %v1744_v5 = vpop.f32.mrf.mxu1  ;;  %v1176_v11 = vmax.f32 %v1150_v1, 0.0  ;;  %1305 = vst [vmem:[%s1271_s5 + $0x40] sm:$0xf] (%p1965_p6), %v1304_v34 }
 0x164   : > { %v1681_v6 = vpop.f32.mrf.mxu0  ;;  %1307 = vst [vmem:[%s1271_s5 + $0x48] sm:$0xf] (%p1965_p6), %v1306_v35 }
 0x165   : > { %v1153_v7 = vadd.f32 %v1743_v4, %v1056_v3  ;;  %v1682_v8 = vadd.f32 %v1681_v6, %v1680_v0  ;;  %v1745_v9 = vpop.f32.mrf.mxu1 }
 0x166   : > { %v1683_v10 = vpop.f32.mrf.mxu0  ;;  %v1746_v17 = vadd.f32 %v1745_v9, %v1744_v5 }
 0x167   : > { %v1177_v12 = vmax.f32 %v1153_v7, 0.0  ;;  %v1061_v13 = vadd.f32 %v1682_v8, %v2250_v2  ;;  %v1747_v14 = vpop.f32.mrf.mxu1 }
 0x168   : > { %v1684_v15 = vpop.f32.mrf.mxu0 }
 0x169   : > { %v1608_v16 = vpack.c.bf16 %v1177_v12, %v1176_v11  ;;  %v1685_v18 = vadd.f32 %v1684_v15, %v1683_v10  ;;  %v1748_v19 = vpop.f32.mrf.mxu1  ;;  %v1158_v20 = vadd.f32 %v1746_v17, %v1061_v13 }
 0x16a   : > { %v1749_v22 = vadd.f32 %v1748_v19, %v1747_v14  ;;  %v1308_v36 = vld [vmem:[%s2257_s29 + $0x28] sm:$0xf] (%p1965_p6)  ;;  %v1310_v37 = vld [vmem:[%s2257_s29 + $0x2c] sm:$0xf] (%p1965_p6) }
 0x16b   : > { %1620 = vst [vmem:[%s2257_s29 + $0x30] sm:$0xff] %v1608_v16   ;;  %v1064_v21 = vadd.f32 %v1685_v18, %v2250_v2  ;;  %v1178_v24 = vmax.f32 %v1158_v20, 0.0  ;;  %v1288_v2 = vld [vmem:[%s2257_s29] sm:$0xf] (%p1965_p6)  ;;  %1309 = vst [vmem:[%s1271_s5 + $0x50] sm:$0xf] (%p1965_p6), %v1308_v36 }
 0x16c   : > { %1289 = vst [vmem:[%s1271_s5] sm:$0xf] (%p1965_p6), %v1288_v2  ;;  %1311 = vst [vmem:[%s1271_s5 + $0x58] sm:$0xf] (%p1965_p6), %v1310_v37 }
 0x16d   : > { %v1161_v23 = vadd.f32 %v1749_v22, %v1064_v21 }
 0x16f   : > { %v1179_v25 = vmax.f32 %v1161_v23, 0.0  ;;  %1266 = sbr.rel (!%p1965_p6) target bundleno = 380 (0x17c), region = 77 }
 0x171   : > { %v1613_v26 = vpack.c.bf16 %v1179_v25, %v1178_v24 }
 0x172   : > { %v1312_v38 = vld [vmem:[%s2257_s29 + $0x30] sm:$0xf] (%p1965_p6)  ;;  %v1314_v39 = vld [vmem:[%s2257_s29 + $0x34] sm:$0xf] (%p1965_p6) }
 0x173   : > { %1621 = vst [vmem:[%s2257_s29 + $0x38] sm:$0xff] %v1613_v26   ;;  %1313 = vst [vmem:[%s1271_s5 + $0x60] sm:$0xf] (%p1965_p6), %v1312_v38 }
 0x174   : > { %1315 = vst [vmem:[%s1271_s5 + $0x68] sm:$0xf] %v1314_v39 }
 0x17a   : > { %v1316_v40 = vld [vmem:[%s2257_s29 + $0x38] sm:$0xf]  ;;  %v1318_v41 = vld [vmem:[%s2257_s29 + $0x3c] sm:$0xf] }
 0x17b   : > { %1317 = vst [vmem:[%s1271_s5 + $0x70] sm:$0xf] %v1316_v40  ;;  %1319 = vst [vmem:[%s1271_s5 + $0x78] sm:$0xf] %v1318_v41 }
 0x17c PF: > { %s13_s16 = sadd.s32 1, %s1908_s16   ;;  %s2322_s12 = smov %s1896_s13 }
 0x17d   : > { %p10_p12 = scmp.ge.s32.totalorder %s13_s16, 4   ;;  %s2323_s13 = smov %s1970_s22 }
 0x17e   : > { %s2324_s14 = smov %s1904_s15  ;;  %s2325_s15 = smov %s2327_s17 }
 0x17f   :  { %12 = sbr.rel (!%p10_p12) target bundleno = 3 (0x3), region = 155 }

// kernel: depth_encoder_forward.15
= control target key start
LH: loop header
LB: loop body
LE: loop exit
PB: predicated region body
PF: predicated region fallthrough
CT: control target
= control target key end

     0   :  { %s2152_s12 = smov 0   ;;  %s2154_s13 = smov 0   ;;  %s2623_s0 = inlined_call_operand.vmem [shape: bf16[32,1024], index: 0, kind: input, shape index: {}]   ;;  %s2624_s1 = inlined_call_operand.vmem [shape: bf16[1024,512], index: 1, kind: input, shape index: {}]   ;;  %s2625_s2 = inlined_call_operand.vmem [shape: f32[1,512], index: 2, kind: input, shape index: {}]   ;;  %s2626_s3 = inlined_call_operand.vmem [shape: bf16[32,512], index: 3, kind: output, shape index: {}]  }
   0x1   :  { %s2156_s14 = smov 0   ;;  %s2158_s15 = smov 0  }
   0x2   :  { %s2160_s16 = smov 0  }
   0x3 LB: > { %s22_s17 = sadd.s32 1, %s2126_s15  ;;  %s1762_s18 = sadd.s32 4294967295, %s2130_s16   ;;  %s2130_s16 = sphi %s2160_s16, %s13_s16   ;;  %s2126_s15 = sphi %s2158_s15, %s2631_s15   ;;  %s2122_s14 = sphi %s2156_s14, %s2630_s14   ;;  %s2118_s13 = sphi %s2154_s13, %s2629_s13   ;;  %s2114_s12 = sphi %s2152_s12, %s2628_s12  }
   0x4   : > { %p23_p0 = scmp.ge.s32.totalorder %s22_s17, 4  ;;  %p65_p1 = scmp.ne.s32.totalorder %s2118_s13, %s2114_s12 }
   0x5   : > { %p66_p2 = scmp.eq.s32.totalorder %s2130_s16, 0  ;;  %p123_p4 = scmp.eq.s32.totalorder %s1762_s18, 3 }
   0x6   : > { %s2633_s17 = smov (%p23_p0, %s22_s17), 0  ;;  %s58_s20 = sadd.s32 1, %s2118_s13 }
   0x7   : > { %p67_p3 = por %p66_p2, %p65_p1  ;;  %s55_s19 = ssub.s32 %s2126_s15, %s2633_s17 }
   0x8   : > { %p56_p5 = scmp.eq.s32.totalorder %s55_s19, 0  ;;  %p2187_p6 = por %p123_p4, %p65_p1 }
   0x9   : > { %p1766_p7 = scmp.ge.s32.totalorder %s2130_s16, 4 }
   0xa   : > { %s2192_s22 = scalar_select %p56_p5, %s2118_s13, %s58_s20  }
   0xb   : > { %155 = sbr.rel (%p1766_p7) target bundleno = 105 (0x69), region = 20 }
  0x10   : > { %158 = sbr.rel (!%p67_p3) target bundleno = 105 (0x69), region = 24  ;;  %s160_s23 = sand.u32 (%p67_p3), 1, %s2118_s13  }
  0x11   : > { %s1768_s24 = sshll.u32 (%p67_p3), %s2126_s15, 2  ;;  %s1767_s25 = sshll.u32 (%p67_p3), %s160_s23, 9 }
  0x12   : > { %s2200_s28 = scalar_lea.vmem (%p67_p3), %s2624_s1, %s1768_s24  ;;  %s2204_s29 = scalar_lea.vmem (%p67_p3), [#allocation2], %s1767_s25 }
  0x13   : > { %v181_v0 = vld [vmem:[%s2200_s28] sm:$0xf] (%p67_p3)  ;;  %v183_v1 = vld [vmem:[%s2200_s28 + $0x10] sm:$0xf] (%p67_p3) }
  0x14   : > { %182 = vst [vmem:[%s2204_s29] sm:$0xf] (%p67_p3), %v181_v0  ;;  %184 = vst [vmem:[%s2204_s29 + $0x4] sm:$0xf] (%p67_p3), %v183_v1  ;;  %v185_v2 = vld [vmem:[%s2200_s28 + $0x20] sm:$0xf] (%p67_p3) }
  0x15   : > { %v187_v3 = vld [vmem:[%s2200_s28 + $0x30] sm:$0xf]  ;;  %v189_v4 = vld [vmem:[%s2200_s28 + $0x40] sm:$0xf]  ;;  %186 = vst [vmem:[%s2204_s29 + $0x8] sm:$0xf] %v185_v2 }
  0x16   : > { %188 = vst [vmem:[%s2204_s29 + $0xc] sm:$0xf] %v187_v3  ;;  %190 = vst [vmem:[%s2204_s29 + $0x10] sm:$0xf] %v189_v4  ;;  %v191_v5 = vld [vmem:[%s2200_s28 + $0x50] sm:$0xf] }
  0x17   : > { %v193_v6 = vld [vmem:[%s2200_s28 + $0x60] sm:$0xf]  ;;  %v195_v7 = vld [vmem:[%s2200_s28 + $0x70] sm:$0xf]  ;;  %192 = vst [vmem:[%s2204_s29 + $0x14] sm:$0xf] %v191_v5 }
  0x18   : > { %194 = vst [vmem:[%s2204_s29 + $0x18] sm:$0xf] %v193_v6  ;;  %196 = vst [vmem:[%s2204_s29 + $0x1c] sm:$0xf] %v195_v7  ;;  %v197_v8 = vld [vmem:[%s2200_s28 + $0x80] sm:$0xf] }
  0x19   : > { %v199_v9 = vld [vmem:[%s2200_s28 + $0x90] sm:$0xf]  ;;  %v201_v10 = vld [vmem:[%s2200_s28 + $0xa0] sm:$0xf]  ;;  %198 = vst [vmem:[%s2204_s29 + $0x20] sm:$0xf] %v197_v8 }
  0x1a   : > { %200 = vst [vmem:[%s2204_s29 + $0x24] sm:$0xf] %v199_v9  ;;  %202 = vst [vmem:[%s2204_s29 + $0x28] sm:$0xf] %v201_v10  ;;  %v203_v11 = vld [vmem:[%s2200_s28 + $0xb0] sm:$0xf] }
  0x1b   : > { %v205_v12 = vld [vmem:[%s2200_s28 + $0xc0] sm:$0xf]  ;;  %v207_v13 = vld [vmem:[%s2200_s28 + $0xd0] sm:$0xf]  ;;  %204 = vst [vmem:[%s2204_s29 + $0x2c] sm:$0xf] %v203_v11 }
  0x1c   : > { %206 = vst [vmem:[%s2204_s29 + $0x30] sm:$0xf] %v205_v12  ;;  %208 = vst [vmem:[%s2204_s29 + $0x34] sm:$0xf] %v207_v13  ;;  %v209_v14 = vld [vmem:[%s2200_s28 + $0xe0] sm:$0xf] }
  0x1d   : > { %v211_v15 = vld [vmem:[%s2200_s28 + $0xf0] sm:$0xf]  ;;  %v213_v16 = vld [vmem:[%s2200_s28 + $0x100] sm:$0xf]  ;;  %210 = vst [vmem:[%s2204_s29 + $0x38] sm:$0xf] %v209_v14 }
  0x1e   : > { %212 = vst [vmem:[%s2204_s29 + $0x3c] sm:$0xf] %v211_v15  ;;  %214 = vst [vmem:[%s2204_s29 + $0x40] sm:$0xf] %v213_v16  ;;  %v215_v17 = vld [vmem:[%s2200_s28 + $0x110] sm:$0xf] }
  0x1f   : > { %v217_v18 = vld [vmem:[%s2200_s28 + $0x120] sm:$0xf]  ;;  %v219_v19 = vld [vmem:[%s2200_s28 + $0x130] sm:$0xf]  ;;  %216 = vst [vmem:[%s2204_s29 + $0x44] sm:$0xf] %v215_v17 }
  0x20   : > { %218 = vst [vmem:[%s2204_s29 + $0x48] sm:$0xf] %v217_v18  ;;  %220 = vst [vmem:[%s2204_s29 + $0x4c] sm:$0xf] %v219_v19  ;;  %v221_v20 = vld [vmem:[%s2200_s28 + $0x140] sm:$0xf] }
  0x21   : > { %v223_v21 = vld [vmem:[%s2200_s28 + $0x150] sm:$0xf]  ;;  %v225_v22 = vld [vmem:[%s2200_s28 + $0x160] sm:$0xf]  ;;  %222 = vst [vmem:[%s2204_s29 + $0x50] sm:$0xf] %v221_v20 }
  0x22   : > { %224 = vst [vmem:[%s2204_s29 + $0x54] sm:$0xf] %v223_v21  ;;  %226 = vst [vmem:[%s2204_s29 + $0x58] sm:$0xf] %v225_v22  ;;  %v227_v23 = vld [vmem:[%s2200_s28 + $0x170] sm:$0xf] }
  0x23   : > { %v229_v24 = vld [vmem:[%s2200_s28 + $0x180] sm:$0xf]  ;;  %v231_v25 = vld [vmem:[%s2200_s28 + $0x190] sm:$0xf]  ;;  %228 = vst [vmem:[%s2204_s29 + $0x5c] sm:$0xf] %v227_v23 }
  0x24   : > { %230 = vst [vmem:[%s2204_s29 + $0x60] sm:$0xf] %v229_v24  ;;  %232 = vst [vmem:[%s2204_s29 + $0x64] sm:$0xf] %v231_v25  ;;  %v233_v26 = vld [vmem:[%s2200_s28 + $0x1a0] sm:$0xf] }
  0x25   : > { %v235_v27 = vld [vmem:[%s2200_s28 + $0x1b0] sm:$0xf]  ;;  %v237_v28 = vld [vmem:[%s2200_s28 + $0x1c0] sm:$0xf]  ;;  %234 = vst [vmem:[%s2204_s29 + $0x68] sm:$0xf] %v233_v26 }
  0x26   : > { %236 = vst [vmem:[%s2204_s29 + $0x6c] sm:$0xf] %v235_v27  ;;  %238 = vst [vmem:[%s2204_s29 + $0x70] sm:$0xf] %v237_v28  ;;  %v239_v29 = vld [vmem:[%s2200_s28 + $0x1d0] sm:$0xf] }
  0x27   : > { %v241_v30 = vld [vmem:[%s2200_s28 + $0x1e0] sm:$0xf]  ;;  %v243_v31 = vld [vmem:[%s2200_s28 + $0x1f0] sm:$0xf]  ;;  %240 = vst [vmem:[%s2204_s29 + $0x74] sm:$0xf] %v239_v29 }
  0x28   : > { %242 = vst [vmem:[%s2204_s29 + $0x78] sm:$0xf] %v241_v30  ;;  %244 = vst [vmem:[%s2204_s29 + $0x7c] sm:$0xf] %v243_v31  ;;  %v245_v32 = vld [vmem:[%s2200_s28 + $0x200] sm:$0xf] }
  0x29   : > { %v247_v33 = vld [vmem:[%s2200_s28 + $0x210] sm:$0xf]  ;;  %v249_v34 = vld [vmem:[%s2200_s28 + $0x220] sm:$0xf]  ;;  %246 = vst [vmem:[%s2204_s29 + $0x80] sm:$0xf] %v245_v32 }
  0x2a   : > { %248 = vst [vmem:[%s2204_s29 + $0x84] sm:$0xf] %v247_v33  ;;  %250 = vst [vmem:[%s2204_s29 + $0x88] sm:$0xf] %v249_v34  ;;  %v251_v35 = vld [vmem:[%s2200_s28 + $0x230] sm:$0xf] }
  0x2b   : > { %v253_v36 = vld [vmem:[%s2200_s28 + $0x240] sm:$0xf]  ;;  %v255_v37 = vld [vmem:[%s2200_s28 + $0x250] sm:$0xf]  ;;  %252 = vst [vmem:[%s2204_s29 + $0x8c] sm:$0xf] %v251_v35 }
  0x2c   : > { %254 = vst [vmem:[%s2204_s29 + $0x90] sm:$0xf] %v253_v36  ;;  %256 = vst [vmem:[%s2204_s29 + $0x94] sm:$0xf] %v255_v37  ;;  %v257_v38 = vld [vmem:[%s2200_s28 + $0x260] sm:$0xf] }
  0x2d   : > { %v259_v39 = vld [vmem:[%s2200_s28 + $0x270] sm:$0xf]  ;;  %v261_v40 = vld [vmem:[%s2200_s28 + $0x280] sm:$0xf]  ;;  %258 = vst [vmem:[%s2204_s29 + $0x98] sm:$0xf] %v257_v38 }
  0x2e   : > { %260 = vst [vmem:[%s2204_s29 + $0x9c] sm:$0xf] %v259_v39  ;;  %262 = vst [vmem:[%s2204_s29 + $0xa0] sm:$0xf] %v261_v40  ;;  %v263_v41 = vld [vmem:[%s2200_s28 + $0x290] sm:$0xf] }
  0x2f   : > { %v265_v42 = vld [vmem:[%s2200_s28 + $0x2a0] sm:$0xf]  ;;  %v267_v43 = vld [vmem:[%s2200_s28 + $0x2b0] sm:$0xf]  ;;  %264 = vst [vmem:[%s2204_s29 + $0xa4] sm:$0xf] %v263_v41 }
  0x30   : > { %266 = vst [vmem:[%s2204_s29 + $0xa8] sm:$0xf] %v265_v42  ;;  %268 = vst [vmem:[%s2204_s29 + $0xac] sm:$0xf] %v267_v43  ;;  %v269_v44 = vld [vmem:[%s2200_s28 + $0x2c0] sm:$0xf] }
  0x31   : > { %v271_v45 = vld [vmem:[%s2200_s28 + $0x2d0] sm:$0xf]  ;;  %v273_v46 = vld [vmem:[%s2200_s28 + $0x2e0] sm:$0xf]  ;;  %270 = vst [vmem:[%s2204_s29 + $0xb0] sm:$0xf] %v269_v44 }
  0x32   : > { %272 = vst [vmem:[%s2204_s29 + $0xb4] sm:$0xf] %v271_v45  ;;  %274 = vst [vmem:[%s2204_s29 + $0xb8] sm:$0xf] %v273_v46  ;;  %v275_v47 = vld [vmem:[%s2200_s28 + $0x2f0] sm:$0xf] }
  0x33   : > { %v277_v48 = vld [vmem:[%s2200_s28 + $0x300] sm:$0xf]  ;;  %v279_v49 = vld [vmem:[%s2200_s28 + $0x310] sm:$0xf]  ;;  %276 = vst [vmem:[%s2204_s29 + $0xbc] sm:$0xf] %v275_v47 }
  0x34   : > { %278 = vst [vmem:[%s2204_s29 + $0xc0] sm:$0xf] %v277_v48  ;;  %280 = vst [vmem:[%s2204_s29 + $0xc4] sm:$0xf] %v279_v49  ;;  %v281_v50 = vld [vmem:[%s2200_s28 + $0x320] sm:$0xf] }
  0x35   : > { %v283_v51 = vld [vmem:[%s2200_s28 + $0x330] sm:$0xf]  ;;  %v285_v52 = vld [vmem:[%s2200_s28 + $0x340] sm:$0xf]  ;;  %282 = vst [vmem:[%s2204_s29 + $0xc8] sm:$0xf] %v281_v50 }
  0x36   : > { %284 = vst [vmem:[%s2204_s29 + $0xcc] sm:$0xf] %v283_v51  ;;  %286 = vst [vmem:[%s2204_s29 + $0xd0] sm:$0xf] %v285_v52  ;;  %v287_v53 = vld [vmem:[%s2200_s28 + $0x350] sm:$0xf] }
  0x37   : > { %v289_v54 = vld [vmem:[%s2200_s28 + $0x360] sm:$0xf]  ;;  %v291_v55 = vld [vmem:[%s2200_s28 + $0x370] sm:$0xf]  ;;  %288 = vst [vmem:[%s2204_s29 + $0xd4] sm:$0xf] %v287_v53 }
  0x38   : > { %290 = vst [vmem:[%s2204_s29 + $0xd8] sm:$0xf] %v289_v54  ;;  %292 = vst [vmem:[%s2204_s29 + $0xdc] sm:$0xf] %v291_v55  ;;  %v293_v56 = vld [vmem:[%s2200_s28 + $0x380] sm:$0xf] }
  0x39   : > { %v295_v57 = vld [vmem:[%s2200_s28 + $0x390] sm:$0xf]  ;;  %v297_v58 = vld [vmem:[%s2200_s28 + $0x3a0] sm:$0xf]  ;;  %294 = vst [vmem:[%s2204_s29 + $0xe0] sm:$0xf] %v293_v56 }
  0x3a   : > { %296 = vst [vmem:[%s2204_s29 + $0xe4] sm:$0xf] %v295_v57  ;;  %298 = vst [vmem:[%s2204_s29 + $0xe8] sm:$0xf] %v297_v58  ;;  %v299_v59 = vld [vmem:[%s2200_s28 + $0x3b0] sm:$0xf] }
  0x3b   : > { %v301_v60 = vld [vmem:[%s2200_s28 + $0x3c0] sm:$0xf]  ;;  %v303_v61 = vld [vmem:[%s2200_s28 + $0x3d0] sm:$0xf]  ;;  %300 = vst [vmem:[%s2204_s29 + $0xec] sm:$0xf] %v299_v59 }
  0x3c   : > { %302 = vst [vmem:[%s2204_s29 + $0xf0] sm:$0xf] %v301_v60  ;;  %304 = vst [vmem:[%s2204_s29 + $0xf4] sm:$0xf] %v303_v61  ;;  %v305_v62 = vld [vmem:[%s2200_s28 + $0x3e0] sm:$0xf] }
  0x3d   : > { %v307_v63 = vld [vmem:[%s2200_s28 + $0x3f0] sm:$0xf]  ;;  %v309_v0 = vld [vmem:[%s2200_s28 + $0x400] sm:$0xf]  ;;  %306 = vst [vmem:[%s2204_s29 + $0xf8] sm:$0xf] %v305_v62 }
  0x3e   : > { %308 = vst [vmem:[%s2204_s29 + $0xfc] sm:$0xf] %v307_v63  ;;  %310 = vst [vmem:[%s2204_s29 + $0x100] sm:$0xf] %v309_v0  ;;  %v311_v1 = vld [vmem:[%s2200_s28 + $0x410] sm:$0xf] }
  0x3f   : > { %v313_v2 = vld [vmem:[%s2200_s28 + $0x420] sm:$0xf]  ;;  %v315_v3 = vld [vmem:[%s2200_s28 + $0x430] sm:$0xf]  ;;  %312 = vst [vmem:[%s2204_s29 + $0x104] sm:$0xf] %v311_v1 }
  0x40   : > { %314 = vst [vmem:[%s2204_s29 + $0x108] sm:$0xf] %v313_v2  ;;  %316 = vst [vmem:[%s2204_s29 + $0x10c] sm:$0xf] %v315_v3  ;;  %v317_v4 = vld [vmem:[%s2200_s28 + $0x440] sm:$0xf] }
  0x41   : > { %v319_v5 = vld [vmem:[%s2200_s28 + $0x450] sm:$0xf]  ;;  %v321_v6 = vld [vmem:[%s2200_s28 + $0x460] sm:$0xf]  ;;  %318 = vst [vmem:[%s2204_s29 + $0x110] sm:$0xf] %v317_v4 }
  0x42   : > { %320 = vst [vmem:[%s2204_s29 + $0x114] sm:$0xf] %v319_v5  ;;  %322 = vst [vmem:[%s2204_s29 + $0x118] sm:$0xf] %v321_v6  ;;  %v323_v7 = vld [vmem:[%s2200_s28 + $0x470] sm:$0xf] }
  0x43   : > { %v325_v8 = vld [vmem:[%s2200_s28 + $0x480] sm:$0xf]  ;;  %v327_v9 = vld [vmem:[%s2200_s28 + $0x490] sm:$0xf]  ;;  %324 = vst [vmem:[%s2204_s29 + $0x11c] sm:$0xf] %v323_v7 }
  0x44   : > { %326 = vst [vmem:[%s2204_s29 + $0x120] sm:$0xf] %v325_v8  ;;  %328 = vst [vmem:[%s2204_s29 + $0x124] sm:$0xf] %v327_v9  ;;  %v329_v10 = vld [vmem:[%s2200_s28 + $0x4a0] sm:$0xf] }
  0x45   : > { %v331_v11 = vld [vmem:[%s2200_s28 + $0x4b0] sm:$0xf]  ;;  %v333_v12 = vld [vmem:[%s2200_s28 + $0x4c0] sm:$0xf]  ;;  %330 = vst [vmem:[%s2204_s29 + $0x128] sm:$0xf] %v329_v10 }
  0x46   : > { %332 = vst [vmem:[%s2204_s29 + $0x12c] sm:$0xf] %v331_v11  ;;  %334 = vst [vmem:[%s2204_s29 + $0x130] sm:$0xf] %v333_v12  ;;  %v335_v13 = vld [vmem:[%s2200_s28 + $0x4d0] sm:$0xf] }
  0x47   : > { %v337_v14 = vld [vmem:[%s2200_s28 + $0x4e0] sm:$0xf]  ;;  %v339_v15 = vld [vmem:[%s2200_s28 + $0x4f0] sm:$0xf]  ;;  %336 = vst [vmem:[%s2204_s29 + $0x134] sm:$0xf] %v335_v13 }
  0x48   : > { %338 = vst [vmem:[%s2204_s29 + $0x138] sm:$0xf] %v337_v14  ;;  %340 = vst [vmem:[%s2204_s29 + $0x13c] sm:$0xf] %v339_v15  ;;  %v341_v16 = vld [vmem:[%s2200_s28 + $0x500] sm:$0xf] }
  0x49   : > { %v343_v17 = vld [vmem:[%s2200_s28 + $0x510] sm:$0xf]  ;;  %v345_v18 = vld [vmem:[%s2200_s28 + $0x520] sm:$0xf]  ;;  %342 = vst [vmem:[%s2204_s29 + $0x140] sm:$0xf] %v341_v16 }
  0x4a   : > { %344 = vst [vmem:[%s2204_s29 + $0x144] sm:$0xf] %v343_v17  ;;  %346 = vst [vmem:[%s2204_s29 + $0x148] sm:$0xf] %v345_v18  ;;  %v347_v19 = vld [vmem:[%s2200_s28 + $0x530] sm:$0xf] }
  0x4b   : > { %v349_v20 = vld [vmem:[%s2200_s28 + $0x540] sm:$0xf]  ;;  %v351_v21 = vld [vmem:[%s2200_s28 + $0x550] sm:$0xf]  ;;  %348 = vst [vmem:[%s2204_s29 + $0x14c] sm:$0xf] %v347_v19 }
  0x4c   : > { %350 = vst [vmem:[%s2204_s29 + $0x150] sm:$0xf] %v349_v20  ;;  %352 = vst [vmem:[%s2204_s29 + $0x154] sm:$0xf] %v351_v21  ;;  %v353_v22 = vld [vmem:[%s2200_s28 + $0x560] sm:$0xf] }
  0x4d   : > { %v355_v23 = vld [vmem:[%s2200_s28 + $0x570] sm:$0xf]  ;;  %v357_v24 = vld [vmem:[%s2200_s28 + $0x580] sm:$0xf]  ;;  %354 = vst [vmem:[%s2204_s29 + $0x158] sm:$0xf] %v353_v22 }
  0x4e   : > { %356 = vst [vmem:[%s2204_s29 + $0x15c] sm:$0xf] %v355_v23  ;;  %358 = vst [vmem:[%s2204_s29 + $0x160] sm:$0xf] %v357_v24  ;;  %v359_v25 = vld [vmem:[%s2200_s28 + $0x590] sm:$0xf] }
  0x4f   : > { %v361_v26 = vld [vmem:[%s2200_s28 + $0x5a0] sm:$0xf]  ;;  %v363_v27 = vld [vmem:[%s2200_s28 + $0x5b0] sm:$0xf]  ;;  %360 = vst [vmem:[%s2204_s29 + $0x164] sm:$0xf] %v359_v25 }
  0x50   : > { %362 = vst [vmem:[%s2204_s29 + $0x168] sm:$0xf] %v361_v26  ;;  %364 = vst [vmem:[%s2204_s29 + $0x16c] sm:$0xf] %v363_v27  ;;  %v365_v28 = vld [vmem:[%s2200_s28 + $0x5c0] sm:$0xf] }
  0x51   : > { %v367_v29 = vld [vmem:[%s2200_s28 + $0x5d0] sm:$0xf]  ;;  %v369_v30 = vld [vmem:[%s2200_s28 + $0x5e0] sm:$0xf]  ;;  %366 = vst [vmem:[%s2204_s29 + $0x170] sm:$0xf] %v365_v28 }
  0x52   : > { %368 = vst [vmem:[%s2204_s29 + $0x174] sm:$0xf] %v367_v29  ;;  %370 = vst [vmem:[%s2204_s29 + $0x178] sm:$0xf] %v369_v30  ;;  %v371_v31 = vld [vmem:[%s2200_s28 + $0x5f0] sm:$0xf] }
  0x53   : > { %v373_v32 = vld [vmem:[%s2200_s28 + $0x600] sm:$0xf]  ;;  %v375_v33 = vld [vmem:[%s2200_s28 + $0x610] sm:$0xf]  ;;  %372 = vst [vmem:[%s2204_s29 + $0x17c] sm:$0xf] %v371_v31 }
  0x54   : > { %374 = vst [vmem:[%s2204_s29 + $0x180] sm:$0xf] %v373_v32  ;;  %376 = vst [vmem:[%s2204_s29 + $0x184] sm:$0xf] %v375_v33  ;;  %v377_v34 = vld [vmem:[%s2200_s28 + $0x620] sm:$0xf] }
  0x55   : > { %v379_v35 = vld [vmem:[%s2200_s28 + $0x630] sm:$0xf]  ;;  %v381_v36 = vld [vmem:[%s2200_s28 + $0x640] sm:$0xf]  ;;  %378 = vst [vmem:[%s2204_s29 + $0x188] sm:$0xf] %v377_v34 }
  0x56   : > { %380 = vst [vmem:[%s2204_s29 + $0x18c] sm:$0xf] %v379_v35  ;;  %382 = vst [vmem:[%s2204_s29 + $0x190] sm:$0xf] %v381_v36  ;;  %v383_v37 = vld [vmem:[%s2200_s28 + $0x650] sm:$0xf] }
  0x57   : > { %v385_v38 = vld [vmem:[%s2200_s28 + $0x660] sm:$0xf]  ;;  %v387_v39 = vld [vmem:[%s2200_s28 + $0x670] sm:$0xf]  ;;  %384 = vst [vmem:[%s2204_s29 + $0x194] sm:$0xf] %v383_v37 }
  0x58   : > { %386 = vst [vmem:[%s2204_s29 + $0x198] sm:$0xf] %v385_v38  ;;  %388 = vst [vmem:[%s2204_s29 + $0x19c] sm:$0xf] %v387_v39  ;;  %v389_v40 = vld [vmem:[%s2200_s28 + $0x680] sm:$0xf] }
  0x59   : > { %v391_v41 = vld [vmem:[%s2200_s28 + $0x690] sm:$0xf]  ;;  %v393_v42 = vld [vmem:[%s2200_s28 + $0x6a0] sm:$0xf]  ;;  %390 = vst [vmem:[%s2204_s29 + $0x1a0] sm:$0xf] %v389_v40 }
  0x5a   : > { %392 = vst [vmem:[%s2204_s29 + $0x1a4] sm:$0xf] %v391_v41  ;;  %394 = vst [vmem:[%s2204_s29 + $0x1a8] sm:$0xf] %v393_v42  ;;  %v395_v43 = vld [vmem:[%s2200_s28 + $0x6b0] sm:$0xf] }
  0x5b   : > { %v397_v44 = vld [vmem:[%s2200_s28 + $0x6c0] sm:$0xf]  ;;  %v399_v45 = vld [vmem:[%s2200_s28 + $0x6d0] sm:$0xf]  ;;  %396 = vst [vmem:[%s2204_s29 + $0x1ac] sm:$0xf] %v395_v43 }
  0x5c   : > { %398 = vst [vmem:[%s2204_s29 + $0x1b0] sm:$0xf] %v397_v44  ;;  %400 = vst [vmem:[%s2204_s29 + $0x1b4] sm:$0xf] %v399_v45  ;;  %v401_v46 = vld [vmem:[%s2200_s28 + $0x6e0] sm:$0xf] }
  0x5d   : > { %v403_v47 = vld [vmem:[%s2200_s28 + $0x6f0] sm:$0xf]  ;;  %v405_v48 = vld [vmem:[%s2200_s28 + $0x700] sm:$0xf]  ;;  %402 = vst [vmem:[%s2204_s29 + $0x1b8] sm:$0xf] %v401_v46 }
  0x5e   : > { %404 = vst [vmem:[%s2204_s29 + $0x1bc] sm:$0xf] %v403_v47  ;;  %406 = vst [vmem:[%s2204_s29 + $0x1c0] sm:$0xf] %v405_v48  ;;  %v407_v49 = vld [vmem:[%s2200_s28 + $0x710] sm:$0xf] }
  0x5f   : > { %v409_v50 = vld [vmem:[%s2200_s28 + $0x720] sm:$0xf]  ;;  %v411_v51 = vld [vmem:[%s2200_s28 + $0x730] sm:$0xf]  ;;  %408 = vst [vmem:[%s2204_s29 + $0x1c4] sm:$0xf] %v407_v49 }
  0x60   : > { %410 = vst [vmem:[%s2204_s29 + $0x1c8] sm:$0xf] %v409_v50  ;;  %412 = vst [vmem:[%s2204_s29 + $0x1cc] sm:$0xf] %v411_v51  ;;  %v413_v52 = vld [vmem:[%s2200_s28 + $0x740] sm:$0xf] }
  0x61   : > { %v415_v53 = vld [vmem:[%s2200_s28 + $0x750] sm:$0xf]  ;;  %v417_v54 = vld [vmem:[%s2200_s28 + $0x760] sm:$0xf]  ;;  %414 = vst [vmem:[%s2204_s29 + $0x1d0] sm:$0xf] %v413_v52 }
  0x62   : > { %416 = vst [vmem:[%s2204_s29 + $0x1d4] sm:$0xf] %v415_v53  ;;  %418 = vst [vmem:[%s2204_s29 + $0x1d8] sm:$0xf] %v417_v54  ;;  %v419_v55 = vld [vmem:[%s2200_s28 + $0x770] sm:$0xf] }
  0x63   : > { %v421_v56 = vld [vmem:[%s2200_s28 + $0x780] sm:$0xf]  ;;  %v423_v57 = vld [vmem:[%s2200_s28 + $0x790] sm:$0xf]  ;;  %420 = vst [vmem:[%s2204_s29 + $0x1dc] sm:$0xf] %v419_v55 }
  0x64   : > { %422 = vst [vmem:[%s2204_s29 + $0x1e0] sm:$0xf] %v421_v56  ;;  %424 = vst [vmem:[%s2204_s29 + $0x1e4] sm:$0xf] %v423_v57  ;;  %v425_v58 = vld [vmem:[%s2200_s28 + $0x7a0] sm:$0xf] }
  0x65   : > { %v427_v59 = vld [vmem:[%s2200_s28 + $0x7b0] sm:$0xf]  ;;  %v429_v60 = vld [vmem:[%s2200_s28 + $0x7c0] sm:$0xf]  ;;  %426 = vst [vmem:[%s2204_s29 + $0x1e8] sm:$0xf] %v425_v58 }
  0x66   : > { %428 = vst [vmem:[%s2204_s29 + $0x1ec] sm:$0xf] %v427_v59  ;;  %430 = vst [vmem:[%s2204_s29 + $0x1f0] sm:$0xf] %v429_v60  ;;  %v431_v61 = vld [vmem:[%s2200_s28 + $0x7d0] sm:$0xf] }
  0x67   : > { %v433_v62 = vld [vmem:[%s2200_s28 + $0x7e0] sm:$0xf]  ;;  %v435_v63 = vld [vmem:[%s2200_s28 + $0x7f0] sm:$0xf]  ;;  %432 = vst [vmem:[%s2204_s29 + $0x1f4] sm:$0xf] %v431_v61 }
  0x68   : > { %434 = vst [vmem:[%s2204_s29 + $0x1f8] sm:$0xf] %v433_v62  ;;  %436 = vst [vmem:[%s2204_s29 + $0x1fc] sm:$0xf] %v435_v63 }
  0x69 PF: > { %p1769_p8 = scmp.ge.s32.totalorder %s2130_s16, 1  ;;  %p721_p9 = scmp.lt.s32.totalorder %s2130_s16, 5 }
  0x6b   : > { %p722_p10 = pnand %p1769_p8, %p721_p9 }
  0x6c   : > { %s728_s30 = sand.u32 (!%p722_p10), 1, %s2114_s12   ;;  %p766_p11 = scmp.lt.s32.totalorder (!%p722_p10), %s2122_s14, 3 }
  0x6d   : > { %725 = sbr.rel (%p722_p10) target bundleno = 406 (0x196), region = 69  ;;  %s1770_s10 = sshll.u32 (!%p722_p10), %s728_s30, 9 }
  0x6e   : > { %s2489_s19 = scalar_lea.vmem (!%p722_p10), [#allocation2], %s1770_s10  ;;  %s1771_s6 = sshll.u32 (!%p722_p10), %s728_s30, 4 }
  0x6f   : > { %s758_s7 = scalar_lea.vmem (!%p722_p10), [#allocation3], %s1771_s6 }
  0x72   : > { %v2466_v0 = vld [vmem:[%s2623_s0] sm:$0xff]  ;;  %v2476_v2 = vld [vmem:[%s2623_s0 + $0x8] sm:$0xff]  ;;  %v2028_v6 = vld [vmem:[%s2489_s19 + $0x78] sm:$0xff]   ;;  %s767_s28 = scalar_select %p766_p11, %s2122_s14, 3 }
  0x73   : > { %v2471_v1 = vld [vmem:[%s2623_s0 + $0x20] sm:$0xff]  ;;  %v2485_v4 = vld [vmem:[%s2623_s0 + $0x28] sm:$0xff]  ;;  %v2029_v7 = vld [vmem:[%s2489_s19 + $0xf8] sm:$0xff]   ;;  %1876 = vmatprep.subr.bf16.mxu0 %v2028_v6  ;;  %s1858_s12 = sshll.u32 (%p2187_p6), %s2122_s14, 2 }
  0x74   : > { %v1774_v3 = vcombine.high %v2466_v0, %v2471_v1  ;;  %v1776_v5 = vcombine.high %v2476_v2, %v2485_v4  ;;  %v2030_v8 = vld [vmem:[%s2489_s19 + $0x38] sm:$0xff]   ;;  %1904 = vmatprep.subr.bf16.mxu1 %v2029_v7  ;;  %v2032_v10 = vld [vmem:[%s2489_s19 + $0x70] sm:$0xff]   ;;  %v2036_v14 = vld [vmem:[%s2489_s19 + $0x68] sm:$0xff]   ;;  %v1773_v42 = vcombine.low %v2466_v0, %v2471_v1  ;;  %v1775_v43 = vcombine.low %v2476_v2, %v2485_v4  ;;  %s768_s5 = scalar_lea.vmem %s2625_s2, %s767_s28  ;;  %s1617_s9 = scalar_lea.vmem (%p2187_p6), %s2626_s3, %s1858_s12 }
  0x75   : > { %v2031_v9 = vld [vmem:[%s2489_s19 + $0xb8] sm:$0xff]   ;;  %1877 = vmatpush3.bf16.msra.mxu0 %v2030_v8  ;;  %v2033_v11 = vld [vmem:[%s2489_s19 + $0xf0] sm:$0xff]   ;;  %v2037_v15 = vld [vmem:[%s2489_s19 + $0xe8] sm:$0xff]  }
  0x76   : > { %1418 = vmatprep.mubr.bf16.mxu0 %v1774_v3  ;;  %1467 = vmatprep.mubr.bf16.mxu1 %v1776_v5  ;;  %v2034_v12 = vld [vmem:[%s2489_s19 + $0x30] sm:$0xff]   ;;  %v2038_v16 = vld [vmem:[%s2489_s19 + $0x28] sm:$0xff]   ;;  %v2040_v18 = vld [vmem:[%s2489_s19 + $0x60] sm:$0xff]  }
  0x77   : > { %1905 = vmatpush3.bf16.msra.mxu1 %v2031_v9  ;;  %1878 = vmatprep.subr.bf16.mxu0 %v2032_v10  ;;  %v2035_v13 = vld [vmem:[%s2489_s19 + $0xb0] sm:$0xff]   ;;  %v2039_v17 = vld [vmem:[%s2489_s19 + $0xa8] sm:$0xff]   ;;  %v2041_v19 = vld [vmem:[%s2489_s19 + $0xe0] sm:$0xff]  }
  0x78   : > { %1906 = vmatprep.subr.bf16.mxu1 %v2033_v11  ;;  %v2042_v20 = vld [vmem:[%s2489_s19 + $0x20] sm:$0xff]   ;;  %v2044_v22 = vld [vmem:[%s2489_s19 + $0x58] sm:$0xff]   ;;  %v2048_v26 = vld [vmem:[%s2489_s19 + $0x50] sm:$0xff]  }
  0x79   : > { %1879 = vmatpush3.bf16.msra.mxu0 %v2034_v12  ;;  %v2043_v21 = vld [vmem:[%s2489_s19 + $0xa0] sm:$0xff]   ;;  %v2045_v23 = vld [vmem:[%s2489_s19 + $0xd8] sm:$0xff]   ;;  %v2049_v27 = vld [vmem:[%s2489_s19 + $0xd0] sm:$0xff]  }
  0x7a   : > { %1880 = vmatprep.subr.bf16.mxu0 %v2036_v14  ;;  %v2046_v24 = vld [vmem:[%s2489_s19 + $0x18] sm:$0xff]   ;;  %v2050_v28 = vld [vmem:[%s2489_s19 + $0x10] sm:$0xff]   ;;  %v2052_v30 = vld [vmem:[%s2489_s19 + $0x48] sm:$0xff]  }
  0x7b   : > { %1907 = vmatpush3.bf16.msra.mxu1 %v2035_v13  ;;  %v2047_v25 = vld [vmem:[%s2489_s19 + $0x98] sm:$0xff]   ;;  %v2051_v29 = vld [vmem:[%s2489_s19 + $0x90] sm:$0xff]   ;;  %v2053_v31 = vld [vmem:[%s2489_s19 + $0xc8] sm:$0xff]  }
  0x7c   : > { %1908 = vmatprep.subr.bf16.mxu1 %v2037_v15  ;;  %v2054_v32 = vld [vmem:[%s2489_s19 + $0x8] sm:$0xff]   ;;  %v2056_v34 = vld [vmem:[%s2489_s19 + $0x40] sm:$0xff]   ;;  %v2060_v44 = vld [vmem:[%s2489_s19 + $0x178] sm:$0xff]  }
  0x7d   : > { %1881 = vmatpush3.bf16.msra.mxu0 %v2038_v16  ;;  %v2055_v33 = vld [vmem:[%s2489_s19 + $0x88] sm:$0xff]   ;;  %v779_v35 = vld [vmem:[%s2623_s0 + $0x40] sm:$0xff]  ;;  %v2061_v45 = vld [vmem:[%s2489_s19 + $0x1f8] sm:$0xff]  }
  0x7e   : > { %1882 = vmatprep.subr.bf16.mxu0 %v2040_v18  ;;  %v783_v36 = vld [vmem:[%s2623_s0 + $0x60] sm:$0xff]  ;;  %v780_v38 = vld [vmem:[%s2623_s0 + $0x48] sm:$0xff]  ;;  %v2062_v47 = vld [vmem:[%s2489_s19 + $0x138] sm:$0xff]  }
  0x7f   : > { %1909 = vmatpush3.bf16.msra.mxu1 %v2039_v17  ;;  %v2057_v37 = vld [vmem:[%s2489_s19 + $0xc0] sm:$0xff]   ;;  %v784_v39 = vld [vmem:[%s2623_s0 + $0x68] sm:$0xff]  ;;  %v1782_v46 = vcombine.high %v779_v35, %v783_v36  ;;  %v2063_v49 = vld [vmem:[%s2489_s19 + $0x1b8] sm:$0xff]   ;;  %v1781_v54 = vcombine.low %v779_v35, %v783_v36 }
  0x80   : > { %1910 = vmatprep.subr.bf16.mxu1 %v2041_v19  ;;  %v2058_v40 = vld [vmem:[%s2489_s19] sm:$0xff]   ;;  %v1784_v48 = vcombine.high %v780_v38, %v784_v39  ;;  %v2064_v50 = vld [vmem:[%s2489_s19 + $0x170] sm:$0xff]   ;;  %v2068_v55 = vld [vmem:[%s2489_s19 + $0x168] sm:$0xff]   ;;  %v1783_v56 = vcombine.low %v780_v38, %v784_v39 }
  0x81   : > { %1883 = vmatpush3.bf16.msra.mxu0 %v2042_v20  ;;  %v2059_v41 = vld [vmem:[%s2489_s19 + $0x80] sm:$0xff]   ;;  %v2065_v51 = vld [vmem:[%s2489_s19 + $0x1f0] sm:$0xff]   ;;  %v2069_v57 = vld [vmem:[%s2489_s19 + $0x1e8] sm:$0xff]  }
  0x82   : > { %1884 = vmatprep.subr.bf16.mxu0 %v2044_v22  ;;  %v2066_v52 = vld [vmem:[%s2489_s19 + $0x130] sm:$0xff]   ;;  %v2070_v58 = vld [vmem:[%s2489_s19 + $0x128] sm:$0xff]   ;;  %v2072_v60 = vld [vmem:[%s2489_s19 + $0x160] sm:$0xff]  }
  0x83   : > { %1911 = vmatpush3.bf16.msra.mxu1 %v2043_v21  ;;  %v2067_v53 = vld [vmem:[%s2489_s19 + $0x1b0] sm:$0xff]   ;;  %v2071_v59 = vld [vmem:[%s2489_s19 + $0x1a8] sm:$0xff]   ;;  %v2073_v61 = vld [vmem:[%s2489_s19 + $0x1e0] sm:$0xff]  }
  0x84   : > { %1912 = vmatprep.subr.bf16.mxu1 %v2045_v23  ;;  %v2074_v62 = vld [vmem:[%s2489_s19 + $0x120] sm:$0xff]   ;;  %v2076_v0 = vld [vmem:[%s2489_s19 + $0x158] sm:$0xff]   ;;  %v2080_v4 = vld [vmem:[%s2489_s19 + $0x150] sm:$0xff]  }
  0x85   : > { %1885 = vmatpush3.bf16.msra.mxu0 %v2046_v24  ;;  %v2075_v63 = vld [vmem:[%s2489_s19 + $0x1a0] sm:$0xff]   ;;  %v2077_v1 = vld [vmem:[%s2489_s19 + $0x1d8] sm:$0xff]   ;;  %v2081_v5 = vld [vmem:[%s2489_s19 + $0x1d0] sm:$0xff]  }
  0x86   : > { %1886 = vmatprep.subr.bf16.mxu0 %v2048_v26  ;;  %v2078_v2 = vld [vmem:[%s2489_s19 + $0x118] sm:$0xff]   ;;  %v2082_v6 = vld [vmem:[%s2489_s19 + $0x110] sm:$0xff]   ;;  %v2084_v8 = vld [vmem:[%s2489_s19 + $0x148] sm:$0xff]  }
  0x87   : > { %1913 = vmatpush3.bf16.msra.mxu1 %v2047_v25  ;;  %v2079_v3 = vld [vmem:[%s2489_s19 + $0x198] sm:$0xff]   ;;  %v2083_v7 = vld [vmem:[%s2489_s19 + $0x190] sm:$0xff]   ;;  %v2085_v9 = vld [vmem:[%s2489_s19 + $0x1c8] sm:$0xff]  }
  0x88   : > { %1914 = vmatprep.subr.bf16.mxu1 %v2049_v27  ;;  %v2086_v10 = vld [vmem:[%s2489_s19 + $0x108] sm:$0xff]   ;;  %v2088_v12 = vld [vmem:[%s2489_s19 + $0x140] sm:$0xff]   ;;  %v773_v13 = vld [vmem:[%s2623_s0 + $0x10] sm:$0xff] }
  0x89   : > { %1887 = vmatpush3.bf16.msra.mxu0 %v2050_v28  ;;  %v2087_v11 = vld [vmem:[%s2489_s19 + $0x188] sm:$0xff]   ;;  %v2089_v14 = vld [vmem:[%s2489_s19 + $0x1c0] sm:$0xff]   ;;  %v777_v17 = vld [vmem:[%s2623_s0 + $0x30] sm:$0xff] }
  0x8a   : > { %1888 = vmatprep.subr.bf16.mxu0 %v2052_v30  ;;  %v2090_v15 = vld [vmem:[%s2489_s19 + $0x100] sm:$0xff]   ;;  %v774_v18 = vld [vmem:[%s2623_s0 + $0x18] sm:$0xff]  ;;  %v1777_v20 = vcombine.low %v773_v13, %v777_v17  ;;  %v1778_v21 = vcombine.high %v773_v13, %v777_v17  ;;  %v781_v24 = vld [vmem:[%s2623_s0 + $0x50] sm:$0xff] }
  0x8b   : > { %1915 = vmatpush3.bf16.msra.mxu1 %v2051_v29  ;;  %v2091_v16 = vld [vmem:[%s2489_s19 + $0x180] sm:$0xff]   ;;  %v778_v19 = vld [vmem:[%s2623_s0 + $0x38] sm:$0xff]  ;;  %v785_v25 = vld [vmem:[%s2623_s0 + $0x70] sm:$0xff] }
  0x8c   : > { %1916 = vmatprep.subr.bf16.mxu1 %v2053_v31  ;;  %v1779_v22 = vcombine.low %v774_v18, %v778_v19  ;;  %v1780_v23 = vcombine.high %v774_v18, %v778_v19  ;;  %v782_v26 = vld [vmem:[%s2623_s0 + $0x58] sm:$0xff]  ;;  %v1786_v27 = vcombine.high %v781_v24, %v785_v25  ;;  %v1785_v30 = vcombine.low %v781_v24, %v785_v25 }
  0x8d   : > { %1889 = vmatpush3.bf16.msra.mxu0 %v2054_v32  ;;  %v786_v28 = vld [vmem:[%s2623_s0 + $0x78] sm:$0xff] }
  0x8e   : > { %1890 = vmatprep.subr.bf16.mxu0 %v2056_v34  ;;  %v1788_v29 = vcombine.high %v782_v26, %v786_v28  ;;  %v1787_v31 = vcombine.low %v782_v26, %v786_v28 }
  0x8f   : > { %1917 = vmatpush3.bf16.msra.mxu1 %v2055_v33 }
  0x90   : > { %1918 = vmatprep.subr.bf16.mxu1 %v2057_v37 }
  0x91   : > { %1891 = vmatpush3.bf16.msra.mxu0 %v2058_v40 }
  0x92   : > { %1932 = vmatprep.subr.bf16.mxu0 %v2060_v44 }
  0x93   : > { %1919 = vmatpush3.bf16.msra.mxu1 %v2059_v41 }
  0x94   : > { %1419 = vmatmul.mubr.bf16.vlgmr.msra.gmra.mxu0 %v1773_v42  ;;  %1960 = vmatprep.subr.bf16.mxu1 %v2061_v45 }
  0x95   : > { %1933 = vmatpush3.bf16.msra.mxu0 %v2062_v47  ;;  %1426 = vmatprep.mubr.bf16.mxu0 %v1782_v46  ;;  %v1772_v47 = vld [vmem:[%s768_s5] ss:$0 sm:$0xff] }
  0x96   : > { %1468 = vmatmul.mubr.bf16.vlgmr.msra.gmra.mxu1 %v1775_v43  ;;  %1934 = vmatprep.subr.bf16.mxu0 %v2064_v50 }
  0x97   : > { %1961 = vmatpush3.bf16.msra.mxu1 %v2063_v49  ;;  %1475 = vmatprep.mubr.bf16.mxu1 %v1784_v48 }
  0x98   : > { %1962 = vmatprep.subr.bf16.mxu1 %v2065_v51 }
  0x99   : > { %1935 = vmatpush3.bf16.msra.mxu0 %v2066_v52 }
  0x9a   : > { %1936 = vmatprep.subr.bf16.mxu0 %v2068_v55 }
  0x9b   : > { %1963 = vmatpush3.bf16.msra.mxu1 %v2067_v53 }
  0x9c   : > { %1964 = vmatprep.subr.bf16.mxu1 %v2069_v57  ;;  %1427 = vmatmul.mubr.bf16.gmra.mxu0 %v1781_v54 }
  0x9d   : > { %1937 = vmatpush3.bf16.msra.mxu0 %v2070_v58  ;;  %1516 = vmatprep.mubr.bf16.mxu0 %v1778_v21 }
  0x9e   : > { %1476 = vmatmul.mubr.bf16.gmra.mxu1 %v1783_v56  ;;  %1938 = vmatprep.subr.bf16.mxu0 %v2072_v60 }
  0x9f   : > { %1965 = vmatpush3.bf16.msra.mxu1 %v2071_v59  ;;  %1565 = vmatprep.mubr.bf16.mxu1 %v1780_v23 }
  0xa0   : > { %1966 = vmatprep.subr.bf16.mxu1 %v2073_v61 }
  0xa1   : > { %1939 = vmatpush3.bf16.msra.mxu0 %v2074_v62 }
  0xa2   : > { %1940 = vmatprep.subr.bf16.mxu0 %v2076_v0 }
  0xa3   : > { %1967 = vmatpush3.bf16.msra.mxu1 %v2075_v63 }
  0xa4   : > { %1968 = vmatprep.subr.bf16.mxu1 %v2077_v1 }
  0xa5   : > { %1941 = vmatpush3.bf16.msra.mxu0 %v2078_v2 }
  0xa6   : > { %1942 = vmatprep.subr.bf16.mxu0 %v2080_v4 }
  0xa7   : > { %1969 = vmatpush3.bf16.msra.mxu1 %v2079_v3 }
  0xa8   : > { %1970 = vmatprep.subr.bf16.mxu1 %v2081_v5 }
  0xa9   : > { %1943 = vmatpush3.bf16.msra.mxu0 %v2082_v6 }
  0xaa   : > { %1944 = vmatprep.subr.bf16.mxu0 %v2084_v8 }
  0xab   : > { %1971 = vmatpush3.bf16.msra.mxu1 %v2083_v7 }
  0xac   : > { %1972 = vmatprep.subr.bf16.mxu1 %v2085_v9 }
  0xad   : > { %1945 = vmatpush3.bf16.msra.mxu0 %v2086_v10 }
  0xae   : > { %1946 = vmatprep.subr.bf16.mxu0 %v2088_v12 }
  0xaf   : > { %1973 = vmatpush3.bf16.msra.mxu1 %v2087_v11 }
  0xb0   : > { %1974 = vmatprep.subr.bf16.mxu1 %v2089_v14 }
  0xb1   : > { %1947 = vmatpush3.bf16.msra.mxu0 %v2090_v15 }
  0xb3   : > { %1975 = vmatpush3.bf16.msra.mxu1 %v2091_v16 }
  0xb4   : > { %1517 = vmatmul.mubr.bf16.vlgmr.msra.gmra.mxu0 %v1777_v20 }
  0xb5   : > { %1524 = vmatprep.mubr.bf16.mxu0 %v1786_v27 }
  0xb6   : > { %1566 = vmatmul.mubr.bf16.vlgmr.msra.gmra.mxu1 %v1779_v22 }
  0xb7   : > { %1573 = vmatprep.mubr.bf16.mxu1 %v1788_v29 }
  0xbc   : > { %1525 = vmatmul.mubr.bf16.gmra.mxu0 %v1785_v30 }
  0xbe   : > { %1574 = vmatmul.mubr.bf16.gmra.mxu1 %v1787_v31 }
 0x154   : > { %v1892_v32 = vpop.f32.mrf.mxu0 }
 0x156   : > { %v1920_v33 = vpop.f32.mrf.mxu1  ;;  %v1893_v34 = vpop.f32.mrf.mxu0 }
 0x157   : > { %v1894_v46 = vadd.f32 %v1893_v34, %v1892_v32 }
 0x158   : > { %v1921_v35 = vpop.f32.mrf.mxu1  ;;  %v1895_v36 = vpop.f32.mrf.mxu0 }
 0x159   : > { %v1421_v50 = vadd.f32 %v1894_v46, %v1772_v47  ;;  %v1922_v51 = vadd.f32 %v1921_v35, %v1920_v33 }
 0x15a   : > { %v1923_v37 = vpop.f32.mrf.mxu1  ;;  %v1896_v38 = vpop.f32.mrf.mxu0 }
 0x15b   : > { %v1897_v52 = vadd.f32 %v1896_v38, %v1895_v36  ;;  %v1470_v58 = vadd.f32 %v1922_v51, %v1421_v50 }
 0x15c   : > { %v1924_v39 = vpop.f32.mrf.mxu1  ;;  %v1898_v40 = vpop.f32.mrf.mxu0 }
 0x15d   : > { %v1424_v59 = vadd.f32 %v1897_v52, %v1772_v47  ;;  %v1925_v63 = vadd.f32 %v1924_v39, %v1923_v37 }
 0x15e   : > { %v1926_v41 = vpop.f32.mrf.mxu1  ;;  %v1899_v42 = vpop.f32.mrf.mxu0 }
 0x15f   : > { %v1900_v55 = vadd.f32 %v1899_v42, %v1898_v40  ;;  %v1473_v5 = vadd.f32 %v1925_v63, %v1424_v59 }
 0x160   : > { %v1927_v43 = vpop.f32.mrf.mxu1  ;;  %v1901_v44 = vpop.f32.mrf.mxu0 }
 0x161   : > { %v1429_v1 = vadd.f32 %v1900_v55, %v1772_v47  ;;  %v1928_v2 = vadd.f32 %v1927_v43, %v1926_v41 }
 0x162   : > { %v1929_v45 = vpop.f32.mrf.mxu1  ;;  %v1902_v48 = vpop.f32.mrf.mxu0 }
 0x163   : > { %v1903_v6 = vadd.f32 %v1902_v48, %v1901_v44  ;;  %v1478_v14 = vadd.f32 %v1928_v2, %v1429_v1 }
 0x164   : > { %v1930_v49 = vpop.f32.mrf.mxu1 }
 0x165   : > { %v1432_v17 = vadd.f32 %v1903_v6, %v1772_v47  ;;  %v1931_v18 = vadd.f32 %v1930_v49, %v1929_v45 }
 0x167   : > { %v1481_v28 = vadd.f32 %v1931_v18, %v1432_v17 }
 0x174   : > { %v1948_v53 = vpop.f32.mrf.mxu0 }
 0x176   : > { %v1976_v54 = vpop.f32.mrf.mxu1  ;;  %v1949_v56 = vpop.f32.mrf.mxu0 }
 0x177   : > { %v1950_v60 = vadd.f32 %v1949_v56, %v1948_v53 }
 0x178   : > { %v1977_v57 = vpop.f32.mrf.mxu1  ;;  %v1951_v61 = vpop.f32.mrf.mxu0 }
 0x179   : > { %v1519_v0 = vadd.f32 %v1950_v60, %v1470_v58  ;;  %v1978_v7 = vadd.f32 %v1977_v57, %v1976_v54 }
 0x17a   : > { %v1979_v62 = vpop.f32.mrf.mxu1  ;;  %v1952_v3 = vpop.f32.mrf.mxu0 }
 0x17b   : > { %v1953_v8 = vadd.f32 %v1952_v3, %v1951_v61  ;;  %v1568_v11 = vadd.f32 %v1978_v7, %v1519_v0 }
 0x17c   : > { %v1980_v4 = vpop.f32.mrf.mxu1  ;;  %v1954_v9 = vpop.f32.mrf.mxu0 }
 0x17d   : > { %v1522_v12 = vadd.f32 %v1953_v8, %v1473_v5  ;;  %v1981_v13 = vadd.f32 %v1980_v4, %v1979_v62  ;;  %v1582_v23 = vmax.f32 %v1568_v11, 0.0 }
 0x17e   : > { %v1982_v10 = vpop.f32.mrf.mxu1  ;;  %v1955_v15 = vpop.f32.mrf.mxu0 }
 0x17f   : > { %v1571_v19 = vadd.f32 %v1981_v13, %v1522_v12  ;;  %v1956_v20 = vadd.f32 %v1955_v15, %v1954_v9 }
 0x180   : > { %v1983_v16 = vpop.f32.mrf.mxu1  ;;  %v1957_v21 = vpop.f32.mrf.mxu0 }
 0x181   : > { %v1583_v24 = vmax.f32 %v1571_v19, 0.0  ;;  %v1527_v25 = vadd.f32 %v1956_v20, %v1478_v14  ;;  %v1984_v30 = vadd.f32 %v1983_v16, %v1982_v10 }
 0x182   : > { %v1985_v22 = vpop.f32.mrf.mxu1  ;;  %v1958_v26 = vpop.f32.mrf.mxu0 }
 0x183   : > { %v1868_v29 = vpack.c.bf16 %v1583_v24, %v1582_v23  ;;  %v1959_v31 = vadd.f32 %v1958_v26, %v1957_v21  ;;  %v1576_v32 = vadd.f32 %v1984_v30, %v1527_v25 }
 0x184   : > { %v1986_v27 = vpop.f32.mrf.mxu1 }
 0x185   : > { %1869 = vst [vmem:[%s758_s7] sm:$0xff] %v1868_v29   ;;  %v1530_v33 = vadd.f32 %v1959_v31, %v1481_v28  ;;  %v1987_v34 = vadd.f32 %v1986_v27, %v1985_v22  ;;  %v1584_v36 = vmax.f32 %v1576_v32, 0.0 }
 0x187   : > { %v1579_v35 = vadd.f32 %v1987_v34, %v1530_v33 }
 0x189   : > { %v1585_v37 = vmax.f32 %v1579_v35, 0.0  ;;  %1612 = sbr.rel (!%p2187_p6) target bundleno = 406 (0x196), region = 77 }
 0x18b   : > { %v1873_v38 = vpack.c.bf16 %v1585_v37, %v1584_v36 }
 0x18c   : > { %v1634_v39 = vld [vmem:[%s758_s7] sm:$0xf] (%p2187_p6)  ;;  %v1636_v40 = vld [vmem:[%s758_s7 + $0x4] sm:$0xf] (%p2187_p6) }
 0x18d   : > { %1875 = vst [vmem:[%s758_s7 + $0x8] sm:$0xff] %v1873_v38   ;;  %1635 = vst [vmem:[%s1617_s9] sm:$0xf] (%p2187_p6), %v1634_v39 }
 0x18e   : > { %1637 = vst [vmem:[%s1617_s9 + $0x10] sm:$0xf] %v1636_v40 }
 0x194   : > { %v1638_v41 = vld [vmem:[%s758_s7 + $0x8] sm:$0xf]  ;;  %v1640_v42 = vld [vmem:[%s758_s7 + $0xc] sm:$0xf] }
 0x195   : > { %1639 = vst [vmem:[%s1617_s9 + $0x20] sm:$0xf] %v1638_v41  ;;  %1641 = vst [vmem:[%s1617_s9 + $0x30] sm:$0xf] %v1640_v42 }
 0x196 PF: > { %s13_s16 = sadd.s32 1, %s2130_s16   ;;  %s2628_s12 = smov %s2118_s13 }
 0x197   : > { %p10_p12 = scmp.ge.s32.totalorder %s13_s16, 6   ;;  %s2629_s13 = smov %s2192_s22 }
 0x198   : > { %s2630_s14 = smov %s2126_s15  ;;  %s2631_s15 = smov %s2633_s17 }
 0x199   :  { %12 = sbr.rel (!%p10_p12) target bundleno = 3 (0x3), region = 155 }

// kernel: depth_encoder_forward.14
= control target key start
LH: loop header
LB: loop body
LE: loop exit
PB: predicated region body
PF: predicated region fallthrough
CT: control target
= control target key end

     0   :  { %s3228_s18 = smov 0   ;;  %s3230_s19 = smov 0   ;;  %s4032_s0 = inlined_call_operand.vmem [shape: bf16[32,256], index: 0, kind: input, shape index: {}]   ;;  %s4033_s1 = inlined_call_operand.vmem [shape: bf16[256,1024], index: 1, kind: input, shape index: {}]   ;;  %s4034_s2 = inlined_call_operand.vmem [shape: f32[1,1024], index: 2, kind: input, shape index: {}]   ;;  %s4035_s3 = inlined_call_operand.vmem [shape: bf16[32,512], index: 3, kind: input, shape index: {}]   ;;  %s4036_s4 = inlined_call_operand.vmem [shape: bf16[512,1024], index: 4, kind: input, shape index: {}]   ;;  %s4037_s5 = inlined_call_operand.vmem [shape: bf16[32,1024], index: 5, kind: output, shape index: {}]  }
   0x1   :  { %s3232_s20 = smov 0   ;;  %s3234_s21 = smov 0  }
   0x2   :  { %s3236_s22 = smov 0  }
   0x3 LB: > { %s24_s23 = sadd.s32 1, %s3192_s21  ;;  %s2567_s24 = sadd.s32 4294967295, %s3196_s22   ;;  %s3196_s22 = sphi %s3236_s22, %s15_s22   ;;  %s3192_s21 = sphi %s3234_s21, %s4043_s21   ;;  %s3188_s20 = sphi %s3232_s20, %s4042_s20   ;;  %s3184_s19 = sphi %s3230_s19, %s4041_s19   ;;  %s3180_s18 = sphi %s3228_s18, %s4040_s18  }
   0x4   : > { %p25_p0 = scmp.ge.s32.totalorder %s24_s23, 2  ;;  %p67_p1 = scmp.ne.s32.totalorder %s3184_s19, %s3180_s18 }
   0x5   : > { %p68_p2 = scmp.eq.s32.totalorder %s3196_s22, 0  ;;  %p177_p4 = scmp.eq.s32.totalorder %s2567_s24, 1 }
   0x6   : > { %s4045_s23 = smov (%p25_p0, %s24_s23), 0  ;;  %s60_s27 = sadd.s32 1, %s3184_s19 }
   0x7   : > { %p3260_p3 = por %p68_p2, %p67_p1  ;;  %s57_s26 = ssub.s32 %s3192_s21, %s4045_s23 }
   0x8   : > { %p58_p5 = scmp.eq.s32.totalorder %s57_s26, 0  ;;  %p3267_p6 = por %p177_p4, %p67_p1 }
   0x9   : > { %p2572_p7 = scmp.ge.s32.totalorder %s3196_s22, 2 }
   0xa   : > { %s3272_s29 = scalar_select %p58_p5, %s3184_s19, %s60_s27  }
   0xb   : > { %219 = sbr.rel (%p2572_p7) target bundleno = 120 (0x78), region = 24 }
  0x10   : > { %222 = sbr.rel (!%p3260_p3) target bundleno = 52 (0x34), region = 28  ;;  %s224_s30 = sand.u32 (%p3260_p3), 1, %s3184_s19  }
  0x11   : > { %s2801_s6 = sshll.u32 (%p3260_p3), %s3192_s21, 4  ;;  %s2573_s7 = sshll.u32 (%p3260_p3), %s224_s30, 9 }
  0x12   : > { %s3282_s10 = scalar_lea.vmem (%p3260_p3), %s4033_s1, %s2801_s6  ;;  %s3287_s11 = scalar_lea.vmem (%p3260_p3), [#allocation2], %s2573_s7 }
  0x13   : > { %v242_v0 = vld [vmem:[%s3282_s10] sm:$0xff] (%p3260_p3)  ;;  %v244_v1 = vld [vmem:[%s3282_s10 + $0x8] sm:$0xff] (%p3260_p3) }
  0x14   : > { %v246_v2 = vld [vmem:[%s3282_s10 + $0x20] sm:$0xff] (%p3260_p3)  ;;  %243 = vst [vmem:[%s3287_s11] sm:$0xff] (%p3260_p3), %v242_v0  ;;  %245 = vst [vmem:[%s3287_s11 + $0x8] sm:$0xff] (%p3260_p3), %v244_v1  ;;  %v248_v3 = vld [vmem:[%s3282_s10 + $0x28] sm:$0xff] (%p3260_p3) }
  0x15   : > { %247 = vst [vmem:[%s3287_s11 + $0x10] sm:$0xff] %v246_v2  ;;  %v250_v4 = vld [vmem:[%s3282_s10 + $0x40] sm:$0xff]  ;;  %v252_v5 = vld [vmem:[%s3282_s10 + $0x48] sm:$0xff]  ;;  %249 = vst [vmem:[%s3287_s11 + $0x18] sm:$0xff] %v248_v3 }
  0x16   : > { %251 = vst [vmem:[%s3287_s11 + $0x20] sm:$0xff] %v250_v4  ;;  %253 = vst [vmem:[%s3287_s11 + $0x28] sm:$0xff] %v252_v5  ;;  %v254_v6 = vld [vmem:[%s3282_s10 + $0x60] sm:$0xff]  ;;  %v256_v7 = vld [vmem:[%s3282_s10 + $0x68] sm:$0xff] }
  0x17   : > { %v258_v8 = vld [vmem:[%s3282_s10 + $0x80] sm:$0xff]  ;;  %255 = vst [vmem:[%s3287_s11 + $0x30] sm:$0xff] %v254_v6  ;;  %257 = vst [vmem:[%s3287_s11 + $0x38] sm:$0xff] %v256_v7  ;;  %v260_v9 = vld [vmem:[%s3282_s10 + $0x88] sm:$0xff] }
  0x18   : > { %259 = vst [vmem:[%s3287_s11 + $0x40] sm:$0xff] %v258_v8  ;;  %v262_v10 = vld [vmem:[%s3282_s10 + $0xa0] sm:$0xff]  ;;  %v264_v11 = vld [vmem:[%s3282_s10 + $0xa8] sm:$0xff]  ;;  %261 = vst [vmem:[%s3287_s11 + $0x48] sm:$0xff] %v260_v9 }
  0x19   : > { %263 = vst [vmem:[%s3287_s11 + $0x50] sm:$0xff] %v262_v10  ;;  %265 = vst [vmem:[%s3287_s11 + $0x58] sm:$0xff] %v264_v11  ;;  %v266_v12 = vld [vmem:[%s3282_s10 + $0xc0] sm:$0xff]  ;;  %v268_v13 = vld [vmem:[%s3282_s10 + $0xc8] sm:$0xff] }
  0x1a   : > { %v270_v14 = vld [vmem:[%s3282_s10 + $0xe0] sm:$0xff]  ;;  %267 = vst [vmem:[%s3287_s11 + $0x60] sm:$0xff] %v266_v12  ;;  %269 = vst [vmem:[%s3287_s11 + $0x68] sm:$0xff] %v268_v13  ;;  %v272_v15 = vld [vmem:[%s3282_s10 + $0xe8] sm:$0xff] }
  0x1b   : > { %271 = vst [vmem:[%s3287_s11 + $0x70] sm:$0xff] %v270_v14  ;;  %v274_v16 = vld [vmem:[%s3282_s10 + $0x100] sm:$0xff]  ;;  %v276_v17 = vld [vmem:[%s3282_s10 + $0x108] sm:$0xff]  ;;  %273 = vst [vmem:[%s3287_s11 + $0x78] sm:$0xff] %v272_v15 }
  0x1c   : > { %275 = vst [vmem:[%s3287_s11 + $0x80] sm:$0xff] %v274_v16  ;;  %277 = vst [vmem:[%s3287_s11 + $0x88] sm:$0xff] %v276_v17  ;;  %v278_v18 = vld [vmem:[%s3282_s10 + $0x120] sm:$0xff]  ;;  %v280_v19 = vld [vmem:[%s3282_s10 + $0x128] sm:$0xff] }
  0x1d   : > { %v282_v20 = vld [vmem:[%s3282_s10 + $0x140] sm:$0xff]  ;;  %279 = vst [vmem:[%s3287_s11 + $0x90] sm:$0xff] %v278_v18  ;;  %281 = vst [vmem:[%s3287_s11 + $0x98] sm:$0xff] %v280_v19  ;;  %v284_v21 = vld [vmem:[%s3282_s10 + $0x148] sm:$0xff] }
  0x1e   : > { %283 = vst [vmem:[%s3287_s11 + $0xa0] sm:$0xff] %v282_v20  ;;  %v286_v22 = vld [vmem:[%s3282_s10 + $0x160] sm:$0xff]  ;;  %v288_v23 = vld [vmem:[%s3282_s10 + $0x168] sm:$0xff]  ;;  %285 = vst [vmem:[%s3287_s11 + $0xa8] sm:$0xff] %v284_v21 }
  0x1f   : > { %287 = vst [vmem:[%s3287_s11 + $0xb0] sm:$0xff] %v286_v22  ;;  %289 = vst [vmem:[%s3287_s11 + $0xb8] sm:$0xff] %v288_v23  ;;  %v290_v24 = vld [vmem:[%s3282_s10 + $0x180] sm:$0xff]  ;;  %v292_v25 = vld [vmem:[%s3282_s10 + $0x188] sm:$0xff] }
  0x20   : > { %v294_v26 = vld [vmem:[%s3282_s10 + $0x1a0] sm:$0xff]  ;;  %291 = vst [vmem:[%s3287_s11 + $0xc0] sm:$0xff] %v290_v24  ;;  %293 = vst [vmem:[%s3287_s11 + $0xc8] sm:$0xff] %v292_v25  ;;  %v296_v27 = vld [vmem:[%s3282_s10 + $0x1a8] sm:$0xff] }
  0x21   : > { %295 = vst [vmem:[%s3287_s11 + $0xd0] sm:$0xff] %v294_v26  ;;  %v298_v28 = vld [vmem:[%s3282_s10 + $0x1c0] sm:$0xff]  ;;  %v300_v29 = vld [vmem:[%s3282_s10 + $0x1c8] sm:$0xff]  ;;  %297 = vst [vmem:[%s3287_s11 + $0xd8] sm:$0xff] %v296_v27 }
  0x22   : > { %299 = vst [vmem:[%s3287_s11 + $0xe0] sm:$0xff] %v298_v28  ;;  %301 = vst [vmem:[%s3287_s11 + $0xe8] sm:$0xff] %v300_v29  ;;  %v302_v30 = vld [vmem:[%s3282_s10 + $0x1e0] sm:$0xff]  ;;  %v304_v31 = vld [vmem:[%s3282_s10 + $0x1e8] sm:$0xff] }
  0x23   : > { %v306_v32 = vld [vmem:[%s3282_s10 + $0x200] sm:$0xff]  ;;  %303 = vst [vmem:[%s3287_s11 + $0xf0] sm:$0xff] %v302_v30  ;;  %305 = vst [vmem:[%s3287_s11 + $0xf8] sm:$0xff] %v304_v31  ;;  %v308_v33 = vld [vmem:[%s3282_s10 + $0x208] sm:$0xff] }
  0x24   : > { %307 = vst [vmem:[%s3287_s11 + $0x100] sm:$0xff] %v306_v32  ;;  %v310_v34 = vld [vmem:[%s3282_s10 + $0x220] sm:$0xff]  ;;  %v312_v35 = vld [vmem:[%s3282_s10 + $0x228] sm:$0xff]  ;;  %309 = vst [vmem:[%s3287_s11 + $0x108] sm:$0xff] %v308_v33 }
  0x25   : > { %311 = vst [vmem:[%s3287_s11 + $0x110] sm:$0xff] %v310_v34  ;;  %313 = vst [vmem:[%s3287_s11 + $0x118] sm:$0xff] %v312_v35  ;;  %v314_v36 = vld [vmem:[%s3282_s10 + $0x240] sm:$0xff]  ;;  %v316_v37 = vld [vmem:[%s3282_s10 + $0x248] sm:$0xff] }
  0x26   : > { %v318_v38 = vld [vmem:[%s3282_s10 + $0x260] sm:$0xff]  ;;  %315 = vst [vmem:[%s3287_s11 + $0x120] sm:$0xff] %v314_v36  ;;  %317 = vst [vmem:[%s3287_s11 + $0x128] sm:$0xff] %v316_v37  ;;  %v320_v39 = vld [vmem:[%s3282_s10 + $0x268] sm:$0xff] }
  0x27   : > { %319 = vst [vmem:[%s3287_s11 + $0x130] sm:$0xff] %v318_v38  ;;  %v322_v40 = vld [vmem:[%s3282_s10 + $0x280] sm:$0xff]  ;;  %v324_v41 = vld [vmem:[%s3282_s10 + $0x288] sm:$0xff]  ;;  %321 = vst [vmem:[%s3287_s11 + $0x138] sm:$0xff] %v320_v39 }
  0x28   : > { %323 = vst [vmem:[%s3287_s11 + $0x140] sm:$0xff] %v322_v40  ;;  %325 = vst [vmem:[%s3287_s11 + $0x148] sm:$0xff] %v324_v41  ;;  %v326_v42 = vld [vmem:[%s3282_s10 + $0x2a0] sm:$0xff]  ;;  %v328_v43 = vld [vmem:[%s3282_s10 + $0x2a8] sm:$0xff] }
  0x29   : > { %v330_v44 = vld [vmem:[%s3282_s10 + $0x2c0] sm:$0xff]  ;;  %327 = vst [vmem:[%s3287_s11 + $0x150] sm:$0xff] %v326_v42  ;;  %329 = vst [vmem:[%s3287_s11 + $0x158] sm:$0xff] %v328_v43  ;;  %v332_v45 = vld [vmem:[%s3282_s10 + $0x2c8] sm:$0xff] }
  0x2a   : > { %331 = vst [vmem:[%s3287_s11 + $0x160] sm:$0xff] %v330_v44  ;;  %v334_v46 = vld [vmem:[%s3282_s10 + $0x2e0] sm:$0xff]  ;;  %v336_v47 = vld [vmem:[%s3282_s10 + $0x2e8] sm:$0xff]  ;;  %333 = vst [vmem:[%s3287_s11 + $0x168] sm:$0xff] %v332_v45 }
  0x2b   : > { %335 = vst [vmem:[%s3287_s11 + $0x170] sm:$0xff] %v334_v46  ;;  %337 = vst [vmem:[%s3287_s11 + $0x178] sm:$0xff] %v336_v47  ;;  %v338_v48 = vld [vmem:[%s3282_s10 + $0x300] sm:$0xff]  ;;  %v340_v49 = vld [vmem:[%s3282_s10 + $0x308] sm:$0xff] }
  0x2c   : > { %v342_v50 = vld [vmem:[%s3282_s10 + $0x320] sm:$0xff]  ;;  %339 = vst [vmem:[%s3287_s11 + $0x180] sm:$0xff] %v338_v48  ;;  %341 = vst [vmem:[%s3287_s11 + $0x188] sm:$0xff] %v340_v49  ;;  %v344_v51 = vld [vmem:[%s3282_s10 + $0x328] sm:$0xff] }
  0x2d   : > { %343 = vst [vmem:[%s3287_s11 + $0x190] sm:$0xff] %v342_v50  ;;  %v346_v52 = vld [vmem:[%s3282_s10 + $0x340] sm:$0xff]  ;;  %v348_v53 = vld [vmem:[%s3282_s10 + $0x348] sm:$0xff]  ;;  %345 = vst [vmem:[%s3287_s11 + $0x198] sm:$0xff] %v344_v51 }
  0x2e   : > { %347 = vst [vmem:[%s3287_s11 + $0x1a0] sm:$0xff] %v346_v52  ;;  %349 = vst [vmem:[%s3287_s11 + $0x1a8] sm:$0xff] %v348_v53  ;;  %v350_v54 = vld [vmem:[%s3282_s10 + $0x360] sm:$0xff]  ;;  %v352_v55 = vld [vmem:[%s3282_s10 + $0x368] sm:$0xff] }
  0x2f   : > { %v354_v56 = vld [vmem:[%s3282_s10 + $0x380] sm:$0xff]  ;;  %351 = vst [vmem:[%s3287_s11 + $0x1b0] sm:$0xff] %v350_v54  ;;  %353 = vst [vmem:[%s3287_s11 + $0x1b8] sm:$0xff] %v352_v55  ;;  %v356_v57 = vld [vmem:[%s3282_s10 + $0x388] sm:$0xff] }
  0x30   : > { %355 = vst [vmem:[%s3287_s11 + $0x1c0] sm:$0xff] %v354_v56  ;;  %v358_v58 = vld [vmem:[%s3282_s10 + $0x3a0] sm:$0xff]  ;;  %v360_v59 = vld [vmem:[%s3282_s10 + $0x3a8] sm:$0xff]  ;;  %357 = vst [vmem:[%s3287_s11 + $0x1c8] sm:$0xff] %v356_v57 }
  0x31   : > { %359 = vst [vmem:[%s3287_s11 + $0x1d0] sm:$0xff] %v358_v58  ;;  %361 = vst [vmem:[%s3287_s11 + $0x1d8] sm:$0xff] %v360_v59  ;;  %v362_v60 = vld [vmem:[%s3282_s10 + $0x3c0] sm:$0xff]  ;;  %v364_v61 = vld [vmem:[%s3282_s10 + $0x3c8] sm:$0xff] }
  0x32   : > { %v366_v62 = vld [vmem:[%s3282_s10 + $0x3e0] sm:$0xff]  ;;  %363 = vst [vmem:[%s3287_s11 + $0x1e0] sm:$0xff] %v362_v60  ;;  %365 = vst [vmem:[%s3287_s11 + $0x1e8] sm:$0xff] %v364_v61  ;;  %v368_v63 = vld [vmem:[%s3282_s10 + $0x3e8] sm:$0xff] }
  0x33   : > { %367 = vst [vmem:[%s3287_s11 + $0x1f0] sm:$0xff] %v366_v62  ;;  %369 = vst [vmem:[%s3287_s11 + $0x1f8] sm:$0xff] %v368_v63 }
  0x34 PF: > { %383 = sbr.rel (!%p3260_p3) target bundleno = 120 (0x78), region = 55  ;;  %s385_s12 = sand.u32 (%p3260_p3), 1, %s3184_s19  }
  0x35   : > { %s2802_s13 = sshll.u32 (%p3260_p3), %s3192_s21, 4  ;;  %s2576_s14 = sshll.u32 (%p3260_p3), %s385_s12, 10 }
  0x36   : > { %s3421_s17 = scalar_lea.vmem (%p3260_p3), %s4036_s4, %s2802_s13  ;;  %s3426_s24 = scalar_lea.vmem (%p3260_p3), [#allocation3], %s2576_s14 }
  0x37   : > { %v403_v0 = vld [vmem:[%s3421_s17] sm:$0xff] (%p3260_p3)  ;;  %v405_v1 = vld [vmem:[%s3421_s17 + $0x8] sm:$0xff] (%p3260_p3) }
  0x38   : > { %v407_v2 = vld [vmem:[%s3421_s17 + $0x20] sm:$0xff] (%p3260_p3)  ;;  %404 = vst [vmem:[%s3426_s24] sm:$0xff] (%p3260_p3), %v403_v0  ;;  %406 = vst [vmem:[%s3426_s24 + $0x8] sm:$0xff] (%p3260_p3), %v405_v1  ;;  %v409_v3 = vld [vmem:[%s3421_s17 + $0x28] sm:$0xff] (%p3260_p3) }
  0x39   : > { %408 = vst [vmem:[%s3426_s24 + $0x10] sm:$0xff] %v407_v2  ;;  %v411_v4 = vld [vmem:[%s3421_s17 + $0x40] sm:$0xff]  ;;  %v413_v5 = vld [vmem:[%s3421_s17 + $0x48] sm:$0xff]  ;;  %410 = vst [vmem:[%s3426_s24 + $0x18] sm:$0xff] %v409_v3 }
  0x3a   : > { %412 = vst [vmem:[%s3426_s24 + $0x20] sm:$0xff] %v411_v4  ;;  %414 = vst [vmem:[%s3426_s24 + $0x28] sm:$0xff] %v413_v5  ;;  %v415_v6 = vld [vmem:[%s3421_s17 + $0x60] sm:$0xff]  ;;  %v417_v7 = vld [vmem:[%s3421_s17 + $0x68] sm:$0xff] }
  0x3b   : > { %v419_v8 = vld [vmem:[%s3421_s17 + $0x80] sm:$0xff]  ;;  %416 = vst [vmem:[%s3426_s24 + $0x30] sm:$0xff] %v415_v6  ;;  %418 = vst [vmem:[%s3426_s24 + $0x38] sm:$0xff] %v417_v7  ;;  %v421_v9 = vld [vmem:[%s3421_s17 + $0x88] sm:$0xff] }
  0x3c   : > { %420 = vst [vmem:[%s3426_s24 + $0x40] sm:$0xff] %v419_v8  ;;  %v423_v10 = vld [vmem:[%s3421_s17 + $0xa0] sm:$0xff]  ;;  %v425_v11 = vld [vmem:[%s3421_s17 + $0xa8] sm:$0xff]  ;;  %422 = vst [vmem:[%s3426_s24 + $0x48] sm:$0xff] %v421_v9 }
  0x3d   : > { %424 = vst [vmem:[%s3426_s24 + $0x50] sm:$0xff] %v423_v10  ;;  %426 = vst [vmem:[%s3426_s24 + $0x58] sm:$0xff] %v425_v11  ;;  %v427_v12 = vld [vmem:[%s3421_s17 + $0xc0] sm:$0xff]  ;;  %v429_v13 = vld [vmem:[%s3421_s17 + $0xc8] sm:$0xff] }
  0x3e   : > { %v431_v14 = vld [vmem:[%s3421_s17 + $0xe0] sm:$0xff]  ;;  %428 = vst [vmem:[%s3426_s24 + $0x60] sm:$0xff] %v427_v12  ;;  %430 = vst [vmem:[%s3426_s24 + $0x68] sm:$0xff] %v429_v13  ;;  %v433_v15 = vld [vmem:[%s3421_s17 + $0xe8] sm:$0xff] }
  0x3f   : > { %432 = vst [vmem:[%s3426_s24 + $0x70] sm:$0xff] %v431_v14  ;;  %v435_v16 = vld [vmem:[%s3421_s17 + $0x100] sm:$0xff]  ;;  %v437_v17 = vld [vmem:[%s3421_s17 + $0x108] sm:$0xff]  ;;  %434 = vst [vmem:[%s3426_s24 + $0x78] sm:$0xff] %v433_v15 }
  0x40   : > { %436 = vst [vmem:[%s3426_s24 + $0x80] sm:$0xff] %v435_v16  ;;  %438 = vst [vmem:[%s3426_s24 + $0x88] sm:$0xff] %v437_v17  ;;  %v439_v18 = vld [vmem:[%s3421_s17 + $0x120] sm:$0xff]  ;;  %v441_v19 = vld [vmem:[%s3421_s17 + $0x128] sm:$0xff] }
  0x41   : > { %v443_v20 = vld [vmem:[%s3421_s17 + $0x140] sm:$0xff]  ;;  %440 = vst [vmem:[%s3426_s24 + $0x90] sm:$0xff] %v439_v18  ;;  %442 = vst [vmem:[%s3426_s24 + $0x98] sm:$0xff] %v441_v19  ;;  %v445_v21 = vld [vmem:[%s3421_s17 + $0x148] sm:$0xff] }
  0x42   : > { %444 = vst [vmem:[%s3426_s24 + $0xa0] sm:$0xff] %v443_v20  ;;  %v447_v22 = vld [vmem:[%s3421_s17 + $0x160] sm:$0xff]  ;;  %v449_v23 = vld [vmem:[%s3421_s17 + $0x168] sm:$0xff]  ;;  %446 = vst [vmem:[%s3426_s24 + $0xa8] sm:$0xff] %v445_v21 }
  0x43   : > { %448 = vst [vmem:[%s3426_s24 + $0xb0] sm:$0xff] %v447_v22  ;;  %450 = vst [vmem:[%s3426_s24 + $0xb8] sm:$0xff] %v449_v23  ;;  %v451_v24 = vld [vmem:[%s3421_s17 + $0x180] sm:$0xff]  ;;  %v453_v25 = vld [vmem:[%s3421_s17 + $0x188] sm:$0xff] }
  0x44   : > { %v455_v26 = vld [vmem:[%s3421_s17 + $0x1a0] sm:$0xff]  ;;  %452 = vst [vmem:[%s3426_s24 + $0xc0] sm:$0xff] %v451_v24  ;;  %454 = vst [vmem:[%s3426_s24 + $0xc8] sm:$0xff] %v453_v25  ;;  %v457_v27 = vld [vmem:[%s3421_s17 + $0x1a8] sm:$0xff] }
  0x45   : > { %456 = vst [vmem:[%s3426_s24 + $0xd0] sm:$0xff] %v455_v26  ;;  %v459_v28 = vld [vmem:[%s3421_s17 + $0x1c0] sm:$0xff]  ;;  %v461_v29 = vld [vmem:[%s3421_s17 + $0x1c8] sm:$0xff]  ;;  %458 = vst [vmem:[%s3426_s24 + $0xd8] sm:$0xff] %v457_v27 }
  0x46   : > { %460 = vst [vmem:[%s3426_s24 + $0xe0] sm:$0xff] %v459_v28  ;;  %462 = vst [vmem:[%s3426_s24 + $0xe8] sm:$0xff] %v461_v29  ;;  %v463_v30 = vld [vmem:[%s3421_s17 + $0x1e0] sm:$0xff]  ;;  %v465_v31 = vld [vmem:[%s3421_s17 + $0x1e8] sm:$0xff] }
  0x47   : > { %v467_v32 = vld [vmem:[%s3421_s17 + $0x200] sm:$0xff]  ;;  %464 = vst [vmem:[%s3426_s24 + $0xf0] sm:$0xff] %v463_v30  ;;  %466 = vst [vmem:[%s3426_s24 + $0xf8] sm:$0xff] %v465_v31  ;;  %v469_v33 = vld [vmem:[%s3421_s17 + $0x208] sm:$0xff] }
  0x48   : > { %468 = vst [vmem:[%s3426_s24 + $0x100] sm:$0xff] %v467_v32  ;;  %v471_v34 = vld [vmem:[%s3421_s17 + $0x220] sm:$0xff]  ;;  %v473_v35 = vld [vmem:[%s3421_s17 + $0x228] sm:$0xff]  ;;  %470 = vst [vmem:[%s3426_s24 + $0x108] sm:$0xff] %v469_v33 }
  0x49   : > { %472 = vst [vmem:[%s3426_s24 + $0x110] sm:$0xff] %v471_v34  ;;  %474 = vst [vmem:[%s3426_s24 + $0x118] sm:$0xff] %v473_v35  ;;  %v475_v36 = vld [vmem:[%s3421_s17 + $0x240] sm:$0xff]  ;;  %v477_v37 = vld [vmem:[%s3421_s17 + $0x248] sm:$0xff] }
  0x4a   : > { %v479_v38 = vld [vmem:[%s3421_s17 + $0x260] sm:$0xff]  ;;  %476 = vst [vmem:[%s3426_s24 + $0x120] sm:$0xff] %v475_v36  ;;  %478 = vst [vmem:[%s3426_s24 + $0x128] sm:$0xff] %v477_v37  ;;  %v481_v39 = vld [vmem:[%s3421_s17 + $0x268] sm:$0xff] }
  0x4b   : > { %480 = vst [vmem:[%s3426_s24 + $0x130] sm:$0xff] %v479_v38  ;;  %v483_v40 = vld [vmem:[%s3421_s17 + $0x280] sm:$0xff]  ;;  %v485_v41 = vld [vmem:[%s3421_s17 + $0x288] sm:$0xff]  ;;  %482 = vst [vmem:[%s3426_s24 + $0x138] sm:$0xff] %v481_v39 }
  0x4c   : > { %484 = vst [vmem:[%s3426_s24 + $0x140] sm:$0xff] %v483_v40  ;;  %486 = vst [vmem:[%s3426_s24 + $0x148] sm:$0xff] %v485_v41  ;;  %v487_v42 = vld [vmem:[%s3421_s17 + $0x2a0] sm:$0xff]  ;;  %v489_v43 = vld [vmem:[%s3421_s17 + $0x2a8] sm:$0xff] }
  0x4d   : > { %v491_v44 = vld [vmem:[%s3421_s17 + $0x2c0] sm:$0xff]  ;;  %488 = vst [vmem:[%s3426_s24 + $0x150] sm:$0xff] %v487_v42  ;;  %490 = vst [vmem:[%s3426_s24 + $0x158] sm:$0xff] %v489_v43  ;;  %v493_v45 = vld [vmem:[%s3421_s17 + $0x2c8] sm:$0xff] }
  0x4e   : > { %492 = vst [vmem:[%s3426_s24 + $0x160] sm:$0xff] %v491_v44  ;;  %v495_v46 = vld [vmem:[%s3421_s17 + $0x2e0] sm:$0xff]  ;;  %v497_v47 = vld [vmem:[%s3421_s17 + $0x2e8] sm:$0xff]  ;;  %494 = vst [vmem:[%s3426_s24 + $0x168] sm:$0xff] %v493_v45 }
  0x4f   : > { %496 = vst [vmem:[%s3426_s24 + $0x170] sm:$0xff] %v495_v46  ;;  %498 = vst [vmem:[%s3426_s24 + $0x178] sm:$0xff] %v497_v47  ;;  %v499_v48 = vld [vmem:[%s3421_s17 + $0x300] sm:$0xff]  ;;  %v501_v49 = vld [vmem:[%s3421_s17 + $0x308] sm:$0xff] }
  0x50   : > { %v503_v50 = vld [vmem:[%s3421_s17 + $0x320] sm:$0xff]  ;;  %500 = vst [vmem:[%s3426_s24 + $0x180] sm:$0xff] %v499_v48  ;;  %502 = vst [vmem:[%s3426_s24 + $0x188] sm:$0xff] %v501_v49  ;;  %v505_v51 = vld [vmem:[%s3421_s17 + $0x328] sm:$0xff] }
  0x51   : > { %504 = vst [vmem:[%s3426_s24 + $0x190] sm:$0xff] %v503_v50  ;;  %v507_v52 = vld [vmem:[%s3421_s17 + $0x340] sm:$0xff]  ;;  %v509_v53 = vld [vmem:[%s3421_s17 + $0x348] sm:$0xff]  ;;  %506 = vst [vmem:[%s3426_s24 + $0x198] sm:$0xff] %v505_v51 }
  0x52   : > { %508 = vst [vmem:[%s3426_s24 + $0x1a0] sm:$0xff] %v507_v52  ;;  %510 = vst [vmem:[%s3426_s24 + $0x1a8] sm:$0xff] %v509_v53  ;;  %v511_v54 = vld [vmem:[%s3421_s17 + $0x360] sm:$0xff]  ;;  %v513_v55 = vld [vmem:[%s3421_s17 + $0x368] sm:$0xff] }
  0x53   : > { %v515_v56 = vld [vmem:[%s3421_s17 + $0x380] sm:$0xff]  ;;  %512 = vst [vmem:[%s3426_s24 + $0x1b0] sm:$0xff] %v511_v54  ;;  %514 = vst [vmem:[%s3426_s24 + $0x1b8] sm:$0xff] %v513_v55  ;;  %v517_v57 = vld [vmem:[%s3421_s17 + $0x388] sm:$0xff] }
  0x54   : > { %516 = vst [vmem:[%s3426_s24 + $0x1c0] sm:$0xff] %v515_v56  ;;  %v519_v58 = vld [vmem:[%s3421_s17 + $0x3a0] sm:$0xff]  ;;  %v521_v59 = vld [vmem:[%s3421_s17 + $0x3a8] sm:$0xff]  ;;  %518 = vst [vmem:[%s3426_s24 + $0x1c8] sm:$0xff] %v517_v57 }
  0x55   : > { %520 = vst [vmem:[%s3426_s24 + $0x1d0] sm:$0xff] %v519_v58  ;;  %522 = vst [vmem:[%s3426_s24 + $0x1d8] sm:$0xff] %v521_v59  ;;  %v523_v60 = vld [vmem:[%s3421_s17 + $0x3c0] sm:$0xff]  ;;  %v525_v61 = vld [vmem:[%s3421_s17 + $0x3c8] sm:$0xff] }
  0x56   : > { %v527_v62 = vld [vmem:[%s3421_s17 + $0x3e0] sm:$0xff]  ;;  %524 = vst [vmem:[%s3426_s24 + $0x1e0] sm:$0xff] %v523_v60  ;;  %526 = vst [vmem:[%s3426_s24 + $0x1e8] sm:$0xff] %v525_v61  ;;  %v529_v63 = vld [vmem:[%s3421_s17 + $0x3e8] sm:$0xff] }
  0x57   : > { %528 = vst [vmem:[%s3426_s24 + $0x1f0] sm:$0xff] %v527_v62  ;;  %v531_v0 = vld [vmem:[%s3421_s17 + $0x400] sm:$0xff]  ;;  %v533_v1 = vld [vmem:[%s3421_s17 + $0x408] sm:$0xff]  ;;  %530 = vst [vmem:[%s3426_s24 + $0x1f8] sm:$0xff] %v529_v63 }
  0x58   : > { %532 = vst [vmem:[%s3426_s24 + $0x200] sm:$0xff] %v531_v0  ;;  %534 = vst [vmem:[%s3426_s24 + $0x208] sm:$0xff] %v533_v1  ;;  %v535_v2 = vld [vmem:[%s3421_s17 + $0x420] sm:$0xff]  ;;  %v537_v3 = vld [vmem:[%s3421_s17 + $0x428] sm:$0xff] }
  0x59   : > { %v539_v4 = vld [vmem:[%s3421_s17 + $0x440] sm:$0xff]  ;;  %536 = vst [vmem:[%s3426_s24 + $0x210] sm:$0xff] %v535_v2  ;;  %538 = vst [vmem:[%s3426_s24 + $0x218] sm:$0xff] %v537_v3  ;;  %v541_v5 = vld [vmem:[%s3421_s17 + $0x448] sm:$0xff] }
  0x5a   : > { %540 = vst [vmem:[%s3426_s24 + $0x220] sm:$0xff] %v539_v4  ;;  %v543_v6 = vld [vmem:[%s3421_s17 + $0x460] sm:$0xff]  ;;  %v545_v7 = vld [vmem:[%s3421_s17 + $0x468] sm:$0xff]  ;;  %542 = vst [vmem:[%s3426_s24 + $0x228] sm:$0xff] %v541_v5 }
  0x5b   : > { %544 = vst [vmem:[%s3426_s24 + $0x230] sm:$0xff] %v543_v6  ;;  %546 = vst [vmem:[%s3426_s24 + $0x238] sm:$0xff] %v545_v7  ;;  %v547_v8 = vld [vmem:[%s3421_s17 + $0x480] sm:$0xff]  ;;  %v549_v9 = vld [vmem:[%s3421_s17 + $0x488] sm:$0xff] }
  0x5c   : > { %v551_v10 = vld [vmem:[%s3421_s17 + $0x4a0] sm:$0xff]  ;;  %548 = vst [vmem:[%s3426_s24 + $0x240] sm:$0xff] %v547_v8  ;;  %550 = vst [vmem:[%s3426_s24 + $0x248] sm:$0xff] %v549_v9  ;;  %v553_v11 = vld [vmem:[%s3421_s17 + $0x4a8] sm:$0xff] }
  0x5d   : > { %552 = vst [vmem:[%s3426_s24 + $0x250] sm:$0xff] %v551_v10  ;;  %v555_v12 = vld [vmem:[%s3421_s17 + $0x4c0] sm:$0xff]  ;;  %v557_v13 = vld [vmem:[%s3421_s17 + $0x4c8] sm:$0xff]  ;;  %554 = vst [vmem:[%s3426_s24 + $0x258] sm:$0xff] %v553_v11 }
  0x5e   : > { %556 = vst [vmem:[%s3426_s24 + $0x260] sm:$0xff] %v555_v12  ;;  %558 = vst [vmem:[%s3426_s24 + $0x268] sm:$0xff] %v557_v13  ;;  %v559_v14 = vld [vmem:[%s3421_s17 + $0x4e0] sm:$0xff]  ;;  %v561_v15 = vld [vmem:[%s3421_s17 + $0x4e8] sm:$0xff] }
  0x5f   : > { %v563_v16 = vld [vmem:[%s3421_s17 + $0x500] sm:$0xff]  ;;  %560 = vst [vmem:[%s3426_s24 + $0x270] sm:$0xff] %v559_v14  ;;  %562 = vst [vmem:[%s3426_s24 + $0x278] sm:$0xff] %v561_v15  ;;  %v565_v17 = vld [vmem:[%s3421_s17 + $0x508] sm:$0xff] }
  0x60   : > { %564 = vst [vmem:[%s3426_s24 + $0x280] sm:$0xff] %v563_v16  ;;  %v567_v18 = vld [vmem:[%s3421_s17 + $0x520] sm:$0xff]  ;;  %v569_v19 = vld [vmem:[%s3421_s17 + $0x528] sm:$0xff]  ;;  %566 = vst [vmem:[%s3426_s24 + $0x288] sm:$0xff] %v565_v17 }
  0x61   : > { %568 = vst [vmem:[%s3426_s24 + $0x290] sm:$0xff] %v567_v18  ;;  %570 = vst [vmem:[%s3426_s24 + $0x298] sm:$0xff] %v569_v19  ;;  %v571_v20 = vld [vmem:[%s3421_s17 + $0x540] sm:$0xff]  ;;  %v573_v21 = vld [vmem:[%s3421_s17 + $0x548] sm:$0xff] }
  0x62   : > { %v575_v22 = vld [vmem:[%s3421_s17 + $0x560] sm:$0xff]  ;;  %572 = vst [vmem:[%s3426_s24 + $0x2a0] sm:$0xff] %v571_v20  ;;  %574 = vst [vmem:[%s3426_s24 + $0x2a8] sm:$0xff] %v573_v21  ;;  %v577_v23 = vld [vmem:[%s3421_s17 + $0x568] sm:$0xff] }
  0x63   : > { %576 = vst [vmem:[%s3426_s24 + $0x2b0] sm:$0xff] %v575_v22  ;;  %v579_v24 = vld [vmem:[%s3421_s17 + $0x580] sm:$0xff]  ;;  %v581_v25 = vld [vmem:[%s3421_s17 + $0x588] sm:$0xff]  ;;  %578 = vst [vmem:[%s3426_s24 + $0x2b8] sm:$0xff] %v577_v23 }
  0x64   : > { %580 = vst [vmem:[%s3426_s24 + $0x2c0] sm:$0xff] %v579_v24  ;;  %582 = vst [vmem:[%s3426_s24 + $0x2c8] sm:$0xff] %v581_v25  ;;  %v583_v26 = vld [vmem:[%s3421_s17 + $0x5a0] sm:$0xff]  ;;  %v585_v27 = vld [vmem:[%s3421_s17 + $0x5a8] sm:$0xff] }
  0x65   : > { %v587_v28 = vld [vmem:[%s3421_s17 + $0x5c0] sm:$0xff]  ;;  %584 = vst [vmem:[%s3426_s24 + $0x2d0] sm:$0xff] %v583_v26  ;;  %586 = vst [vmem:[%s3426_s24 + $0x2d8] sm:$0xff] %v585_v27  ;;  %v589_v29 = vld [vmem:[%s3421_s17 + $0x5c8] sm:$0xff] }
  0x66   : > { %588 = vst [vmem:[%s3426_s24 + $0x2e0] sm:$0xff] %v587_v28  ;;  %v591_v30 = vld [vmem:[%s3421_s17 + $0x5e0] sm:$0xff]  ;;  %v593_v31 = vld [vmem:[%s3421_s17 + $0x5e8] sm:$0xff]  ;;  %590 = vst [vmem:[%s3426_s24 + $0x2e8] sm:$0xff] %v589_v29 }
  0x67   : > { %592 = vst [vmem:[%s3426_s24 + $0x2f0] sm:$0xff] %v591_v30  ;;  %594 = vst [vmem:[%s3426_s24 + $0x2f8] sm:$0xff] %v593_v31  ;;  %v595_v32 = vld [vmem:[%s3421_s17 + $0x600] sm:$0xff]  ;;  %v597_v33 = vld [vmem:[%s3421_s17 + $0x608] sm:$0xff] }
  0x68   : > { %v599_v34 = vld [vmem:[%s3421_s17 + $0x620] sm:$0xff]  ;;  %596 = vst [vmem:[%s3426_s24 + $0x300] sm:$0xff] %v595_v32  ;;  %598 = vst [vmem:[%s3426_s24 + $0x308] sm:$0xff] %v597_v33  ;;  %v601_v35 = vld [vmem:[%s3421_s17 + $0x628] sm:$0xff] }
  0x69   : > { %600 = vst [vmem:[%s3426_s24 + $0x310] sm:$0xff] %v599_v34  ;;  %v603_v36 = vld [vmem:[%s3421_s17 + $0x640] sm:$0xff]  ;;  %v605_v37 = vld [vmem:[%s3421_s17 + $0x648] sm:$0xff]  ;;  %602 = vst [vmem:[%s3426_s24 + $0x318] sm:$0xff] %v601_v35 }
  0x6a   : > { %604 = vst [vmem:[%s3426_s24 + $0x320] sm:$0xff] %v603_v36  ;;  %606 = vst [vmem:[%s3426_s24 + $0x328] sm:$0xff] %v605_v37  ;;  %v607_v38 = vld [vmem:[%s3421_s17 + $0x660] sm:$0xff]  ;;  %v609_v39 = vld [vmem:[%s3421_s17 + $0x668] sm:$0xff] }
  0x6b   : > { %v611_v40 = vld [vmem:[%s3421_s17 + $0x680] sm:$0xff]  ;;  %608 = vst [vmem:[%s3426_s24 + $0x330] sm:$0xff] %v607_v38  ;;  %610 = vst [vmem:[%s3426_s24 + $0x338] sm:$0xff] %v609_v39  ;;  %v613_v41 = vld [vmem:[%s3421_s17 + $0x688] sm:$0xff] }
  0x6c   : > { %612 = vst [vmem:[%s3426_s24 + $0x340] sm:$0xff] %v611_v40  ;;  %v615_v42 = vld [vmem:[%s3421_s17 + $0x6a0] sm:$0xff]  ;;  %v617_v43 = vld [vmem:[%s3421_s17 + $0x6a8] sm:$0xff]  ;;  %614 = vst [vmem:[%s3426_s24 + $0x348] sm:$0xff] %v613_v41 }
  0x6d   : > { %616 = vst [vmem:[%s3426_s24 + $0x350] sm:$0xff] %v615_v42  ;;  %618 = vst [vmem:[%s3426_s24 + $0x358] sm:$0xff] %v617_v43  ;;  %v619_v44 = vld [vmem:[%s3421_s17 + $0x6c0] sm:$0xff]  ;;  %v621_v45 = vld [vmem:[%s3421_s17 + $0x6c8] sm:$0xff] }
  0x6e   : > { %v623_v46 = vld [vmem:[%s3421_s17 + $0x6e0] sm:$0xff]  ;;  %620 = vst [vmem:[%s3426_s24 + $0x360] sm:$0xff] %v619_v44  ;;  %622 = vst [vmem:[%s3426_s24 + $0x368] sm:$0xff] %v621_v45  ;;  %v625_v47 = vld [vmem:[%s3421_s17 + $0x6e8] sm:$0xff] }
  0x6f   : > { %624 = vst [vmem:[%s3426_s24 + $0x370] sm:$0xff] %v623_v46  ;;  %v627_v48 = vld [vmem:[%s3421_s17 + $0x700] sm:$0xff]  ;;  %v629_v49 = vld [vmem:[%s3421_s17 + $0x708] sm:$0xff]  ;;  %626 = vst [vmem:[%s3426_s24 + $0x378] sm:$0xff] %v625_v47 }
  0x70   : > { %628 = vst [vmem:[%s3426_s24 + $0x380] sm:$0xff] %v627_v48  ;;  %630 = vst [vmem:[%s3426_s24 + $0x388] sm:$0xff] %v629_v49  ;;  %v631_v50 = vld [vmem:[%s3421_s17 + $0x720] sm:$0xff]  ;;  %v633_v51 = vld [vmem:[%s3421_s17 + $0x728] sm:$0xff] }
  0x71   : > { %v635_v52 = vld [vmem:[%s3421_s17 + $0x740] sm:$0xff]  ;;  %632 = vst [vmem:[%s3426_s24 + $0x390] sm:$0xff] %v631_v50  ;;  %634 = vst [vmem:[%s3426_s24 + $0x398] sm:$0xff] %v633_v51  ;;  %v637_v53 = vld [vmem:[%s3421_s17 + $0x748] sm:$0xff] }
  0x72   : > { %636 = vst [vmem:[%s3426_s24 + $0x3a0] sm:$0xff] %v635_v52  ;;  %v639_v54 = vld [vmem:[%s3421_s17 + $0x760] sm:$0xff]  ;;  %v641_v55 = vld [vmem:[%s3421_s17 + $0x768] sm:$0xff]  ;;  %638 = vst [vmem:[%s3426_s24 + $0x3a8] sm:$0xff] %v637_v53 }
  0x73   : > { %640 = vst [vmem:[%s3426_s24 + $0x3b0] sm:$0xff] %v639_v54  ;;  %642 = vst [vmem:[%s3426_s24 + $0x3b8] sm:$0xff] %v641_v55  ;;  %v643_v56 = vld [vmem:[%s3421_s17 + $0x780] sm:$0xff]  ;;  %v645_v57 = vld [vmem:[%s3421_s17 + $0x788] sm:$0xff] }
  0x74   : > { %v647_v58 = vld [vmem:[%s3421_s17 + $0x7a0] sm:$0xff]  ;;  %644 = vst [vmem:[%s3426_s24 + $0x3c0] sm:$0xff] %v643_v56  ;;  %646 = vst [vmem:[%s3426_s24 + $0x3c8] sm:$0xff] %v645_v57  ;;  %v649_v59 = vld [vmem:[%s3421_s17 + $0x7a8] sm:$0xff] }
  0x75   : > { %648 = vst [vmem:[%s3426_s24 + $0x3d0] sm:$0xff] %v647_v58  ;;  %v651_v60 = vld [vmem:[%s3421_s17 + $0x7c0] sm:$0xff]  ;;  %v653_v61 = vld [vmem:[%s3421_s17 + $0x7c8] sm:$0xff]  ;;  %650 = vst [vmem:[%s3426_s24 + $0x3d8] sm:$0xff] %v649_v59 }
  0x76   : > { %652 = vst [vmem:[%s3426_s24 + $0x3e0] sm:$0xff] %v651_v60  ;;  %654 = vst [vmem:[%s3426_s24 + $0x3e8] sm:$0xff] %v653_v61  ;;  %v655_v62 = vld [vmem:[%s3421_s17 + $0x7e0] sm:$0xff]  ;;  %v657_v63 = vld [vmem:[%s3421_s17 + $0x7e8] sm:$0xff] }
  0x77   : > { %656 = vst [vmem:[%s3426_s24 + $0x3f0] sm:$0xff] %v655_v62  ;;  %658 = vst [vmem:[%s3426_s24 + $0x3f8] sm:$0xff] %v657_v63 }
  0x78 PF: > { %p2579_p8 = scmp.ge.s32.totalorder %s3196_s22, 1  ;;  %p663_p9 = scmp.lt.s32.totalorder %s3196_s22, 3 }
  0x7a   : > { %p664_p10 = pnand %p2579_p8, %p663_p9 }
  0x7b   : > { %s3684_s25 = sand.u32 (!%p664_p10), 1, %s3180_s18   ;;  %s2583_s13 = sshll.u32 (!%p664_p10), %s3188_s20, 2 }
  0x7c   : > { %667 = sbr.rel (%p664_p10) target bundleno = 548 (0x224), region = 78  ;;  %s2581_s26 = sshll.u32 (!%p664_p10), %s3684_s25, 10 }
  0x7d   : > { %s3697_s8 = scalar_lea.vmem (!%p664_p10), [#allocation3], %s2581_s26  ;;  %s2580_s27 = sshll.u32 (!%p664_p10), %s3684_s25, 9 }
  0x7e   : > { %s3831_s30 = scalar_lea.vmem (!%p664_p10), [#allocation2], %s2580_s27  ;;  %p732_p11 = scmp.lt.s32.totalorder (!%p664_p10), %s2583_s13, 7 }
  0x7f   : > { %s2582_s17 = sshll.u32 (!%p664_p10), %s3684_s25, 6 }
  0x80   : > { %s3981_s25 = scalar_lea.vmem (!%p664_p10), [#allocation4], %s2582_s17 }
  0x81   : > { %v3690_v0 = vld [vmem:[%s4035_s3 + $0x4] ss:$16 sps:$4 sm:$0xff]   ;;  %v3695_v1 = vld [vmem:[%s4035_s3 + $0xc] ss:$16 sps:$4 sm:$0xff]   ;;  %v2856_v4 = vld [vmem:[%s3697_s8 + $0xe0] ss:$16 sps:$4 sm:$0xff]  }
  0x82   : > { %v2852_v2 = vld [vmem:[%s3697_s8 + $0xe4] ss:$16 sps:$4 sm:$0xff]   ;;  %1662 = vmatprep.mubr.bf16.mxu0 %v3690_v0  ;;  %1715 = vmatprep.mubr.bf16.mxu1 %v3695_v1  ;;  %v2857_v5 = vld [vmem:[%s3697_s8 + $0x2e0] ss:$16 sps:$4 sm:$0xff]   ;;  %s4047_s13 = smov (!%p732_p11, %s2583_s13), 7  ;;  %s2811_s24 = sshll.u32 (%p3267_p6), %s3188_s20, 4 }
  0x83   : > { %v2854_v3 = vld [vmem:[%s3697_s8 + $0x2e4] ss:$16 sps:$4 sm:$0xff]   ;;  %1630 = vmatprep.subr.bf16.mxu0 %v2852_v2  ;;  %v2862_v8 = vld [vmem:[%s3697_s8 + $0xc0] ss:$16 sps:$4 sm:$0xff]   ;;  %s734_s16 = scalar_lea.vmem %s4034_s2, %s4047_s13 }
  0x84   : > { %1683 = vmatprep.subr.bf16.mxu1 %v2854_v3  ;;  %v2858_v6 = vld [vmem:[%s3697_s8 + $0xc4] ss:$16 sps:$4 sm:$0xff]   ;;  %1631 = vmatpush1.bf16.msra.mxu0 %v2856_v4  ;;  %v2863_v9 = vld [vmem:[%s3697_s8 + $0x2c0] ss:$16 sps:$4 sm:$0xff]   ;;  %v2956_v4 = vld [vmem:[%s3697_s8 + $0xec] ss:$16 sps:$4 sm:$0xff]  }
  0x85   : > { %1684 = vmatpush1.bf16.msra.mxu1 %v2857_v5  ;;  %v2860_v7 = vld [vmem:[%s3697_s8 + $0x2c4] ss:$16 sps:$4 sm:$0xff]   ;;  %1632 = vmatprep.subr.bf16.mxu0 %v2858_v6  ;;  %v2868_v12 = vld [vmem:[%s3697_s8 + $0xa0] ss:$16 sps:$4 sm:$0xff]   ;;  %v2959_v5 = vld [vmem:[%s3697_s8 + $0x2ec] ss:$16 sps:$4 sm:$0xff]  }
  0x86   : > { %1685 = vmatprep.subr.bf16.mxu1 %v2860_v7  ;;  %v2864_v10 = vld [vmem:[%s3697_s8 + $0xa4] ss:$16 sps:$4 sm:$0xff]   ;;  %v2869_v13 = vld [vmem:[%s3697_s8 + $0x2a0] ss:$16 sps:$4 sm:$0xff]   ;;  %v3775_v7 = vld [vmem:[%s4035_s3 + $0x8] ss:$16 sps:$4 sm:$0xff]  }
  0x87   : > { %v2866_v11 = vld [vmem:[%s3697_s8 + $0x2a4] ss:$16 sps:$4 sm:$0xff]   ;;  %v2874_v16 = vld [vmem:[%s3697_s8 + $0x80] ss:$16 sps:$4 sm:$0xff]  }
  0x88   : > { %1633 = vmatpush1.bf16.msra.mxu0 %v2862_v8  ;;  %v2870_v14 = vld [vmem:[%s3697_s8 + $0x84] ss:$16 sps:$4 sm:$0xff]   ;;  %v2875_v17 = vld [vmem:[%s3697_s8 + $0x280] ss:$16 sps:$4 sm:$0xff]   ;;  %v2954_v8 = vld [vmem:[%s3697_s8 + $0xe8] ss:$16 sps:$4 sm:$0xff]  }
  0x89   : > { %1686 = vmatpush1.bf16.msra.mxu1 %v2863_v9  ;;  %1634 = vmatprep.subr.bf16.mxu0 %v2864_v10  ;;  %v2872_v15 = vld [vmem:[%s3697_s8 + $0x284] ss:$16 sps:$4 sm:$0xff]   ;;  %v2880_v20 = vld [vmem:[%s3697_s8 + $0x60] ss:$16 sps:$4 sm:$0xff]   ;;  %v2957_v9 = vld [vmem:[%s3697_s8 + $0x2e8] ss:$16 sps:$4 sm:$0xff]  }
  0x8a   : > { %1687 = vmatprep.subr.bf16.mxu1 %v2866_v11  ;;  %v2876_v18 = vld [vmem:[%s3697_s8 + $0x64] ss:$16 sps:$4 sm:$0xff]   ;;  %v2881_v21 = vld [vmem:[%s3697_s8 + $0x260] ss:$16 sps:$4 sm:$0xff]   ;;  %v2962_v10 = vld [vmem:[%s3697_s8 + $0xcc] ss:$16 sps:$4 sm:$0xff]  }
  0x8b   : > { %v2878_v19 = vld [vmem:[%s3697_s8 + $0x264] ss:$16 sps:$4 sm:$0xff]   ;;  %v2886_v24 = vld [vmem:[%s3697_s8 + $0x40] ss:$16 sps:$4 sm:$0xff]   ;;  %v2965_v11 = vld [vmem:[%s3697_s8 + $0x2cc] ss:$16 sps:$4 sm:$0xff]  }
  0x8c   : > { %1635 = vmatpush1.bf16.msra.mxu0 %v2868_v12  ;;  %v2882_v22 = vld [vmem:[%s3697_s8 + $0x44] ss:$16 sps:$4 sm:$0xff]   ;;  %v2887_v25 = vld [vmem:[%s3697_s8 + $0x240] ss:$16 sps:$4 sm:$0xff]   ;;  %v2960_v12 = vld [vmem:[%s3697_s8 + $0xc8] ss:$16 sps:$4 sm:$0xff]  }
  0x8d   : > { %1688 = vmatpush1.bf16.msra.mxu1 %v2869_v13  ;;  %1636 = vmatprep.subr.bf16.mxu0 %v2870_v14  ;;  %v2884_v23 = vld [vmem:[%s3697_s8 + $0x244] ss:$16 sps:$4 sm:$0xff]   ;;  %v2892_v28 = vld [vmem:[%s3697_s8 + $0x20] ss:$16 sps:$4 sm:$0xff]   ;;  %v2963_v13 = vld [vmem:[%s3697_s8 + $0x2c8] ss:$16 sps:$4 sm:$0xff]  }
  0x8e   : > { %1689 = vmatprep.subr.bf16.mxu1 %v2872_v15  ;;  %v2888_v26 = vld [vmem:[%s3697_s8 + $0x24] ss:$16 sps:$4 sm:$0xff]   ;;  %v2893_v29 = vld [vmem:[%s3697_s8 + $0x220] ss:$16 sps:$4 sm:$0xff]   ;;  %v2968_v14 = vld [vmem:[%s3697_s8 + $0xac] ss:$16 sps:$4 sm:$0xff]  }
  0x8f   : > { %v2890_v27 = vld [vmem:[%s3697_s8 + $0x224] ss:$16 sps:$4 sm:$0xff]   ;;  %v2898_v32 = vld [vmem:[%s3697_s8] ss:$16 sps:$4 sm:$0xff]   ;;  %v2971_v15 = vld [vmem:[%s3697_s8 + $0x2ac] ss:$16 sps:$4 sm:$0xff]  }
  0x90   : > { %1637 = vmatpush1.bf16.msra.mxu0 %v2874_v16  ;;  %v2894_v30 = vld [vmem:[%s3697_s8 + $0x4] ss:$16 sps:$4 sm:$0xff]   ;;  %v2899_v33 = vld [vmem:[%s3697_s8 + $0x200] ss:$16 sps:$4 sm:$0xff]   ;;  %v2966_v16 = vld [vmem:[%s3697_s8 + $0xa8] ss:$16 sps:$4 sm:$0xff]  }
  0x91   : > { %1690 = vmatpush1.bf16.msra.mxu1 %v2875_v17  ;;  %1638 = vmatprep.subr.bf16.mxu0 %v2876_v18  ;;  %v2896_v31 = vld [vmem:[%s3697_s8 + $0x204] ss:$16 sps:$4 sm:$0xff]   ;;  %v2904_v36 = vld [vmem:[%s3697_s8 + $0x1e0] ss:$16 sps:$4 sm:$0xff]   ;;  %v2969_v17 = vld [vmem:[%s3697_s8 + $0x2a8] ss:$16 sps:$4 sm:$0xff]  }
  0x92   : > { %1691 = vmatprep.subr.bf16.mxu1 %v2878_v19  ;;  %v2900_v34 = vld [vmem:[%s3697_s8 + $0x1e4] ss:$16 sps:$4 sm:$0xff]   ;;  %v2905_v37 = vld [vmem:[%s3697_s8 + $0x3e0] ss:$16 sps:$4 sm:$0xff]   ;;  %v2974_v18 = vld [vmem:[%s3697_s8 + $0x8c] ss:$16 sps:$4 sm:$0xff]  }
  0x93   : > { %v2902_v35 = vld [vmem:[%s3697_s8 + $0x3e4] ss:$16 sps:$4 sm:$0xff]   ;;  %v2910_v40 = vld [vmem:[%s3697_s8 + $0x1c0] ss:$16 sps:$4 sm:$0xff]   ;;  %v2977_v19 = vld [vmem:[%s3697_s8 + $0x28c] ss:$16 sps:$4 sm:$0xff]  }
  0x94   : > { %1639 = vmatpush1.bf16.msra.mxu0 %v2880_v20  ;;  %v2906_v38 = vld [vmem:[%s3697_s8 + $0x1c4] ss:$16 sps:$4 sm:$0xff]   ;;  %v2911_v41 = vld [vmem:[%s3697_s8 + $0x3c0] ss:$16 sps:$4 sm:$0xff]   ;;  %v2972_v20 = vld [vmem:[%s3697_s8 + $0x88] ss:$16 sps:$4 sm:$0xff]  }
  0x95   : > { %1692 = vmatpush1.bf16.msra.mxu1 %v2881_v21  ;;  %1640 = vmatprep.subr.bf16.mxu0 %v2882_v22  ;;  %v2908_v39 = vld [vmem:[%s3697_s8 + $0x3c4] ss:$16 sps:$4 sm:$0xff]   ;;  %v2916_v44 = vld [vmem:[%s3697_s8 + $0x1a0] ss:$16 sps:$4 sm:$0xff]   ;;  %v2975_v21 = vld [vmem:[%s3697_s8 + $0x288] ss:$16 sps:$4 sm:$0xff]  }
  0x96   : > { %1693 = vmatprep.subr.bf16.mxu1 %v2884_v23  ;;  %v2912_v42 = vld [vmem:[%s3697_s8 + $0x1a4] ss:$16 sps:$4 sm:$0xff]   ;;  %v2917_v45 = vld [vmem:[%s3697_s8 + $0x3a0] ss:$16 sps:$4 sm:$0xff]   ;;  %v2980_v22 = vld [vmem:[%s3697_s8 + $0x6c] ss:$16 sps:$4 sm:$0xff]  }
  0x97   : > { %v2914_v43 = vld [vmem:[%s3697_s8 + $0x3a4] ss:$16 sps:$4 sm:$0xff]   ;;  %v2922_v48 = vld [vmem:[%s3697_s8 + $0x180] ss:$16 sps:$4 sm:$0xff]   ;;  %v2983_v23 = vld [vmem:[%s3697_s8 + $0x26c] ss:$16 sps:$4 sm:$0xff]  }
  0x98   : > { %1641 = vmatpush1.bf16.msra.mxu0 %v2886_v24  ;;  %v2918_v46 = vld [vmem:[%s3697_s8 + $0x184] ss:$16 sps:$4 sm:$0xff]   ;;  %v2923_v49 = vld [vmem:[%s3697_s8 + $0x380] ss:$16 sps:$4 sm:$0xff]  }
  0x99   : > { %1694 = vmatpush1.bf16.msra.mxu1 %v2887_v25  ;;  %1642 = vmatprep.subr.bf16.mxu0 %v2888_v26  ;;  %v2920_v47 = vld [vmem:[%s3697_s8 + $0x384] ss:$16 sps:$4 sm:$0xff]   ;;  %v2928_v52 = vld [vmem:[%s3697_s8 + $0x160] ss:$16 sps:$4 sm:$0xff]   ;;  %v2978_v25 = vld [vmem:[%s3697_s8 + $0x68] ss:$16 sps:$4 sm:$0xff]  }
  0x9a   : > { %1695 = vmatprep.subr.bf16.mxu1 %v2890_v27  ;;  %v2924_v50 = vld [vmem:[%s3697_s8 + $0x164] ss:$16 sps:$4 sm:$0xff]   ;;  %v2929_v53 = vld [vmem:[%s3697_s8 + $0x360] ss:$16 sps:$4 sm:$0xff]   ;;  %v3804_v26 = vld [vmem:[%s4035_s3 + $0x2c] ss:$16 sps:$4 sm:$0xff]  }
  0x9b   : > { %v2926_v51 = vld [vmem:[%s3697_s8 + $0x364] ss:$16 sps:$4 sm:$0xff]   ;;  %v2934_v56 = vld [vmem:[%s3697_s8 + $0x140] ss:$16 sps:$4 sm:$0xff]  }
  0x9c   : > { %1643 = vmatpush1.bf16.msra.mxu0 %v2892_v28  ;;  %v2930_v54 = vld [vmem:[%s3697_s8 + $0x144] ss:$16 sps:$4 sm:$0xff]   ;;  %v2935_v57 = vld [vmem:[%s3697_s8 + $0x340] ss:$16 sps:$4 sm:$0xff]   ;;  %v3815_v28 = vld [vmem:[%s4035_s3 + $0x28] ss:$16 sps:$4 sm:$0xff]  }
  0x9d   : > { %1696 = vmatpush1.bf16.msra.mxu1 %v2893_v29  ;;  %1644 = vmatprep.subr.bf16.mxu0 %v2894_v30  ;;  %v2932_v55 = vld [vmem:[%s3697_s8 + $0x344] ss:$16 sps:$4 sm:$0xff]   ;;  %v2940_v60 = vld [vmem:[%s3697_s8 + $0x120] ss:$16 sps:$4 sm:$0xff]   ;;  %v2981_v29 = vld [vmem:[%s3697_s8 + $0x268] ss:$16 sps:$4 sm:$0xff]  }
  0x9e   : > { %1697 = vmatprep.subr.bf16.mxu1 %v2896_v31  ;;  %v2936_v58 = vld [vmem:[%s3697_s8 + $0x124] ss:$16 sps:$4 sm:$0xff]   ;;  %v2941_v61 = vld [vmem:[%s3697_s8 + $0x320] ss:$16 sps:$4 sm:$0xff]   ;;  %v2986_v30 = vld [vmem:[%s3697_s8 + $0x4c] ss:$16 sps:$4 sm:$0xff]  }
  0x9f   : > { %v2938_v59 = vld [vmem:[%s3697_s8 + $0x324] ss:$16 sps:$4 sm:$0xff]   ;;  %v2946_v2 = vld [vmem:[%s3697_s8 + $0x100] ss:$16 sps:$4 sm:$0xff]   ;;  %v2989_v31 = vld [vmem:[%s3697_s8 + $0x24c] ss:$16 sps:$4 sm:$0xff]  }
  0xa0   : > { %1645 = vmatpush1.bf16.msra.mxu0 %v2898_v32  ;;  %v2942_v62 = vld [vmem:[%s3697_s8 + $0x104] ss:$16 sps:$4 sm:$0xff]   ;;  %v2947_v3 = vld [vmem:[%s3697_s8 + $0x300] ss:$16 sps:$4 sm:$0xff]   ;;  %v2984_v32 = vld [vmem:[%s3697_s8 + $0x48] ss:$16 sps:$4 sm:$0xff]  }
  0xa1   : > { %1698 = vmatpush1.bf16.msra.mxu1 %v2899_v33  ;;  %1646 = vmatprep.subr.bf16.mxu0 %v2900_v34  ;;  %v2944_v63 = vld [vmem:[%s3697_s8 + $0x304] ss:$16 sps:$4 sm:$0xff]   ;;  %v3770_v6 = vld [vmem:[%s4035_s3] ss:$16 sps:$4 sm:$0xff]   ;;  %v2987_v33 = vld [vmem:[%s3697_s8 + $0x248] ss:$16 sps:$4 sm:$0xff]  }
  0xa2   : > { %1699 = vmatprep.subr.bf16.mxu1 %v2902_v35  ;;  %v3798_v24 = vld [vmem:[%s4035_s3 + $0x24] ss:$16 sps:$4 sm:$0xff]   ;;  %v3810_v27 = vld [vmem:[%s4035_s3 + $0x20] ss:$16 sps:$4 sm:$0xff]   ;;  %v2992_v34 = vld [vmem:[%s3697_s8 + $0x2c] ss:$16 sps:$4 sm:$0xff]  }
  0xa3   : > { %v2995_v35 = vld [vmem:[%s3697_s8 + $0x22c] ss:$16 sps:$4 sm:$0xff]  }
  0xa4   : > { %1647 = vmatpush2.bf16.msra.mxu0 %v2904_v36  ;;  %v2990_v36 = vld [vmem:[%s3697_s8 + $0x28] ss:$16 sps:$4 sm:$0xff]  }
  0xa5   : > { %1700 = vmatpush2.bf16.msra.mxu1 %v2905_v37  ;;  %1648 = vmatprep.subr.bf16.mxu0 %v2906_v38  ;;  %v2998_v37 = vld [vmem:[%s3697_s8 + $0xc] ss:$16 sps:$4 sm:$0xff]  }
  0xa6   : > { %1701 = vmatprep.subr.bf16.mxu1 %v2908_v39  ;;  %v3001_v38 = vld [vmem:[%s3697_s8 + $0x20c] ss:$16 sps:$4 sm:$0xff]   ;;  %v2996_v39 = vld [vmem:[%s3697_s8 + $0x8] ss:$16 sps:$4 sm:$0xff]  }
  0xa8   : > { %1649 = vmatpush2.bf16.msra.mxu0 %v2910_v40  ;;  %v3004_v40 = vld [vmem:[%s3697_s8 + $0x1ec] ss:$16 sps:$4 sm:$0xff]  }
  0xa9   : > { %1702 = vmatpush2.bf16.msra.mxu1 %v2911_v41  ;;  %1650 = vmatprep.subr.bf16.mxu0 %v2912_v42  ;;  %v3007_v41 = vld [vmem:[%s3697_s8 + $0x3ec] ss:$16 sps:$4 sm:$0xff]   ;;  %v3002_v42 = vld [vmem:[%s3697_s8 + $0x1e8] ss:$16 sps:$4 sm:$0xff]  }
  0xaa   : > { %1703 = vmatprep.subr.bf16.mxu1 %v2914_v43  ;;  %v3005_v43 = vld [vmem:[%s3697_s8 + $0x3e8] ss:$16 sps:$4 sm:$0xff]  }
  0xac   : > { %1651 = vmatpush2.bf16.msra.mxu0 %v2916_v44  ;;  %v3010_v44 = vld [vmem:[%s3697_s8 + $0x1cc] ss:$16 sps:$4 sm:$0xff]  }
  0xad   : > { %1704 = vmatpush2.bf16.msra.mxu1 %v2917_v45  ;;  %1652 = vmatprep.subr.bf16.mxu0 %v2918_v46  ;;  %v3013_v45 = vld [vmem:[%s3697_s8 + $0x3cc] ss:$16 sps:$4 sm:$0xff]   ;;  %v3008_v46 = vld [vmem:[%s3697_s8 + $0x1c8] ss:$16 sps:$4 sm:$0xff]  }
  0xae   : > { %1705 = vmatprep.subr.bf16.mxu1 %v2920_v47  ;;  %v3011_v47 = vld [vmem:[%s3697_s8 + $0x3c8] ss:$16 sps:$4 sm:$0xff]  }
  0xb0   : > { %1653 = vmatpush2.bf16.msra.mxu0 %v2922_v48  ;;  %v3016_v48 = vld [vmem:[%s3697_s8 + $0x1ac] ss:$16 sps:$4 sm:$0xff]  }
  0xb1   : > { %1706 = vmatpush2.bf16.msra.mxu1 %v2923_v49  ;;  %1654 = vmatprep.subr.bf16.mxu0 %v2924_v50  ;;  %v3019_v49 = vld [vmem:[%s3697_s8 + $0x3ac] ss:$16 sps:$4 sm:$0xff]   ;;  %v3014_v50 = vld [vmem:[%s3697_s8 + $0x1a8] ss:$16 sps:$4 sm:$0xff]  }
  0xb2   : > { %1707 = vmatprep.subr.bf16.mxu1 %v2926_v51  ;;  %v3017_v51 = vld [vmem:[%s3697_s8 + $0x3a8] ss:$16 sps:$4 sm:$0xff]  }
  0xb4   : > { %1655 = vmatpush2.bf16.msra.mxu0 %v2928_v52  ;;  %v3022_v52 = vld [vmem:[%s3697_s8 + $0x18c] ss:$16 sps:$4 sm:$0xff]  }
  0xb5   : > { %1708 = vmatpush2.bf16.msra.mxu1 %v2929_v53  ;;  %1656 = vmatprep.subr.bf16.mxu0 %v2930_v54  ;;  %v3025_v53 = vld [vmem:[%s3697_s8 + $0x38c] ss:$16 sps:$4 sm:$0xff]   ;;  %v3020_v54 = vld [vmem:[%s3697_s8 + $0x188] ss:$16 sps:$4 sm:$0xff]  }
  0xb6   : > { %1709 = vmatprep.subr.bf16.mxu1 %v2932_v55  ;;  %v3023_v55 = vld [vmem:[%s3697_s8 + $0x388] ss:$16 sps:$4 sm:$0xff]  }
  0xb8   : > { %1657 = vmatpush2.bf16.msra.mxu0 %v2934_v56  ;;  %v3028_v56 = vld [vmem:[%s3697_s8 + $0x16c] ss:$16 sps:$4 sm:$0xff]  }
  0xb9   : > { %1710 = vmatpush2.bf16.msra.mxu1 %v2935_v57  ;;  %1658 = vmatprep.subr.bf16.mxu0 %v2936_v58  ;;  %v3031_v57 = vld [vmem:[%s3697_s8 + $0x36c] ss:$16 sps:$4 sm:$0xff]   ;;  %v3026_v58 = vld [vmem:[%s3697_s8 + $0x168] ss:$16 sps:$4 sm:$0xff]  }
  0xba   : > { %1711 = vmatprep.subr.bf16.mxu1 %v2938_v59  ;;  %v3029_v59 = vld [vmem:[%s3697_s8 + $0x368] ss:$16 sps:$4 sm:$0xff]  }
  0xbc   : > { %1659 = vmatpush2.bf16.msra.mxu0 %v2940_v60  ;;  %v3040_v60 = vld [vmem:[%s3697_s8 + $0x14c] ss:$16 sps:$4 sm:$0xff]  }
  0xbd   : > { %1712 = vmatpush2.bf16.msra.mxu1 %v2941_v61  ;;  %1660 = vmatprep.subr.bf16.mxu0 %v2942_v62  ;;  %v3043_v61 = vld [vmem:[%s3697_s8 + $0x34c] ss:$16 sps:$4 sm:$0xff]   ;;  %v3038_v62 = vld [vmem:[%s3697_s8 + $0x148] ss:$16 sps:$4 sm:$0xff]  }
  0xbe   : > { %1713 = vmatprep.subr.bf16.mxu1 %v2944_v63  ;;  %v3041_v63 = vld [vmem:[%s3697_s8 + $0x348] ss:$16 sps:$4 sm:$0xff]  }
  0xc0   : > { %1661 = vmatpush2.bf16.msra.mxu0 %v2946_v2  ;;  %v3046_v2 = vld [vmem:[%s3697_s8 + $0x12c] ss:$16 sps:$4 sm:$0xff]  }
  0xc1   : > { %1714 = vmatpush2.bf16.msra.mxu1 %v2947_v3  ;;  %1736 = vmatprep.subr.bf16.mxu0 %v2956_v4  ;;  %v3049_v3 = vld [vmem:[%s3697_s8 + $0x32c] ss:$16 sps:$4 sm:$0xff]   ;;  %v3044_v4 = vld [vmem:[%s3697_s8 + $0x128] ss:$16 sps:$4 sm:$0xff]  }
  0xc2   : > { %1789 = vmatprep.subr.bf16.mxu1 %v2959_v5  ;;  %v3047_v5 = vld [vmem:[%s3697_s8 + $0x328] ss:$16 sps:$4 sm:$0xff]  }
  0xc3   : > { %1663 = vmatmul.mubr.bf16.vlgmr.msra.gmra.mxu0 %v3770_v6 }
  0xc4   : > { %1716 = vmatmul.mubr.bf16.vlgmr.msra.gmra.mxu1 %v3775_v7  ;;  %1737 = vmatpush1.bf16.msra.mxu0 %v2954_v8  ;;  %v3052_v8 = vld [vmem:[%s3697_s8 + $0x10c] ss:$16 sps:$4 sm:$0xff]  }
  0xc5   : > { %1790 = vmatpush1.bf16.msra.mxu1 %v2957_v9  ;;  %1738 = vmatprep.subr.bf16.mxu0 %v2962_v10  ;;  %v3055_v9 = vld [vmem:[%s3697_s8 + $0x30c] ss:$16 sps:$4 sm:$0xff]   ;;  %v3050_v10 = vld [vmem:[%s3697_s8 + $0x108] ss:$16 sps:$4 sm:$0xff]  }
  0xc6   : > { %1791 = vmatprep.subr.bf16.mxu1 %v2965_v11  ;;  %1672 = vmatprep.mubr.bf16.mxu0 %v3798_v24  ;;  %v3053_v11 = vld [vmem:[%s3697_s8 + $0x308] ss:$16 sps:$4 sm:$0xff]  }
  0xc7   : > { %1725 = vmatprep.mubr.bf16.mxu1 %v3804_v26 }
  0xc8   : > { %1739 = vmatpush1.bf16.msra.mxu0 %v2960_v12  ;;  %v3058_v12 = vld [vmem:[%s3831_s30 + $0xe4] ss:$16 sps:$4 sm:$0xff]  }
  0xc9   : > { %1792 = vmatpush1.bf16.msra.mxu1 %v2963_v13  ;;  %1740 = vmatprep.subr.bf16.mxu0 %v2968_v14  ;;  %v3061_v13 = vld [vmem:[%s3831_s30 + $0xec] ss:$16 sps:$4 sm:$0xff]   ;;  %v3056_v14 = vld [vmem:[%s3831_s30 + $0xe0] ss:$16 sps:$4 sm:$0xff]  }
  0xca   : > { %1793 = vmatprep.subr.bf16.mxu1 %v2971_v15  ;;  %v3059_v15 = vld [vmem:[%s3831_s30 + $0xe8] ss:$16 sps:$4 sm:$0xff]  }
  0xcb   : > { %1673 = vmatmul.mubr.bf16.gmra.mxu0 %v3810_v27 }
  0xcc   : > { %1741 = vmatpush1.bf16.msra.mxu0 %v2966_v16  ;;  %1726 = vmatmul.mubr.bf16.gmra.mxu1 %v3815_v28  ;;  %v3064_v16 = vld [vmem:[%s3831_s30 + $0xc4] ss:$16 sps:$4 sm:$0xff]  }
  0xcd   : > { %1794 = vmatpush1.bf16.msra.mxu1 %v2969_v17  ;;  %1742 = vmatprep.subr.bf16.mxu0 %v2974_v18  ;;  %v3067_v17 = vld [vmem:[%s3831_s30 + $0xcc] ss:$16 sps:$4 sm:$0xff]   ;;  %v3062_v18 = vld [vmem:[%s3831_s30 + $0xc0] ss:$16 sps:$4 sm:$0xff]  }
  0xce   : > { %1795 = vmatprep.subr.bf16.mxu1 %v2977_v19  ;;  %1768 = vmatprep.mubr.bf16.mxu0 %v3690_v0  ;;  %v2993_v0 = vld [vmem:[%s3697_s8 + $0x228] ss:$16 sps:$4 sm:$0xff]  }
  0xcf   : > { %1821 = vmatprep.mubr.bf16.mxu1 %v3695_v1  ;;  %v2999_v1 = vld [vmem:[%s3697_s8 + $0x208] ss:$16 sps:$4 sm:$0xff]  }
  0xd0   : > { %1743 = vmatpush1.bf16.msra.mxu0 %v2972_v20  ;;  %v3065_v19 = vld [vmem:[%s3831_s30 + $0xc8] ss:$16 sps:$4 sm:$0xff]   ;;  %v3070_v20 = vld [vmem:[%s3831_s30 + $0xa4] ss:$16 sps:$4 sm:$0xff]  }
  0xd1   : > { %1796 = vmatpush1.bf16.msra.mxu1 %v2975_v21  ;;  %1744 = vmatprep.subr.bf16.mxu0 %v2980_v22  ;;  %v3073_v21 = vld [vmem:[%s3831_s30 + $0xac] ss:$16 sps:$4 sm:$0xff]   ;;  %v3076_v22 = vld [vmem:[%s3831_s30 + $0x84] ss:$16 sps:$4 sm:$0xff]  }
  0xd2   : > { %1797 = vmatprep.subr.bf16.mxu1 %v2983_v23  ;;  %v3079_v23 = vld [vmem:[%s3831_s30 + $0x8c] ss:$16 sps:$4 sm:$0xff]  }
  0xd4   : > { %1745 = vmatpush1.bf16.msra.mxu0 %v2978_v25  ;;  %v3154_v25 = vld [vmem:[%s4032_s0 + $0x4] ss:$8 sps:$4 sm:$0xff]  }
  0xd5   : > { %1798 = vmatpush1.bf16.msra.mxu1 %v2981_v29  ;;  %1746 = vmatprep.subr.bf16.mxu0 %v2986_v30  ;;  %v3082_v29 = vld [vmem:[%s3831_s30 + $0x64] ss:$16 sps:$4 sm:$0xff]   ;;  %v3085_v30 = vld [vmem:[%s3831_s30 + $0x6c] ss:$16 sps:$4 sm:$0xff]  }
  0xd6   : > { %1799 = vmatprep.subr.bf16.mxu1 %v2989_v31  ;;  %v3088_v31 = vld [vmem:[%s3831_s30 + $0x44] ss:$16 sps:$4 sm:$0xff]  }
  0xd8   : > { %1747 = vmatpush1.bf16.msra.mxu0 %v2984_v32  ;;  %v3091_v32 = vld [vmem:[%s3831_s30 + $0x4c] ss:$16 sps:$4 sm:$0xff]  }
  0xd9   : > { %1800 = vmatpush1.bf16.msra.mxu1 %v2987_v33  ;;  %1748 = vmatprep.subr.bf16.mxu0 %v2992_v34  ;;  %v3086_v33 = vld [vmem:[%s3831_s30 + $0x40] ss:$16 sps:$4 sm:$0xff]   ;;  %v3089_v34 = vld [vmem:[%s3831_s30 + $0x48] ss:$16 sps:$4 sm:$0xff]  }
  0xda   : > { %1801 = vmatprep.subr.bf16.mxu1 %v2995_v35  ;;  %v3094_v35 = vld [vmem:[%s3831_s30 + $0x24] ss:$16 sps:$4 sm:$0xff]  }
  0xdc   : > { %1749 = vmatpush1.bf16.msra.mxu0 %v2990_v36  ;;  %v3097_v36 = vld [vmem:[%s3831_s30 + $0x2c] ss:$16 sps:$4 sm:$0xff]  }
  0xdd   : > { %1802 = vmatpush1.bf16.msra.mxu1 %v2993_v0  ;;  %1750 = vmatprep.subr.bf16.mxu0 %v2998_v37  ;;  %v3092_v0 = vld [vmem:[%s3831_s30 + $0x20] ss:$16 sps:$4 sm:$0xff]   ;;  %v3095_v37 = vld [vmem:[%s3831_s30 + $0x28] ss:$16 sps:$4 sm:$0xff]  }
  0xde   : > { %1803 = vmatprep.subr.bf16.mxu1 %v3001_v38  ;;  %v3100_v38 = vld [vmem:[%s3831_s30 + $0x4] ss:$16 sps:$4 sm:$0xff]  }
  0xe0   : > { %1751 = vmatpush1.bf16.msra.mxu0 %v2996_v39  ;;  %v3103_v39 = vld [vmem:[%s3831_s30 + $0xc] ss:$16 sps:$4 sm:$0xff]  }
  0xe1   : > { %1804 = vmatpush1.bf16.msra.mxu1 %v2999_v1  ;;  %1752 = vmatprep.subr.bf16.mxu0 %v3004_v40  ;;  %v3098_v1 = vld [vmem:[%s3831_s30] ss:$16 sps:$4 sm:$0xff]   ;;  %v3101_v40 = vld [vmem:[%s3831_s30 + $0x8] ss:$16 sps:$4 sm:$0xff]  }
  0xe2   : > { %1805 = vmatprep.subr.bf16.mxu1 %v3007_v41  ;;  %v3106_v41 = vld [vmem:[%s3831_s30 + $0x1e4] ss:$16 sps:$4 sm:$0xff]  }
  0xe4   : > { %1753 = vmatpush2.bf16.msra.mxu0 %v3002_v42  ;;  %v3109_v42 = vld [vmem:[%s3831_s30 + $0x1ec] ss:$16 sps:$4 sm:$0xff]  }
  0xe5   : > { %1806 = vmatpush2.bf16.msra.mxu1 %v3005_v43  ;;  %1754 = vmatprep.subr.bf16.mxu0 %v3010_v44  ;;  %v3104_v43 = vld [vmem:[%s3831_s30 + $0x1e0] ss:$16 sps:$4 sm:$0xff]   ;;  %v3107_v44 = vld [vmem:[%s3831_s30 + $0x1e8] ss:$16 sps:$4 sm:$0xff]  }
  0xe6   : > { %1807 = vmatprep.subr.bf16.mxu1 %v3013_v45  ;;  %v3112_v45 = vld [vmem:[%s3831_s30 + $0x1c4] ss:$16 sps:$4 sm:$0xff]  }
  0xe8   : > { %1755 = vmatpush2.bf16.msra.mxu0 %v3008_v46  ;;  %v3115_v46 = vld [vmem:[%s3831_s30 + $0x1cc] ss:$16 sps:$4 sm:$0xff]  }
  0xe9   : > { %1808 = vmatpush2.bf16.msra.mxu1 %v3011_v47  ;;  %1756 = vmatprep.subr.bf16.mxu0 %v3016_v48  ;;  %v3110_v47 = vld [vmem:[%s3831_s30 + $0x1c0] ss:$16 sps:$4 sm:$0xff]   ;;  %v3113_v48 = vld [vmem:[%s3831_s30 + $0x1c8] ss:$16 sps:$4 sm:$0xff]  }
  0xea   : > { %1809 = vmatprep.subr.bf16.mxu1 %v3019_v49  ;;  %v3118_v49 = vld [vmem:[%s3831_s30 + $0x1a4] ss:$16 sps:$4 sm:$0xff]  }
  0xec   : > { %1757 = vmatpush2.bf16.msra.mxu0 %v3014_v50  ;;  %v3121_v50 = vld [vmem:[%s3831_s30 + $0x1ac] ss:$16 sps:$4 sm:$0xff]  }
  0xed   : > { %1810 = vmatpush2.bf16.msra.mxu1 %v3017_v51  ;;  %1758 = vmatprep.subr.bf16.mxu0 %v3022_v52  ;;  %v3116_v51 = vld [vmem:[%s3831_s30 + $0x1a0] ss:$16 sps:$4 sm:$0xff]   ;;  %v3119_v52 = vld [vmem:[%s3831_s30 + $0x1a8] ss:$16 sps:$4 sm:$0xff]  }
  0xee   : > { %1811 = vmatprep.subr.bf16.mxu1 %v3025_v53  ;;  %v3124_v53 = vld [vmem:[%s3831_s30 + $0x184] ss:$16 sps:$4 sm:$0xff]  }
  0xf0   : > { %1759 = vmatpush2.bf16.msra.mxu0 %v3020_v54  ;;  %v3127_v54 = vld [vmem:[%s3831_s30 + $0x18c] ss:$16 sps:$4 sm:$0xff]  }
  0xf1   : > { %1812 = vmatpush2.bf16.msra.mxu1 %v3023_v55  ;;  %1760 = vmatprep.subr.bf16.mxu0 %v3028_v56  ;;  %v3122_v55 = vld [vmem:[%s3831_s30 + $0x180] ss:$16 sps:$4 sm:$0xff]   ;;  %v3125_v56 = vld [vmem:[%s3831_s30 + $0x188] ss:$16 sps:$4 sm:$0xff]  }
  0xf2   : > { %1813 = vmatprep.subr.bf16.mxu1 %v3031_v57  ;;  %v3130_v57 = vld [vmem:[%s3831_s30 + $0x164] ss:$16 sps:$4 sm:$0xff]  }
  0xf4   : > { %1761 = vmatpush2.bf16.msra.mxu0 %v3026_v58  ;;  %v3133_v58 = vld [vmem:[%s3831_s30 + $0x16c] ss:$16 sps:$4 sm:$0xff]  }
  0xf5   : > { %1814 = vmatpush2.bf16.msra.mxu1 %v3029_v59  ;;  %1762 = vmatprep.subr.bf16.mxu0 %v3040_v60  ;;  %v3128_v59 = vld [vmem:[%s3831_s30 + $0x160] ss:$16 sps:$4 sm:$0xff]   ;;  %v3131_v60 = vld [vmem:[%s3831_s30 + $0x168] ss:$16 sps:$4 sm:$0xff]  }
  0xf6   : > { %1815 = vmatprep.subr.bf16.mxu1 %v3043_v61  ;;  %v3136_v61 = vld [vmem:[%s3831_s30 + $0x144] ss:$16 sps:$4 sm:$0xff]  }
  0xf8   : > { %1763 = vmatpush2.bf16.msra.mxu0 %v3038_v62  ;;  %v3139_v62 = vld [vmem:[%s3831_s30 + $0x14c] ss:$16 sps:$4 sm:$0xff]  }
  0xf9   : > { %1816 = vmatpush2.bf16.msra.mxu1 %v3041_v63  ;;  %1764 = vmatprep.subr.bf16.mxu0 %v3046_v2  ;;  %v3134_v63 = vld [vmem:[%s3831_s30 + $0x140] ss:$16 sps:$4 sm:$0xff]   ;;  %v3137_v2 = vld [vmem:[%s3831_s30 + $0x148] ss:$16 sps:$4 sm:$0xff]  }
  0xfa   : > { %1817 = vmatprep.subr.bf16.mxu1 %v3049_v3  ;;  %v3142_v3 = vld [vmem:[%s3831_s30 + $0x124] ss:$16 sps:$4 sm:$0xff]  }
  0xfc   : > { %1765 = vmatpush2.bf16.msra.mxu0 %v3044_v4  ;;  %v3145_v4 = vld [vmem:[%s3831_s30 + $0x12c] ss:$16 sps:$4 sm:$0xff]  }
  0xfd   : > { %1818 = vmatpush2.bf16.msra.mxu1 %v3047_v5  ;;  %1766 = vmatprep.subr.bf16.mxu0 %v3052_v8  ;;  %v3140_v5 = vld [vmem:[%s3831_s30 + $0x120] ss:$16 sps:$4 sm:$0xff]   ;;  %v3143_v8 = vld [vmem:[%s3831_s30 + $0x128] ss:$16 sps:$4 sm:$0xff]  }
  0xfe   : > { %1819 = vmatprep.subr.bf16.mxu1 %v3055_v9  ;;  %v3148_v9 = vld [vmem:[%s3831_s30 + $0x104] ss:$16 sps:$4 sm:$0xff]  }
 0x100   : > { %1767 = vmatpush2.bf16.msra.mxu0 %v3050_v10  ;;  %v3151_v10 = vld [vmem:[%s3831_s30 + $0x10c] ss:$16 sps:$4 sm:$0xff]  }
 0x101   : > { %1820 = vmatpush2.bf16.msra.mxu1 %v3053_v11  ;;  %2182 = vmatprep.subr.bf16.mxu0 %v3058_v12  ;;  %v3146_v11 = vld [vmem:[%s3831_s30 + $0x100] ss:$16 sps:$4 sm:$0xff]   ;;  %v3149_v12 = vld [vmem:[%s3831_s30 + $0x108] ss:$16 sps:$4 sm:$0xff]  }
 0x102   : > { %2235 = vmatprep.subr.bf16.mxu1 %v3061_v13  ;;  %v3152_v13 = vld [vmem:[%s4032_s0] ss:$8 sps:$4 sm:$0xff]  }
 0x103   : > { %1769 = vmatmul.mubr.bf16.vlgmr.msra.gmra.mxu0 %v3770_v6  ;;  %v3068_v6 = vld [vmem:[%s3831_s30 + $0xa0] ss:$16 sps:$4 sm:$0xff]  }
 0x104   : > { %1822 = vmatmul.mubr.bf16.vlgmr.msra.gmra.mxu1 %v3775_v7  ;;  %2183 = vmatpush1.bf16.msra.mxu0 %v3056_v14  ;;  %v3071_v7 = vld [vmem:[%s3831_s30 + $0xa8] ss:$16 sps:$4 sm:$0xff]   ;;  %v3155_v14 = vld [vmem:[%s4032_s0 + $0x14] ss:$8 sps:$4 sm:$0xff]  }
 0x105   : > { %2236 = vmatpush1.bf16.msra.mxu1 %v3059_v15  ;;  %2184 = vmatprep.subr.bf16.mxu0 %v3064_v16  ;;  %v3157_v15 = vld [vmem:[%s4032_s0 + $0x10] ss:$8 sps:$4 sm:$0xff]  }
 0x106   : > { %2237 = vmatprep.subr.bf16.mxu1 %v3067_v17  ;;  %1778 = vmatprep.mubr.bf16.mxu0 %v3798_v24  ;;  %v3074_v24 = vld [vmem:[%s3831_s30 + $0x80] ss:$16 sps:$4 sm:$0xff]  }
 0x107   : > { %1831 = vmatprep.mubr.bf16.mxu1 %v3804_v26  ;;  %v3077_v26 = vld [vmem:[%s3831_s30 + $0x88] ss:$16 sps:$4 sm:$0xff]  }
 0x108   : > { %2185 = vmatpush1.bf16.msra.mxu0 %v3062_v18 }
 0x109   : > { %2238 = vmatpush1.bf16.msra.mxu1 %v3065_v19  ;;  %2186 = vmatprep.subr.bf16.mxu0 %v3070_v20 }
 0x10a   : > { %2239 = vmatprep.subr.bf16.mxu1 %v3073_v21 }
 0x10b   : > { %1779 = vmatmul.mubr.bf16.gmra.mxu0 %v3810_v27  ;;  %v3080_v27 = vld [vmem:[%s3831_s30 + $0x60] ss:$16 sps:$4 sm:$0xff]  }
 0x10c   : > { %1832 = vmatmul.mubr.bf16.gmra.mxu1 %v3815_v28  ;;  %2187 = vmatpush1.bf16.msra.mxu0 %v3068_v6  ;;  %v3083_v28 = vld [vmem:[%s3831_s30 + $0x68] ss:$16 sps:$4 sm:$0xff]   ;;  %s2410_s30 = scalar_lea.vmem (%p3267_p6), %s4037_s5, %s2811_s24 }
 0x10d   : > { %2240 = vmatpush1.bf16.msra.mxu1 %v3071_v7  ;;  %2188 = vmatprep.subr.bf16.mxu0 %v3076_v22 }
 0x10e   : > { %2241 = vmatprep.subr.bf16.mxu1 %v3079_v23  ;;  %2214 = vmatprep.mubr.bf16.mxu0 %v3154_v25 }
 0x10f   : > { %2267 = vmatprep.mubr.bf16.mxu1 %v3154_v25 }
 0x110   : > { %2189 = vmatpush1.bf16.msra.mxu0 %v3074_v24 }
 0x111   : > { %2242 = vmatpush1.bf16.msra.mxu1 %v3077_v26  ;;  %2190 = vmatprep.subr.bf16.mxu0 %v3082_v29 }
 0x112   : > { %2243 = vmatprep.subr.bf16.mxu1 %v3085_v30 }
 0x114   : > { %2191 = vmatpush1.bf16.msra.mxu0 %v3080_v27 }
 0x115   : > { %2244 = vmatpush1.bf16.msra.mxu1 %v3083_v28  ;;  %2192 = vmatprep.subr.bf16.mxu0 %v3088_v31 }
 0x116   : > { %2245 = vmatprep.subr.bf16.mxu1 %v3091_v32 }
 0x118   : > { %2193 = vmatpush1.bf16.msra.mxu0 %v3086_v33 }
 0x119   : > { %2246 = vmatpush1.bf16.msra.mxu1 %v3089_v34  ;;  %2194 = vmatprep.subr.bf16.mxu0 %v3094_v35 }
 0x11a   : > { %2247 = vmatprep.subr.bf16.mxu1 %v3097_v36 }
 0x11c   : > { %2195 = vmatpush1.bf16.msra.mxu0 %v3092_v0 }
 0x11d   : > { %2248 = vmatpush1.bf16.msra.mxu1 %v3095_v37  ;;  %2196 = vmatprep.subr.bf16.mxu0 %v3100_v38 }
 0x11e   : > { %2249 = vmatprep.subr.bf16.mxu1 %v3103_v39  ;;  %v2290_v39 = vlaneseq }
 0x120   : > { %2197 = vmatpush1.bf16.msra.mxu0 %v3098_v1 }
 0x121   : > { %2250 = vmatpush1.bf16.msra.mxu1 %v3101_v40  ;;  %2198 = vmatprep.subr.bf16.mxu0 %v3106_v41  ;;  %v2291_v41 = vshrl.u32 %v2290_v39, 7 }
 0x122   : > { %2251 = vmatprep.subr.bf16.mxu1 %v3109_v42 }
 0x124   : > { %2199 = vmatpush2.bf16.msra.mxu0 %v3104_v43 }
 0x125   : > { %2252 = vmatpush2.bf16.msra.mxu1 %v3107_v44  ;;  %2200 = vmatprep.subr.bf16.mxu0 %v3112_v45  ;;  %v2292_v44 = vsub.s32 0, %v2291_v41  ;;  %v2300_v45 = vsub.s32 2, %v2291_v41 }
 0x126   : > { %2253 = vmatprep.subr.bf16.mxu1 %v3115_v46  ;;  %v2288_v46 = vld [vmem:[%s734_s16] sm:$0xf] }
 0x128   : > { %2201 = vmatpush2.bf16.msra.mxu0 %v3110_v47  ;;  %v2296_v47 = vsub.s32 1, %v2291_v41 }
 0x129   : > { %2254 = vmatpush2.bf16.msra.mxu1 %v3113_v48  ;;  %2202 = vmatprep.subr.bf16.mxu0 %v3118_v49  ;;  %v2304_v48 = vsub.s32 3, %v2291_v41 }
 0x12a   : > { %2255 = vmatprep.subr.bf16.mxu1 %v3121_v50 }
 0x12c   : > { %2203 = vmatpush2.bf16.msra.mxu0 %v3116_v51 }
 0x12d   : > { %2256 = vmatpush2.bf16.msra.mxu1 %v3119_v52  ;;  %2204 = vmatprep.subr.bf16.mxu0 %v3124_v53  ;;  %v3964_v53 = vrot.slane %v2288_v46, %v2292_v44 }
 0x12e   : > { %2257 = vmatprep.subr.bf16.mxu1 %v3127_v54  ;;  %v3966_v54 = vrot.slane %v2288_v46, %v2300_v45 }
 0x130   : > { %2205 = vmatpush2.bf16.msra.mxu0 %v3122_v55 }
 0x131   : > { %2258 = vmatpush2.bf16.msra.mxu1 %v3125_v56  ;;  %2206 = vmatprep.subr.bf16.mxu0 %v3130_v57 }
 0x132   : > { %2259 = vmatprep.subr.bf16.mxu1 %v3133_v58  ;;  %v3968_v58 = vrot.slane %v2288_v46, %v2296_v47 }
 0x134   : > { %2207 = vmatpush2.bf16.msra.mxu0 %v3128_v59 }
 0x135   : > { %2260 = vmatpush2.bf16.msra.mxu1 %v3131_v60  ;;  %2208 = vmatprep.subr.bf16.mxu0 %v3136_v61 }
 0x136   : > { %2261 = vmatprep.subr.bf16.mxu1 %v3139_v62  ;;  %v3970_v62 = vrot.slane %v2288_v46, %v2304_v48 }
 0x138   : > { %2209 = vmatpush2.bf16.msra.mxu0 %v3134_v63 }
 0x139   : > { %2262 = vmatpush2.bf16.msra.mxu1 %v3137_v2  ;;  %2210 = vmatprep.subr.bf16.mxu0 %v3142_v3 }
 0x13a   : > { %2263 = vmatprep.subr.bf16.mxu1 %v3145_v4 }
 0x13c   : > { %2211 = vmatpush2.bf16.msra.mxu0 %v3140_v5 }
 0x13d   : > { %2264 = vmatpush2.bf16.msra.mxu1 %v3143_v8  ;;  %2212 = vmatprep.subr.bf16.mxu0 %v3148_v9 }
 0x13e   : > { %2265 = vmatprep.subr.bf16.mxu1 %v3151_v10 }
 0x140   : > { %2213 = vmatpush2.bf16.msra.mxu0 %v3146_v11 }
 0x141   : > { %2266 = vmatpush2.bf16.msra.mxu1 %v3149_v12 }
 0x143   : > { %2215 = vmatmul.mubr.bf16.vlgmr.msra.gmra.mxu0 %v3152_v13 }
 0x144   : > { %2268 = vmatmul.mubr.bf16.vlgmr.msra.gmra.mxu1 %v3152_v13  ;;  %2224 = vmatprep.mubr.bf16.mxu0 %v3155_v14 }
 0x145   : > { %2277 = vmatprep.mubr.bf16.mxu1 %v3155_v14 }
 0x14b   : > { %2225 = vmatmul.mubr.bf16.gmra.mxu0 %v3157_v15 }
 0x14c   : > { %2278 = vmatmul.mubr.bf16.gmra.mxu1 %v3157_v15 }
 0x183   : > { %v1664_v16 = vpop.f32.mrf.mxu0 }
 0x184   : > { %v1717_v17 = vpop.f32.mrf.mxu1 }
 0x185   : > { %v1666_v18 = vpop.f32.mrf.mxu0  ;;  %v1718_v51 = vadd.f32 %v1717_v17, %v1664_v16 }
 0x186   : > { %v1719_v19 = vpop.f32.mrf.mxu1 }
 0x187   : > { %v1668_v20 = vpop.f32.mrf.mxu0  ;;  %v1720_v55 = vadd.f32 %v1719_v19, %v1666_v18 }
 0x188   : > { %v1721_v21 = vpop.f32.mrf.mxu1 }
 0x189   : > { %v1670_v6 = vpop.f32.mrf.mxu0  ;;  %v1722_v63 = vadd.f32 %v1721_v21, %v1668_v20 }
 0x18a   : > { %v1723_v7 = vpop.f32.mrf.mxu1 }
 0x18b   : > { %v1674_v22 = vpop.f32.mrf.mxu0  ;;  %v1724_v2 = vadd.f32 %v1723_v7, %v1670_v6 }
 0x18c   : > { %v1727_v23 = vpop.f32.mrf.mxu1 }
 0x18d   : > { %v1676_v25 = vpop.f32.mrf.mxu0  ;;  %v1728_v11 = vadd.f32 %v1727_v23, %v1674_v22 }
 0x18e   : > { %v1729_v24 = vpop.f32.mrf.mxu1 }
 0x18f   : > { %v1678_v26 = vpop.f32.mrf.mxu0  ;;  %v1730_v12 = vadd.f32 %v1729_v24, %v1676_v25 }
 0x190   : > { %v1731_v29 = vpop.f32.mrf.mxu1 }
 0x191   : > { %v1680_v30 = vpop.f32.mrf.mxu0  ;;  %v1732_v13 = vadd.f32 %v1731_v29, %v1678_v26 }
 0x192   : > { %v1733_v27 = vpop.f32.mrf.mxu1 }
 0x193   : > { %v1734_v17 = vadd.f32 %v1733_v27, %v1680_v30 }
 0x1c3   : > { %v1770_v28 = vpop.f32.mrf.mxu0 }
 0x1c4   : > { %v1823_v31 = vpop.f32.mrf.mxu1 }
 0x1c5   : > { %v1772_v32 = vpop.f32.mrf.mxu0  ;;  %v1824_v52 = vadd.f32 %v1823_v31, %v1770_v28 }
 0x1c6   : > { %v1825_v33 = vpop.f32.mrf.mxu1 }
 0x1c7   : > { %v1774_v34 = vpop.f32.mrf.mxu0  ;;  %v1826_v59 = vadd.f32 %v1825_v33, %v1772_v32 }
 0x1c8   : > { %v1827_v35 = vpop.f32.mrf.mxu1 }
 0x1c9   : > { %v1776_v36 = vpop.f32.mrf.mxu0  ;;  %v1828_v14 = vadd.f32 %v1827_v35, %v1774_v34 }
 0x1ca   : > { %v1829_v0 = vpop.f32.mrf.mxu1 }
 0x1cb   : > { %v1780_v37 = vpop.f32.mrf.mxu0  ;;  %v1830_v18 = vadd.f32 %v1829_v0, %v1776_v36 }
 0x1cc   : > { %v1833_v38 = vpop.f32.mrf.mxu1 }
 0x1cd   : > { %v1782_v1 = vpop.f32.mrf.mxu0  ;;  %v1834_v24 = vadd.f32 %v1833_v38, %v1780_v37 }
 0x1ce   : > { %v1835_v40 = vpop.f32.mrf.mxu1 }
 0x1cf   : > { %v3956_v42 = vpop.f32.mrf.mxu0  ;;  %v1836_v26 = vadd.f32 %v1835_v40, %v1782_v1 }
 0x1d0   : > { %v3958_v43 = vpop.f32.mrf.mxu1 }
 0x1d1   : > { %v3960_v49 = vpop.f32.mrf.mxu0 }
 0x1d2   : > { %v3962_v50 = vpop.f32.mrf.mxu1 }
 0x203   : > { %v2216_v56 = vpop.f32.mrf.mxu0 }
 0x204   : > { %v2269_v57 = vpop.f32.mrf.mxu1  ;;  %v2217_v60 = vadd.f32 %v2216_v56, %v1718_v51  ;;  %v1838_v51 = vadd.f32 %v3958_v43, %v3956_v42 }
 0x205   : > { %v2270_v61 = vadd.f32 %v2269_v57, %v1824_v52  ;;  %v2218_v3 = vpop.f32.mrf.mxu0  ;;  %v1840_v52 = vadd.f32 %v3962_v50, %v3960_v49 }
 0x206   : > { %v2271_v4 = vpop.f32.mrf.mxu1  ;;  %v2310_v5 = vadd.f32 %v3964_v53, %v2217_v60  ;;  %v2219_v9 = vadd.f32 %v2218_v3, %v1720_v55 }
 0x207   : > { %v2312_v8 = vadd.f32 %v3966_v54, %v2270_v61  ;;  %v2272_v10 = vadd.f32 %v2271_v4, %v1826_v59  ;;  %v2220_v15 = vpop.f32.mrf.mxu0 }
 0x208   : > { %v2273_v16 = vpop.f32.mrf.mxu1  ;;  %v2311_v19 = vadd.f32 %v3968_v58, %v2219_v9  ;;  %v2326_v21 = vmax.f32 %v2310_v5, 0.0  ;;  %v2221_v7 = vadd.f32 %v2220_v15, %v1722_v63 }
 0x209   : > { %v2313_v20 = vadd.f32 %v3970_v62, %v2272_v10  ;;  %v2328_v6 = vmax.f32 %v2312_v8, 0.0  ;;  %v2274_v28 = vadd.f32 %v2273_v16, %v1828_v14  ;;  %v2222_v31 = vpop.f32.mrf.mxu0 }
 0x20a   : > { %v2275_v32 = vpop.f32.mrf.mxu1  ;;  %v2327_v33 = vmax.f32 %v2311_v19, 0.0  ;;  %v2223_v23 = vadd.f32 %v2222_v31, %v1724_v2  ;;  %v2314_v29 = vadd.f32 %v3964_v53, %v2221_v7 }
 0x20b   : > { %v2329_v22 = vmax.f32 %v2313_v20, 0.0  ;;  %v2276_v25 = vadd.f32 %v2275_v32, %v1830_v18  ;;  %v2316_v30 = vadd.f32 %v3966_v54, %v2274_v28  ;;  %v2226_v27 = vpop.f32.mrf.mxu0 }
 0x20c   : > { %v2279_v34 = vpop.f32.mrf.mxu1  ;;  %v2803_v35 = vpack.c.bf16 %v2327_v33, %v2326_v21  ;;  %v2315_v0 = vadd.f32 %v3968_v58, %v2223_v23  ;;  %v2330_v41 = vmax.f32 %v2314_v29, 0.0  ;;  %v2227_v45 = vadd.f32 %v2226_v27, %v1728_v11 }
 0x20d   : > { %v2804_v36 = vpack.c.bf16 %v2329_v22, %v2328_v6  ;;  %v2317_v39 = vadd.f32 %v3970_v62, %v2276_v25  ;;  %v2332_v44 = vmax.f32 %v2316_v30, 0.0  ;;  %v2280_v46 = vadd.f32 %v2279_v34, %v1834_v24  ;;  %v2228_v47 = vpop.f32.mrf.mxu0 }
 0x20e   : > { %v2281_v48 = vpop.f32.mrf.mxu1  ;;  %2390 = vst [vmem:[%s3981_s25] sm:$0xff] %v2803_v35  ;;  %v2331_v37 = vmax.f32 %v2315_v0, 0.0  ;;  %v2229_v1 = vadd.f32 %v2228_v47, %v1730_v12  ;;  %v2318_v55 = vadd.f32 %v3964_v53, %v2227_v45 }
 0x20f   : > { %2391 = vst [vmem:[%s3981_s25 + $0x8] sm:$0xff] %v2804_v36  ;;  %v2333_v38 = vmax.f32 %v2317_v39, 0.0  ;;  %v2282_v40 = vadd.f32 %v2281_v48, %v1836_v26  ;;  %v2320_v56 = vadd.f32 %v3966_v54, %v2280_v46  ;;  %v2230_v57 = vpop.f32.mrf.mxu0 }
 0x210   : > { %v2283_v59 = vpop.f32.mrf.mxu1  ;;  %v2805_v60 = vpack.c.bf16 %v2331_v37, %v2330_v41  ;;  %v2319_v63 = vadd.f32 %v3968_v58, %v2229_v1  ;;  %v2334_v3 = vmax.f32 %v2318_v55, 0.0  ;;  %v2231_v42 = vadd.f32 %v2230_v57, %v1732_v13 }
 0x211   : > { %v2806_v61 = vpack.c.bf16 %v2333_v38, %v2332_v44  ;;  %v2321_v2 = vadd.f32 %v3970_v62, %v2282_v40  ;;  %v2336_v4 = vmax.f32 %v2320_v56, 0.0  ;;  %v2284_v43 = vadd.f32 %v2283_v59, %v1838_v51  ;;  %v2232_v49 = vpop.f32.mrf.mxu0 }
 0x212   : > { %v2285_v50 = vpop.f32.mrf.mxu1  ;;  %2392 = vst [vmem:[%s3981_s25 + $0x10] sm:$0xff] %v2805_v60  ;;  %v2335_v5 = vmax.f32 %v2319_v63, 0.0  ;;  %v2233_v9 = vadd.f32 %v2232_v49, %v1734_v17  ;;  %v2322_v11 = vadd.f32 %v3964_v53, %v2231_v42 }
 0x213   : > { %2393 = vst [vmem:[%s3981_s25 + $0x18] sm:$0xff] %v2806_v61  ;;  %v2337_v8 = vmax.f32 %v2321_v2, 0.0  ;;  %v2286_v10 = vadd.f32 %v2285_v50, %v1840_v52  ;;  %v2324_v12 = vadd.f32 %v3966_v54, %v2284_v43 }
 0x214   : > { %v2807_v14 = vpack.c.bf16 %v2335_v5, %v2334_v3  ;;  %v2323_v13 = vadd.f32 %v3968_v58, %v2233_v9  ;;  %v2338_v18 = vmax.f32 %v2322_v11, 0.0 }
 0x215   : > { %v2808_v15 = vpack.c.bf16 %v2337_v8, %v2336_v4  ;;  %v2325_v16 = vadd.f32 %v3970_v62, %v2286_v10  ;;  %v2340_v19 = vmax.f32 %v2324_v12, 0.0  ;;  %v2423_v53 = vld [vmem:[%s3981_s25] sm:$0xff] (%p3267_p6) }
 0x216   : > { %2394 = vst [vmem:[%s3981_s25 + $0x20] sm:$0xff] %v2807_v14  ;;  %v2339_v20 = vmax.f32 %v2323_v13, 0.0  ;;  %v2425_v54 = vld [vmem:[%s3981_s25 + $0x8] sm:$0xff] (%p3267_p6)  ;;  %2424 = vst [vmem:[%s2410_s30] sm:$0xff] (%p3267_p6), %v2423_v53 }
 0x217   : > { %2395 = vst [vmem:[%s3981_s25 + $0x28] sm:$0xff] %v2808_v15  ;;  %v2341_v21 = vmax.f32 %v2325_v16, 0.0  ;;  %2404 = sbr.rel (!%p3267_p6) target bundleno = 548 (0x224), region = 90  ;;  %2426 = vst [vmem:[%s2410_s30 + $0x8] sm:$0xff] (%p3267_p6), %v2425_v54 }
 0x218   : > { %v2809_v17 = vpack.c.bf16 %v2339_v20, %v2338_v18 }
 0x219   : > { %v2810_v6 = vpack.c.bf16 %v2341_v21, %v2340_v19  ;;  %v2427_v58 = vld [vmem:[%s3981_s25 + $0x10] sm:$0xff] (%p3267_p6) }
 0x21a   : > { %2396 = vst [vmem:[%s3981_s25 + $0x30] sm:$0xff] %v2809_v17  ;;  %v2429_v62 = vld [vmem:[%s3981_s25 + $0x18] sm:$0xff] (%p3267_p6)  ;;  %2428 = vst [vmem:[%s2410_s30 + $0x20] sm:$0xff] (%p3267_p6), %v2427_v58 }
 0x21b   : > { %2397 = vst [vmem:[%s3981_s25 + $0x38] sm:$0xff] %v2810_v6  ;;  %2430 = vst [vmem:[%s2410_s30 + $0x28] sm:$0xff] (%p3267_p6), %v2429_v62 }
 0x21d   : > { %v2431_v7 = vld [vmem:[%s3981_s25 + $0x20] sm:$0xff] }
 0x21e   : > { %v2433_v28 = vld [vmem:[%s3981_s25 + $0x28] sm:$0xff]  ;;  %2432 = vst [vmem:[%s2410_s30 + $0x40] sm:$0xff] %v2431_v7 }
 0x21f   : > { %2434 = vst [vmem:[%s2410_s30 + $0x48] sm:$0xff] %v2433_v28 }
 0x221   : > { %v2435_v31 = vld [vmem:[%s3981_s25 + $0x30] sm:$0xff] }
 0x222   : > { %v2437_v32 = vld [vmem:[%s3981_s25 + $0x38] sm:$0xff]  ;;  %2436 = vst [vmem:[%s2410_s30 + $0x60] sm:$0xff] %v2435_v31 }
 0x223   : > { %2438 = vst [vmem:[%s2410_s30 + $0x68] sm:$0xff] %v2437_v32 }
 0x224 PF: > { %s15_s22 = sadd.s32 1, %s3196_s22   ;;  %s4040_s18 = smov %s3184_s19 }
 0x225   : > { %p12_p12 = scmp.ge.s32.totalorder %s15_s22, 4   ;;  %s4041_s19 = smov %s3272_s29 }
 0x226   : > { %s4042_s20 = smov %s3192_s21  ;;  %s4043_s21 = smov %s4045_s23 }
 0x227   :  { %14 = sbr.rel (!%p12_p12) target bundleno = 3 (0x3), region = 161 }

// kernel: depth_encoder_forward.17
= control target key start
LH: loop header
LB: loop body
LE: loop exit
PB: predicated region body
PF: predicated region fallthrough
CT: control target
= control target key end

     0   :  { %s3391_s12 = smov 0   ;;  %s3393_s13 = smov 0   ;;  %s4170_s0 = inlined_call_operand.vmem [shape: bf16[8,2048], index: 0, kind: input, shape index: {}]   ;;  %s4171_s1 = inlined_call_operand.vmem [shape: bf16[2048,256], index: 1, kind: input, shape index: {}]   ;;  %s4172_s2 = inlined_call_operand.vmem [shape: f32[1,256], index: 2, kind: input, shape index: {}]   ;;  %s4173_s3 = inlined_call_operand.vmem [shape: f32[8,256], index: 3, kind: output, shape index: {}]  }
   0x1   :  { %s3395_s14 = smov 0   ;;  %s3397_s15 = smov 0  }
   0x2   :  { %s3399_s16 = smov 0  }
   0x3 LB: > { %s22_s17 = sadd.s32 1, %s3365_s15  ;;  %p65_p1 = scmp.ne.s32.totalorder %s3357_s13, %s3353_s12  ;;  %s3369_s16 = sphi %s3399_s16, %s13_s16   ;;  %s3365_s15 = sphi %s3397_s15, %s4177_s15   ;;  %s3361_s14 = sphi %s3395_s14, %s4176_s14   ;;  %s3357_s13 = sphi %s3393_s13, %s4175_s13   ;;  %s3353_s12 = sphi %s3391_s12, %s4174_s12  }
   0x4   : > { %p23_p0 = scmp.ge.s32.totalorder %s22_s17, 2  ;;  %p66_p2 = scmp.eq.s32.totalorder %s3369_s16, 0 }
   0x5   : > { %s58_s19 = sadd.s32 1, %s3357_s13  ;;  %p2818_p5 = scmp.ge.s32.totalorder %s3369_s16, 2 }
   0x6   : > { %s4179_s17 = smov (%p23_p0, %s22_s17), 0  ;;  %p67_p3 = por %p66_p2, %p65_p1 }
   0x7   : > { %s55_s18 = ssub.s32 %s3365_s15, %s4179_s17  ;;  %153 = sbr.rel (%p2818_p5) target bundleno = 186 (0xba), region = 20 }
   0x8   : > { %p56_p4 = scmp.eq.s32.totalorder %s55_s18, 0 }
   0xa   : > { %s3426_s20 = scalar_select %p56_p4, %s3357_s13, %s58_s19  }
   0xc   : > { %156 = sbr.rel (!%p67_p3) target bundleno = 186 (0xba), region = 24  ;;  %s158_s21 = sand.u32 (%p67_p3), 1, %s3357_s13  }
   0xd   : > { %s2820_s22 = sshll.u32 (%p67_p3), %s3365_s15, 2  ;;  %s2819_s23 = sshll.u32 (%p67_p3), %s158_s21, 10 }
   0xe   : > { %s3434_s26 = scalar_lea.vmem (%p67_p3), %s4171_s1, %s2820_s22  ;;  %s3438_s27 = scalar_lea.vmem (%p67_p3), [#allocation2], %s2819_s23 }
   0xf   : > { %v179_v0 = vld [vmem:[%s3434_s26] sm:$0xf] (%p67_p3)  ;;  %v181_v1 = vld [vmem:[%s3434_s26 + $0x8] sm:$0xf] (%p67_p3)  ;;  %v183_v2 = vld [vmem:[%s3434_s26 + $0x10] sm:$0xf] (%p67_p3) }
  0x10   : > { %180 = vst [vmem:[%s3438_s27] sm:$0xf] (%p67_p3), %v179_v0  ;;  %182 = vst [vmem:[%s3438_s27 + $0x4] sm:$0xf] (%p67_p3), %v181_v1  ;;  %v185_v3 = vld [vmem:[%s3434_s26 + $0x18] sm:$0xf] (%p67_p3) }
  0x11   : > { %v187_v4 = vld [vmem:[%s3434_s26 + $0x20] sm:$0xf]  ;;  %184 = vst [vmem:[%s3438_s27 + $0x8] sm:$0xf] %v183_v2  ;;  %186 = vst [vmem:[%s3438_s27 + $0xc] sm:$0xf] %v185_v3 }
  0x12   : > { %188 = vst [vmem:[%s3438_s27 + $0x10] sm:$0xf] %v187_v4  ;;  %v189_v5 = vld [vmem:[%s3434_s26 + $0x28] sm:$0xf]  ;;  %v191_v6 = vld [vmem:[%s3434_s26 + $0x30] sm:$0xf] }
  0x13   : > { %v193_v7 = vld [vmem:[%s3434_s26 + $0x38] sm:$0xf]  ;;  %190 = vst [vmem:[%s3438_s27 + $0x14] sm:$0xf] %v189_v5  ;;  %192 = vst [vmem:[%s3438_s27 + $0x18] sm:$0xf] %v191_v6 }
  0x14   : > { %194 = vst [vmem:[%s3438_s27 + $0x1c] sm:$0xf] %v193_v7  ;;  %v195_v8 = vld [vmem:[%s3434_s26 + $0x40] sm:$0xf]  ;;  %v197_v9 = vld [vmem:[%s3434_s26 + $0x48] sm:$0xf] }
  0x15   : > { %v199_v10 = vld [vmem:[%s3434_s26 + $0x50] sm:$0xf]  ;;  %196 = vst [vmem:[%s3438_s27 + $0x20] sm:$0xf] %v195_v8  ;;  %198 = vst [vmem:[%s3438_s27 + $0x24] sm:$0xf] %v197_v9 }
  0x16   : > { %200 = vst [vmem:[%s3438_s27 + $0x28] sm:$0xf] %v199_v10  ;;  %v201_v11 = vld [vmem:[%s3434_s26 + $0x58] sm:$0xf]  ;;  %v203_v12 = vld [vmem:[%s3434_s26 + $0x60] sm:$0xf] }
  0x17   : > { %v205_v13 = vld [vmem:[%s3434_s26 + $0x68] sm:$0xf]  ;;  %202 = vst [vmem:[%s3438_s27 + $0x2c] sm:$0xf] %v201_v11  ;;  %204 = vst [vmem:[%s3438_s27 + $0x30] sm:$0xf] %v203_v12 }
  0x18   : > { %206 = vst [vmem:[%s3438_s27 + $0x34] sm:$0xf] %v205_v13  ;;  %v207_v14 = vld [vmem:[%s3434_s26 + $0x70] sm:$0xf]  ;;  %v209_v15 = vld [vmem:[%s3434_s26 + $0x78] sm:$0xf] }
  0x19   : > { %v211_v16 = vld [vmem:[%s3434_s26 + $0x80] sm:$0xf]  ;;  %208 = vst [vmem:[%s3438_s27 + $0x38] sm:$0xf] %v207_v14  ;;  %210 = vst [vmem:[%s3438_s27 + $0x3c] sm:$0xf] %v209_v15 }
  0x1a   : > { %212 = vst [vmem:[%s3438_s27 + $0x40] sm:$0xf] %v211_v16  ;;  %v213_v17 = vld [vmem:[%s3434_s26 + $0x88] sm:$0xf]  ;;  %v215_v18 = vld [vmem:[%s3434_s26 + $0x90] sm:$0xf] }
  0x1b   : > { %v217_v19 = vld [vmem:[%s3434_s26 + $0x98] sm:$0xf]  ;;  %214 = vst [vmem:[%s3438_s27 + $0x44] sm:$0xf] %v213_v17  ;;  %216 = vst [vmem:[%s3438_s27 + $0x48] sm:$0xf] %v215_v18 }
  0x1c   : > { %218 = vst [vmem:[%s3438_s27 + $0x4c] sm:$0xf] %v217_v19  ;;  %v219_v20 = vld [vmem:[%s3434_s26 + $0xa0] sm:$0xf]  ;;  %v221_v21 = vld [vmem:[%s3434_s26 + $0xa8] sm:$0xf] }
  0x1d   : > { %v223_v22 = vld [vmem:[%s3434_s26 + $0xb0] sm:$0xf]  ;;  %220 = vst [vmem:[%s3438_s27 + $0x50] sm:$0xf] %v219_v20  ;;  %222 = vst [vmem:[%s3438_s27 + $0x54] sm:$0xf] %v221_v21 }
  0x1e   : > { %224 = vst [vmem:[%s3438_s27 + $0x58] sm:$0xf] %v223_v22  ;;  %v225_v23 = vld [vmem:[%s3434_s26 + $0xb8] sm:$0xf]  ;;  %v227_v24 = vld [vmem:[%s3434_s26 + $0xc0] sm:$0xf] }
  0x1f   : > { %v229_v25 = vld [vmem:[%s3434_s26 + $0xc8] sm:$0xf]  ;;  %226 = vst [vmem:[%s3438_s27 + $0x5c] sm:$0xf] %v225_v23  ;;  %228 = vst [vmem:[%s3438_s27 + $0x60] sm:$0xf] %v227_v24 }
  0x20   : > { %230 = vst [vmem:[%s3438_s27 + $0x64] sm:$0xf] %v229_v25  ;;  %v231_v26 = vld [vmem:[%s3434_s26 + $0xd0] sm:$0xf]  ;;  %v233_v27 = vld [vmem:[%s3434_s26 + $0xd8] sm:$0xf] }
  0x21   : > { %v235_v28 = vld [vmem:[%s3434_s26 + $0xe0] sm:$0xf]  ;;  %232 = vst [vmem:[%s3438_s27 + $0x68] sm:$0xf] %v231_v26  ;;  %234 = vst [vmem:[%s3438_s27 + $0x6c] sm:$0xf] %v233_v27 }
  0x22   : > { %236 = vst [vmem:[%s3438_s27 + $0x70] sm:$0xf] %v235_v28  ;;  %v237_v29 = vld [vmem:[%s3434_s26 + $0xe8] sm:$0xf]  ;;  %v239_v30 = vld [vmem:[%s3434_s26 + $0xf0] sm:$0xf] }
  0x23   : > { %v241_v31 = vld [vmem:[%s3434_s26 + $0xf8] sm:$0xf]  ;;  %238 = vst [vmem:[%s3438_s27 + $0x74] sm:$0xf] %v237_v29  ;;  %240 = vst [vmem:[%s3438_s27 + $0x78] sm:$0xf] %v239_v30 }
  0x24   : > { %242 = vst [vmem:[%s3438_s27 + $0x7c] sm:$0xf] %v241_v31  ;;  %v243_v32 = vld [vmem:[%s3434_s26 + $0x100] sm:$0xf]  ;;  %v245_v33 = vld [vmem:[%s3434_s26 + $0x108] sm:$0xf] }
  0x25   : > { %v247_v34 = vld [vmem:[%s3434_s26 + $0x110] sm:$0xf]  ;;  %244 = vst [vmem:[%s3438_s27 + $0x80] sm:$0xf] %v243_v32  ;;  %246 = vst [vmem:[%s3438_s27 + $0x84] sm:$0xf] %v245_v33 }
  0x26   : > { %248 = vst [vmem:[%s3438_s27 + $0x88] sm:$0xf] %v247_v34  ;;  %v249_v35 = vld [vmem:[%s3434_s26 + $0x118] sm:$0xf]  ;;  %v251_v36 = vld [vmem:[%s3434_s26 + $0x120] sm:$0xf] }
  0x27   : > { %v253_v37 = vld [vmem:[%s3434_s26 + $0x128] sm:$0xf]  ;;  %250 = vst [vmem:[%s3438_s27 + $0x8c] sm:$0xf] %v249_v35  ;;  %252 = vst [vmem:[%s3438_s27 + $0x90] sm:$0xf] %v251_v36 }
  0x28   : > { %254 = vst [vmem:[%s3438_s27 + $0x94] sm:$0xf] %v253_v37  ;;  %v255_v38 = vld [vmem:[%s3434_s26 + $0x130] sm:$0xf]  ;;  %v257_v39 = vld [vmem:[%s3434_s26 + $0x138] sm:$0xf] }
  0x29   : > { %v259_v40 = vld [vmem:[%s3434_s26 + $0x140] sm:$0xf]  ;;  %256 = vst [vmem:[%s3438_s27 + $0x98] sm:$0xf] %v255_v38  ;;  %258 = vst [vmem:[%s3438_s27 + $0x9c] sm:$0xf] %v257_v39 }
  0x2a   : > { %260 = vst [vmem:[%s3438_s27 + $0xa0] sm:$0xf] %v259_v40  ;;  %v261_v41 = vld [vmem:[%s3434_s26 + $0x148] sm:$0xf]  ;;  %v263_v42 = vld [vmem:[%s3434_s26 + $0x150] sm:$0xf] }
  0x2b   : > { %v265_v43 = vld [vmem:[%s3434_s26 + $0x158] sm:$0xf]  ;;  %262 = vst [vmem:[%s3438_s27 + $0xa4] sm:$0xf] %v261_v41  ;;  %264 = vst [vmem:[%s3438_s27 + $0xa8] sm:$0xf] %v263_v42 }
  0x2c   : > { %266 = vst [vmem:[%s3438_s27 + $0xac] sm:$0xf] %v265_v43  ;;  %v267_v44 = vld [vmem:[%s3434_s26 + $0x160] sm:$0xf]  ;;  %v269_v45 = vld [vmem:[%s3434_s26 + $0x168] sm:$0xf] }
  0x2d   : > { %v271_v46 = vld [vmem:[%s3434_s26 + $0x170] sm:$0xf]  ;;  %268 = vst [vmem:[%s3438_s27 + $0xb0] sm:$0xf] %v267_v44  ;;  %270 = vst [vmem:[%s3438_s27 + $0xb4] sm:$0xf] %v269_v45 }
  0x2e   : > { %272 = vst [vmem:[%s3438_s27 + $0xb8] sm:$0xf] %v271_v46  ;;  %v273_v47 = vld [vmem:[%s3434_s26 + $0x178] sm:$0xf]  ;;  %v275_v48 = vld [vmem:[%s3434_s26 + $0x180] sm:$0xf] }
  0x2f   : > { %v277_v49 = vld [vmem:[%s3434_s26 + $0x188] sm:$0xf]  ;;  %274 = vst [vmem:[%s3438_s27 + $0xbc] sm:$0xf] %v273_v47  ;;  %276 = vst [vmem:[%s3438_s27 + $0xc0] sm:$0xf] %v275_v48 }
  0x30   : > { %278 = vst [vmem:[%s3438_s27 + $0xc4] sm:$0xf] %v277_v49  ;;  %v279_v50 = vld [vmem:[%s3434_s26 + $0x190] sm:$0xf]  ;;  %v281_v51 = vld [vmem:[%s3434_s26 + $0x198] sm:$0xf] }
  0x31   : > { %v283_v52 = vld [vmem:[%s3434_s26 + $0x1a0] sm:$0xf]  ;;  %280 = vst [vmem:[%s3438_s27 + $0xc8] sm:$0xf] %v279_v50  ;;  %282 = vst [vmem:[%s3438_s27 + $0xcc] sm:$0xf] %v281_v51 }
  0x32   : > { %284 = vst [vmem:[%s3438_s27 + $0xd0] sm:$0xf] %v283_v52  ;;  %v285_v53 = vld [vmem:[%s3434_s26 + $0x1a8] sm:$0xf]  ;;  %v287_v54 = vld [vmem:[%s3434_s26 + $0x1b0] sm:$0xf] }
  0x33   : > { %v289_v55 = vld [vmem:[%s3434_s26 + $0x1b8] sm:$0xf]  ;;  %286 = vst [vmem:[%s3438_s27 + $0xd4] sm:$0xf] %v285_v53  ;;  %288 = vst [vmem:[%s3438_s27 + $0xd8] sm:$0xf] %v287_v54 }
  0x34   : > { %290 = vst [vmem:[%s3438_s27 + $0xdc] sm:$0xf] %v289_v55  ;;  %v291_v56 = vld [vmem:[%s3434_s26 + $0x1c0] sm:$0xf]  ;;  %v293_v57 = vld [vmem:[%s3434_s26 + $0x1c8] sm:$0xf] }
  0x35   : > { %v295_v58 = vld [vmem:[%s3434_s26 + $0x1d0] sm:$0xf]  ;;  %292 = vst [vmem:[%s3438_s27 + $0xe0] sm:$0xf] %v291_v56  ;;  %294 = vst [vmem:[%s3438_s27 + $0xe4] sm:$0xf] %v293_v57 }
  0x36   : > { %296 = vst [vmem:[%s3438_s27 + $0xe8] sm:$0xf] %v295_v58  ;;  %v297_v59 = vld [vmem:[%s3434_s26 + $0x1d8] sm:$0xf]  ;;  %v299_v60 = vld [vmem:[%s3434_s26 + $0x1e0] sm:$0xf] }
  0x37   : > { %v301_v61 = vld [vmem:[%s3434_s26 + $0x1e8] sm:$0xf]  ;;  %298 = vst [vmem:[%s3438_s27 + $0xec] sm:$0xf] %v297_v59  ;;  %300 = vst [vmem:[%s3438_s27 + $0xf0] sm:$0xf] %v299_v60 }
  0x38   : > { %302 = vst [vmem:[%s3438_s27 + $0xf4] sm:$0xf] %v301_v61  ;;  %v303_v62 = vld [vmem:[%s3434_s26 + $0x1f0] sm:$0xf]  ;;  %v305_v63 = vld [vmem:[%s3434_s26 + $0x1f8] sm:$0xf] }
  0x39   : > { %v307_v0 = vld [vmem:[%s3434_s26 + $0x200] sm:$0xf]  ;;  %304 = vst [vmem:[%s3438_s27 + $0xf8] sm:$0xf] %v303_v62  ;;  %306 = vst [vmem:[%s3438_s27 + $0xfc] sm:$0xf] %v305_v63 }
  0x3a   : > { %308 = vst [vmem:[%s3438_s27 + $0x100] sm:$0xf] %v307_v0  ;;  %v309_v1 = vld [vmem:[%s3434_s26 + $0x208] sm:$0xf]  ;;  %v311_v2 = vld [vmem:[%s3434_s26 + $0x210] sm:$0xf] }
  0x3b   : > { %v313_v3 = vld [vmem:[%s3434_s26 + $0x218] sm:$0xf]  ;;  %310 = vst [vmem:[%s3438_s27 + $0x104] sm:$0xf] %v309_v1  ;;  %312 = vst [vmem:[%s3438_s27 + $0x108] sm:$0xf] %v311_v2 }
  0x3c   : > { %314 = vst [vmem:[%s3438_s27 + $0x10c] sm:$0xf] %v313_v3  ;;  %v315_v4 = vld [vmem:[%s3434_s26 + $0x220] sm:$0xf]  ;;  %v317_v5 = vld [vmem:[%s3434_s26 + $0x228] sm:$0xf] }
  0x3d   : > { %v319_v6 = vld [vmem:[%s3434_s26 + $0x230] sm:$0xf]  ;;  %316 = vst [vmem:[%s3438_s27 + $0x110] sm:$0xf] %v315_v4  ;;  %318 = vst [vmem:[%s3438_s27 + $0x114] sm:$0xf] %v317_v5 }
  0x3e   : > { %320 = vst [vmem:[%s3438_s27 + $0x118] sm:$0xf] %v319_v6  ;;  %v321_v7 = vld [vmem:[%s3434_s26 + $0x238] sm:$0xf]  ;;  %v323_v8 = vld [vmem:[%s3434_s26 + $0x240] sm:$0xf] }
  0x3f   : > { %v325_v9 = vld [vmem:[%s3434_s26 + $0x248] sm:$0xf]  ;;  %322 = vst [vmem:[%s3438_s27 + $0x11c] sm:$0xf] %v321_v7  ;;  %324 = vst [vmem:[%s3438_s27 + $0x120] sm:$0xf] %v323_v8 }
  0x40   : > { %326 = vst [vmem:[%s3438_s27 + $0x124] sm:$0xf] %v325_v9  ;;  %v327_v10 = vld [vmem:[%s3434_s26 + $0x250] sm:$0xf]  ;;  %v329_v11 = vld [vmem:[%s3434_s26 + $0x258] sm:$0xf] }
  0x41   : > { %v331_v12 = vld [vmem:[%s3434_s26 + $0x260] sm:$0xf]  ;;  %328 = vst [vmem:[%s3438_s27 + $0x128] sm:$0xf] %v327_v10  ;;  %330 = vst [vmem:[%s3438_s27 + $0x12c] sm:$0xf] %v329_v11 }
  0x42   : > { %332 = vst [vmem:[%s3438_s27 + $0x130] sm:$0xf] %v331_v12  ;;  %v333_v13 = vld [vmem:[%s3434_s26 + $0x268] sm:$0xf]  ;;  %v335_v14 = vld [vmem:[%s3434_s26 + $0x270] sm:$0xf] }
  0x43   : > { %v337_v15 = vld [vmem:[%s3434_s26 + $0x278] sm:$0xf]  ;;  %334 = vst [vmem:[%s3438_s27 + $0x134] sm:$0xf] %v333_v13  ;;  %336 = vst [vmem:[%s3438_s27 + $0x138] sm:$0xf] %v335_v14 }
  0x44   : > { %338 = vst [vmem:[%s3438_s27 + $0x13c] sm:$0xf] %v337_v15  ;;  %v339_v16 = vld [vmem:[%s3434_s26 + $0x280] sm:$0xf]  ;;  %v341_v17 = vld [vmem:[%s3434_s26 + $0x288] sm:$0xf] }
  0x45   : > { %v343_v18 = vld [vmem:[%s3434_s26 + $0x290] sm:$0xf]  ;;  %340 = vst [vmem:[%s3438_s27 + $0x140] sm:$0xf] %v339_v16  ;;  %342 = vst [vmem:[%s3438_s27 + $0x144] sm:$0xf] %v341_v17 }
  0x46   : > { %344 = vst [vmem:[%s3438_s27 + $0x148] sm:$0xf] %v343_v18  ;;  %v345_v19 = vld [vmem:[%s3434_s26 + $0x298] sm:$0xf]  ;;  %v347_v20 = vld [vmem:[%s3434_s26 + $0x2a0] sm:$0xf] }
  0x47   : > { %v349_v21 = vld [vmem:[%s3434_s26 + $0x2a8] sm:$0xf]  ;;  %346 = vst [vmem:[%s3438_s27 + $0x14c] sm:$0xf] %v345_v19  ;;  %348 = vst [vmem:[%s3438_s27 + $0x150] sm:$0xf] %v347_v20 }
  0x48   : > { %350 = vst [vmem:[%s3438_s27 + $0x154] sm:$0xf] %v349_v21  ;;  %v351_v22 = vld [vmem:[%s3434_s26 + $0x2b0] sm:$0xf]  ;;  %v353_v23 = vld [vmem:[%s3434_s26 + $0x2b8] sm:$0xf] }
  0x49   : > { %v355_v24 = vld [vmem:[%s3434_s26 + $0x2c0] sm:$0xf]  ;;  %352 = vst [vmem:[%s3438_s27 + $0x158] sm:$0xf] %v351_v22  ;;  %354 = vst [vmem:[%s3438_s27 + $0x15c] sm:$0xf] %v353_v23 }
  0x4a   : > { %356 = vst [vmem:[%s3438_s27 + $0x160] sm:$0xf] %v355_v24  ;;  %v357_v25 = vld [vmem:[%s3434_s26 + $0x2c8] sm:$0xf]  ;;  %v359_v26 = vld [vmem:[%s3434_s26 + $0x2d0] sm:$0xf] }
  0x4b   : > { %v361_v27 = vld [vmem:[%s3434_s26 + $0x2d8] sm:$0xf]  ;;  %358 = vst [vmem:[%s3438_s27 + $0x164] sm:$0xf] %v357_v25  ;;  %360 = vst [vmem:[%s3438_s27 + $0x168] sm:$0xf] %v359_v26 }
  0x4c   : > { %362 = vst [vmem:[%s3438_s27 + $0x16c] sm:$0xf] %v361_v27  ;;  %v363_v28 = vld [vmem:[%s3434_s26 + $0x2e0] sm:$0xf]  ;;  %v365_v29 = vld [vmem:[%s3434_s26 + $0x2e8] sm:$0xf] }
  0x4d   : > { %v367_v30 = vld [vmem:[%s3434_s26 + $0x2f0] sm:$0xf]  ;;  %364 = vst [vmem:[%s3438_s27 + $0x170] sm:$0xf] %v363_v28  ;;  %366 = vst [vmem:[%s3438_s27 + $0x174] sm:$0xf] %v365_v29 }
  0x4e   : > { %368 = vst [vmem:[%s3438_s27 + $0x178] sm:$0xf] %v367_v30  ;;  %v369_v31 = vld [vmem:[%s3434_s26 + $0x2f8] sm:$0xf]  ;;  %v371_v32 = vld [vmem:[%s3434_s26 + $0x300] sm:$0xf] }
  0x4f   : > { %v373_v33 = vld [vmem:[%s3434_s26 + $0x308] sm:$0xf]  ;;  %370 = vst [vmem:[%s3438_s27 + $0x17c] sm:$0xf] %v369_v31  ;;  %372 = vst [vmem:[%s3438_s27 + $0x180] sm:$0xf] %v371_v32 }
  0x50   : > { %374 = vst [vmem:[%s3438_s27 + $0x184] sm:$0xf] %v373_v33  ;;  %v375_v34 = vld [vmem:[%s3434_s26 + $0x310] sm:$0xf]  ;;  %v377_v35 = vld [vmem:[%s3434_s26 + $0x318] sm:$0xf] }
  0x51   : > { %v379_v36 = vld [vmem:[%s3434_s26 + $0x320] sm:$0xf]  ;;  %376 = vst [vmem:[%s3438_s27 + $0x188] sm:$0xf] %v375_v34  ;;  %378 = vst [vmem:[%s3438_s27 + $0x18c] sm:$0xf] %v377_v35 }
  0x52   : > { %380 = vst [vmem:[%s3438_s27 + $0x190] sm:$0xf] %v379_v36  ;;  %v381_v37 = vld [vmem:[%s3434_s26 + $0x328] sm:$0xf]  ;;  %v383_v38 = vld [vmem:[%s3434_s26 + $0x330] sm:$0xf] }
  0x53   : > { %v385_v39 = vld [vmem:[%s3434_s26 + $0x338] sm:$0xf]  ;;  %382 = vst [vmem:[%s3438_s27 + $0x194] sm:$0xf] %v381_v37  ;;  %384 = vst [vmem:[%s3438_s27 + $0x198] sm:$0xf] %v383_v38 }
  0x54   : > { %386 = vst [vmem:[%s3438_s27 + $0x19c] sm:$0xf] %v385_v39  ;;  %v387_v40 = vld [vmem:[%s3434_s26 + $0x340] sm:$0xf]  ;;  %v389_v41 = vld [vmem:[%s3434_s26 + $0x348] sm:$0xf] }
  0x55   : > { %v391_v42 = vld [vmem:[%s3434_s26 + $0x350] sm:$0xf]  ;;  %388 = vst [vmem:[%s3438_s27 + $0x1a0] sm:$0xf] %v387_v40  ;;  %390 = vst [vmem:[%s3438_s27 + $0x1a4] sm:$0xf] %v389_v41 }
  0x56   : > { %392 = vst [vmem:[%s3438_s27 + $0x1a8] sm:$0xf] %v391_v42  ;;  %v393_v43 = vld [vmem:[%s3434_s26 + $0x358] sm:$0xf]  ;;  %v395_v44 = vld [vmem:[%s3434_s26 + $0x360] sm:$0xf] }
  0x57   : > { %v397_v45 = vld [vmem:[%s3434_s26 + $0x368] sm:$0xf]  ;;  %394 = vst [vmem:[%s3438_s27 + $0x1ac] sm:$0xf] %v393_v43  ;;  %396 = vst [vmem:[%s3438_s27 + $0x1b0] sm:$0xf] %v395_v44 }
  0x58   : > { %398 = vst [vmem:[%s3438_s27 + $0x1b4] sm:$0xf] %v397_v45  ;;  %v399_v46 = vld [vmem:[%s3434_s26 + $0x370] sm:$0xf]  ;;  %v401_v47 = vld [vmem:[%s3434_s26 + $0x378] sm:$0xf] }
  0x59   : > { %v403_v48 = vld [vmem:[%s3434_s26 + $0x380] sm:$0xf]  ;;  %400 = vst [vmem:[%s3438_s27 + $0x1b8] sm:$0xf] %v399_v46  ;;  %402 = vst [vmem:[%s3438_s27 + $0x1bc] sm:$0xf] %v401_v47 }
  0x5a   : > { %404 = vst [vmem:[%s3438_s27 + $0x1c0] sm:$0xf] %v403_v48  ;;  %v405_v49 = vld [vmem:[%s3434_s26 + $0x388] sm:$0xf]  ;;  %v407_v50 = vld [vmem:[%s3434_s26 + $0x390] sm:$0xf] }
  0x5b   : > { %v409_v51 = vld [vmem:[%s3434_s26 + $0x398] sm:$0xf]  ;;  %406 = vst [vmem:[%s3438_s27 + $0x1c4] sm:$0xf] %v405_v49  ;;  %408 = vst [vmem:[%s3438_s27 + $0x1c8] sm:$0xf] %v407_v50 }
  0x5c   : > { %410 = vst [vmem:[%s3438_s27 + $0x1cc] sm:$0xf] %v409_v51  ;;  %v411_v52 = vld [vmem:[%s3434_s26 + $0x3a0] sm:$0xf]  ;;  %v413_v53 = vld [vmem:[%s3434_s26 + $0x3a8] sm:$0xf] }
  0x5d   : > { %v415_v54 = vld [vmem:[%s3434_s26 + $0x3b0] sm:$0xf]  ;;  %412 = vst [vmem:[%s3438_s27 + $0x1d0] sm:$0xf] %v411_v52  ;;  %414 = vst [vmem:[%s3438_s27 + $0x1d4] sm:$0xf] %v413_v53 }
  0x5e   : > { %416 = vst [vmem:[%s3438_s27 + $0x1d8] sm:$0xf] %v415_v54  ;;  %v417_v55 = vld [vmem:[%s3434_s26 + $0x3b8] sm:$0xf]  ;;  %v419_v56 = vld [vmem:[%s3434_s26 + $0x3c0] sm:$0xf] }
  0x5f   : > { %v421_v57 = vld [vmem:[%s3434_s26 + $0x3c8] sm:$0xf]  ;;  %418 = vst [vmem:[%s3438_s27 + $0x1dc] sm:$0xf] %v417_v55  ;;  %420 = vst [vmem:[%s3438_s27 + $0x1e0] sm:$0xf] %v419_v56 }
  0x60   : > { %422 = vst [vmem:[%s3438_s27 + $0x1e4] sm:$0xf] %v421_v57  ;;  %v423_v58 = vld [vmem:[%s3434_s26 + $0x3d0] sm:$0xf]  ;;  %v425_v59 = vld [vmem:[%s3434_s26 + $0x3d8] sm:$0xf] }
  0x61   : > { %v427_v60 = vld [vmem:[%s3434_s26 + $0x3e0] sm:$0xf]  ;;  %424 = vst [vmem:[%s3438_s27 + $0x1e8] sm:$0xf] %v423_v58  ;;  %426 = vst [vmem:[%s3438_s27 + $0x1ec] sm:$0xf] %v425_v59 }
  0x62   : > { %428 = vst [vmem:[%s3438_s27 + $0x1f0] sm:$0xf] %v427_v60  ;;  %v429_v61 = vld [vmem:[%s3434_s26 + $0x3e8] sm:$0xf]  ;;  %v431_v62 = vld [vmem:[%s3434_s26 + $0x3f0] sm:$0xf] }
  0x63   : > { %v433_v63 = vld [vmem:[%s3434_s26 + $0x3f8] sm:$0xf]  ;;  %430 = vst [vmem:[%s3438_s27 + $0x1f4] sm:$0xf] %v429_v61  ;;  %432 = vst [vmem:[%s3438_s27 + $0x1f8] sm:$0xf] %v431_v62 }
  0x64   : > { %434 = vst [vmem:[%s3438_s27 + $0x1fc] sm:$0xf] %v433_v63  ;;  %v435_v0 = vld [vmem:[%s3434_s26 + $0x400] sm:$0xf]  ;;  %v437_v1 = vld [vmem:[%s3434_s26 + $0x408] sm:$0xf] }
  0x65   : > { %v439_v2 = vld [vmem:[%s3434_s26 + $0x410] sm:$0xf]  ;;  %436 = vst [vmem:[%s3438_s27 + $0x200] sm:$0xf] %v435_v0  ;;  %438 = vst [vmem:[%s3438_s27 + $0x204] sm:$0xf] %v437_v1 }
  0x66   : > { %440 = vst [vmem:[%s3438_s27 + $0x208] sm:$0xf] %v439_v2  ;;  %v441_v3 = vld [vmem:[%s3434_s26 + $0x418] sm:$0xf]  ;;  %v443_v4 = vld [vmem:[%s3434_s26 + $0x420] sm:$0xf] }
  0x67   : > { %v445_v5 = vld [vmem:[%s3434_s26 + $0x428] sm:$0xf]  ;;  %442 = vst [vmem:[%s3438_s27 + $0x20c] sm:$0xf] %v441_v3  ;;  %444 = vst [vmem:[%s3438_s27 + $0x210] sm:$0xf] %v443_v4 }
  0x68   : > { %446 = vst [vmem:[%s3438_s27 + $0x214] sm:$0xf] %v445_v5  ;;  %v447_v6 = vld [vmem:[%s3434_s26 + $0x430] sm:$0xf]  ;;  %v449_v7 = vld [vmem:[%s3434_s26 + $0x438] sm:$0xf] }
  0x69   : > { %v451_v8 = vld [vmem:[%s3434_s26 + $0x440] sm:$0xf]  ;;  %448 = vst [vmem:[%s3438_s27 + $0x218] sm:$0xf] %v447_v6  ;;  %450 = vst [vmem:[%s3438_s27 + $0x21c] sm:$0xf] %v449_v7 }
  0x6a   : > { %452 = vst [vmem:[%s3438_s27 + $0x220] sm:$0xf] %v451_v8  ;;  %v453_v9 = vld [vmem:[%s3434_s26 + $0x448] sm:$0xf]  ;;  %v455_v10 = vld [vmem:[%s3434_s26 + $0x450] sm:$0xf] }
  0x6b   : > { %v457_v11 = vld [vmem:[%s3434_s26 + $0x458] sm:$0xf]  ;;  %454 = vst [vmem:[%s3438_s27 + $0x224] sm:$0xf] %v453_v9  ;;  %456 = vst [vmem:[%s3438_s27 + $0x228] sm:$0xf] %v455_v10 }
  0x6c   : > { %458 = vst [vmem:[%s3438_s27 + $0x22c] sm:$0xf] %v457_v11  ;;  %v459_v12 = vld [vmem:[%s3434_s26 + $0x460] sm:$0xf]  ;;  %v461_v13 = vld [vmem:[%s3434_s26 + $0x468] sm:$0xf] }
  0x6d   : > { %v463_v14 = vld [vmem:[%s3434_s26 + $0x470] sm:$0xf]  ;;  %460 = vst [vmem:[%s3438_s27 + $0x230] sm:$0xf] %v459_v12  ;;  %462 = vst [vmem:[%s3438_s27 + $0x234] sm:$0xf] %v461_v13 }
  0x6e   : > { %464 = vst [vmem:[%s3438_s27 + $0x238] sm:$0xf] %v463_v14  ;;  %v465_v15 = vld [vmem:[%s3434_s26 + $0x478] sm:$0xf]  ;;  %v467_v16 = vld [vmem:[%s3434_s26 + $0x480] sm:$0xf] }
  0x6f   : > { %v469_v17 = vld [vmem:[%s3434_s26 + $0x488] sm:$0xf]  ;;  %466 = vst [vmem:[%s3438_s27 + $0x23c] sm:$0xf] %v465_v15  ;;  %468 = vst [vmem:[%s3438_s27 + $0x240] sm:$0xf] %v467_v16 }
  0x70   : > { %470 = vst [vmem:[%s3438_s27 + $0x244] sm:$0xf] %v469_v17  ;;  %v471_v18 = vld [vmem:[%s3434_s26 + $0x490] sm:$0xf]  ;;  %v473_v19 = vld [vmem:[%s3434_s26 + $0x498] sm:$0xf] }
  0x71   : > { %v475_v20 = vld [vmem:[%s3434_s26 + $0x4a0] sm:$0xf]  ;;  %472 = vst [vmem:[%s3438_s27 + $0x248] sm:$0xf] %v471_v18  ;;  %474 = vst [vmem:[%s3438_s27 + $0x24c] sm:$0xf] %v473_v19 }
  0x72   : > { %476 = vst [vmem:[%s3438_s27 + $0x250] sm:$0xf] %v475_v20  ;;  %v477_v21 = vld [vmem:[%s3434_s26 + $0x4a8] sm:$0xf]  ;;  %v479_v22 = vld [vmem:[%s3434_s26 + $0x4b0] sm:$0xf] }
  0x73   : > { %v481_v23 = vld [vmem:[%s3434_s26 + $0x4b8] sm:$0xf]  ;;  %478 = vst [vmem:[%s3438_s27 + $0x254] sm:$0xf] %v477_v21  ;;  %480 = vst [vmem:[%s3438_s27 + $0x258] sm:$0xf] %v479_v22 }
  0x74   : > { %482 = vst [vmem:[%s3438_s27 + $0x25c] sm:$0xf] %v481_v23  ;;  %v483_v24 = vld [vmem:[%s3434_s26 + $0x4c0] sm:$0xf]  ;;  %v485_v25 = vld [vmem:[%s3434_s26 + $0x4c8] sm:$0xf] }
  0x75   : > { %v487_v26 = vld [vmem:[%s3434_s26 + $0x4d0] sm:$0xf]  ;;  %484 = vst [vmem:[%s3438_s27 + $0x260] sm:$0xf] %v483_v24  ;;  %486 = vst [vmem:[%s3438_s27 + $0x264] sm:$0xf] %v485_v25 }
  0x76   : > { %488 = vst [vmem:[%s3438_s27 + $0x268] sm:$0xf] %v487_v26  ;;  %v489_v27 = vld [vmem:[%s3434_s26 + $0x4d8] sm:$0xf]  ;;  %v491_v28 = vld [vmem:[%s3434_s26 + $0x4e0] sm:$0xf] }
  0x77   : > { %v493_v29 = vld [vmem:[%s3434_s26 + $0x4e8] sm:$0xf]  ;;  %490 = vst [vmem:[%s3438_s27 + $0x26c] sm:$0xf] %v489_v27  ;;  %492 = vst [vmem:[%s3438_s27 + $0x270] sm:$0xf] %v491_v28 }
  0x78   : > { %494 = vst [vmem:[%s3438_s27 + $0x274] sm:$0xf] %v493_v29  ;;  %v495_v30 = vld [vmem:[%s3434_s26 + $0x4f0] sm:$0xf]  ;;  %v497_v31 = vld [vmem:[%s3434_s26 + $0x4f8] sm:$0xf] }
  0x79   : > { %v499_v32 = vld [vmem:[%s3434_s26 + $0x500] sm:$0xf]  ;;  %496 = vst [vmem:[%s3438_s27 + $0x278] sm:$0xf] %v495_v30  ;;  %498 = vst [vmem:[%s3438_s27 + $0x27c] sm:$0xf] %v497_v31 }
  0x7a   : > { %500 = vst [vmem:[%s3438_s27 + $0x280] sm:$0xf] %v499_v32  ;;  %v501_v33 = vld [vmem:[%s3434_s26 + $0x508] sm:$0xf]  ;;  %v503_v34 = vld [vmem:[%s3434_s26 + $0x510] sm:$0xf] }
  0x7b   : > { %v505_v35 = vld [vmem:[%s3434_s26 + $0x518] sm:$0xf]  ;;  %502 = vst [vmem:[%s3438_s27 + $0x284] sm:$0xf] %v501_v33  ;;  %504 = vst [vmem:[%s3438_s27 + $0x288] sm:$0xf] %v503_v34 }
  0x7c   : > { %506 = vst [vmem:[%s3438_s27 + $0x28c] sm:$0xf] %v505_v35  ;;  %v507_v36 = vld [vmem:[%s3434_s26 + $0x520] sm:$0xf]  ;;  %v509_v37 = vld [vmem:[%s3434_s26 + $0x528] sm:$0xf] }
  0x7d   : > { %v511_v38 = vld [vmem:[%s3434_s26 + $0x530] sm:$0xf]  ;;  %508 = vst [vmem:[%s3438_s27 + $0x290] sm:$0xf] %v507_v36  ;;  %510 = vst [vmem:[%s3438_s27 + $0x294] sm:$0xf] %v509_v37 }
  0x7e   : > { %512 = vst [vmem:[%s3438_s27 + $0x298] sm:$0xf] %v511_v38  ;;  %v513_v39 = vld [vmem:[%s3434_s26 + $0x538] sm:$0xf]  ;;  %v515_v40 = vld [vmem:[%s3434_s26 + $0x540] sm:$0xf] }
  0x7f   : > { %v517_v41 = vld [vmem:[%s3434_s26 + $0x548] sm:$0xf]  ;;  %514 = vst [vmem:[%s3438_s27 + $0x29c] sm:$0xf] %v513_v39  ;;  %516 = vst [vmem:[%s3438_s27 + $0x2a0] sm:$0xf] %v515_v40 }
  0x80   : > { %518 = vst [vmem:[%s3438_s27 + $0x2a4] sm:$0xf] %v517_v41  ;;  %v519_v42 = vld [vmem:[%s3434_s26 + $0x550] sm:$0xf]  ;;  %v521_v43 = vld [vmem:[%s3434_s26 + $0x558] sm:$0xf] }
  0x81   : > { %v523_v44 = vld [vmem:[%s3434_s26 + $0x560] sm:$0xf]  ;;  %520 = vst [vmem:[%s3438_s27 + $0x2a8] sm:$0xf] %v519_v42  ;;  %522 = vst [vmem:[%s3438_s27 + $0x2ac] sm:$0xf] %v521_v43 }
  0x82   : > { %524 = vst [vmem:[%s3438_s27 + $0x2b0] sm:$0xf] %v523_v44  ;;  %v525_v45 = vld [vmem:[%s3434_s26 + $0x568] sm:$0xf]  ;;  %v527_v46 = vld [vmem:[%s3434_s26 + $0x570] sm:$0xf] }
  0x83   : > { %v529_v47 = vld [vmem:[%s3434_s26 + $0x578] sm:$0xf]  ;;  %526 = vst [vmem:[%s3438_s27 + $0x2b4] sm:$0xf] %v525_v45  ;;  %528 = vst [vmem:[%s3438_s27 + $0x2b8] sm:$0xf] %v527_v46 }
  0x84   : > { %530 = vst [vmem:[%s3438_s27 + $0x2bc] sm:$0xf] %v529_v47  ;;  %v531_v48 = vld [vmem:[%s3434_s26 + $0x580] sm:$0xf]  ;;  %v533_v49 = vld [vmem:[%s3434_s26 + $0x588] sm:$0xf] }
  0x85   : > { %v535_v50 = vld [vmem:[%s3434_s26 + $0x590] sm:$0xf]  ;;  %532 = vst [vmem:[%s3438_s27 + $0x2c0] sm:$0xf] %v531_v48  ;;  %534 = vst [vmem:[%s3438_s27 + $0x2c4] sm:$0xf] %v533_v49 }
  0x86   : > { %536 = vst [vmem:[%s3438_s27 + $0x2c8] sm:$0xf] %v535_v50  ;;  %v537_v51 = vld [vmem:[%s3434_s26 + $0x598] sm:$0xf]  ;;  %v539_v52 = vld [vmem:[%s3434_s26 + $0x5a0] sm:$0xf] }
  0x87   : > { %v541_v53 = vld [vmem:[%s3434_s26 + $0x5a8] sm:$0xf]  ;;  %538 = vst [vmem:[%s3438_s27 + $0x2cc] sm:$0xf] %v537_v51  ;;  %540 = vst [vmem:[%s3438_s27 + $0x2d0] sm:$0xf] %v539_v52 }
  0x88   : > { %542 = vst [vmem:[%s3438_s27 + $0x2d4] sm:$0xf] %v541_v53  ;;  %v543_v54 = vld [vmem:[%s3434_s26 + $0x5b0] sm:$0xf]  ;;  %v545_v55 = vld [vmem:[%s3434_s26 + $0x5b8] sm:$0xf] }
  0x89   : > { %v547_v56 = vld [vmem:[%s3434_s26 + $0x5c0] sm:$0xf]  ;;  %544 = vst [vmem:[%s3438_s27 + $0x2d8] sm:$0xf] %v543_v54  ;;  %546 = vst [vmem:[%s3438_s27 + $0x2dc] sm:$0xf] %v545_v55 }
  0x8a   : > { %548 = vst [vmem:[%s3438_s27 + $0x2e0] sm:$0xf] %v547_v56  ;;  %v549_v57 = vld [vmem:[%s3434_s26 + $0x5c8] sm:$0xf]  ;;  %v551_v58 = vld [vmem:[%s3434_s26 + $0x5d0] sm:$0xf] }
  0x8b   : > { %v553_v59 = vld [vmem:[%s3434_s26 + $0x5d8] sm:$0xf]  ;;  %550 = vst [vmem:[%s3438_s27 + $0x2e4] sm:$0xf] %v549_v57  ;;  %552 = vst [vmem:[%s3438_s27 + $0x2e8] sm:$0xf] %v551_v58 }
  0x8c   : > { %554 = vst [vmem:[%s3438_s27 + $0x2ec] sm:$0xf] %v553_v59  ;;  %v555_v60 = vld [vmem:[%s3434_s26 + $0x5e0] sm:$0xf]  ;;  %v557_v61 = vld [vmem:[%s3434_s26 + $0x5e8] sm:$0xf] }
  0x8d   : > { %v559_v62 = vld [vmem:[%s3434_s26 + $0x5f0] sm:$0xf]  ;;  %556 = vst [vmem:[%s3438_s27 + $0x2f0] sm:$0xf] %v555_v60  ;;  %558 = vst [vmem:[%s3438_s27 + $0x2f4] sm:$0xf] %v557_v61 }
  0x8e   : > { %560 = vst [vmem:[%s3438_s27 + $0x2f8] sm:$0xf] %v559_v62  ;;  %v561_v63 = vld [vmem:[%s3434_s26 + $0x5f8] sm:$0xf]  ;;  %v563_v0 = vld [vmem:[%s3434_s26 + $0x600] sm:$0xf] }
  0x8f   : > { %v565_v1 = vld [vmem:[%s3434_s26 + $0x608] sm:$0xf]  ;;  %562 = vst [vmem:[%s3438_s27 + $0x2fc] sm:$0xf] %v561_v63  ;;  %564 = vst [vmem:[%s3438_s27 + $0x300] sm:$0xf] %v563_v0 }
  0x90   : > { %566 = vst [vmem:[%s3438_s27 + $0x304] sm:$0xf] %v565_v1  ;;  %v567_v2 = vld [vmem:[%s3434_s26 + $0x610] sm:$0xf]  ;;  %v569_v3 = vld [vmem:[%s3434_s26 + $0x618] sm:$0xf] }
  0x91   : > { %v571_v4 = vld [vmem:[%s3434_s26 + $0x620] sm:$0xf]  ;;  %568 = vst [vmem:[%s3438_s27 + $0x308] sm:$0xf] %v567_v2  ;;  %570 = vst [vmem:[%s3438_s27 + $0x30c] sm:$0xf] %v569_v3 }
  0x92   : > { %572 = vst [vmem:[%s3438_s27 + $0x310] sm:$0xf] %v571_v4  ;;  %v573_v5 = vld [vmem:[%s3434_s26 + $0x628] sm:$0xf]  ;;  %v575_v6 = vld [vmem:[%s3434_s26 + $0x630] sm:$0xf] }
  0x93   : > { %v577_v7 = vld [vmem:[%s3434_s26 + $0x638] sm:$0xf]  ;;  %574 = vst [vmem:[%s3438_s27 + $0x314] sm:$0xf] %v573_v5  ;;  %576 = vst [vmem:[%s3438_s27 + $0x318] sm:$0xf] %v575_v6 }
  0x94   : > { %578 = vst [vmem:[%s3438_s27 + $0x31c] sm:$0xf] %v577_v7  ;;  %v579_v8 = vld [vmem:[%s3434_s26 + $0x640] sm:$0xf]  ;;  %v581_v9 = vld [vmem:[%s3434_s26 + $0x648] sm:$0xf] }
  0x95   : > { %v583_v10 = vld [vmem:[%s3434_s26 + $0x650] sm:$0xf]  ;;  %580 = vst [vmem:[%s3438_s27 + $0x320] sm:$0xf] %v579_v8  ;;  %582 = vst [vmem:[%s3438_s27 + $0x324] sm:$0xf] %v581_v9 }
  0x96   : > { %584 = vst [vmem:[%s3438_s27 + $0x328] sm:$0xf] %v583_v10  ;;  %v585_v11 = vld [vmem:[%s3434_s26 + $0x658] sm:$0xf]  ;;  %v587_v12 = vld [vmem:[%s3434_s26 + $0x660] sm:$0xf] }
  0x97   : > { %v589_v13 = vld [vmem:[%s3434_s26 + $0x668] sm:$0xf]  ;;  %586 = vst [vmem:[%s3438_s27 + $0x32c] sm:$0xf] %v585_v11  ;;  %588 = vst [vmem:[%s3438_s27 + $0x330] sm:$0xf] %v587_v12 }
  0x98   : > { %590 = vst [vmem:[%s3438_s27 + $0x334] sm:$0xf] %v589_v13  ;;  %v591_v14 = vld [vmem:[%s3434_s26 + $0x670] sm:$0xf]  ;;  %v593_v15 = vld [vmem:[%s3434_s26 + $0x678] sm:$0xf] }
  0x99   : > { %v595_v16 = vld [vmem:[%s3434_s26 + $0x680] sm:$0xf]  ;;  %592 = vst [vmem:[%s3438_s27 + $0x338] sm:$0xf] %v591_v14  ;;  %594 = vst [vmem:[%s3438_s27 + $0x33c] sm:$0xf] %v593_v15 }
  0x9a   : > { %596 = vst [vmem:[%s3438_s27 + $0x340] sm:$0xf] %v595_v16  ;;  %v597_v17 = vld [vmem:[%s3434_s26 + $0x688] sm:$0xf]  ;;  %v599_v18 = vld [vmem:[%s3434_s26 + $0x690] sm:$0xf] }
  0x9b   : > { %v601_v19 = vld [vmem:[%s3434_s26 + $0x698] sm:$0xf]  ;;  %598 = vst [vmem:[%s3438_s27 + $0x344] sm:$0xf] %v597_v17  ;;  %600 = vst [vmem:[%s3438_s27 + $0x348] sm:$0xf] %v599_v18 }
  0x9c   : > { %602 = vst [vmem:[%s3438_s27 + $0x34c] sm:$0xf] %v601_v19  ;;  %v603_v20 = vld [vmem:[%s3434_s26 + $0x6a0] sm:$0xf]  ;;  %v605_v21 = vld [vmem:[%s3434_s26 + $0x6a8] sm:$0xf] }
  0x9d   : > { %v607_v22 = vld [vmem:[%s3434_s26 + $0x6b0] sm:$0xf]  ;;  %604 = vst [vmem:[%s3438_s27 + $0x350] sm:$0xf] %v603_v20  ;;  %606 = vst [vmem:[%s3438_s27 + $0x354] sm:$0xf] %v605_v21 }
  0x9e   : > { %608 = vst [vmem:[%s3438_s27 + $0x358] sm:$0xf] %v607_v22  ;;  %v609_v23 = vld [vmem:[%s3434_s26 + $0x6b8] sm:$0xf]  ;;  %v611_v24 = vld [vmem:[%s3434_s26 + $0x6c0] sm:$0xf] }
  0x9f   : > { %v613_v25 = vld [vmem:[%s3434_s26 + $0x6c8] sm:$0xf]  ;;  %610 = vst [vmem:[%s3438_s27 + $0x35c] sm:$0xf] %v609_v23  ;;  %612 = vst [vmem:[%s3438_s27 + $0x360] sm:$0xf] %v611_v24 }
  0xa0   : > { %614 = vst [vmem:[%s3438_s27 + $0x364] sm:$0xf] %v613_v25  ;;  %v615_v26 = vld [vmem:[%s3434_s26 + $0x6d0] sm:$0xf]  ;;  %v617_v27 = vld [vmem:[%s3434_s26 + $0x6d8] sm:$0xf] }
  0xa1   : > { %v619_v28 = vld [vmem:[%s3434_s26 + $0x6e0] sm:$0xf]  ;;  %616 = vst [vmem:[%s3438_s27 + $0x368] sm:$0xf] %v615_v26  ;;  %618 = vst [vmem:[%s3438_s27 + $0x36c] sm:$0xf] %v617_v27 }
  0xa2   : > { %620 = vst [vmem:[%s3438_s27 + $0x370] sm:$0xf] %v619_v28  ;;  %v621_v29 = vld [vmem:[%s3434_s26 + $0x6e8] sm:$0xf]  ;;  %v623_v30 = vld [vmem:[%s3434_s26 + $0x6f0] sm:$0xf] }
  0xa3   : > { %v625_v31 = vld [vmem:[%s3434_s26 + $0x6f8] sm:$0xf]  ;;  %622 = vst [vmem:[%s3438_s27 + $0x374] sm:$0xf] %v621_v29  ;;  %624 = vst [vmem:[%s3438_s27 + $0x378] sm:$0xf] %v623_v30 }
  0xa4   : > { %626 = vst [vmem:[%s3438_s27 + $0x37c] sm:$0xf] %v625_v31  ;;  %v627_v32 = vld [vmem:[%s3434_s26 + $0x700] sm:$0xf]  ;;  %v629_v33 = vld [vmem:[%s3434_s26 + $0x708] sm:$0xf] }
  0xa5   : > { %v631_v34 = vld [vmem:[%s3434_s26 + $0x710] sm:$0xf]  ;;  %628 = vst [vmem:[%s3438_s27 + $0x380] sm:$0xf] %v627_v32  ;;  %630 = vst [vmem:[%s3438_s27 + $0x384] sm:$0xf] %v629_v33 }
  0xa6   : > { %632 = vst [vmem:[%s3438_s27 + $0x388] sm:$0xf] %v631_v34  ;;  %v633_v35 = vld [vmem:[%s3434_s26 + $0x718] sm:$0xf]  ;;  %v635_v36 = vld [vmem:[%s3434_s26 + $0x720] sm:$0xf] }
  0xa7   : > { %v637_v37 = vld [vmem:[%s3434_s26 + $0x728] sm:$0xf]  ;;  %634 = vst [vmem:[%s3438_s27 + $0x38c] sm:$0xf] %v633_v35  ;;  %636 = vst [vmem:[%s3438_s27 + $0x390] sm:$0xf] %v635_v36 }
  0xa8   : > { %638 = vst [vmem:[%s3438_s27 + $0x394] sm:$0xf] %v637_v37  ;;  %v639_v38 = vld [vmem:[%s3434_s26 + $0x730] sm:$0xf]  ;;  %v641_v39 = vld [vmem:[%s3434_s26 + $0x738] sm:$0xf] }
  0xa9   : > { %v643_v40 = vld [vmem:[%s3434_s26 + $0x740] sm:$0xf]  ;;  %640 = vst [vmem:[%s3438_s27 + $0x398] sm:$0xf] %v639_v38  ;;  %642 = vst [vmem:[%s3438_s27 + $0x39c] sm:$0xf] %v641_v39 }
  0xaa   : > { %644 = vst [vmem:[%s3438_s27 + $0x3a0] sm:$0xf] %v643_v40  ;;  %v645_v41 = vld [vmem:[%s3434_s26 + $0x748] sm:$0xf]  ;;  %v647_v42 = vld [vmem:[%s3434_s26 + $0x750] sm:$0xf] }
  0xab   : > { %v649_v43 = vld [vmem:[%s3434_s26 + $0x758] sm:$0xf]  ;;  %646 = vst [vmem:[%s3438_s27 + $0x3a4] sm:$0xf] %v645_v41  ;;  %648 = vst [vmem:[%s3438_s27 + $0x3a8] sm:$0xf] %v647_v42 }
  0xac   : > { %650 = vst [vmem:[%s3438_s27 + $0x3ac] sm:$0xf] %v649_v43  ;;  %v651_v44 = vld [vmem:[%s3434_s26 + $0x760] sm:$0xf]  ;;  %v653_v45 = vld [vmem:[%s3434_s26 + $0x768] sm:$0xf] }
  0xad   : > { %v655_v46 = vld [vmem:[%s3434_s26 + $0x770] sm:$0xf]  ;;  %652 = vst [vmem:[%s3438_s27 + $0x3b0] sm:$0xf] %v651_v44  ;;  %654 = vst [vmem:[%s3438_s27 + $0x3b4] sm:$0xf] %v653_v45 }
  0xae   : > { %656 = vst [vmem:[%s3438_s27 + $0x3b8] sm:$0xf] %v655_v46  ;;  %v657_v47 = vld [vmem:[%s3434_s26 + $0x778] sm:$0xf]  ;;  %v659_v48 = vld [vmem:[%s3434_s26 + $0x780] sm:$0xf] }
  0xaf   : > { %v661_v49 = vld [vmem:[%s3434_s26 + $0x788] sm:$0xf]  ;;  %658 = vst [vmem:[%s3438_s27 + $0x3bc] sm:$0xf] %v657_v47  ;;  %660 = vst [vmem:[%s3438_s27 + $0x3c0] sm:$0xf] %v659_v48 }
  0xb0   : > { %662 = vst [vmem:[%s3438_s27 + $0x3c4] sm:$0xf] %v661_v49  ;;  %v663_v50 = vld [vmem:[%s3434_s26 + $0x790] sm:$0xf]  ;;  %v665_v51 = vld [vmem:[%s3434_s26 + $0x798] sm:$0xf] }
  0xb1   : > { %v667_v52 = vld [vmem:[%s3434_s26 + $0x7a0] sm:$0xf]  ;;  %664 = vst [vmem:[%s3438_s27 + $0x3c8] sm:$0xf] %v663_v50  ;;  %666 = vst [vmem:[%s3438_s27 + $0x3cc] sm:$0xf] %v665_v51 }
  0xb2   : > { %668 = vst [vmem:[%s3438_s27 + $0x3d0] sm:$0xf] %v667_v52  ;;  %v669_v53 = vld [vmem:[%s3434_s26 + $0x7a8] sm:$0xf]  ;;  %v671_v54 = vld [vmem:[%s3434_s26 + $0x7b0] sm:$0xf] }
  0xb3   : > { %v673_v55 = vld [vmem:[%s3434_s26 + $0x7b8] sm:$0xf]  ;;  %670 = vst [vmem:[%s3438_s27 + $0x3d4] sm:$0xf] %v669_v53  ;;  %672 = vst [vmem:[%s3438_s27 + $0x3d8] sm:$0xf] %v671_v54 }
  0xb4   : > { %674 = vst [vmem:[%s3438_s27 + $0x3dc] sm:$0xf] %v673_v55  ;;  %v675_v56 = vld [vmem:[%s3434_s26 + $0x7c0] sm:$0xf]  ;;  %v677_v57 = vld [vmem:[%s3434_s26 + $0x7c8] sm:$0xf] }
  0xb5   : > { %v679_v58 = vld [vmem:[%s3434_s26 + $0x7d0] sm:$0xf]  ;;  %676 = vst [vmem:[%s3438_s27 + $0x3e0] sm:$0xf] %v675_v56  ;;  %678 = vst [vmem:[%s3438_s27 + $0x3e4] sm:$0xf] %v677_v57 }
  0xb6   : > { %680 = vst [vmem:[%s3438_s27 + $0x3e8] sm:$0xf] %v679_v58  ;;  %v681_v59 = vld [vmem:[%s3434_s26 + $0x7d8] sm:$0xf]  ;;  %v683_v60 = vld [vmem:[%s3434_s26 + $0x7e0] sm:$0xf] }
  0xb7   : > { %v685_v61 = vld [vmem:[%s3434_s26 + $0x7e8] sm:$0xf]  ;;  %682 = vst [vmem:[%s3438_s27 + $0x3ec] sm:$0xf] %v681_v59  ;;  %684 = vst [vmem:[%s3438_s27 + $0x3f0] sm:$0xf] %v683_v60 }
  0xb8   : > { %686 = vst [vmem:[%s3438_s27 + $0x3f4] sm:$0xf] %v685_v61  ;;  %v687_v62 = vld [vmem:[%s3434_s26 + $0x7f0] sm:$0xf]  ;;  %v689_v63 = vld [vmem:[%s3434_s26 + $0x7f8] sm:$0xf] }
  0xb9   : > { %688 = vst [vmem:[%s3438_s27 + $0x3f8] sm:$0xf] %v687_v62  ;;  %690 = vst [vmem:[%s3438_s27 + $0x3fc] sm:$0xf] %v689_v63 }
  0xba PF: > { %p2821_p6 = scmp.ge.s32.totalorder %s3369_s16, 1  ;;  %p1231_p7 = scmp.lt.s32.totalorder %s3369_s16, 3 }
  0xbc   : > { %p1232_p8 = pnand %p2821_p6, %p1231_p7 }
  0xbd   : > { %s1238_s28 = sand.u32 (!%p1232_p8), 1, %s3353_s12   ;;  %p1277_p9 = scmp.lt.s32.totalorder (!%p1232_p8), %s3361_s14, 1 }
  0xbe   : > { %1235 = sbr.rel (%p1232_p8) target bundleno = 530 (0x212), region = 69  ;;  %s2822_s6 = sshll.u32 (!%p1232_p8), %s1238_s28, 10 }
  0xbf   : > { %s3967_s7 = scalar_lea.vmem (!%p1232_p8), [#allocation2], %s2822_s6 }
  0xc3   : > { %v3956_v0 = vld [vmem:[%s4170_s0] sm:$0xff]  ;;  %v3961_v1 = vld [vmem:[%s4170_s0 + $0x8] sm:$0xff]  ;;  %v3187_v4 = vld [vmem:[%s3967_s7 + $0x78] sm:$0xff]   ;;  %s4181_s14 = smov (!%p1277_p9, %s3361_s14), 1 }
  0xc4   : > { %v2826_v2 = vcombine.high %v3956_v0, %v3956_v0  ;;  %v2828_v3 = vcombine.high %v3961_v1, %v3961_v1  ;;  %v3188_v5 = vld [vmem:[%s3967_s7 + $0xf8] sm:$0xff]   ;;  %2971 = vmatprep.subr.bf16.mxu0 %v3187_v4  ;;  %v3191_v8 = vld [vmem:[%s3967_s7 + $0x70] sm:$0xff]   ;;  %v3195_v12 = vld [vmem:[%s3967_s7 + $0x68] sm:$0xff]   ;;  %v2825_v38 = vcombine.low %v3956_v0, %v3956_v0  ;;  %v2827_v39 = vcombine.low %v3961_v1, %v3961_v1  ;;  %s1279_s28 = scalar_lea.vmem %s4172_s2, %s4181_s14  ;;  %s2823_s29 = sshll.u32 %s4181_s14, 3 }
  0xc5   : > { %v3189_v6 = vld [vmem:[%s3967_s7 + $0x38] sm:$0xff]   ;;  %2993 = vmatprep.subr.bf16.mxu1 %v3188_v5  ;;  %v3192_v9 = vld [vmem:[%s3967_s7 + $0xf0] sm:$0xff]   ;;  %v3196_v13 = vld [vmem:[%s3967_s7 + $0xe8] sm:$0xff]   ;;  %s1287_s5 = scalar_lea.vmem %s4173_s3, %s2823_s29 }
  0xc6   : > { %2416 = vmatprep.mubr.bf16.mxu0 %v2826_v2  ;;  %2456 = vmatprep.mubr.bf16.mxu1 %v2828_v3  ;;  %v3190_v7 = vld [vmem:[%s3967_s7 + $0xb8] sm:$0xff]   ;;  %v3193_v10 = vld [vmem:[%s3967_s7 + $0x30] sm:$0xff]   ;;  %v3197_v14 = vld [vmem:[%s3967_s7 + $0x28] sm:$0xff]  }
  0xc7   : > { %2972 = vmatpush3.bf16.msra.mxu0 %v3189_v6  ;;  %2994 = vmatpush3.bf16.msra.mxu1 %v3190_v7  ;;  %v3194_v11 = vld [vmem:[%s3967_s7 + $0xb0] sm:$0xff]   ;;  %v3198_v15 = vld [vmem:[%s3967_s7 + $0xa8] sm:$0xff]   ;;  %v3199_v16 = vld [vmem:[%s3967_s7 + $0x60] sm:$0xff]  }
  0xc8   : > { %2973 = vmatprep.subr.bf16.mxu0 %v3191_v8  ;;  %2995 = vmatprep.subr.bf16.mxu1 %v3192_v9  ;;  %v3200_v17 = vld [vmem:[%s3967_s7 + $0xe0] sm:$0xff]   ;;  %v3203_v20 = vld [vmem:[%s3967_s7 + $0x58] sm:$0xff]   ;;  %v3207_v24 = vld [vmem:[%s3967_s7 + $0x50] sm:$0xff]  }
  0xc9   : > { %v3201_v18 = vld [vmem:[%s3967_s7 + $0x20] sm:$0xff]   ;;  %v3204_v21 = vld [vmem:[%s3967_s7 + $0xd8] sm:$0xff]   ;;  %v3208_v25 = vld [vmem:[%s3967_s7 + $0xd0] sm:$0xff]  }
  0xca   : > { %v3202_v19 = vld [vmem:[%s3967_s7 + $0xa0] sm:$0xff]   ;;  %v3205_v22 = vld [vmem:[%s3967_s7 + $0x18] sm:$0xff]   ;;  %v3209_v26 = vld [vmem:[%s3967_s7 + $0x10] sm:$0xff]  }
  0xcb   : > { %2974 = vmatpush3.bf16.msra.mxu0 %v3193_v10  ;;  %2996 = vmatpush3.bf16.msra.mxu1 %v3194_v11  ;;  %v3206_v23 = vld [vmem:[%s3967_s7 + $0x98] sm:$0xff]   ;;  %v3210_v27 = vld [vmem:[%s3967_s7 + $0x90] sm:$0xff]   ;;  %v3211_v28 = vld [vmem:[%s3967_s7 + $0x48] sm:$0xff]  }
  0xcc   : > { %2975 = vmatprep.subr.bf16.mxu0 %v3195_v12  ;;  %2997 = vmatprep.subr.bf16.mxu1 %v3196_v13  ;;  %v3212_v29 = vld [vmem:[%s3967_s7 + $0xc8] sm:$0xff]   ;;  %v3215_v32 = vld [vmem:[%s3967_s7 + $0x40] sm:$0xff]   ;;  %v4001_v33 = vld [vmem:[%s4170_s0 + $0x10] sm:$0xff] }
  0xcd   : > { %v3213_v30 = vld [vmem:[%s3967_s7 + $0x8] sm:$0xff]   ;;  %v3216_v34 = vld [vmem:[%s3967_s7 + $0xc0] sm:$0xff]   ;;  %v4007_v35 = vld [vmem:[%s4170_s0 + $0x18] sm:$0xff]  ;;  %v2830_v42 = vcombine.high %v4001_v33, %v4001_v33  ;;  %v2829_v12 = vcombine.low %v4001_v33, %v4001_v33 }
  0xce   : > { %v3214_v31 = vld [vmem:[%s3967_s7 + $0x88] sm:$0xff]   ;;  %v3217_v36 = vld [vmem:[%s3967_s7] sm:$0xff]   ;;  %v3223_v40 = vld [vmem:[%s3967_s7 + $0x178] sm:$0xff]   ;;  %v2832_v44 = vcombine.high %v4007_v35, %v4007_v35  ;;  %v2831_v13 = vcombine.low %v4007_v35, %v4007_v35 }
  0xcf   : > { %2976 = vmatpush3.bf16.msra.mxu0 %v3197_v14  ;;  %2998 = vmatpush3.bf16.msra.mxu1 %v3198_v15  ;;  %v3218_v37 = vld [vmem:[%s3967_s7 + $0x80] sm:$0xff]   ;;  %v3224_v41 = vld [vmem:[%s3967_s7 + $0x1f8] sm:$0xff]   ;;  %v3227_v46 = vld [vmem:[%s3967_s7 + $0x170] sm:$0xff]  }
  0xd0   : > { %2977 = vmatprep.subr.bf16.mxu0 %v3199_v16  ;;  %2999 = vmatprep.subr.bf16.mxu1 %v3200_v17  ;;  %v3225_v43 = vld [vmem:[%s3967_s7 + $0x138] sm:$0xff]   ;;  %v3228_v47 = vld [vmem:[%s3967_s7 + $0x1f0] sm:$0xff]   ;;  %v3231_v50 = vld [vmem:[%s3967_s7 + $0x168] sm:$0xff]  }
  0xd1   : > { %v3226_v45 = vld [vmem:[%s3967_s7 + $0x1b8] sm:$0xff]   ;;  %v3229_v48 = vld [vmem:[%s3967_s7 + $0x130] sm:$0xff]   ;;  %v3232_v51 = vld [vmem:[%s3967_s7 + $0x1e8] sm:$0xff]  }
  0xd2   : > { %v3230_v49 = vld [vmem:[%s3967_s7 + $0x1b0] sm:$0xff]   ;;  %v3233_v52 = vld [vmem:[%s3967_s7 + $0x128] sm:$0xff]   ;;  %v3235_v54 = vld [vmem:[%s3967_s7 + $0x160] sm:$0xff]  }
  0xd3   : > { %2978 = vmatpush3.bf16.msra.mxu0 %v3201_v18  ;;  %3000 = vmatpush3.bf16.msra.mxu1 %v3202_v19  ;;  %v3234_v53 = vld [vmem:[%s3967_s7 + $0x1a8] sm:$0xff]   ;;  %v3236_v55 = vld [vmem:[%s3967_s7 + $0x1e0] sm:$0xff]   ;;  %v3239_v58 = vld [vmem:[%s3967_s7 + $0x158] sm:$0xff]  }
  0xd4   : > { %2979 = vmatprep.subr.bf16.mxu0 %v3203_v20  ;;  %3001 = vmatprep.subr.bf16.mxu1 %v3204_v21  ;;  %v3237_v56 = vld [vmem:[%s3967_s7 + $0x120] sm:$0xff]   ;;  %v3240_v59 = vld [vmem:[%s3967_s7 + $0x1d8] sm:$0xff]   ;;  %v3243_v62 = vld [vmem:[%s3967_s7 + $0x150] sm:$0xff]  }
  0xd5   : > { %v3238_v57 = vld [vmem:[%s3967_s7 + $0x1a0] sm:$0xff]   ;;  %v3241_v60 = vld [vmem:[%s3967_s7 + $0x118] sm:$0xff]   ;;  %v3244_v63 = vld [vmem:[%s3967_s7 + $0x1d0] sm:$0xff]  }
  0xd6   : > { %v3242_v61 = vld [vmem:[%s3967_s7 + $0x198] sm:$0xff]   ;;  %v3245_v0 = vld [vmem:[%s3967_s7 + $0x110] sm:$0xff]   ;;  %v3247_v2 = vld [vmem:[%s3967_s7 + $0x148] sm:$0xff]  }
  0xd7   : > { %2980 = vmatpush3.bf16.msra.mxu0 %v3205_v22  ;;  %3002 = vmatpush3.bf16.msra.mxu1 %v3206_v23  ;;  %v3246_v1 = vld [vmem:[%s3967_s7 + $0x190] sm:$0xff]   ;;  %v3248_v3 = vld [vmem:[%s3967_s7 + $0x1c8] sm:$0xff]   ;;  %v3251_v6 = vld [vmem:[%s3967_s7 + $0x140] sm:$0xff]  }
  0xd8   : > { %2981 = vmatprep.subr.bf16.mxu0 %v3207_v24  ;;  %3003 = vmatprep.subr.bf16.mxu1 %v3208_v25  ;;  %v3249_v4 = vld [vmem:[%s3967_s7 + $0x108] sm:$0xff]   ;;  %v4051_v7 = vld [vmem:[%s4170_s0 + $0x20] sm:$0xff]  ;;  %v3259_v14 = vld [vmem:[%s3967_s7 + $0x278] sm:$0xff]  }
  0xd9   : > { %v3250_v5 = vld [vmem:[%s3967_s7 + $0x188] sm:$0xff]   ;;  %v3252_v8 = vld [vmem:[%s3967_s7 + $0x1c0] sm:$0xff]   ;;  %v3260_v15 = vld [vmem:[%s3967_s7 + $0x2f8] sm:$0xff]   ;;  %v2834_v16 = vcombine.high %v4051_v7, %v4051_v7 }
  0xda   : > { %v4057_v9 = vld [vmem:[%s4170_s0 + $0x28] sm:$0xff]  ;;  %v3253_v10 = vld [vmem:[%s3967_s7 + $0x100] sm:$0xff]   ;;  %v3261_v17 = vld [vmem:[%s3967_s7 + $0x238] sm:$0xff]  }
  0xdb   : > { %2982 = vmatpush3.bf16.msra.mxu0 %v3209_v26  ;;  %3004 = vmatpush3.bf16.msra.mxu1 %v3210_v27  ;;  %v3254_v11 = vld [vmem:[%s3967_s7 + $0x180] sm:$0xff]   ;;  %v2836_v18 = vcombine.high %v4057_v9, %v4057_v9  ;;  %v3262_v19 = vld [vmem:[%s3967_s7 + $0x2b8] sm:$0xff]   ;;  %v3263_v20 = vld [vmem:[%s3967_s7 + $0x270] sm:$0xff]  }
  0xdc   : > { %2983 = vmatprep.subr.bf16.mxu0 %v3211_v28  ;;  %3005 = vmatprep.subr.bf16.mxu1 %v3212_v29  ;;  %v3264_v21 = vld [vmem:[%s3967_s7 + $0x2f0] sm:$0xff]   ;;  %v3267_v24 = vld [vmem:[%s3967_s7 + $0x268] sm:$0xff]   ;;  %v3271_v28 = vld [vmem:[%s3967_s7 + $0x260] sm:$0xff]  }
  0xdd   : > { %v3265_v22 = vld [vmem:[%s3967_s7 + $0x230] sm:$0xff]   ;;  %v3268_v25 = vld [vmem:[%s3967_s7 + $0x2e8] sm:$0xff]   ;;  %v3272_v29 = vld [vmem:[%s3967_s7 + $0x2e0] sm:$0xff]  }
  0xde   : > { %v3266_v23 = vld [vmem:[%s3967_s7 + $0x2b0] sm:$0xff]   ;;  %v3269_v26 = vld [vmem:[%s3967_s7 + $0x228] sm:$0xff]   ;;  %v3276_v33 = vld [vmem:[%s3967_s7 + $0x2d8] sm:$0xff]  }
  0xdf   : > { %2984 = vmatpush3.bf16.msra.mxu0 %v3213_v30  ;;  %3006 = vmatpush3.bf16.msra.mxu1 %v3214_v31  ;;  %v3270_v27 = vld [vmem:[%s3967_s7 + $0x2a8] sm:$0xff]   ;;  %v3273_v30 = vld [vmem:[%s3967_s7 + $0x220] sm:$0xff]   ;;  %v3278_v35 = vld [vmem:[%s3967_s7 + $0x298] sm:$0xff]  }
  0xe0   : > { %2985 = vmatprep.subr.bf16.mxu0 %v3215_v32  ;;  %3007 = vmatprep.subr.bf16.mxu1 %v3216_v34  ;;  %v3274_v31 = vld [vmem:[%s3967_s7 + $0x2a0] sm:$0xff]   ;;  %v3275_v32 = vld [vmem:[%s3967_s7 + $0x258] sm:$0xff]  }
  0xe1   : > { %v3277_v34 = vld [vmem:[%s3967_s7 + $0x218] sm:$0xff]  }
  0xe3   : > { %2986 = vmatpush3.bf16.msra.mxu0 %v3217_v36  ;;  %3008 = vmatpush3.bf16.msra.mxu1 %v3218_v37  ;;  %v3279_v36 = vld [vmem:[%s3967_s7 + $0x250] sm:$0xff]  }
  0xe4   : > { %3015 = vmatprep.subr.bf16.mxu0 %v3223_v40  ;;  %3037 = vmatprep.subr.bf16.mxu1 %v3224_v41  ;;  %v3280_v37 = vld [vmem:[%s3967_s7 + $0x2d0] sm:$0xff]   ;;  %v3283_v40 = vld [vmem:[%s3967_s7 + $0x248] sm:$0xff]  }
  0xe5   : > { %v3284_v41 = vld [vmem:[%s3967_s7 + $0x2c8] sm:$0xff]  }
  0xe6   : > { %2417 = vmatmul.mubr.bf16.vlgmr.msra.gmra.mxu0 %v2825_v38  ;;  %2457 = vmatmul.mubr.bf16.vlgmr.msra.gmra.mxu1 %v2827_v39  ;;  %v3281_v38 = vld [vmem:[%s3967_s7 + $0x210] sm:$0xff]  }
  0xe7   : > { %3016 = vmatpush3.bf16.msra.mxu0 %v3225_v43  ;;  %3038 = vmatpush3.bf16.msra.mxu1 %v3226_v45  ;;  %v3282_v39 = vld [vmem:[%s3967_s7 + $0x290] sm:$0xff]   ;;  %v3286_v43 = vld [vmem:[%s3967_s7 + $0x288] sm:$0xff]   ;;  %v3288_v45 = vld [vmem:[%s3967_s7 + $0x2c0] sm:$0xff]  }
  0xe8   : > { %2496 = vmatprep.mubr.bf16.mxu0 %v2830_v42  ;;  %3017 = vmatprep.subr.bf16.mxu0 %v3227_v46  ;;  %v3285_v42 = vld [vmem:[%s3967_s7 + $0x208] sm:$0xff]   ;;  %v3289_v46 = vld [vmem:[%s3967_s7 + $0x200] sm:$0xff]  }
  0xe9   : > { %2536 = vmatprep.mubr.bf16.mxu1 %v2832_v44  ;;  %3039 = vmatprep.subr.bf16.mxu1 %v3228_v47  ;;  %v3287_v44 = vld [vmem:[%s3967_s7 + $0x240] sm:$0xff]  }
  0xea   : > { %v3290_v47 = vld [vmem:[%s3967_s7 + $0x280] sm:$0xff]  }
  0xeb   : > { %3018 = vmatpush3.bf16.msra.mxu0 %v3229_v48  ;;  %3040 = vmatpush3.bf16.msra.mxu1 %v3230_v49  ;;  %v2833_v48 = vcombine.low %v4051_v7, %v4051_v7  ;;  %v2835_v49 = vcombine.low %v4057_v9, %v4057_v9  ;;  %v3316_v7 = vld [vmem:[%s3967_s7 + $0x3d0] sm:$0xff]  }
  0xec   : > { %3019 = vmatprep.subr.bf16.mxu0 %v3231_v50  ;;  %3041 = vmatprep.subr.bf16.mxu1 %v3232_v51  ;;  %v3295_v50 = vld [vmem:[%s3967_s7 + $0x378] sm:$0xff]   ;;  %v3318_v9 = vld [vmem:[%s3967_s7 + $0x390] sm:$0xff]  }
  0xed   : > { %v3296_v51 = vld [vmem:[%s3967_s7 + $0x3f8] sm:$0xff]  }
  0xef   : > { %3020 = vmatpush3.bf16.msra.mxu0 %v3233_v52  ;;  %3042 = vmatpush3.bf16.msra.mxu1 %v3234_v53  ;;  %v3297_v52 = vld [vmem:[%s3967_s7 + $0x338] sm:$0xff]  }
  0xf0   : > { %3021 = vmatprep.subr.bf16.mxu0 %v3235_v54  ;;  %3043 = vmatprep.subr.bf16.mxu1 %v3236_v55  ;;  %v3298_v53 = vld [vmem:[%s3967_s7 + $0x3b8] sm:$0xff]   ;;  %v3299_v54 = vld [vmem:[%s3967_s7 + $0x370] sm:$0xff]  }
  0xf1   : > { %v3300_v55 = vld [vmem:[%s3967_s7 + $0x3f0] sm:$0xff]  }
  0xf3   : > { %3022 = vmatpush3.bf16.msra.mxu0 %v3237_v56  ;;  %3044 = vmatpush3.bf16.msra.mxu1 %v3238_v57  ;;  %v3301_v56 = vld [vmem:[%s3967_s7 + $0x330] sm:$0xff]  }
  0xf4   : > { %3023 = vmatprep.subr.bf16.mxu0 %v3239_v58  ;;  %3045 = vmatprep.subr.bf16.mxu1 %v3240_v59  ;;  %v3302_v57 = vld [vmem:[%s3967_s7 + $0x3b0] sm:$0xff]   ;;  %v3303_v58 = vld [vmem:[%s3967_s7 + $0x368] sm:$0xff]  }
  0xf5   : > { %v3304_v59 = vld [vmem:[%s3967_s7 + $0x3e8] sm:$0xff]  }
  0xf7   : > { %3024 = vmatpush3.bf16.msra.mxu0 %v3241_v60  ;;  %3046 = vmatpush3.bf16.msra.mxu1 %v3242_v61  ;;  %v3305_v60 = vld [vmem:[%s3967_s7 + $0x328] sm:$0xff]  }
  0xf8   : > { %3025 = vmatprep.subr.bf16.mxu0 %v3243_v62  ;;  %3047 = vmatprep.subr.bf16.mxu1 %v3244_v63  ;;  %v3306_v61 = vld [vmem:[%s3967_s7 + $0x3a8] sm:$0xff]   ;;  %v3307_v62 = vld [vmem:[%s3967_s7 + $0x360] sm:$0xff]  }
  0xf9   : > { %v3308_v63 = vld [vmem:[%s3967_s7 + $0x3e0] sm:$0xff]  }
  0xfb   : > { %3026 = vmatpush3.bf16.msra.mxu0 %v3245_v0  ;;  %3048 = vmatpush3.bf16.msra.mxu1 %v3246_v1  ;;  %v3309_v0 = vld [vmem:[%s3967_s7 + $0x320] sm:$0xff]  }
  0xfc   : > { %3027 = vmatprep.subr.bf16.mxu0 %v3247_v2  ;;  %3049 = vmatprep.subr.bf16.mxu1 %v3248_v3  ;;  %v3310_v1 = vld [vmem:[%s3967_s7 + $0x3a0] sm:$0xff]   ;;  %v3311_v2 = vld [vmem:[%s3967_s7 + $0x358] sm:$0xff]  }
  0xfd   : > { %v3312_v3 = vld [vmem:[%s3967_s7 + $0x3d8] sm:$0xff]  }
  0xff   : > { %3028 = vmatpush3.bf16.msra.mxu0 %v3249_v4  ;;  %3050 = vmatpush3.bf16.msra.mxu1 %v3250_v5  ;;  %v3313_v4 = vld [vmem:[%s3967_s7 + $0x318] sm:$0xff]  }
 0x100   : > { %3029 = vmatprep.subr.bf16.mxu0 %v3251_v6  ;;  %3051 = vmatprep.subr.bf16.mxu1 %v3252_v8  ;;  %v3314_v5 = vld [vmem:[%s3967_s7 + $0x398] sm:$0xff]   ;;  %v3315_v6 = vld [vmem:[%s3967_s7 + $0x350] sm:$0xff]  }
 0x101   : > { %v3317_v8 = vld [vmem:[%s3967_s7 + $0x310] sm:$0xff]  }
 0x103   : > { %3030 = vmatpush3.bf16.msra.mxu0 %v3253_v10  ;;  %3052 = vmatpush3.bf16.msra.mxu1 %v3254_v11  ;;  %v3319_v10 = vld [vmem:[%s3967_s7 + $0x348] sm:$0xff]  }
 0x104   : > { %3059 = vmatprep.subr.bf16.mxu0 %v3259_v14  ;;  %3081 = vmatprep.subr.bf16.mxu1 %v3260_v15  ;;  %v3320_v11 = vld [vmem:[%s3967_s7 + $0x3c8] sm:$0xff]   ;;  %v3323_v14 = vld [vmem:[%s3967_s7 + $0x340] sm:$0xff]  }
 0x105   : > { %v3324_v15 = vld [vmem:[%s3967_s7 + $0x3c0] sm:$0xff]  }
 0x106   : > { %2497 = vmatmul.mubr.bf16.vlgmr.msra.gmra.mxu0 %v2829_v12  ;;  %2537 = vmatmul.mubr.bf16.vlgmr.msra.gmra.mxu1 %v2831_v13  ;;  %v3321_v12 = vld [vmem:[%s3967_s7 + $0x308] sm:$0xff]  }
 0x107   : > { %3060 = vmatpush3.bf16.msra.mxu0 %v3261_v17  ;;  %3082 = vmatpush3.bf16.msra.mxu1 %v3262_v19  ;;  %v3322_v13 = vld [vmem:[%s3967_s7 + $0x388] sm:$0xff]   ;;  %v3326_v17 = vld [vmem:[%s3967_s7 + $0x380] sm:$0xff]   ;;  %v1296_v19 = vld [vmem:[%s4170_s0 + $0x38] sm:$0xff] }
 0x108   : > { %2576 = vmatprep.mubr.bf16.mxu0 %v2834_v16  ;;  %3061 = vmatprep.subr.bf16.mxu0 %v3263_v20  ;;  %v3325_v16 = vld [vmem:[%s3967_s7 + $0x300] sm:$0xff]  }
 0x109   : > { %2616 = vmatprep.mubr.bf16.mxu1 %v2836_v18  ;;  %3083 = vmatprep.subr.bf16.mxu1 %v3264_v21  ;;  %v1295_v18 = vld [vmem:[%s4170_s0 + $0x30] sm:$0xff] }
 0x10a   : > { %v2837_v20 = vcombine.low %v1295_v18, %v1295_v18  ;;  %v2838_v21 = vcombine.high %v1295_v18, %v1295_v18 }
 0x10b   : > { %3062 = vmatpush3.bf16.msra.mxu0 %v3265_v22  ;;  %3084 = vmatpush3.bf16.msra.mxu1 %v3266_v23  ;;  %v2839_v22 = vcombine.low %v1296_v19, %v1296_v19  ;;  %v2840_v23 = vcombine.high %v1296_v19, %v1296_v19 }
 0x10c   : > { %3063 = vmatprep.subr.bf16.mxu0 %v3267_v24  ;;  %3085 = vmatprep.subr.bf16.mxu1 %v3268_v25 }
 0x10f   : > { %3064 = vmatpush3.bf16.msra.mxu0 %v3269_v26  ;;  %3086 = vmatpush3.bf16.msra.mxu1 %v3270_v27  ;;  %v2824_v26 = vld [vmem:[%s1279_s28] ss:$0 sm:$0xff] }
 0x110   : > { %3065 = vmatprep.subr.bf16.mxu0 %v3271_v28  ;;  %3087 = vmatprep.subr.bf16.mxu1 %v3272_v29 }
 0x113   : > { %3066 = vmatpush3.bf16.msra.mxu0 %v3273_v30  ;;  %3088 = vmatpush3.bf16.msra.mxu1 %v3274_v31 }
 0x114   : > { %3067 = vmatprep.subr.bf16.mxu0 %v3275_v32  ;;  %3089 = vmatprep.subr.bf16.mxu1 %v3276_v33 }
 0x117   : > { %3068 = vmatpush3.bf16.msra.mxu0 %v3277_v34  ;;  %3090 = vmatpush3.bf16.msra.mxu1 %v3278_v35 }
 0x118   : > { %3069 = vmatprep.subr.bf16.mxu0 %v3279_v36  ;;  %3091 = vmatprep.subr.bf16.mxu1 %v3280_v37 }
 0x11b   : > { %3070 = vmatpush3.bf16.msra.mxu0 %v3281_v38  ;;  %3092 = vmatpush3.bf16.msra.mxu1 %v3282_v39 }
 0x11c   : > { %3071 = vmatprep.subr.bf16.mxu0 %v3283_v40  ;;  %3093 = vmatprep.subr.bf16.mxu1 %v3284_v41 }
 0x11f   : > { %3072 = vmatpush3.bf16.msra.mxu0 %v3285_v42  ;;  %3094 = vmatpush3.bf16.msra.mxu1 %v3286_v43 }
 0x120   : > { %3073 = vmatprep.subr.bf16.mxu0 %v3287_v44  ;;  %3095 = vmatprep.subr.bf16.mxu1 %v3288_v45 }
 0x123   : > { %3074 = vmatpush3.bf16.msra.mxu0 %v3289_v46  ;;  %3096 = vmatpush3.bf16.msra.mxu1 %v3290_v47 }
 0x124   : > { %3103 = vmatprep.subr.bf16.mxu0 %v3295_v50  ;;  %3125 = vmatprep.subr.bf16.mxu1 %v3296_v51 }
 0x126   : > { %2577 = vmatmul.mubr.bf16.vlgmr.msra.gmra.mxu0 %v2833_v48  ;;  %2617 = vmatmul.mubr.bf16.vlgmr.msra.gmra.mxu1 %v2835_v49 }
 0x127   : > { %3104 = vmatpush3.bf16.msra.mxu0 %v3297_v52  ;;  %3126 = vmatpush3.bf16.msra.mxu1 %v3298_v53 }
 0x128   : > { %3105 = vmatprep.subr.bf16.mxu0 %v3299_v54  ;;  %3127 = vmatprep.subr.bf16.mxu1 %v3300_v55 }
 0x129   : > { %2656 = vmatprep.mubr.bf16.mxu0 %v2838_v21  ;;  %2696 = vmatprep.mubr.bf16.mxu1 %v2840_v23 }
 0x12b   : > { %3106 = vmatpush3.bf16.msra.mxu0 %v3301_v56  ;;  %3128 = vmatpush3.bf16.msra.mxu1 %v3302_v57 }
 0x12c   : > { %3107 = vmatprep.subr.bf16.mxu0 %v3303_v58  ;;  %3129 = vmatprep.subr.bf16.mxu1 %v3304_v59 }
 0x12f   : > { %3108 = vmatpush3.bf16.msra.mxu0 %v3305_v60  ;;  %3130 = vmatpush3.bf16.msra.mxu1 %v3306_v61 }
 0x130   : > { %3109 = vmatprep.subr.bf16.mxu0 %v3307_v62  ;;  %3131 = vmatprep.subr.bf16.mxu1 %v3308_v63 }
 0x133   : > { %3110 = vmatpush3.bf16.msra.mxu0 %v3309_v0  ;;  %3132 = vmatpush3.bf16.msra.mxu1 %v3310_v1 }
 0x134   : > { %3111 = vmatprep.subr.bf16.mxu0 %v3311_v2  ;;  %3133 = vmatprep.subr.bf16.mxu1 %v3312_v3 }
 0x137   : > { %3112 = vmatpush3.bf16.msra.mxu0 %v3313_v4  ;;  %3134 = vmatpush3.bf16.msra.mxu1 %v3314_v5 }
 0x138   : > { %3113 = vmatprep.subr.bf16.mxu0 %v3315_v6  ;;  %3135 = vmatprep.subr.bf16.mxu1 %v3316_v7 }
 0x13b   : > { %3114 = vmatpush3.bf16.msra.mxu0 %v3317_v8  ;;  %3136 = vmatpush3.bf16.msra.mxu1 %v3318_v9 }
 0x13c   : > { %3115 = vmatprep.subr.bf16.mxu0 %v3319_v10  ;;  %3137 = vmatprep.subr.bf16.mxu1 %v3320_v11 }
 0x13f   : > { %3116 = vmatpush3.bf16.msra.mxu0 %v3321_v12  ;;  %3138 = vmatpush3.bf16.msra.mxu1 %v3322_v13 }
 0x140   : > { %3117 = vmatprep.subr.bf16.mxu0 %v3323_v14  ;;  %3139 = vmatprep.subr.bf16.mxu1 %v3324_v15 }
 0x143   : > { %3118 = vmatpush3.bf16.msra.mxu0 %v3325_v16  ;;  %3140 = vmatpush3.bf16.msra.mxu1 %v3326_v17 }
 0x146   : > { %2657 = vmatmul.mubr.bf16.vlgmr.msra.gmra.mxu0 %v2837_v20  ;;  %2697 = vmatmul.mubr.bf16.vlgmr.msra.gmra.mxu1 %v2839_v22 }
 0x1a6   : > { %v2987_v24 = vpop.f32.mrf.mxu0  ;;  %v3009_v25 = vpop.f32.mrf.mxu1 }
 0x1a8   : > { %v2988_v27 = vpop.f32.mrf.mxu0  ;;  %v3010_v29 = vpop.f32.mrf.mxu1 }
 0x1a9   : > { %v2989_v28 = vadd.f32 %v2988_v27, %v2987_v24  ;;  %v3011_v30 = vadd.f32 %v3010_v29, %v3009_v25 }
 0x1aa   : > { %v2990_v31 = vpop.f32.mrf.mxu0  ;;  %v3012_v33 = vpop.f32.mrf.mxu1 }
 0x1ab   : > { %v2419_v32 = vadd.f32 %v2989_v28, %v2824_v26 }
 0x1ac   : > { %v2991_v34 = vpop.f32.mrf.mxu0  ;;  %v3013_v36 = vpop.f32.mrf.mxu1 }
 0x1ad   : > { %v2459_v35 = vadd.f32 %v3011_v30, %v2419_v32 }
 0x1c6   : > { %v3031_v37 = vpop.f32.mrf.mxu0  ;;  %v3053_v38 = vpop.f32.mrf.mxu1 }
 0x1c8   : > { %v3032_v39 = vpop.f32.mrf.mxu0  ;;  %v3054_v40 = vpop.f32.mrf.mxu1 }
 0x1c9   : > { %v3033_v53 = vadd.f32 %v3032_v39, %v3031_v37  ;;  %v3055_v55 = vadd.f32 %v3054_v40, %v3053_v38 }
 0x1ca   : > { %v3034_v41 = vpop.f32.mrf.mxu0  ;;  %v3056_v42 = vpop.f32.mrf.mxu1 }
 0x1cb   : > { %v2499_v54 = vadd.f32 %v3033_v53, %v2459_v35 }
 0x1cc   : > { %v3035_v43 = vpop.f32.mrf.mxu0  ;;  %v3057_v44 = vpop.f32.mrf.mxu1 }
 0x1cd   : > { %v2539_v57 = vadd.f32 %v3055_v55, %v2499_v54 }
 0x1e6   : > { %v3075_v45 = vpop.f32.mrf.mxu0  ;;  %v3097_v46 = vpop.f32.mrf.mxu1 }
 0x1e8   : > { %v3076_v47 = vpop.f32.mrf.mxu0  ;;  %v3098_v48 = vpop.f32.mrf.mxu1 }
 0x1e9   : > { %v3077_v56 = vadd.f32 %v3076_v47, %v3075_v45  ;;  %v3099_v59 = vadd.f32 %v3098_v48, %v3097_v46 }
 0x1ea   : > { %v3078_v49 = vpop.f32.mrf.mxu0  ;;  %v3100_v50 = vpop.f32.mrf.mxu1 }
 0x1eb   : > { %v2579_v58 = vadd.f32 %v3077_v56, %v2539_v57 }
 0x1ec   : > { %v3079_v51 = vpop.f32.mrf.mxu0  ;;  %v3101_v52 = vpop.f32.mrf.mxu1 }
 0x1ed   : > { %v2619_v0 = vadd.f32 %v3099_v59, %v2579_v58 }
 0x206   : > { %v3119_v60 = vpop.f32.mrf.mxu0  ;;  %v3141_v61 = vpop.f32.mrf.mxu1 }
 0x208   : > { %v3120_v62 = vpop.f32.mrf.mxu0  ;;  %v3142_v63 = vpop.f32.mrf.mxu1 }
 0x209   : > { %v3121_v1 = vadd.f32 %v3120_v62, %v3119_v60  ;;  %v3143_v5 = vadd.f32 %v3142_v63, %v3141_v61 }
 0x20a   : > { %v3122_v2 = vpop.f32.mrf.mxu0  ;;  %v3144_v3 = vpop.f32.mrf.mxu1 }
 0x20b   : > { %v2659_v4 = vadd.f32 %v3121_v1, %v2619_v0 }
 0x20c   : > { %v3123_v6 = vpop.f32.mrf.mxu0  ;;  %v3145_v7 = vpop.f32.mrf.mxu1 }
 0x20d   : > { %v2699_v8 = vadd.f32 %v3143_v5, %v2659_v4 }
 0x20f   : > { %v2704_v9 = vmax.f32 %v2699_v8, 0.0 }
 0x211   : > { %2705 = vst [vmem:[%s1287_s5] sm:$0xff] %v2704_v9 }
 0x212 PF: > { %s13_s16 = sadd.s32 1, %s3369_s16   ;;  %s4174_s12 = smov %s3357_s13 }
 0x213   : > { %p10_p10 = scmp.ge.s32.totalorder %s13_s16, 4   ;;  %s4175_s13 = smov %s3426_s20 }
 0x214   : > { %s4176_s14 = smov %s3365_s15  ;;  %s4177_s15 = smov %s4179_s17 }
 0x215   :  { %12 = sbr.rel (!%p10_p10) target bundleno = 3 (0x3), region = 114 }

// kernel: depth_encoder_forward.16
= control target key start
LH: loop header
LB: loop body
LE: loop exit
PB: predicated region body
PF: predicated region fallthrough
CT: control target
= control target key end

     0   :  { %s5289_s18 = smov 0   ;;  %s5291_s19 = smov 0   ;;  %s6656_s0 = inlined_call_operand.vmem [shape: bf16[8,512], index: 0, kind: input, shape index: {}]   ;;  %s6657_s1 = inlined_call_operand.vmem [shape: bf16[512,2048], index: 1, kind: input, shape index: {}]   ;;  %s6658_s2 = inlined_call_operand.vmem [shape: f32[1,2048], index: 2, kind: input, shape index: {}]   ;;  %s6659_s3 = inlined_call_operand.vmem [shape: bf16[8,1024], index: 3, kind: input, shape index: {}]   ;;  %s6660_s4 = inlined_call_operand.vmem [shape: bf16[1024,2048], index: 4, kind: input, shape index: {}]   ;;  %s6661_s5 = inlined_call_operand.vmem [shape: bf16[8,2048], index: 5, kind: output, shape index: {}]  }
   0x1   :  { %s5293_s20 = smov 0   ;;  %s5295_s21 = smov 0  }
   0x2   :  { %s5297_s22 = smov 0  }
   0x3 LB: > { %s24_s23 = sadd.s32 1, %s5253_s21  ;;  %p67_p1 = scmp.ne.s32.totalorder %s5245_s19, %s5241_s18  ;;  %s5257_s22 = sphi %s5297_s22, %s15_s22   ;;  %s5253_s21 = sphi %s5295_s21, %s6666_s21   ;;  %s5249_s20 = sphi %s5293_s20, %s6665_s20   ;;  %s5245_s19 = sphi %s5291_s19, %s6664_s19   ;;  %s5241_s18 = sphi %s5289_s18, %s6663_s18  }
   0x4   : > { %p25_p0 = scmp.ge.s32.totalorder %s24_s23, 4  ;;  %p68_p2 = scmp.eq.s32.totalorder %s5257_s22, 0 }
   0x5   : > { %s60_s26 = sadd.s32 1, %s5245_s19  ;;  %p4174_p5 = scmp.ge.s32.totalorder %s5257_s22, 4 }
   0x6   : > { %s6668_s23 = smov (%p25_p0, %s24_s23), 0  ;;  %p5320_p3 = por %p68_p2, %p67_p1 }
   0x7   : > { %s57_s25 = ssub.s32 %s5253_s21, %s6668_s23  ;;  %215 = sbr.rel (%p4174_p5) target bundleno = 212 (0xd4), region = 24 }
   0x8   : > { %p58_p4 = scmp.eq.s32.totalorder %s57_s25, 0 }
   0xa   : > { %s5328_s27 = scalar_select %p58_p4, %s5245_s19, %s60_s26  }
   0xc   : > { %218 = sbr.rel (!%p5320_p3) target bundleno = 80 (0x50), region = 28  ;;  %s220_s28 = sand.u32 (%p5320_p3), 1, %s5245_s19  }
   0xd   : > { %s4587_s29 = sshll.u32 (%p5320_p3), %s5253_s21, 4  ;;  %s4175_s30 = sshll.u32 (%p5320_p3), %s220_s28, 10 }
   0xe   : > { %s5338_s8 = scalar_lea.vmem (%p5320_p3), %s6657_s1, %s4587_s29  ;;  %s5343_s9 = scalar_lea.vmem (%p5320_p3), [#allocation2], %s4175_s30 }
   0xf   : > { %v238_v0 = vld [vmem:[%s5338_s8] sm:$0xff] (%p5320_p3)  ;;  %v240_v1 = vld [vmem:[%s5338_s8 + $0x8] sm:$0xff] (%p5320_p3) }
  0x10   : > { %v242_v2 = vld [vmem:[%s5338_s8 + $0x40] sm:$0xff] (%p5320_p3)  ;;  %239 = vst [vmem:[%s5343_s9] sm:$0xff] (%p5320_p3), %v238_v0  ;;  %241 = vst [vmem:[%s5343_s9 + $0x8] sm:$0xff] (%p5320_p3), %v240_v1  ;;  %v244_v3 = vld [vmem:[%s5338_s8 + $0x48] sm:$0xff] (%p5320_p3) }
  0x11   : > { %243 = vst [vmem:[%s5343_s9 + $0x10] sm:$0xff] %v242_v2  ;;  %v246_v4 = vld [vmem:[%s5338_s8 + $0x80] sm:$0xff]  ;;  %v248_v5 = vld [vmem:[%s5338_s8 + $0x88] sm:$0xff]  ;;  %245 = vst [vmem:[%s5343_s9 + $0x18] sm:$0xff] %v244_v3 }
  0x12   : > { %247 = vst [vmem:[%s5343_s9 + $0x20] sm:$0xff] %v246_v4  ;;  %249 = vst [vmem:[%s5343_s9 + $0x28] sm:$0xff] %v248_v5  ;;  %v250_v6 = vld [vmem:[%s5338_s8 + $0xc0] sm:$0xff]  ;;  %v252_v7 = vld [vmem:[%s5338_s8 + $0xc8] sm:$0xff] }
  0x13   : > { %v254_v8 = vld [vmem:[%s5338_s8 + $0x100] sm:$0xff]  ;;  %251 = vst [vmem:[%s5343_s9 + $0x30] sm:$0xff] %v250_v6  ;;  %253 = vst [vmem:[%s5343_s9 + $0x38] sm:$0xff] %v252_v7  ;;  %v256_v9 = vld [vmem:[%s5338_s8 + $0x108] sm:$0xff] }
  0x14   : > { %255 = vst [vmem:[%s5343_s9 + $0x40] sm:$0xff] %v254_v8  ;;  %v258_v10 = vld [vmem:[%s5338_s8 + $0x140] sm:$0xff]  ;;  %v260_v11 = vld [vmem:[%s5338_s8 + $0x148] sm:$0xff]  ;;  %257 = vst [vmem:[%s5343_s9 + $0x48] sm:$0xff] %v256_v9 }
  0x15   : > { %259 = vst [vmem:[%s5343_s9 + $0x50] sm:$0xff] %v258_v10  ;;  %261 = vst [vmem:[%s5343_s9 + $0x58] sm:$0xff] %v260_v11  ;;  %v262_v12 = vld [vmem:[%s5338_s8 + $0x180] sm:$0xff]  ;;  %v264_v13 = vld [vmem:[%s5338_s8 + $0x188] sm:$0xff] }
  0x16   : > { %v266_v14 = vld [vmem:[%s5338_s8 + $0x1c0] sm:$0xff]  ;;  %263 = vst [vmem:[%s5343_s9 + $0x60] sm:$0xff] %v262_v12  ;;  %265 = vst [vmem:[%s5343_s9 + $0x68] sm:$0xff] %v264_v13  ;;  %v268_v15 = vld [vmem:[%s5338_s8 + $0x1c8] sm:$0xff] }
  0x17   : > { %267 = vst [vmem:[%s5343_s9 + $0x70] sm:$0xff] %v266_v14  ;;  %v270_v16 = vld [vmem:[%s5338_s8 + $0x200] sm:$0xff]  ;;  %v272_v17 = vld [vmem:[%s5338_s8 + $0x208] sm:$0xff]  ;;  %269 = vst [vmem:[%s5343_s9 + $0x78] sm:$0xff] %v268_v15 }
  0x18   : > { %271 = vst [vmem:[%s5343_s9 + $0x80] sm:$0xff] %v270_v16  ;;  %273 = vst [vmem:[%s5343_s9 + $0x88] sm:$0xff] %v272_v17  ;;  %v274_v18 = vld [vmem:[%s5338_s8 + $0x240] sm:$0xff]  ;;  %v276_v19 = vld [vmem:[%s5338_s8 + $0x248] sm:$0xff] }
  0x19   : > { %v278_v20 = vld [vmem:[%s5338_s8 + $0x280] sm:$0xff]  ;;  %275 = vst [vmem:[%s5343_s9 + $0x90] sm:$0xff] %v274_v18  ;;  %277 = vst [vmem:[%s5343_s9 + $0x98] sm:$0xff] %v276_v19  ;;  %v280_v21 = vld [vmem:[%s5338_s8 + $0x288] sm:$0xff] }
  0x1a   : > { %279 = vst [vmem:[%s5343_s9 + $0xa0] sm:$0xff] %v278_v20  ;;  %v282_v22 = vld [vmem:[%s5338_s8 + $0x2c0] sm:$0xff]  ;;  %v284_v23 = vld [vmem:[%s5338_s8 + $0x2c8] sm:$0xff]  ;;  %281 = vst [vmem:[%s5343_s9 + $0xa8] sm:$0xff] %v280_v21 }
  0x1b   : > { %283 = vst [vmem:[%s5343_s9 + $0xb0] sm:$0xff] %v282_v22  ;;  %285 = vst [vmem:[%s5343_s9 + $0xb8] sm:$0xff] %v284_v23  ;;  %v286_v24 = vld [vmem:[%s5338_s8 + $0x300] sm:$0xff]  ;;  %v288_v25 = vld [vmem:[%s5338_s8 + $0x308] sm:$0xff] }
  0x1c   : > { %v290_v26 = vld [vmem:[%s5338_s8 + $0x340] sm:$0xff]  ;;  %287 = vst [vmem:[%s5343_s9 + $0xc0] sm:$0xff] %v286_v24  ;;  %289 = vst [vmem:[%s5343_s9 + $0xc8] sm:$0xff] %v288_v25  ;;  %v292_v27 = vld [vmem:[%s5338_s8 + $0x348] sm:$0xff] }
  0x1d   : > { %291 = vst [vmem:[%s5343_s9 + $0xd0] sm:$0xff] %v290_v26  ;;  %v294_v28 = vld [vmem:[%s5338_s8 + $0x380] sm:$0xff]  ;;  %v296_v29 = vld [vmem:[%s5338_s8 + $0x388] sm:$0xff]  ;;  %293 = vst [vmem:[%s5343_s9 + $0xd8] sm:$0xff] %v292_v27 }
  0x1e   : > { %295 = vst [vmem:[%s5343_s9 + $0xe0] sm:$0xff] %v294_v28  ;;  %297 = vst [vmem:[%s5343_s9 + $0xe8] sm:$0xff] %v296_v29  ;;  %v298_v30 = vld [vmem:[%s5338_s8 + $0x3c0] sm:$0xff]  ;;  %v300_v31 = vld [vmem:[%s5338_s8 + $0x3c8] sm:$0xff] }
  0x1f   : > { %v302_v32 = vld [vmem:[%s5338_s8 + $0x400] sm:$0xff]  ;;  %299 = vst [vmem:[%s5343_s9 + $0xf0] sm:$0xff] %v298_v30  ;;  %301 = vst [vmem:[%s5343_s9 + $0xf8] sm:$0xff] %v300_v31  ;;  %v304_v33 = vld [vmem:[%s5338_s8 + $0x408] sm:$0xff] }
  0x20   : > { %303 = vst [vmem:[%s5343_s9 + $0x100] sm:$0xff] %v302_v32  ;;  %v306_v34 = vld [vmem:[%s5338_s8 + $0x440] sm:$0xff]  ;;  %v308_v35 = vld [vmem:[%s5338_s8 + $0x448] sm:$0xff]  ;;  %305 = vst [vmem:[%s5343_s9 + $0x108] sm:$0xff] %v304_v33 }
  0x21   : > { %307 = vst [vmem:[%s5343_s9 + $0x110] sm:$0xff] %v306_v34  ;;  %309 = vst [vmem:[%s5343_s9 + $0x118] sm:$0xff] %v308_v35  ;;  %v310_v36 = vld [vmem:[%s5338_s8 + $0x480] sm:$0xff]  ;;  %v312_v37 = vld [vmem:[%s5338_s8 + $0x488] sm:$0xff] }
  0x22   : > { %v314_v38 = vld [vmem:[%s5338_s8 + $0x4c0] sm:$0xff]  ;;  %311 = vst [vmem:[%s5343_s9 + $0x120] sm:$0xff] %v310_v36  ;;  %313 = vst [vmem:[%s5343_s9 + $0x128] sm:$0xff] %v312_v37  ;;  %v316_v39 = vld [vmem:[%s5338_s8 + $0x4c8] sm:$0xff] }
  0x23   : > { %315 = vst [vmem:[%s5343_s9 + $0x130] sm:$0xff] %v314_v38  ;;  %v318_v40 = vld [vmem:[%s5338_s8 + $0x500] sm:$0xff]  ;;  %v320_v41 = vld [vmem:[%s5338_s8 + $0x508] sm:$0xff]  ;;  %317 = vst [vmem:[%s5343_s9 + $0x138] sm:$0xff] %v316_v39 }
  0x24   : > { %319 = vst [vmem:[%s5343_s9 + $0x140] sm:$0xff] %v318_v40  ;;  %321 = vst [vmem:[%s5343_s9 + $0x148] sm:$0xff] %v320_v41  ;;  %v322_v42 = vld [vmem:[%s5338_s8 + $0x540] sm:$0xff]  ;;  %v324_v43 = vld [vmem:[%s5338_s8 + $0x548] sm:$0xff] }
  0x25   : > { %v326_v44 = vld [vmem:[%s5338_s8 + $0x580] sm:$0xff]  ;;  %323 = vst [vmem:[%s5343_s9 + $0x150] sm:$0xff] %v322_v42  ;;  %325 = vst [vmem:[%s5343_s9 + $0x158] sm:$0xff] %v324_v43  ;;  %v328_v45 = vld [vmem:[%s5338_s8 + $0x588] sm:$0xff] }
  0x26   : > { %327 = vst [vmem:[%s5343_s9 + $0x160] sm:$0xff] %v326_v44  ;;  %v330_v46 = vld [vmem:[%s5338_s8 + $0x5c0] sm:$0xff]  ;;  %v332_v47 = vld [vmem:[%s5338_s8 + $0x5c8] sm:$0xff]  ;;  %329 = vst [vmem:[%s5343_s9 + $0x168] sm:$0xff] %v328_v45 }
  0x27   : > { %331 = vst [vmem:[%s5343_s9 + $0x170] sm:$0xff] %v330_v46  ;;  %333 = vst [vmem:[%s5343_s9 + $0x178] sm:$0xff] %v332_v47  ;;  %v334_v48 = vld [vmem:[%s5338_s8 + $0x600] sm:$0xff]  ;;  %v336_v49 = vld [vmem:[%s5338_s8 + $0x608] sm:$0xff] }
  0x28   : > { %v338_v50 = vld [vmem:[%s5338_s8 + $0x640] sm:$0xff]  ;;  %335 = vst [vmem:[%s5343_s9 + $0x180] sm:$0xff] %v334_v48  ;;  %337 = vst [vmem:[%s5343_s9 + $0x188] sm:$0xff] %v336_v49  ;;  %v340_v51 = vld [vmem:[%s5338_s8 + $0x648] sm:$0xff] }
  0x29   : > { %339 = vst [vmem:[%s5343_s9 + $0x190] sm:$0xff] %v338_v50  ;;  %v342_v52 = vld [vmem:[%s5338_s8 + $0x680] sm:$0xff]  ;;  %v344_v53 = vld [vmem:[%s5338_s8 + $0x688] sm:$0xff]  ;;  %341 = vst [vmem:[%s5343_s9 + $0x198] sm:$0xff] %v340_v51 }
  0x2a   : > { %343 = vst [vmem:[%s5343_s9 + $0x1a0] sm:$0xff] %v342_v52  ;;  %345 = vst [vmem:[%s5343_s9 + $0x1a8] sm:$0xff] %v344_v53  ;;  %v346_v54 = vld [vmem:[%s5338_s8 + $0x6c0] sm:$0xff]  ;;  %v348_v55 = vld [vmem:[%s5338_s8 + $0x6c8] sm:$0xff] }
  0x2b   : > { %v350_v56 = vld [vmem:[%s5338_s8 + $0x700] sm:$0xff]  ;;  %347 = vst [vmem:[%s5343_s9 + $0x1b0] sm:$0xff] %v346_v54  ;;  %349 = vst [vmem:[%s5343_s9 + $0x1b8] sm:$0xff] %v348_v55  ;;  %v352_v57 = vld [vmem:[%s5338_s8 + $0x708] sm:$0xff] }
  0x2c   : > { %351 = vst [vmem:[%s5343_s9 + $0x1c0] sm:$0xff] %v350_v56  ;;  %v354_v58 = vld [vmem:[%s5338_s8 + $0x740] sm:$0xff]  ;;  %v356_v59 = vld [vmem:[%s5338_s8 + $0x748] sm:$0xff]  ;;  %353 = vst [vmem:[%s5343_s9 + $0x1c8] sm:$0xff] %v352_v57 }
  0x2d   : > { %355 = vst [vmem:[%s5343_s9 + $0x1d0] sm:$0xff] %v354_v58  ;;  %357 = vst [vmem:[%s5343_s9 + $0x1d8] sm:$0xff] %v356_v59  ;;  %v358_v60 = vld [vmem:[%s5338_s8 + $0x780] sm:$0xff]  ;;  %v360_v61 = vld [vmem:[%s5338_s8 + $0x788] sm:$0xff] }
  0x2e   : > { %v362_v62 = vld [vmem:[%s5338_s8 + $0x7c0] sm:$0xff]  ;;  %359 = vst [vmem:[%s5343_s9 + $0x1e0] sm:$0xff] %v358_v60  ;;  %361 = vst [vmem:[%s5343_s9 + $0x1e8] sm:$0xff] %v360_v61  ;;  %v364_v63 = vld [vmem:[%s5338_s8 + $0x7c8] sm:$0xff] }
  0x2f   : > { %363 = vst [vmem:[%s5343_s9 + $0x1f0] sm:$0xff] %v362_v62  ;;  %v366_v0 = vld [vmem:[%s5338_s8 + $0x800] sm:$0xff]  ;;  %v368_v1 = vld [vmem:[%s5338_s8 + $0x808] sm:$0xff]  ;;  %365 = vst [vmem:[%s5343_s9 + $0x1f8] sm:$0xff] %v364_v63 }
  0x30   : > { %367 = vst [vmem:[%s5343_s9 + $0x200] sm:$0xff] %v366_v0  ;;  %369 = vst [vmem:[%s5343_s9 + $0x208] sm:$0xff] %v368_v1  ;;  %v370_v2 = vld [vmem:[%s5338_s8 + $0x840] sm:$0xff]  ;;  %v372_v3 = vld [vmem:[%s5338_s8 + $0x848] sm:$0xff] }
  0x31   : > { %v374_v4 = vld [vmem:[%s5338_s8 + $0x880] sm:$0xff]  ;;  %371 = vst [vmem:[%s5343_s9 + $0x210] sm:$0xff] %v370_v2  ;;  %373 = vst [vmem:[%s5343_s9 + $0x218] sm:$0xff] %v372_v3  ;;  %v376_v5 = vld [vmem:[%s5338_s8 + $0x888] sm:$0xff] }
  0x32   : > { %375 = vst [vmem:[%s5343_s9 + $0x220] sm:$0xff] %v374_v4  ;;  %v378_v6 = vld [vmem:[%s5338_s8 + $0x8c0] sm:$0xff]  ;;  %v380_v7 = vld [vmem:[%s5338_s8 + $0x8c8] sm:$0xff]  ;;  %377 = vst [vmem:[%s5343_s9 + $0x228] sm:$0xff] %v376_v5 }
  0x33   : > { %379 = vst [vmem:[%s5343_s9 + $0x230] sm:$0xff] %v378_v6  ;;  %381 = vst [vmem:[%s5343_s9 + $0x238] sm:$0xff] %v380_v7  ;;  %v382_v8 = vld [vmem:[%s5338_s8 + $0x900] sm:$0xff]  ;;  %v384_v9 = vld [vmem:[%s5338_s8 + $0x908] sm:$0xff] }
  0x34   : > { %v386_v10 = vld [vmem:[%s5338_s8 + $0x940] sm:$0xff]  ;;  %383 = vst [vmem:[%s5343_s9 + $0x240] sm:$0xff] %v382_v8  ;;  %385 = vst [vmem:[%s5343_s9 + $0x248] sm:$0xff] %v384_v9  ;;  %v388_v11 = vld [vmem:[%s5338_s8 + $0x948] sm:$0xff] }
  0x35   : > { %387 = vst [vmem:[%s5343_s9 + $0x250] sm:$0xff] %v386_v10  ;;  %v390_v12 = vld [vmem:[%s5338_s8 + $0x980] sm:$0xff]  ;;  %v392_v13 = vld [vmem:[%s5338_s8 + $0x988] sm:$0xff]  ;;  %389 = vst [vmem:[%s5343_s9 + $0x258] sm:$0xff] %v388_v11 }
  0x36   : > { %391 = vst [vmem:[%s5343_s9 + $0x260] sm:$0xff] %v390_v12  ;;  %393 = vst [vmem:[%s5343_s9 + $0x268] sm:$0xff] %v392_v13  ;;  %v394_v14 = vld [vmem:[%s5338_s8 + $0x9c0] sm:$0xff]  ;;  %v396_v15 = vld [vmem:[%s5338_s8 + $0x9c8] sm:$0xff] }
  0x37   : > { %v398_v16 = vld [vmem:[%s5338_s8 + $0xa00] sm:$0xff]  ;;  %395 = vst [vmem:[%s5343_s9 + $0x270] sm:$0xff] %v394_v14  ;;  %397 = vst [vmem:[%s5343_s9 + $0x278] sm:$0xff] %v396_v15  ;;  %v400_v17 = vld [vmem:[%s5338_s8 + $0xa08] sm:$0xff] }
  0x38   : > { %399 = vst [vmem:[%s5343_s9 + $0x280] sm:$0xff] %v398_v16  ;;  %v402_v18 = vld [vmem:[%s5338_s8 + $0xa40] sm:$0xff]  ;;  %v404_v19 = vld [vmem:[%s5338_s8 + $0xa48] sm:$0xff]  ;;  %401 = vst [vmem:[%s5343_s9 + $0x288] sm:$0xff] %v400_v17 }
  0x39   : > { %403 = vst [vmem:[%s5343_s9 + $0x290] sm:$0xff] %v402_v18  ;;  %405 = vst [vmem:[%s5343_s9 + $0x298] sm:$0xff] %v404_v19  ;;  %v406_v20 = vld [vmem:[%s5338_s8 + $0xa80] sm:$0xff]  ;;  %v408_v21 = vld [vmem:[%s5338_s8 + $0xa88] sm:$0xff] }
  0x3a   : > { %v410_v22 = vld [vmem:[%s5338_s8 + $0xac0] sm:$0xff]  ;;  %407 = vst [vmem:[%s5343_s9 + $0x2a0] sm:$0xff] %v406_v20  ;;  %409 = vst [vmem:[%s5343_s9 + $0x2a8] sm:$0xff] %v408_v21  ;;  %v412_v23 = vld [vmem:[%s5338_s8 + $0xac8] sm:$0xff] }
  0x3b   : > { %411 = vst [vmem:[%s5343_s9 + $0x2b0] sm:$0xff] %v410_v22  ;;  %v414_v24 = vld [vmem:[%s5338_s8 + $0xb00] sm:$0xff]  ;;  %v416_v25 = vld [vmem:[%s5338_s8 + $0xb08] sm:$0xff]  ;;  %413 = vst [vmem:[%s5343_s9 + $0x2b8] sm:$0xff] %v412_v23 }
  0x3c   : > { %415 = vst [vmem:[%s5343_s9 + $0x2c0] sm:$0xff] %v414_v24  ;;  %417 = vst [vmem:[%s5343_s9 + $0x2c8] sm:$0xff] %v416_v25  ;;  %v418_v26 = vld [vmem:[%s5338_s8 + $0xb40] sm:$0xff]  ;;  %v420_v27 = vld [vmem:[%s5338_s8 + $0xb48] sm:$0xff] }
  0x3d   : > { %v422_v28 = vld [vmem:[%s5338_s8 + $0xb80] sm:$0xff]  ;;  %419 = vst [vmem:[%s5343_s9 + $0x2d0] sm:$0xff] %v418_v26  ;;  %421 = vst [vmem:[%s5343_s9 + $0x2d8] sm:$0xff] %v420_v27  ;;  %v424_v29 = vld [vmem:[%s5338_s8 + $0xb88] sm:$0xff] }
  0x3e   : > { %423 = vst [vmem:[%s5343_s9 + $0x2e0] sm:$0xff] %v422_v28  ;;  %v426_v30 = vld [vmem:[%s5338_s8 + $0xbc0] sm:$0xff]  ;;  %v428_v31 = vld [vmem:[%s5338_s8 + $0xbc8] sm:$0xff]  ;;  %425 = vst [vmem:[%s5343_s9 + $0x2e8] sm:$0xff] %v424_v29 }
  0x3f   : > { %427 = vst [vmem:[%s5343_s9 + $0x2f0] sm:$0xff] %v426_v30  ;;  %429 = vst [vmem:[%s5343_s9 + $0x2f8] sm:$0xff] %v428_v31  ;;  %v430_v32 = vld [vmem:[%s5338_s8 + $0xc00] sm:$0xff]  ;;  %v432_v33 = vld [vmem:[%s5338_s8 + $0xc08] sm:$0xff] }
  0x40   : > { %v434_v34 = vld [vmem:[%s5338_s8 + $0xc40] sm:$0xff]  ;;  %431 = vst [vmem:[%s5343_s9 + $0x300] sm:$0xff] %v430_v32  ;;  %433 = vst [vmem:[%s5343_s9 + $0x308] sm:$0xff] %v432_v33  ;;  %v436_v35 = vld [vmem:[%s5338_s8 + $0xc48] sm:$0xff] }
  0x41   : > { %435 = vst [vmem:[%s5343_s9 + $0x310] sm:$0xff] %v434_v34  ;;  %v438_v36 = vld [vmem:[%s5338_s8 + $0xc80] sm:$0xff]  ;;  %v440_v37 = vld [vmem:[%s5338_s8 + $0xc88] sm:$0xff]  ;;  %437 = vst [vmem:[%s5343_s9 + $0x318] sm:$0xff] %v436_v35 }
  0x42   : > { %439 = vst [vmem:[%s5343_s9 + $0x320] sm:$0xff] %v438_v36  ;;  %441 = vst [vmem:[%s5343_s9 + $0x328] sm:$0xff] %v440_v37  ;;  %v442_v38 = vld [vmem:[%s5338_s8 + $0xcc0] sm:$0xff]  ;;  %v444_v39 = vld [vmem:[%s5338_s8 + $0xcc8] sm:$0xff] }
  0x43   : > { %v446_v40 = vld [vmem:[%s5338_s8 + $0xd00] sm:$0xff]  ;;  %443 = vst [vmem:[%s5343_s9 + $0x330] sm:$0xff] %v442_v38  ;;  %445 = vst [vmem:[%s5343_s9 + $0x338] sm:$0xff] %v444_v39  ;;  %v448_v41 = vld [vmem:[%s5338_s8 + $0xd08] sm:$0xff] }
  0x44   : > { %447 = vst [vmem:[%s5343_s9 + $0x340] sm:$0xff] %v446_v40  ;;  %v450_v42 = vld [vmem:[%s5338_s8 + $0xd40] sm:$0xff]  ;;  %v452_v43 = vld [vmem:[%s5338_s8 + $0xd48] sm:$0xff]  ;;  %449 = vst [vmem:[%s5343_s9 + $0x348] sm:$0xff] %v448_v41 }
  0x45   : > { %451 = vst [vmem:[%s5343_s9 + $0x350] sm:$0xff] %v450_v42  ;;  %453 = vst [vmem:[%s5343_s9 + $0x358] sm:$0xff] %v452_v43  ;;  %v454_v44 = vld [vmem:[%s5338_s8 + $0xd80] sm:$0xff]  ;;  %v456_v45 = vld [vmem:[%s5338_s8 + $0xd88] sm:$0xff] }
  0x46   : > { %v458_v46 = vld [vmem:[%s5338_s8 + $0xdc0] sm:$0xff]  ;;  %455 = vst [vmem:[%s5343_s9 + $0x360] sm:$0xff] %v454_v44  ;;  %457 = vst [vmem:[%s5343_s9 + $0x368] sm:$0xff] %v456_v45  ;;  %v460_v47 = vld [vmem:[%s5338_s8 + $0xdc8] sm:$0xff] }
  0x47   : > { %459 = vst [vmem:[%s5343_s9 + $0x370] sm:$0xff] %v458_v46  ;;  %v462_v48 = vld [vmem:[%s5338_s8 + $0xe00] sm:$0xff]  ;;  %v464_v49 = vld [vmem:[%s5338_s8 + $0xe08] sm:$0xff]  ;;  %461 = vst [vmem:[%s5343_s9 + $0x378] sm:$0xff] %v460_v47 }
  0x48   : > { %463 = vst [vmem:[%s5343_s9 + $0x380] sm:$0xff] %v462_v48  ;;  %465 = vst [vmem:[%s5343_s9 + $0x388] sm:$0xff] %v464_v49  ;;  %v466_v50 = vld [vmem:[%s5338_s8 + $0xe40] sm:$0xff]  ;;  %v468_v51 = vld [vmem:[%s5338_s8 + $0xe48] sm:$0xff] }
  0x49   : > { %v470_v52 = vld [vmem:[%s5338_s8 + $0xe80] sm:$0xff]  ;;  %467 = vst [vmem:[%s5343_s9 + $0x390] sm:$0xff] %v466_v50  ;;  %469 = vst [vmem:[%s5343_s9 + $0x398] sm:$0xff] %v468_v51  ;;  %v472_v53 = vld [vmem:[%s5338_s8 + $0xe88] sm:$0xff] }
  0x4a   : > { %471 = vst [vmem:[%s5343_s9 + $0x3a0] sm:$0xff] %v470_v52  ;;  %v474_v54 = vld [vmem:[%s5338_s8 + $0xec0] sm:$0xff]  ;;  %v476_v55 = vld [vmem:[%s5338_s8 + $0xec8] sm:$0xff]  ;;  %473 = vst [vmem:[%s5343_s9 + $0x3a8] sm:$0xff] %v472_v53 }
  0x4b   : > { %475 = vst [vmem:[%s5343_s9 + $0x3b0] sm:$0xff] %v474_v54  ;;  %477 = vst [vmem:[%s5343_s9 + $0x3b8] sm:$0xff] %v476_v55  ;;  %v478_v56 = vld [vmem:[%s5338_s8 + $0xf00] sm:$0xff]  ;;  %v480_v57 = vld [vmem:[%s5338_s8 + $0xf08] sm:$0xff] }
  0x4c   : > { %v482_v58 = vld [vmem:[%s5338_s8 + $0xf40] sm:$0xff]  ;;  %479 = vst [vmem:[%s5343_s9 + $0x3c0] sm:$0xff] %v478_v56  ;;  %481 = vst [vmem:[%s5343_s9 + $0x3c8] sm:$0xff] %v480_v57  ;;  %v484_v59 = vld [vmem:[%s5338_s8 + $0xf48] sm:$0xff] }
  0x4d   : > { %483 = vst [vmem:[%s5343_s9 + $0x3d0] sm:$0xff] %v482_v58  ;;  %v486_v60 = vld [vmem:[%s5338_s8 + $0xf80] sm:$0xff]  ;;  %v488_v61 = vld [vmem:[%s5338_s8 + $0xf88] sm:$0xff]  ;;  %485 = vst [vmem:[%s5343_s9 + $0x3d8] sm:$0xff] %v484_v59 }
  0x4e   : > { %487 = vst [vmem:[%s5343_s9 + $0x3e0] sm:$0xff] %v486_v60  ;;  %489 = vst [vmem:[%s5343_s9 + $0x3e8] sm:$0xff] %v488_v61  ;;  %v490_v62 = vld [vmem:[%s5338_s8 + $0xfc0] sm:$0xff]  ;;  %v492_v63 = vld [vmem:[%s5338_s8 + $0xfc8] sm:$0xff] }
  0x4f   : > { %491 = vst [vmem:[%s5343_s9 + $0x3f0] sm:$0xff] %v490_v62  ;;  %493 = vst [vmem:[%s5343_s9 + $0x3f8] sm:$0xff] %v492_v63 }
  0x50 PF: > { %507 = sbr.rel (!%p5320_p3) target bundleno = 212 (0xd4), region = 55  ;;  %s509_s10 = sand.u32 (%p5320_p3), 1, %s5245_s19  }
  0x51   : > { %s4588_s11 = sshll.u32 (%p5320_p3), %s5253_s21, 4  ;;  %s4178_s12 = sshll.u32 (%p5320_p3), %s509_s10, 11 }
  0x52   : > { %s5605_s15 = scalar_lea.vmem (%p5320_p3), %s6660_s4, %s4588_s11  ;;  %s5610_s16 = scalar_lea.vmem (%p5320_p3), [#allocation3], %s4178_s12 }
  0x53   : > { %v527_v0 = vld [vmem:[%s5605_s15] sm:$0xff] (%p5320_p3)  ;;  %v529_v1 = vld [vmem:[%s5605_s15 + $0x8] sm:$0xff] (%p5320_p3) }
  0x54   : > { %v531_v2 = vld [vmem:[%s5605_s15 + $0x40] sm:$0xff] (%p5320_p3)  ;;  %528 = vst [vmem:[%s5610_s16] sm:$0xff] (%p5320_p3), %v527_v0  ;;  %530 = vst [vmem:[%s5610_s16 + $0x8] sm:$0xff] (%p5320_p3), %v529_v1  ;;  %v533_v3 = vld [vmem:[%s5605_s15 + $0x48] sm:$0xff] (%p5320_p3) }
  0x55   : > { %532 = vst [vmem:[%s5610_s16 + $0x10] sm:$0xff] %v531_v2  ;;  %v535_v4 = vld [vmem:[%s5605_s15 + $0x80] sm:$0xff]  ;;  %v537_v5 = vld [vmem:[%s5605_s15 + $0x88] sm:$0xff]  ;;  %534 = vst [vmem:[%s5610_s16 + $0x18] sm:$0xff] %v533_v3 }
  0x56   : > { %536 = vst [vmem:[%s5610_s16 + $0x20] sm:$0xff] %v535_v4  ;;  %538 = vst [vmem:[%s5610_s16 + $0x28] sm:$0xff] %v537_v5  ;;  %v539_v6 = vld [vmem:[%s5605_s15 + $0xc0] sm:$0xff]  ;;  %v541_v7 = vld [vmem:[%s5605_s15 + $0xc8] sm:$0xff] }
  0x57   : > { %v543_v8 = vld [vmem:[%s5605_s15 + $0x100] sm:$0xff]  ;;  %540 = vst [vmem:[%s5610_s16 + $0x30] sm:$0xff] %v539_v6  ;;  %542 = vst [vmem:[%s5610_s16 + $0x38] sm:$0xff] %v541_v7  ;;  %v545_v9 = vld [vmem:[%s5605_s15 + $0x108] sm:$0xff] }
  0x58   : > { %544 = vst [vmem:[%s5610_s16 + $0x40] sm:$0xff] %v543_v8  ;;  %v547_v10 = vld [vmem:[%s5605_s15 + $0x140] sm:$0xff]  ;;  %v549_v11 = vld [vmem:[%s5605_s15 + $0x148] sm:$0xff]  ;;  %546 = vst [vmem:[%s5610_s16 + $0x48] sm:$0xff] %v545_v9 }
  0x59   : > { %548 = vst [vmem:[%s5610_s16 + $0x50] sm:$0xff] %v547_v10  ;;  %550 = vst [vmem:[%s5610_s16 + $0x58] sm:$0xff] %v549_v11  ;;  %v551_v12 = vld [vmem:[%s5605_s15 + $0x180] sm:$0xff]  ;;  %v553_v13 = vld [vmem:[%s5605_s15 + $0x188] sm:$0xff] }
  0x5a   : > { %v555_v14 = vld [vmem:[%s5605_s15 + $0x1c0] sm:$0xff]  ;;  %552 = vst [vmem:[%s5610_s16 + $0x60] sm:$0xff] %v551_v12  ;;  %554 = vst [vmem:[%s5610_s16 + $0x68] sm:$0xff] %v553_v13  ;;  %v557_v15 = vld [vmem:[%s5605_s15 + $0x1c8] sm:$0xff] }
  0x5b   : > { %556 = vst [vmem:[%s5610_s16 + $0x70] sm:$0xff] %v555_v14  ;;  %v559_v16 = vld [vmem:[%s5605_s15 + $0x200] sm:$0xff]  ;;  %v561_v17 = vld [vmem:[%s5605_s15 + $0x208] sm:$0xff]  ;;  %558 = vst [vmem:[%s5610_s16 + $0x78] sm:$0xff] %v557_v15 }
  0x5c   : > { %560 = vst [vmem:[%s5610_s16 + $0x80] sm:$0xff] %v559_v16  ;;  %562 = vst [vmem:[%s5610_s16 + $0x88] sm:$0xff] %v561_v17  ;;  %v563_v18 = vld [vmem:[%s5605_s15 + $0x240] sm:$0xff]  ;;  %v565_v19 = vld [vmem:[%s5605_s15 + $0x248] sm:$0xff] }
  0x5d   : > { %v567_v20 = vld [vmem:[%s5605_s15 + $0x280] sm:$0xff]  ;;  %564 = vst [vmem:[%s5610_s16 + $0x90] sm:$0xff] %v563_v18  ;;  %566 = vst [vmem:[%s5610_s16 + $0x98] sm:$0xff] %v565_v19  ;;  %v569_v21 = vld [vmem:[%s5605_s15 + $0x288] sm:$0xff] }
  0x5e   : > { %568 = vst [vmem:[%s5610_s16 + $0xa0] sm:$0xff] %v567_v20  ;;  %v571_v22 = vld [vmem:[%s5605_s15 + $0x2c0] sm:$0xff]  ;;  %v573_v23 = vld [vmem:[%s5605_s15 + $0x2c8] sm:$0xff]  ;;  %570 = vst [vmem:[%s5610_s16 + $0xa8] sm:$0xff] %v569_v21 }
  0x5f   : > { %572 = vst [vmem:[%s5610_s16 + $0xb0] sm:$0xff] %v571_v22  ;;  %574 = vst [vmem:[%s5610_s16 + $0xb8] sm:$0xff] %v573_v23  ;;  %v575_v24 = vld [vmem:[%s5605_s15 + $0x300] sm:$0xff]  ;;  %v577_v25 = vld [vmem:[%s5605_s15 + $0x308] sm:$0xff] }
  0x60   : > { %v579_v26 = vld [vmem:[%s5605_s15 + $0x340] sm:$0xff]  ;;  %576 = vst [vmem:[%s5610_s16 + $0xc0] sm:$0xff] %v575_v24  ;;  %578 = vst [vmem:[%s5610_s16 + $0xc8] sm:$0xff] %v577_v25  ;;  %v581_v27 = vld [vmem:[%s5605_s15 + $0x348] sm:$0xff] }
  0x61   : > { %580 = vst [vmem:[%s5610_s16 + $0xd0] sm:$0xff] %v579_v26  ;;  %v583_v28 = vld [vmem:[%s5605_s15 + $0x380] sm:$0xff]  ;;  %v585_v29 = vld [vmem:[%s5605_s15 + $0x388] sm:$0xff]  ;;  %582 = vst [vmem:[%s5610_s16 + $0xd8] sm:$0xff] %v581_v27 }
  0x62   : > { %584 = vst [vmem:[%s5610_s16 + $0xe0] sm:$0xff] %v583_v28  ;;  %586 = vst [vmem:[%s5610_s16 + $0xe8] sm:$0xff] %v585_v29  ;;  %v587_v30 = vld [vmem:[%s5605_s15 + $0x3c0] sm:$0xff]  ;;  %v589_v31 = vld [vmem:[%s5605_s15 + $0x3c8] sm:$0xff] }
  0x63   : > { %v591_v32 = vld [vmem:[%s5605_s15 + $0x400] sm:$0xff]  ;;  %588 = vst [vmem:[%s5610_s16 + $0xf0] sm:$0xff] %v587_v30  ;;  %590 = vst [vmem:[%s5610_s16 + $0xf8] sm:$0xff] %v589_v31  ;;  %v593_v33 = vld [vmem:[%s5605_s15 + $0x408] sm:$0xff] }
  0x64   : > { %592 = vst [vmem:[%s5610_s16 + $0x100] sm:$0xff] %v591_v32  ;;  %v595_v34 = vld [vmem:[%s5605_s15 + $0x440] sm:$0xff]  ;;  %v597_v35 = vld [vmem:[%s5605_s15 + $0x448] sm:$0xff]  ;;  %594 = vst [vmem:[%s5610_s16 + $0x108] sm:$0xff] %v593_v33 }
  0x65   : > { %596 = vst [vmem:[%s5610_s16 + $0x110] sm:$0xff] %v595_v34  ;;  %598 = vst [vmem:[%s5610_s16 + $0x118] sm:$0xff] %v597_v35  ;;  %v599_v36 = vld [vmem:[%s5605_s15 + $0x480] sm:$0xff]  ;;  %v601_v37 = vld [vmem:[%s5605_s15 + $0x488] sm:$0xff] }
  0x66   : > { %v603_v38 = vld [vmem:[%s5605_s15 + $0x4c0] sm:$0xff]  ;;  %600 = vst [vmem:[%s5610_s16 + $0x120] sm:$0xff] %v599_v36  ;;  %602 = vst [vmem:[%s5610_s16 + $0x128] sm:$0xff] %v601_v37  ;;  %v605_v39 = vld [vmem:[%s5605_s15 + $0x4c8] sm:$0xff] }
  0x67   : > { %604 = vst [vmem:[%s5610_s16 + $0x130] sm:$0xff] %v603_v38  ;;  %v607_v40 = vld [vmem:[%s5605_s15 + $0x500] sm:$0xff]  ;;  %v609_v41 = vld [vmem:[%s5605_s15 + $0x508] sm:$0xff]  ;;  %606 = vst [vmem:[%s5610_s16 + $0x138] sm:$0xff] %v605_v39 }
  0x68   : > { %608 = vst [vmem:[%s5610_s16 + $0x140] sm:$0xff] %v607_v40  ;;  %610 = vst [vmem:[%s5610_s16 + $0x148] sm:$0xff] %v609_v41  ;;  %v611_v42 = vld [vmem:[%s5605_s15 + $0x540] sm:$0xff]  ;;  %v613_v43 = vld [vmem:[%s5605_s15 + $0x548] sm:$0xff] }
  0x69   : > { %v615_v44 = vld [vmem:[%s5605_s15 + $0x580] sm:$0xff]  ;;  %612 = vst [vmem:[%s5610_s16 + $0x150] sm:$0xff] %v611_v42  ;;  %614 = vst [vmem:[%s5610_s16 + $0x158] sm:$0xff] %v613_v43  ;;  %v617_v45 = vld [vmem:[%s5605_s15 + $0x588] sm:$0xff] }
  0x6a   : > { %616 = vst [vmem:[%s5610_s16 + $0x160] sm:$0xff] %v615_v44  ;;  %v619_v46 = vld [vmem:[%s5605_s15 + $0x5c0] sm:$0xff]  ;;  %v621_v47 = vld [vmem:[%s5605_s15 + $0x5c8] sm:$0xff]  ;;  %618 = vst [vmem:[%s5610_s16 + $0x168] sm:$0xff] %v617_v45 }
  0x6b   : > { %620 = vst [vmem:[%s5610_s16 + $0x170] sm:$0xff] %v619_v46  ;;  %622 = vst [vmem:[%s5610_s16 + $0x178] sm:$0xff] %v621_v47  ;;  %v623_v48 = vld [vmem:[%s5605_s15 + $0x600] sm:$0xff]  ;;  %v625_v49 = vld [vmem:[%s5605_s15 + $0x608] sm:$0xff] }
  0x6c   : > { %v627_v50 = vld [vmem:[%s5605_s15 + $0x640] sm:$0xff]  ;;  %624 = vst [vmem:[%s5610_s16 + $0x180] sm:$0xff] %v623_v48  ;;  %626 = vst [vmem:[%s5610_s16 + $0x188] sm:$0xff] %v625_v49  ;;  %v629_v51 = vld [vmem:[%s5605_s15 + $0x648] sm:$0xff] }
  0x6d   : > { %628 = vst [vmem:[%s5610_s16 + $0x190] sm:$0xff] %v627_v50  ;;  %v631_v52 = vld [vmem:[%s5605_s15 + $0x680] sm:$0xff]  ;;  %v633_v53 = vld [vmem:[%s5605_s15 + $0x688] sm:$0xff]  ;;  %630 = vst [vmem:[%s5610_s16 + $0x198] sm:$0xff] %v629_v51 }
  0x6e   : > { %632 = vst [vmem:[%s5610_s16 + $0x1a0] sm:$0xff] %v631_v52  ;;  %634 = vst [vmem:[%s5610_s16 + $0x1a8] sm:$0xff] %v633_v53  ;;  %v635_v54 = vld [vmem:[%s5605_s15 + $0x6c0] sm:$0xff]  ;;  %v637_v55 = vld [vmem:[%s5605_s15 + $0x6c8] sm:$0xff] }
  0x6f   : > { %v639_v56 = vld [vmem:[%s5605_s15 + $0x700] sm:$0xff]  ;;  %636 = vst [vmem:[%s5610_s16 + $0x1b0] sm:$0xff] %v635_v54  ;;  %638 = vst [vmem:[%s5610_s16 + $0x1b8] sm:$0xff] %v637_v55  ;;  %v641_v57 = vld [vmem:[%s5605_s15 + $0x708] sm:$0xff] }
  0x70   : > { %640 = vst [vmem:[%s5610_s16 + $0x1c0] sm:$0xff] %v639_v56  ;;  %v643_v58 = vld [vmem:[%s5605_s15 + $0x740] sm:$0xff]  ;;  %v645_v59 = vld [vmem:[%s5605_s15 + $0x748] sm:$0xff]  ;;  %642 = vst [vmem:[%s5610_s16 + $0x1c8] sm:$0xff] %v641_v57 }
  0x71   : > { %644 = vst [vmem:[%s5610_s16 + $0x1d0] sm:$0xff] %v643_v58  ;;  %646 = vst [vmem:[%s5610_s16 + $0x1d8] sm:$0xff] %v645_v59  ;;  %v647_v60 = vld [vmem:[%s5605_s15 + $0x780] sm:$0xff]  ;;  %v649_v61 = vld [vmem:[%s5605_s15 + $0x788] sm:$0xff] }
  0x72   : > { %v651_v62 = vld [vmem:[%s5605_s15 + $0x7c0] sm:$0xff]  ;;  %648 = vst [vmem:[%s5610_s16 + $0x1e0] sm:$0xff] %v647_v60  ;;  %650 = vst [vmem:[%s5610_s16 + $0x1e8] sm:$0xff] %v649_v61  ;;  %v653_v63 = vld [vmem:[%s5605_s15 + $0x7c8] sm:$0xff] }
  0x73   : > { %652 = vst [vmem:[%s5610_s16 + $0x1f0] sm:$0xff] %v651_v62  ;;  %v655_v0 = vld [vmem:[%s5605_s15 + $0x800] sm:$0xff]  ;;  %v657_v1 = vld [vmem:[%s5605_s15 + $0x808] sm:$0xff]  ;;  %654 = vst [vmem:[%s5610_s16 + $0x1f8] sm:$0xff] %v653_v63 }
  0x74   : > { %656 = vst [vmem:[%s5610_s16 + $0x200] sm:$0xff] %v655_v0  ;;  %658 = vst [vmem:[%s5610_s16 + $0x208] sm:$0xff] %v657_v1  ;;  %v659_v2 = vld [vmem:[%s5605_s15 + $0x840] sm:$0xff]  ;;  %v661_v3 = vld [vmem:[%s5605_s15 + $0x848] sm:$0xff] }
  0x75   : > { %v663_v4 = vld [vmem:[%s5605_s15 + $0x880] sm:$0xff]  ;;  %660 = vst [vmem:[%s5610_s16 + $0x210] sm:$0xff] %v659_v2  ;;  %662 = vst [vmem:[%s5610_s16 + $0x218] sm:$0xff] %v661_v3  ;;  %v665_v5 = vld [vmem:[%s5605_s15 + $0x888] sm:$0xff] }
  0x76   : > { %664 = vst [vmem:[%s5610_s16 + $0x220] sm:$0xff] %v663_v4  ;;  %v667_v6 = vld [vmem:[%s5605_s15 + $0x8c0] sm:$0xff]  ;;  %v669_v7 = vld [vmem:[%s5605_s15 + $0x8c8] sm:$0xff]  ;;  %666 = vst [vmem:[%s5610_s16 + $0x228] sm:$0xff] %v665_v5 }
  0x77   : > { %668 = vst [vmem:[%s5610_s16 + $0x230] sm:$0xff] %v667_v6  ;;  %670 = vst [vmem:[%s5610_s16 + $0x238] sm:$0xff] %v669_v7  ;;  %v671_v8 = vld [vmem:[%s5605_s15 + $0x900] sm:$0xff]  ;;  %v673_v9 = vld [vmem:[%s5605_s15 + $0x908] sm:$0xff] }
  0x78   : > { %v675_v10 = vld [vmem:[%s5605_s15 + $0x940] sm:$0xff]  ;;  %672 = vst [vmem:[%s5610_s16 + $0x240] sm:$0xff] %v671_v8  ;;  %674 = vst [vmem:[%s5610_s16 + $0x248] sm:$0xff] %v673_v9  ;;  %v677_v11 = vld [vmem:[%s5605_s15 + $0x948] sm:$0xff] }
  0x79   : > { %676 = vst [vmem:[%s5610_s16 + $0x250] sm:$0xff] %v675_v10  ;;  %v679_v12 = vld [vmem:[%s5605_s15 + $0x980] sm:$0xff]  ;;  %v681_v13 = vld [vmem:[%s5605_s15 + $0x988] sm:$0xff]  ;;  %678 = vst [vmem:[%s5610_s16 + $0x258] sm:$0xff] %v677_v11 }
  0x7a   : > { %680 = vst [vmem:[%s5610_s16 + $0x260] sm:$0xff] %v679_v12  ;;  %682 = vst [vmem:[%s5610_s16 + $0x268] sm:$0xff] %v681_v13  ;;  %v683_v14 = vld [vmem:[%s5605_s15 + $0x9c0] sm:$0xff]  ;;  %v685_v15 = vld [vmem:[%s5605_s15 + $0x9c8] sm:$0xff] }
  0x7b   : > { %v687_v16 = vld [vmem:[%s5605_s15 + $0xa00] sm:$0xff]  ;;  %684 = vst [vmem:[%s5610_s16 + $0x270] sm:$0xff] %v683_v14  ;;  %686 = vst [vmem:[%s5610_s16 + $0x278] sm:$0xff] %v685_v15  ;;  %v689_v17 = vld [vmem:[%s5605_s15 + $0xa08] sm:$0xff] }
  0x7c   : > { %688 = vst [vmem:[%s5610_s16 + $0x280] sm:$0xff] %v687_v16  ;;  %v691_v18 = vld [vmem:[%s5605_s15 + $0xa40] sm:$0xff]  ;;  %v693_v19 = vld [vmem:[%s5605_s15 + $0xa48] sm:$0xff]  ;;  %690 = vst [vmem:[%s5610_s16 + $0x288] sm:$0xff] %v689_v17 }
  0x7d   : > { %692 = vst [vmem:[%s5610_s16 + $0x290] sm:$0xff] %v691_v18  ;;  %694 = vst [vmem:[%s5610_s16 + $0x298] sm:$0xff] %v693_v19  ;;  %v695_v20 = vld [vmem:[%s5605_s15 + $0xa80] sm:$0xff]  ;;  %v697_v21 = vld [vmem:[%s5605_s15 + $0xa88] sm:$0xff] }
  0x7e   : > { %v699_v22 = vld [vmem:[%s5605_s15 + $0xac0] sm:$0xff]  ;;  %696 = vst [vmem:[%s5610_s16 + $0x2a0] sm:$0xff] %v695_v20  ;;  %698 = vst [vmem:[%s5610_s16 + $0x2a8] sm:$0xff] %v697_v21  ;;  %v701_v23 = vld [vmem:[%s5605_s15 + $0xac8] sm:$0xff] }
  0x7f   : > { %700 = vst [vmem:[%s5610_s16 + $0x2b0] sm:$0xff] %v699_v22  ;;  %v703_v24 = vld [vmem:[%s5605_s15 + $0xb00] sm:$0xff]  ;;  %v705_v25 = vld [vmem:[%s5605_s15 + $0xb08] sm:$0xff]  ;;  %702 = vst [vmem:[%s5610_s16 + $0x2b8] sm:$0xff] %v701_v23 }
  0x80   : > { %704 = vst [vmem:[%s5610_s16 + $0x2c0] sm:$0xff] %v703_v24  ;;  %706 = vst [vmem:[%s5610_s16 + $0x2c8] sm:$0xff] %v705_v25  ;;  %v707_v26 = vld [vmem:[%s5605_s15 + $0xb40] sm:$0xff]  ;;  %v709_v27 = vld [vmem:[%s5605_s15 + $0xb48] sm:$0xff] }
  0x81   : > { %v711_v28 = vld [vmem:[%s5605_s15 + $0xb80] sm:$0xff]  ;;  %708 = vst [vmem:[%s5610_s16 + $0x2d0] sm:$0xff] %v707_v26  ;;  %710 = vst [vmem:[%s5610_s16 + $0x2d8] sm:$0xff] %v709_v27  ;;  %v713_v29 = vld [vmem:[%s5605_s15 + $0xb88] sm:$0xff] }
  0x82   : > { %712 = vst [vmem:[%s5610_s16 + $0x2e0] sm:$0xff] %v711_v28  ;;  %v715_v30 = vld [vmem:[%s5605_s15 + $0xbc0] sm:$0xff]  ;;  %v717_v31 = vld [vmem:[%s5605_s15 + $0xbc8] sm:$0xff]  ;;  %714 = vst [vmem:[%s5610_s16 + $0x2e8] sm:$0xff] %v713_v29 }
  0x83   : > { %716 = vst [vmem:[%s5610_s16 + $0x2f0] sm:$0xff] %v715_v30  ;;  %718 = vst [vmem:[%s5610_s16 + $0x2f8] sm:$0xff] %v717_v31  ;;  %v719_v32 = vld [vmem:[%s5605_s15 + $0xc00] sm:$0xff]  ;;  %v721_v33 = vld [vmem:[%s5605_s15 + $0xc08] sm:$0xff] }
  0x84   : > { %v723_v34 = vld [vmem:[%s5605_s15 + $0xc40] sm:$0xff]  ;;  %720 = vst [vmem:[%s5610_s16 + $0x300] sm:$0xff] %v719_v32  ;;  %722 = vst [vmem:[%s5610_s16 + $0x308] sm:$0xff] %v721_v33  ;;  %v725_v35 = vld [vmem:[%s5605_s15 + $0xc48] sm:$0xff] }
  0x85   : > { %724 = vst [vmem:[%s5610_s16 + $0x310] sm:$0xff] %v723_v34  ;;  %v727_v36 = vld [vmem:[%s5605_s15 + $0xc80] sm:$0xff]  ;;  %v729_v37 = vld [vmem:[%s5605_s15 + $0xc88] sm:$0xff]  ;;  %726 = vst [vmem:[%s5610_s16 + $0x318] sm:$0xff] %v725_v35 }
  0x86   : > { %728 = vst [vmem:[%s5610_s16 + $0x320] sm:$0xff] %v727_v36  ;;  %730 = vst [vmem:[%s5610_s16 + $0x328] sm:$0xff] %v729_v37  ;;  %v731_v38 = vld [vmem:[%s5605_s15 + $0xcc0] sm:$0xff]  ;;  %v733_v39 = vld [vmem:[%s5605_s15 + $0xcc8] sm:$0xff] }
  0x87   : > { %v735_v40 = vld [vmem:[%s5605_s15 + $0xd00] sm:$0xff]  ;;  %732 = vst [vmem:[%s5610_s16 + $0x330] sm:$0xff] %v731_v38  ;;  %734 = vst [vmem:[%s5610_s16 + $0x338] sm:$0xff] %v733_v39  ;;  %v737_v41 = vld [vmem:[%s5605_s15 + $0xd08] sm:$0xff] }
  0x88   : > { %736 = vst [vmem:[%s5610_s16 + $0x340] sm:$0xff] %v735_v40  ;;  %v739_v42 = vld [vmem:[%s5605_s15 + $0xd40] sm:$0xff]  ;;  %v741_v43 = vld [vmem:[%s5605_s15 + $0xd48] sm:$0xff]  ;;  %738 = vst [vmem:[%s5610_s16 + $0x348] sm:$0xff] %v737_v41 }
  0x89   : > { %740 = vst [vmem:[%s5610_s16 + $0x350] sm:$0xff] %v739_v42  ;;  %742 = vst [vmem:[%s5610_s16 + $0x358] sm:$0xff] %v741_v43  ;;  %v743_v44 = vld [vmem:[%s5605_s15 + $0xd80] sm:$0xff]  ;;  %v745_v45 = vld [vmem:[%s5605_s15 + $0xd88] sm:$0xff] }
  0x8a   : > { %v747_v46 = vld [vmem:[%s5605_s15 + $0xdc0] sm:$0xff]  ;;  %744 = vst [vmem:[%s5610_s16 + $0x360] sm:$0xff] %v743_v44  ;;  %746 = vst [vmem:[%s5610_s16 + $0x368] sm:$0xff] %v745_v45  ;;  %v749_v47 = vld [vmem:[%s5605_s15 + $0xdc8] sm:$0xff] }
  0x8b   : > { %748 = vst [vmem:[%s5610_s16 + $0x370] sm:$0xff] %v747_v46  ;;  %v751_v48 = vld [vmem:[%s5605_s15 + $0xe00] sm:$0xff]  ;;  %v753_v49 = vld [vmem:[%s5605_s15 + $0xe08] sm:$0xff]  ;;  %750 = vst [vmem:[%s5610_s16 + $0x378] sm:$0xff] %v749_v47 }
  0x8c   : > { %752 = vst [vmem:[%s5610_s16 + $0x380] sm:$0xff] %v751_v48  ;;  %754 = vst [vmem:[%s5610_s16 + $0x388] sm:$0xff] %v753_v49  ;;  %v755_v50 = vld [vmem:[%s5605_s15 + $0xe40] sm:$0xff]  ;;  %v757_v51 = vld [vmem:[%s5605_s15 + $0xe48] sm:$0xff] }
  0x8d   : > { %v759_v52 = vld [vmem:[%s5605_s15 + $0xe80] sm:$0xff]  ;;  %756 = vst [vmem:[%s5610_s16 + $0x390] sm:$0xff] %v755_v50  ;;  %758 = vst [vmem:[%s5610_s16 + $0x398] sm:$0xff] %v757_v51  ;;  %v761_v53 = vld [vmem:[%s5605_s15 + $0xe88] sm:$0xff] }
  0x8e   : > { %760 = vst [vmem:[%s5610_s16 + $0x3a0] sm:$0xff] %v759_v52  ;;  %v763_v54 = vld [vmem:[%s5605_s15 + $0xec0] sm:$0xff]  ;;  %v765_v55 = vld [vmem:[%s5605_s15 + $0xec8] sm:$0xff]  ;;  %762 = vst [vmem:[%s5610_s16 + $0x3a8] sm:$0xff] %v761_v53 }
  0x8f   : > { %764 = vst [vmem:[%s5610_s16 + $0x3b0] sm:$0xff] %v763_v54  ;;  %766 = vst [vmem:[%s5610_s16 + $0x3b8] sm:$0xff] %v765_v55  ;;  %v767_v56 = vld [vmem:[%s5605_s15 + $0xf00] sm:$0xff]  ;;  %v769_v57 = vld [vmem:[%s5605_s15 + $0xf08] sm:$0xff] }
  0x90   : > { %v771_v58 = vld [vmem:[%s5605_s15 + $0xf40] sm:$0xff]  ;;  %768 = vst [vmem:[%s5610_s16 + $0x3c0] sm:$0xff] %v767_v56  ;;  %770 = vst [vmem:[%s5610_s16 + $0x3c8] sm:$0xff] %v769_v57  ;;  %v773_v59 = vld [vmem:[%s5605_s15 + $0xf48] sm:$0xff] }
  0x91   : > { %772 = vst [vmem:[%s5610_s16 + $0x3d0] sm:$0xff] %v771_v58  ;;  %v775_v60 = vld [vmem:[%s5605_s15 + $0xf80] sm:$0xff]  ;;  %v777_v61 = vld [vmem:[%s5605_s15 + $0xf88] sm:$0xff]  ;;  %774 = vst [vmem:[%s5610_s16 + $0x3d8] sm:$0xff] %v773_v59 }
  0x92   : > { %776 = vst [vmem:[%s5610_s16 + $0x3e0] sm:$0xff] %v775_v60  ;;  %778 = vst [vmem:[%s5610_s16 + $0x3e8] sm:$0xff] %v777_v61  ;;  %v779_v62 = vld [vmem:[%s5605_s15 + $0xfc0] sm:$0xff]  ;;  %v781_v63 = vld [vmem:[%s5605_s15 + $0xfc8] sm:$0xff] }
  0x93   : > { %v783_v0 = vld [vmem:[%s5605_s15 + $0x1000] sm:$0xff]  ;;  %780 = vst [vmem:[%s5610_s16 + $0x3f0] sm:$0xff] %v779_v62  ;;  %782 = vst [vmem:[%s5610_s16 + $0x3f8] sm:$0xff] %v781_v63  ;;  %v785_v1 = vld [vmem:[%s5605_s15 + $0x1008] sm:$0xff] }
  0x94   : > { %784 = vst [vmem:[%s5610_s16 + $0x400] sm:$0xff] %v783_v0  ;;  %v787_v2 = vld [vmem:[%s5605_s15 + $0x1040] sm:$0xff]  ;;  %v789_v3 = vld [vmem:[%s5605_s15 + $0x1048] sm:$0xff]  ;;  %786 = vst [vmem:[%s5610_s16 + $0x408] sm:$0xff] %v785_v1 }
  0x95   : > { %788 = vst [vmem:[%s5610_s16 + $0x410] sm:$0xff] %v787_v2  ;;  %790 = vst [vmem:[%s5610_s16 + $0x418] sm:$0xff] %v789_v3  ;;  %v791_v4 = vld [vmem:[%s5605_s15 + $0x1080] sm:$0xff]  ;;  %v793_v5 = vld [vmem:[%s5605_s15 + $0x1088] sm:$0xff] }
  0x96   : > { %v795_v6 = vld [vmem:[%s5605_s15 + $0x10c0] sm:$0xff]  ;;  %792 = vst [vmem:[%s5610_s16 + $0x420] sm:$0xff] %v791_v4  ;;  %794 = vst [vmem:[%s5610_s16 + $0x428] sm:$0xff] %v793_v5  ;;  %v797_v7 = vld [vmem:[%s5605_s15 + $0x10c8] sm:$0xff] }
  0x97   : > { %796 = vst [vmem:[%s5610_s16 + $0x430] sm:$0xff] %v795_v6  ;;  %v799_v8 = vld [vmem:[%s5605_s15 + $0x1100] sm:$0xff]  ;;  %v801_v9 = vld [vmem:[%s5605_s15 + $0x1108] sm:$0xff]  ;;  %798 = vst [vmem:[%s5610_s16 + $0x438] sm:$0xff] %v797_v7 }
  0x98   : > { %800 = vst [vmem:[%s5610_s16 + $0x440] sm:$0xff] %v799_v8  ;;  %802 = vst [vmem:[%s5610_s16 + $0x448] sm:$0xff] %v801_v9  ;;  %v803_v10 = vld [vmem:[%s5605_s15 + $0x1140] sm:$0xff]  ;;  %v805_v11 = vld [vmem:[%s5605_s15 + $0x1148] sm:$0xff] }
  0x99   : > { %v807_v12 = vld [vmem:[%s5605_s15 + $0x1180] sm:$0xff]  ;;  %804 = vst [vmem:[%s5610_s16 + $0x450] sm:$0xff] %v803_v10  ;;  %806 = vst [vmem:[%s5610_s16 + $0x458] sm:$0xff] %v805_v11  ;;  %v809_v13 = vld [vmem:[%s5605_s15 + $0x1188] sm:$0xff] }
  0x9a   : > { %808 = vst [vmem:[%s5610_s16 + $0x460] sm:$0xff] %v807_v12  ;;  %v811_v14 = vld [vmem:[%s5605_s15 + $0x11c0] sm:$0xff]  ;;  %v813_v15 = vld [vmem:[%s5605_s15 + $0x11c8] sm:$0xff]  ;;  %810 = vst [vmem:[%s5610_s16 + $0x468] sm:$0xff] %v809_v13 }
  0x9b   : > { %812 = vst [vmem:[%s5610_s16 + $0x470] sm:$0xff] %v811_v14  ;;  %814 = vst [vmem:[%s5610_s16 + $0x478] sm:$0xff] %v813_v15  ;;  %v815_v16 = vld [vmem:[%s5605_s15 + $0x1200] sm:$0xff]  ;;  %v817_v17 = vld [vmem:[%s5605_s15 + $0x1208] sm:$0xff] }
  0x9c   : > { %v819_v18 = vld [vmem:[%s5605_s15 + $0x1240] sm:$0xff]  ;;  %816 = vst [vmem:[%s5610_s16 + $0x480] sm:$0xff] %v815_v16  ;;  %818 = vst [vmem:[%s5610_s16 + $0x488] sm:$0xff] %v817_v17  ;;  %v821_v19 = vld [vmem:[%s5605_s15 + $0x1248] sm:$0xff] }
  0x9d   : > { %820 = vst [vmem:[%s5610_s16 + $0x490] sm:$0xff] %v819_v18  ;;  %v823_v20 = vld [vmem:[%s5605_s15 + $0x1280] sm:$0xff]  ;;  %v825_v21 = vld [vmem:[%s5605_s15 + $0x1288] sm:$0xff]  ;;  %822 = vst [vmem:[%s5610_s16 + $0x498] sm:$0xff] %v821_v19 }
  0x9e   : > { %824 = vst [vmem:[%s5610_s16 + $0x4a0] sm:$0xff] %v823_v20  ;;  %826 = vst [vmem:[%s5610_s16 + $0x4a8] sm:$0xff] %v825_v21  ;;  %v827_v22 = vld [vmem:[%s5605_s15 + $0x12c0] sm:$0xff]  ;;  %v829_v23 = vld [vmem:[%s5605_s15 + $0x12c8] sm:$0xff] }
  0x9f   : > { %v831_v24 = vld [vmem:[%s5605_s15 + $0x1300] sm:$0xff]  ;;  %828 = vst [vmem:[%s5610_s16 + $0x4b0] sm:$0xff] %v827_v22  ;;  %830 = vst [vmem:[%s5610_s16 + $0x4b8] sm:$0xff] %v829_v23  ;;  %v833_v25 = vld [vmem:[%s5605_s15 + $0x1308] sm:$0xff] }
  0xa0   : > { %832 = vst [vmem:[%s5610_s16 + $0x4c0] sm:$0xff] %v831_v24  ;;  %v835_v26 = vld [vmem:[%s5605_s15 + $0x1340] sm:$0xff]  ;;  %v837_v27 = vld [vmem:[%s5605_s15 + $0x1348] sm:$0xff]  ;;  %834 = vst [vmem:[%s5610_s16 + $0x4c8] sm:$0xff] %v833_v25 }
  0xa1   : > { %836 = vst [vmem:[%s5610_s16 + $0x4d0] sm:$0xff] %v835_v26  ;;  %838 = vst [vmem:[%s5610_s16 + $0x4d8] sm:$0xff] %v837_v27  ;;  %v839_v28 = vld [vmem:[%s5605_s15 + $0x1380] sm:$0xff]  ;;  %v841_v29 = vld [vmem:[%s5605_s15 + $0x1388] sm:$0xff] }
  0xa2   : > { %v843_v30 = vld [vmem:[%s5605_s15 + $0x13c0] sm:$0xff]  ;;  %840 = vst [vmem:[%s5610_s16 + $0x4e0] sm:$0xff] %v839_v28  ;;  %842 = vst [vmem:[%s5610_s16 + $0x4e8] sm:$0xff] %v841_v29  ;;  %v845_v31 = vld [vmem:[%s5605_s15 + $0x13c8] sm:$0xff] }
  0xa3   : > { %844 = vst [vmem:[%s5610_s16 + $0x4f0] sm:$0xff] %v843_v30  ;;  %v847_v32 = vld [vmem:[%s5605_s15 + $0x1400] sm:$0xff]  ;;  %v849_v33 = vld [vmem:[%s5605_s15 + $0x1408] sm:$0xff]  ;;  %846 = vst [vmem:[%s5610_s16 + $0x4f8] sm:$0xff] %v845_v31 }
  0xa4   : > { %848 = vst [vmem:[%s5610_s16 + $0x500] sm:$0xff] %v847_v32  ;;  %850 = vst [vmem:[%s5610_s16 + $0x508] sm:$0xff] %v849_v33  ;;  %v851_v34 = vld [vmem:[%s5605_s15 + $0x1440] sm:$0xff]  ;;  %v853_v35 = vld [vmem:[%s5605_s15 + $0x1448] sm:$0xff] }
  0xa5   : > { %v855_v36 = vld [vmem:[%s5605_s15 + $0x1480] sm:$0xff]  ;;  %852 = vst [vmem:[%s5610_s16 + $0x510] sm:$0xff] %v851_v34  ;;  %854 = vst [vmem:[%s5610_s16 + $0x518] sm:$0xff] %v853_v35  ;;  %v857_v37 = vld [vmem:[%s5605_s15 + $0x1488] sm:$0xff] }
  0xa6   : > { %856 = vst [vmem:[%s5610_s16 + $0x520] sm:$0xff] %v855_v36  ;;  %v859_v38 = vld [vmem:[%s5605_s15 + $0x14c0] sm:$0xff]  ;;  %v861_v39 = vld [vmem:[%s5605_s15 + $0x14c8] sm:$0xff]  ;;  %858 = vst [vmem:[%s5610_s16 + $0x528] sm:$0xff] %v857_v37 }
  0xa7   : > { %860 = vst [vmem:[%s5610_s16 + $0x530] sm:$0xff] %v859_v38  ;;  %862 = vst [vmem:[%s5610_s16 + $0x538] sm:$0xff] %v861_v39  ;;  %v863_v40 = vld [vmem:[%s5605_s15 + $0x1500] sm:$0xff]  ;;  %v865_v41 = vld [vmem:[%s5605_s15 + $0x1508] sm:$0xff] }
  0xa8   : > { %v867_v42 = vld [vmem:[%s5605_s15 + $0x1540] sm:$0xff]  ;;  %864 = vst [vmem:[%s5610_s16 + $0x540] sm:$0xff] %v863_v40  ;;  %866 = vst [vmem:[%s5610_s16 + $0x548] sm:$0xff] %v865_v41  ;;  %v869_v43 = vld [vmem:[%s5605_s15 + $0x1548] sm:$0xff] }
  0xa9   : > { %868 = vst [vmem:[%s5610_s16 + $0x550] sm:$0xff] %v867_v42  ;;  %v871_v44 = vld [vmem:[%s5605_s15 + $0x1580] sm:$0xff]  ;;  %v873_v45 = vld [vmem:[%s5605_s15 + $0x1588] sm:$0xff]  ;;  %870 = vst [vmem:[%s5610_s16 + $0x558] sm:$0xff] %v869_v43 }
  0xaa   : > { %872 = vst [vmem:[%s5610_s16 + $0x560] sm:$0xff] %v871_v44  ;;  %874 = vst [vmem:[%s5610_s16 + $0x568] sm:$0xff] %v873_v45  ;;  %v875_v46 = vld [vmem:[%s5605_s15 + $0x15c0] sm:$0xff]  ;;  %v877_v47 = vld [vmem:[%s5605_s15 + $0x15c8] sm:$0xff] }
  0xab   : > { %v879_v48 = vld [vmem:[%s5605_s15 + $0x1600] sm:$0xff]  ;;  %876 = vst [vmem:[%s5610_s16 + $0x570] sm:$0xff] %v875_v46  ;;  %878 = vst [vmem:[%s5610_s16 + $0x578] sm:$0xff] %v877_v47  ;;  %v881_v49 = vld [vmem:[%s5605_s15 + $0x1608] sm:$0xff] }
  0xac   : > { %880 = vst [vmem:[%s5610_s16 + $0x580] sm:$0xff] %v879_v48  ;;  %v883_v50 = vld [vmem:[%s5605_s15 + $0x1640] sm:$0xff]  ;;  %v885_v51 = vld [vmem:[%s5605_s15 + $0x1648] sm:$0xff]  ;;  %882 = vst [vmem:[%s5610_s16 + $0x588] sm:$0xff] %v881_v49 }
  0xad   : > { %884 = vst [vmem:[%s5610_s16 + $0x590] sm:$0xff] %v883_v50  ;;  %886 = vst [vmem:[%s5610_s16 + $0x598] sm:$0xff] %v885_v51  ;;  %v887_v52 = vld [vmem:[%s5605_s15 + $0x1680] sm:$0xff]  ;;  %v889_v53 = vld [vmem:[%s5605_s15 + $0x1688] sm:$0xff] }
  0xae   : > { %v891_v54 = vld [vmem:[%s5605_s15 + $0x16c0] sm:$0xff]  ;;  %888 = vst [vmem:[%s5610_s16 + $0x5a0] sm:$0xff] %v887_v52  ;;  %890 = vst [vmem:[%s5610_s16 + $0x5a8] sm:$0xff] %v889_v53  ;;  %v893_v55 = vld [vmem:[%s5605_s15 + $0x16c8] sm:$0xff] }
  0xaf   : > { %892 = vst [vmem:[%s5610_s16 + $0x5b0] sm:$0xff] %v891_v54  ;;  %v895_v56 = vld [vmem:[%s5605_s15 + $0x1700] sm:$0xff]  ;;  %v897_v57 = vld [vmem:[%s5605_s15 + $0x1708] sm:$0xff]  ;;  %894 = vst [vmem:[%s5610_s16 + $0x5b8] sm:$0xff] %v893_v55 }
  0xb0   : > { %896 = vst [vmem:[%s5610_s16 + $0x5c0] sm:$0xff] %v895_v56  ;;  %898 = vst [vmem:[%s5610_s16 + $0x5c8] sm:$0xff] %v897_v57  ;;  %v899_v58 = vld [vmem:[%s5605_s15 + $0x1740] sm:$0xff]  ;;  %v901_v59 = vld [vmem:[%s5605_s15 + $0x1748] sm:$0xff] }
  0xb1   : > { %v903_v60 = vld [vmem:[%s5605_s15 + $0x1780] sm:$0xff]  ;;  %900 = vst [vmem:[%s5610_s16 + $0x5d0] sm:$0xff] %v899_v58  ;;  %902 = vst [vmem:[%s5610_s16 + $0x5d8] sm:$0xff] %v901_v59  ;;  %v905_v61 = vld [vmem:[%s5605_s15 + $0x1788] sm:$0xff] }
  0xb2   : > { %904 = vst [vmem:[%s5610_s16 + $0x5e0] sm:$0xff] %v903_v60  ;;  %v907_v62 = vld [vmem:[%s5605_s15 + $0x17c0] sm:$0xff]  ;;  %v909_v63 = vld [vmem:[%s5605_s15 + $0x17c8] sm:$0xff]  ;;  %906 = vst [vmem:[%s5610_s16 + $0x5e8] sm:$0xff] %v905_v61 }
  0xb3   : > { %908 = vst [vmem:[%s5610_s16 + $0x5f0] sm:$0xff] %v907_v62  ;;  %910 = vst [vmem:[%s5610_s16 + $0x5f8] sm:$0xff] %v909_v63  ;;  %v911_v0 = vld [vmem:[%s5605_s15 + $0x1800] sm:$0xff]  ;;  %v913_v1 = vld [vmem:[%s5605_s15 + $0x1808] sm:$0xff] }
  0xb4   : > { %v915_v2 = vld [vmem:[%s5605_s15 + $0x1840] sm:$0xff]  ;;  %912 = vst [vmem:[%s5610_s16 + $0x600] sm:$0xff] %v911_v0  ;;  %914 = vst [vmem:[%s5610_s16 + $0x608] sm:$0xff] %v913_v1  ;;  %v917_v3 = vld [vmem:[%s5605_s15 + $0x1848] sm:$0xff] }
  0xb5   : > { %916 = vst [vmem:[%s5610_s16 + $0x610] sm:$0xff] %v915_v2  ;;  %v919_v4 = vld [vmem:[%s5605_s15 + $0x1880] sm:$0xff]  ;;  %v921_v5 = vld [vmem:[%s5605_s15 + $0x1888] sm:$0xff]  ;;  %918 = vst [vmem:[%s5610_s16 + $0x618] sm:$0xff] %v917_v3 }
  0xb6   : > { %920 = vst [vmem:[%s5610_s16 + $0x620] sm:$0xff] %v919_v4  ;;  %922 = vst [vmem:[%s5610_s16 + $0x628] sm:$0xff] %v921_v5  ;;  %v923_v6 = vld [vmem:[%s5605_s15 + $0x18c0] sm:$0xff]  ;;  %v925_v7 = vld [vmem:[%s5605_s15 + $0x18c8] sm:$0xff] }
  0xb7   : > { %v927_v8 = vld [vmem:[%s5605_s15 + $0x1900] sm:$0xff]  ;;  %924 = vst [vmem:[%s5610_s16 + $0x630] sm:$0xff] %v923_v6  ;;  %926 = vst [vmem:[%s5610_s16 + $0x638] sm:$0xff] %v925_v7  ;;  %v929_v9 = vld [vmem:[%s5605_s15 + $0x1908] sm:$0xff] }
  0xb8   : > { %928 = vst [vmem:[%s5610_s16 + $0x640] sm:$0xff] %v927_v8  ;;  %v931_v10 = vld [vmem:[%s5605_s15 + $0x1940] sm:$0xff]  ;;  %v933_v11 = vld [vmem:[%s5605_s15 + $0x1948] sm:$0xff]  ;;  %930 = vst [vmem:[%s5610_s16 + $0x648] sm:$0xff] %v929_v9 }
  0xb9   : > { %932 = vst [vmem:[%s5610_s16 + $0x650] sm:$0xff] %v931_v10  ;;  %934 = vst [vmem:[%s5610_s16 + $0x658] sm:$0xff] %v933_v11  ;;  %v935_v12 = vld [vmem:[%s5605_s15 + $0x1980] sm:$0xff]  ;;  %v937_v13 = vld [vmem:[%s5605_s15 + $0x1988] sm:$0xff] }
  0xba   : > { %v939_v14 = vld [vmem:[%s5605_s15 + $0x19c0] sm:$0xff]  ;;  %936 = vst [vmem:[%s5610_s16 + $0x660] sm:$0xff] %v935_v12  ;;  %938 = vst [vmem:[%s5610_s16 + $0x668] sm:$0xff] %v937_v13  ;;  %v941_v15 = vld [vmem:[%s5605_s15 + $0x19c8] sm:$0xff] }
  0xbb   : > { %940 = vst [vmem:[%s5610_s16 + $0x670] sm:$0xff] %v939_v14  ;;  %v943_v16 = vld [vmem:[%s5605_s15 + $0x1a00] sm:$0xff]  ;;  %v945_v17 = vld [vmem:[%s5605_s15 + $0x1a08] sm:$0xff]  ;;  %942 = vst [vmem:[%s5610_s16 + $0x678] sm:$0xff] %v941_v15 }
  0xbc   : > { %944 = vst [vmem:[%s5610_s16 + $0x680] sm:$0xff] %v943_v16  ;;  %946 = vst [vmem:[%s5610_s16 + $0x688] sm:$0xff] %v945_v17  ;;  %v947_v18 = vld [vmem:[%s5605_s15 + $0x1a40] sm:$0xff]  ;;  %v949_v19 = vld [vmem:[%s5605_s15 + $0x1a48] sm:$0xff] }
  0xbd   : > { %v951_v20 = vld [vmem:[%s5605_s15 + $0x1a80] sm:$0xff]  ;;  %948 = vst [vmem:[%s5610_s16 + $0x690] sm:$0xff] %v947_v18  ;;  %950 = vst [vmem:[%s5610_s16 + $0x698] sm:$0xff] %v949_v19  ;;  %v953_v21 = vld [vmem:[%s5605_s15 + $0x1a88] sm:$0xff] }
  0xbe   : > { %952 = vst [vmem:[%s5610_s16 + $0x6a0] sm:$0xff] %v951_v20  ;;  %v955_v22 = vld [vmem:[%s5605_s15 + $0x1ac0] sm:$0xff]  ;;  %v957_v23 = vld [vmem:[%s5605_s15 + $0x1ac8] sm:$0xff]  ;;  %954 = vst [vmem:[%s5610_s16 + $0x6a8] sm:$0xff] %v953_v21 }
  0xbf   : > { %956 = vst [vmem:[%s5610_s16 + $0x6b0] sm:$0xff] %v955_v22  ;;  %958 = vst [vmem:[%s5610_s16 + $0x6b8] sm:$0xff] %v957_v23  ;;  %v959_v24 = vld [vmem:[%s5605_s15 + $0x1b00] sm:$0xff]  ;;  %v961_v25 = vld [vmem:[%s5605_s15 + $0x1b08] sm:$0xff] }
  0xc0   : > { %v963_v26 = vld [vmem:[%s5605_s15 + $0x1b40] sm:$0xff]  ;;  %960 = vst [vmem:[%s5610_s16 + $0x6c0] sm:$0xff] %v959_v24  ;;  %962 = vst [vmem:[%s5610_s16 + $0x6c8] sm:$0xff] %v961_v25  ;;  %v965_v27 = vld [vmem:[%s5605_s15 + $0x1b48] sm:$0xff] }
  0xc1   : > { %964 = vst [vmem:[%s5610_s16 + $0x6d0] sm:$0xff] %v963_v26  ;;  %v967_v28 = vld [vmem:[%s5605_s15 + $0x1b80] sm:$0xff]  ;;  %v969_v29 = vld [vmem:[%s5605_s15 + $0x1b88] sm:$0xff]  ;;  %966 = vst [vmem:[%s5610_s16 + $0x6d8] sm:$0xff] %v965_v27 }
  0xc2   : > { %968 = vst [vmem:[%s5610_s16 + $0x6e0] sm:$0xff] %v967_v28  ;;  %970 = vst [vmem:[%s5610_s16 + $0x6e8] sm:$0xff] %v969_v29  ;;  %v971_v30 = vld [vmem:[%s5605_s15 + $0x1bc0] sm:$0xff]  ;;  %v973_v31 = vld [vmem:[%s5605_s15 + $0x1bc8] sm:$0xff] }
  0xc3   : > { %v975_v32 = vld [vmem:[%s5605_s15 + $0x1c00] sm:$0xff]  ;;  %972 = vst [vmem:[%s5610_s16 + $0x6f0] sm:$0xff] %v971_v30  ;;  %974 = vst [vmem:[%s5610_s16 + $0x6f8] sm:$0xff] %v973_v31  ;;  %v977_v33 = vld [vmem:[%s5605_s15 + $0x1c08] sm:$0xff] }
  0xc4   : > { %976 = vst [vmem:[%s5610_s16 + $0x700] sm:$0xff] %v975_v32  ;;  %v979_v34 = vld [vmem:[%s5605_s15 + $0x1c40] sm:$0xff]  ;;  %v981_v35 = vld [vmem:[%s5605_s15 + $0x1c48] sm:$0xff]  ;;  %978 = vst [vmem:[%s5610_s16 + $0x708] sm:$0xff] %v977_v33 }
  0xc5   : > { %980 = vst [vmem:[%s5610_s16 + $0x710] sm:$0xff] %v979_v34  ;;  %982 = vst [vmem:[%s5610_s16 + $0x718] sm:$0xff] %v981_v35  ;;  %v983_v36 = vld [vmem:[%s5605_s15 + $0x1c80] sm:$0xff]  ;;  %v985_v37 = vld [vmem:[%s5605_s15 + $0x1c88] sm:$0xff] }
  0xc6   : > { %v987_v38 = vld [vmem:[%s5605_s15 + $0x1cc0] sm:$0xff]  ;;  %984 = vst [vmem:[%s5610_s16 + $0x720] sm:$0xff] %v983_v36  ;;  %986 = vst [vmem:[%s5610_s16 + $0x728] sm:$0xff] %v985_v37  ;;  %v989_v39 = vld [vmem:[%s5605_s15 + $0x1cc8] sm:$0xff] }
  0xc7   : > { %988 = vst [vmem:[%s5610_s16 + $0x730] sm:$0xff] %v987_v38  ;;  %v991_v40 = vld [vmem:[%s5605_s15 + $0x1d00] sm:$0xff]  ;;  %v993_v41 = vld [vmem:[%s5605_s15 + $0x1d08] sm:$0xff]  ;;  %990 = vst [vmem:[%s5610_s16 + $0x738] sm:$0xff] %v989_v39 }
  0xc8   : > { %992 = vst [vmem:[%s5610_s16 + $0x740] sm:$0xff] %v991_v40  ;;  %994 = vst [vmem:[%s5610_s16 + $0x748] sm:$0xff] %v993_v41  ;;  %v995_v42 = vld [vmem:[%s5605_s15 + $0x1d40] sm:$0xff]  ;;  %v997_v43 = vld [vmem:[%s5605_s15 + $0x1d48] sm:$0xff] }
  0xc9   : > { %v999_v44 = vld [vmem:[%s5605_s15 + $0x1d80] sm:$0xff]  ;;  %996 = vst [vmem:[%s5610_s16 + $0x750] sm:$0xff] %v995_v42  ;;  %998 = vst [vmem:[%s5610_s16 + $0x758] sm:$0xff] %v997_v43  ;;  %v1001_v45 = vld [vmem:[%s5605_s15 + $0x1d88] sm:$0xff] }
  0xca   : > { %1000 = vst [vmem:[%s5610_s16 + $0x760] sm:$0xff] %v999_v44  ;;  %v1003_v46 = vld [vmem:[%s5605_s15 + $0x1dc0] sm:$0xff]  ;;  %v1005_v47 = vld [vmem:[%s5605_s15 + $0x1dc8] sm:$0xff]  ;;  %1002 = vst [vmem:[%s5610_s16 + $0x768] sm:$0xff] %v1001_v45 }
  0xcb   : > { %1004 = vst [vmem:[%s5610_s16 + $0x770] sm:$0xff] %v1003_v46  ;;  %1006 = vst [vmem:[%s5610_s16 + $0x778] sm:$0xff] %v1005_v47  ;;  %v1007_v48 = vld [vmem:[%s5605_s15 + $0x1e00] sm:$0xff]  ;;  %v1009_v49 = vld [vmem:[%s5605_s15 + $0x1e08] sm:$0xff] }
  0xcc   : > { %v1011_v50 = vld [vmem:[%s5605_s15 + $0x1e40] sm:$0xff]  ;;  %1008 = vst [vmem:[%s5610_s16 + $0x780] sm:$0xff] %v1007_v48  ;;  %1010 = vst [vmem:[%s5610_s16 + $0x788] sm:$0xff] %v1009_v49  ;;  %v1013_v51 = vld [vmem:[%s5605_s15 + $0x1e48] sm:$0xff] }
  0xcd   : > { %1012 = vst [vmem:[%s5610_s16 + $0x790] sm:$0xff] %v1011_v50  ;;  %v1015_v52 = vld [vmem:[%s5605_s15 + $0x1e80] sm:$0xff]  ;;  %v1017_v53 = vld [vmem:[%s5605_s15 + $0x1e88] sm:$0xff]  ;;  %1014 = vst [vmem:[%s5610_s16 + $0x798] sm:$0xff] %v1013_v51 }
  0xce   : > { %1016 = vst [vmem:[%s5610_s16 + $0x7a0] sm:$0xff] %v1015_v52  ;;  %1018 = vst [vmem:[%s5610_s16 + $0x7a8] sm:$0xff] %v1017_v53  ;;  %v1019_v54 = vld [vmem:[%s5605_s15 + $0x1ec0] sm:$0xff]  ;;  %v1021_v55 = vld [vmem:[%s5605_s15 + $0x1ec8] sm:$0xff] }
  0xcf   : > { %v1023_v56 = vld [vmem:[%s5605_s15 + $0x1f00] sm:$0xff]  ;;  %1020 = vst [vmem:[%s5610_s16 + $0x7b0] sm:$0xff] %v1019_v54  ;;  %1022 = vst [vmem:[%s5610_s16 + $0x7b8] sm:$0xff] %v1021_v55  ;;  %v1025_v57 = vld [vmem:[%s5605_s15 + $0x1f08] sm:$0xff] }
  0xd0   : > { %1024 = vst [vmem:[%s5610_s16 + $0x7c0] sm:$0xff] %v1023_v56  ;;  %v1027_v58 = vld [vmem:[%s5605_s15 + $0x1f40] sm:$0xff]  ;;  %v1029_v59 = vld [vmem:[%s5605_s15 + $0x1f48] sm:$0xff]  ;;  %1026 = vst [vmem:[%s5610_s16 + $0x7c8] sm:$0xff] %v1025_v57 }
  0xd1   : > { %1028 = vst [vmem:[%s5610_s16 + $0x7d0] sm:$0xff] %v1027_v58  ;;  %1030 = vst [vmem:[%s5610_s16 + $0x7d8] sm:$0xff] %v1029_v59  ;;  %v1031_v60 = vld [vmem:[%s5605_s15 + $0x1f80] sm:$0xff]  ;;  %v1033_v61 = vld [vmem:[%s5605_s15 + $0x1f88] sm:$0xff] }
  0xd2   : > { %v1035_v62 = vld [vmem:[%s5605_s15 + $0x1fc0] sm:$0xff]  ;;  %1032 = vst [vmem:[%s5610_s16 + $0x7e0] sm:$0xff] %v1031_v60  ;;  %1034 = vst [vmem:[%s5610_s16 + $0x7e8] sm:$0xff] %v1033_v61  ;;  %v1037_v63 = vld [vmem:[%s5605_s15 + $0x1fc8] sm:$0xff] }
  0xd3   : > { %1036 = vst [vmem:[%s5610_s16 + $0x7f0] sm:$0xff] %v1035_v62  ;;  %1038 = vst [vmem:[%s5610_s16 + $0x7f8] sm:$0xff] %v1037_v63 }
  0xd4 PF: > { %p4181_p6 = scmp.ge.s32.totalorder %s5257_s22, 1  ;;  %p1043_p7 = scmp.lt.s32.totalorder %s5257_s22, 5 }
  0xd6   : > { %p1044_p8 = pnand %p4181_p6, %p1043_p7 }
  0xd7   : > { %s1050_s17 = sand.u32 (!%p1044_p8), 1, %s5241_s18   ;;  %s4184_s15 = sshll.u32 (!%p1044_p8), %s5249_s20, 2 }
  0xd8   : > { %1047 = sbr.rel (%p1044_p8) target bundleno = 814 (0x32e), region = 78  ;;  %s4183_s29 = sshll.u32 (!%p1044_p8), %s1050_s17, 11 }
  0xd9   : > { %s6144_s30 = scalar_lea.vmem (!%p1044_p8), [#allocation3], %s4183_s29  ;;  %s4182_s10 = sshll.u32 (!%p1044_p8), %s1050_s17, 10 }
  0xda   : > { %s6366_s11 = scalar_lea.vmem (!%p1044_p8), [#allocation2], %s4182_s10  ;;  %p1113_p9 = scmp.lt.s32.totalorder (!%p1044_p8), %s4184_s15, 15 }
  0xdd   : > { %v6127_v0 = vld [vmem:[%s6659_s3] sm:$0xff]  ;;  %v6132_v1 = vld [vmem:[%s6659_s3 + $0x8] sm:$0xff]  ;;  %s6670_s15 = smov (!%p1113_p9, %s4184_s15), 15 }
  0xde   : > { %v6138_v2 = vcombine.high %v6127_v0, %v6127_v0  ;;  %v6142_v3 = vcombine.high %v6132_v1, %v6132_v1  ;;  %v4631_v4 = vld [vmem:[%s6144_s30 + $0xe4] ss:$16 sps:$4 sm:$0xff]   ;;  %v4635_v6 = vld [vmem:[%s6144_s30 + $0xe0] ss:$16 sps:$4 sm:$0xff]   ;;  %s1115_s24 = scalar_lea.vmem %s6658_s2, %s6670_s15  ;;  %s4186_s20 = sshll.u32 %s6670_s15, 2 }
  0xdf   : > { %v4633_v5 = vld [vmem:[%s6144_s30 + $0x2e4] ss:$16 sps:$4 sm:$0xff]   ;;  %2831 = vmatprep.subr.bf16.mxu0 %v4631_v4  ;;  %v4636_v7 = vld [vmem:[%s6144_s30 + $0x2e0] ss:$16 sps:$4 sm:$0xff]   ;;  %s1131_s28 = scalar_lea.vmem %s6661_s5, %s4186_s20 }
  0xe0   : > { %2863 = vmatprep.mubr.bf16.mxu0 %v6138_v2  ;;  %2904 = vmatprep.mubr.bf16.mxu1 %v6142_v3  ;;  %v4637_v8 = vld [vmem:[%s6144_s30 + $0xc4] ss:$16 sps:$4 sm:$0xff]   ;;  %v4641_v10 = vld [vmem:[%s6144_s30 + $0xc0] ss:$16 sps:$4 sm:$0xff]  }
  0xe1   : > { %2872 = vmatprep.subr.bf16.mxu1 %v4633_v5  ;;  %2832 = vmatpush1.bf16.msra.mxu0 %v4635_v6  ;;  %v4639_v9 = vld [vmem:[%s6144_s30 + $0x2c4] ss:$16 sps:$4 sm:$0xff]   ;;  %v4642_v11 = vld [vmem:[%s6144_s30 + $0x2c0] ss:$16 sps:$4 sm:$0xff]  }
  0xe2   : > { %2873 = vmatpush1.bf16.msra.mxu1 %v4636_v7  ;;  %2833 = vmatprep.subr.bf16.mxu0 %v4637_v8  ;;  %v4643_v12 = vld [vmem:[%s6144_s30 + $0xa4] ss:$16 sps:$4 sm:$0xff]   ;;  %v4647_v14 = vld [vmem:[%s6144_s30 + $0xa0] ss:$16 sps:$4 sm:$0xff]  }
  0xe3   : > { %2874 = vmatprep.subr.bf16.mxu1 %v4639_v9  ;;  %v4645_v13 = vld [vmem:[%s6144_s30 + $0x2a4] ss:$16 sps:$4 sm:$0xff]   ;;  %v4648_v15 = vld [vmem:[%s6144_s30 + $0x2a0] ss:$16 sps:$4 sm:$0xff]  }
  0xe4   : > { %v4649_v16 = vld [vmem:[%s6144_s30 + $0x84] ss:$16 sps:$4 sm:$0xff]   ;;  %v4653_v18 = vld [vmem:[%s6144_s30 + $0x80] ss:$16 sps:$4 sm:$0xff]  }
  0xe5   : > { %2834 = vmatpush1.bf16.msra.mxu0 %v4641_v10  ;;  %v4651_v17 = vld [vmem:[%s6144_s30 + $0x284] ss:$16 sps:$4 sm:$0xff]   ;;  %v4654_v19 = vld [vmem:[%s6144_s30 + $0x280] ss:$16 sps:$4 sm:$0xff]  }
  0xe6   : > { %2875 = vmatpush1.bf16.msra.mxu1 %v4642_v11  ;;  %2835 = vmatprep.subr.bf16.mxu0 %v4643_v12  ;;  %v4655_v20 = vld [vmem:[%s6144_s30 + $0x64] ss:$16 sps:$4 sm:$0xff]   ;;  %v4659_v22 = vld [vmem:[%s6144_s30 + $0x60] ss:$16 sps:$4 sm:$0xff]   ;;  %v6222_v11 = vld [vmem:[%s6659_s3 + $0x18] sm:$0xff]  ;;  %v6226_v12 = vcombine.low %v6127_v0, %v6127_v0 }
  0xe7   : > { %2876 = vmatprep.subr.bf16.mxu1 %v4645_v13  ;;  %v4657_v21 = vld [vmem:[%s6144_s30 + $0x264] ss:$16 sps:$4 sm:$0xff]   ;;  %v4660_v23 = vld [vmem:[%s6144_s30 + $0x260] ss:$16 sps:$4 sm:$0xff]   ;;  %v6230_v13 = vcombine.low %v6132_v1, %v6132_v1  ;;  %v6242_v1 = vcombine.high %v6222_v11, %v6222_v11 }
  0xe8   : > { %v4661_v24 = vld [vmem:[%s6144_s30 + $0x44] ss:$16 sps:$4 sm:$0xff]   ;;  %v4665_v26 = vld [vmem:[%s6144_s30 + $0x40] ss:$16 sps:$4 sm:$0xff]  }
  0xe9   : > { %2836 = vmatpush1.bf16.msra.mxu0 %v4647_v14  ;;  %v4663_v25 = vld [vmem:[%s6144_s30 + $0x244] ss:$16 sps:$4 sm:$0xff]   ;;  %v4666_v27 = vld [vmem:[%s6144_s30 + $0x240] ss:$16 sps:$4 sm:$0xff]  }
  0xea   : > { %2877 = vmatpush1.bf16.msra.mxu1 %v4648_v15  ;;  %2837 = vmatprep.subr.bf16.mxu0 %v4649_v16  ;;  %v4667_v28 = vld [vmem:[%s6144_s30 + $0x24] ss:$16 sps:$4 sm:$0xff]   ;;  %v4671_v30 = vld [vmem:[%s6144_s30 + $0x20] ss:$16 sps:$4 sm:$0xff]  }
  0xeb   : > { %2878 = vmatprep.subr.bf16.mxu1 %v4651_v17  ;;  %v4669_v29 = vld [vmem:[%s6144_s30 + $0x224] ss:$16 sps:$4 sm:$0xff]   ;;  %v4672_v31 = vld [vmem:[%s6144_s30 + $0x220] ss:$16 sps:$4 sm:$0xff]  }
  0xec   : > { %v4673_v32 = vld [vmem:[%s6144_s30 + $0x4] ss:$16 sps:$4 sm:$0xff]   ;;  %v4677_v34 = vld [vmem:[%s6144_s30] ss:$16 sps:$4 sm:$0xff]  }
  0xed   : > { %2838 = vmatpush1.bf16.msra.mxu0 %v4653_v18  ;;  %v4675_v33 = vld [vmem:[%s6144_s30 + $0x204] ss:$16 sps:$4 sm:$0xff]   ;;  %v4678_v35 = vld [vmem:[%s6144_s30 + $0x200] ss:$16 sps:$4 sm:$0xff]  }
  0xee   : > { %2879 = vmatpush1.bf16.msra.mxu1 %v4654_v19  ;;  %2839 = vmatprep.subr.bf16.mxu0 %v4655_v20  ;;  %v4679_v36 = vld [vmem:[%s6144_s30 + $0x1e4] ss:$16 sps:$4 sm:$0xff]   ;;  %v4683_v38 = vld [vmem:[%s6144_s30 + $0x1e0] ss:$16 sps:$4 sm:$0xff]  }
  0xef   : > { %2880 = vmatprep.subr.bf16.mxu1 %v4657_v21  ;;  %v4681_v37 = vld [vmem:[%s6144_s30 + $0x3e4] ss:$16 sps:$4 sm:$0xff]   ;;  %v4684_v39 = vld [vmem:[%s6144_s30 + $0x3e0] ss:$16 sps:$4 sm:$0xff]  }
  0xf0   : > { %v4685_v40 = vld [vmem:[%s6144_s30 + $0x1c4] ss:$16 sps:$4 sm:$0xff]   ;;  %v4689_v42 = vld [vmem:[%s6144_s30 + $0x1c0] ss:$16 sps:$4 sm:$0xff]  }
  0xf1   : > { %2840 = vmatpush1.bf16.msra.mxu0 %v4659_v22  ;;  %v4687_v41 = vld [vmem:[%s6144_s30 + $0x3c4] ss:$16 sps:$4 sm:$0xff]   ;;  %v4690_v43 = vld [vmem:[%s6144_s30 + $0x3c0] ss:$16 sps:$4 sm:$0xff]  }
  0xf2   : > { %2881 = vmatpush1.bf16.msra.mxu1 %v4660_v23  ;;  %2841 = vmatprep.subr.bf16.mxu0 %v4661_v24  ;;  %v4691_v44 = vld [vmem:[%s6144_s30 + $0x1a4] ss:$16 sps:$4 sm:$0xff]   ;;  %v4695_v46 = vld [vmem:[%s6144_s30 + $0x1a0] ss:$16 sps:$4 sm:$0xff]  }
  0xf3   : > { %2882 = vmatprep.subr.bf16.mxu1 %v4663_v25  ;;  %v4693_v45 = vld [vmem:[%s6144_s30 + $0x3a4] ss:$16 sps:$4 sm:$0xff]   ;;  %v4696_v47 = vld [vmem:[%s6144_s30 + $0x3a0] ss:$16 sps:$4 sm:$0xff]  }
  0xf4   : > { %v4697_v48 = vld [vmem:[%s6144_s30 + $0x184] ss:$16 sps:$4 sm:$0xff]   ;;  %v4701_v50 = vld [vmem:[%s6144_s30 + $0x180] ss:$16 sps:$4 sm:$0xff]  }
  0xf5   : > { %2842 = vmatpush1.bf16.msra.mxu0 %v4665_v26  ;;  %v4699_v49 = vld [vmem:[%s6144_s30 + $0x384] ss:$16 sps:$4 sm:$0xff]   ;;  %v4702_v51 = vld [vmem:[%s6144_s30 + $0x380] ss:$16 sps:$4 sm:$0xff]  }
  0xf6   : > { %2883 = vmatpush1.bf16.msra.mxu1 %v4666_v27  ;;  %2843 = vmatprep.subr.bf16.mxu0 %v4667_v28  ;;  %v4703_v52 = vld [vmem:[%s6144_s30 + $0x164] ss:$16 sps:$4 sm:$0xff]   ;;  %v4707_v54 = vld [vmem:[%s6144_s30 + $0x160] ss:$16 sps:$4 sm:$0xff]  }
  0xf7   : > { %2884 = vmatprep.subr.bf16.mxu1 %v4669_v29  ;;  %v4705_v53 = vld [vmem:[%s6144_s30 + $0x364] ss:$16 sps:$4 sm:$0xff]   ;;  %v4708_v55 = vld [vmem:[%s6144_s30 + $0x360] ss:$16 sps:$4 sm:$0xff]  }
  0xf8   : > { %v4709_v56 = vld [vmem:[%s6144_s30 + $0x144] ss:$16 sps:$4 sm:$0xff]   ;;  %v4713_v58 = vld [vmem:[%s6144_s30 + $0x140] ss:$16 sps:$4 sm:$0xff]  }
  0xf9   : > { %2844 = vmatpush1.bf16.msra.mxu0 %v4671_v30  ;;  %v4711_v57 = vld [vmem:[%s6144_s30 + $0x344] ss:$16 sps:$4 sm:$0xff]   ;;  %v4714_v59 = vld [vmem:[%s6144_s30 + $0x340] ss:$16 sps:$4 sm:$0xff]  }
  0xfa   : > { %2885 = vmatpush1.bf16.msra.mxu1 %v4672_v31  ;;  %2845 = vmatprep.subr.bf16.mxu0 %v4673_v32  ;;  %v4715_v60 = vld [vmem:[%s6144_s30 + $0x124] ss:$16 sps:$4 sm:$0xff]   ;;  %v4719_v62 = vld [vmem:[%s6144_s30 + $0x120] ss:$16 sps:$4 sm:$0xff]  }
  0xfb   : > { %2886 = vmatprep.subr.bf16.mxu1 %v4675_v33  ;;  %v4717_v61 = vld [vmem:[%s6144_s30 + $0x324] ss:$16 sps:$4 sm:$0xff]   ;;  %v4720_v63 = vld [vmem:[%s6144_s30 + $0x320] ss:$16 sps:$4 sm:$0xff]  }
  0xfc   : > { %v4721_v4 = vld [vmem:[%s6144_s30 + $0x104] ss:$16 sps:$4 sm:$0xff]   ;;  %v4725_v6 = vld [vmem:[%s6144_s30 + $0x100] ss:$16 sps:$4 sm:$0xff]  }
  0xfd   : > { %2846 = vmatpush1.bf16.msra.mxu0 %v4677_v34  ;;  %v4723_v5 = vld [vmem:[%s6144_s30 + $0x304] ss:$16 sps:$4 sm:$0xff]   ;;  %v4726_v7 = vld [vmem:[%s6144_s30 + $0x300] ss:$16 sps:$4 sm:$0xff]  }
  0xfe   : > { %2887 = vmatpush1.bf16.msra.mxu1 %v4678_v35  ;;  %2847 = vmatprep.subr.bf16.mxu0 %v4679_v36  ;;  %v4733_v8 = vld [vmem:[%s6144_s30 + $0x4e4] ss:$16 sps:$4 sm:$0xff]   ;;  %v4731_v14 = vld [vmem:[%s6144_s30 + $0x4e0] ss:$16 sps:$4 sm:$0xff]  }
  0xff   : > { %2888 = vmatprep.subr.bf16.mxu1 %v4681_v37  ;;  %v4736_v9 = vld [vmem:[%s6144_s30 + $0x6e4] ss:$16 sps:$4 sm:$0xff]   ;;  %v4734_v15 = vld [vmem:[%s6144_s30 + $0x6e0] ss:$16 sps:$4 sm:$0xff]  }
 0x100   : > { %v6217_v10 = vld [vmem:[%s6659_s3 + $0x10] sm:$0xff] }
 0x101   : > { %2848 = vmatpush2.bf16.msra.mxu0 %v4683_v38  ;;  %v4739_v16 = vld [vmem:[%s6144_s30 + $0x4c4] ss:$16 sps:$4 sm:$0xff]   ;;  %v6238_v0 = vcombine.high %v6217_v10, %v6217_v10  ;;  %v4737_v18 = vld [vmem:[%s6144_s30 + $0x4c0] ss:$16 sps:$4 sm:$0xff]  }
 0x102   : > { %2889 = vmatpush2.bf16.msra.mxu1 %v4684_v39  ;;  %2849 = vmatprep.subr.bf16.mxu0 %v4685_v40  ;;  %v4742_v17 = vld [vmem:[%s6144_s30 + $0x6c4] ss:$16 sps:$4 sm:$0xff]   ;;  %v4740_v19 = vld [vmem:[%s6144_s30 + $0x6c0] ss:$16 sps:$4 sm:$0xff]  }
 0x103   : > { %2890 = vmatprep.subr.bf16.mxu1 %v4687_v41  ;;  %v4745_v20 = vld [vmem:[%s6144_s30 + $0x4a4] ss:$16 sps:$4 sm:$0xff]   ;;  %v4743_v22 = vld [vmem:[%s6144_s30 + $0x4a0] ss:$16 sps:$4 sm:$0xff]  }
 0x104   : > { %v4748_v21 = vld [vmem:[%s6144_s30 + $0x6a4] ss:$16 sps:$4 sm:$0xff]   ;;  %v4746_v23 = vld [vmem:[%s6144_s30 + $0x6a0] ss:$16 sps:$4 sm:$0xff]  }
 0x105   : > { %2850 = vmatpush2.bf16.msra.mxu0 %v4689_v42  ;;  %v4751_v24 = vld [vmem:[%s6144_s30 + $0x484] ss:$16 sps:$4 sm:$0xff]   ;;  %v4749_v26 = vld [vmem:[%s6144_s30 + $0x480] ss:$16 sps:$4 sm:$0xff]  }
 0x106   : > { %2891 = vmatpush2.bf16.msra.mxu1 %v4690_v43  ;;  %2851 = vmatprep.subr.bf16.mxu0 %v4691_v44  ;;  %v4754_v25 = vld [vmem:[%s6144_s30 + $0x684] ss:$16 sps:$4 sm:$0xff]   ;;  %v4752_v27 = vld [vmem:[%s6144_s30 + $0x680] ss:$16 sps:$4 sm:$0xff]  }
 0x107   : > { %2892 = vmatprep.subr.bf16.mxu1 %v4693_v45  ;;  %v4757_v28 = vld [vmem:[%s6144_s30 + $0x464] ss:$16 sps:$4 sm:$0xff]   ;;  %v4755_v30 = vld [vmem:[%s6144_s30 + $0x460] ss:$16 sps:$4 sm:$0xff]  }
 0x108   : > { %v4760_v29 = vld [vmem:[%s6144_s30 + $0x664] ss:$16 sps:$4 sm:$0xff]   ;;  %v4758_v31 = vld [vmem:[%s6144_s30 + $0x660] ss:$16 sps:$4 sm:$0xff]  }
 0x109   : > { %2852 = vmatpush2.bf16.msra.mxu0 %v4695_v46  ;;  %v4763_v32 = vld [vmem:[%s6144_s30 + $0x444] ss:$16 sps:$4 sm:$0xff]   ;;  %v4761_v34 = vld [vmem:[%s6144_s30 + $0x440] ss:$16 sps:$4 sm:$0xff]  }
 0x10a   : > { %2893 = vmatpush2.bf16.msra.mxu1 %v4696_v47  ;;  %2853 = vmatprep.subr.bf16.mxu0 %v4697_v48  ;;  %v4766_v33 = vld [vmem:[%s6144_s30 + $0x644] ss:$16 sps:$4 sm:$0xff]   ;;  %v4764_v35 = vld [vmem:[%s6144_s30 + $0x640] ss:$16 sps:$4 sm:$0xff]  }
 0x10b   : > { %2894 = vmatprep.subr.bf16.mxu1 %v4699_v49  ;;  %v4769_v36 = vld [vmem:[%s6144_s30 + $0x424] ss:$16 sps:$4 sm:$0xff]   ;;  %v4767_v38 = vld [vmem:[%s6144_s30 + $0x420] ss:$16 sps:$4 sm:$0xff]  }
 0x10c   : > { %v4772_v37 = vld [vmem:[%s6144_s30 + $0x624] ss:$16 sps:$4 sm:$0xff]   ;;  %v4770_v39 = vld [vmem:[%s6144_s30 + $0x620] ss:$16 sps:$4 sm:$0xff]  }
 0x10d   : > { %2854 = vmatpush2.bf16.msra.mxu0 %v4701_v50  ;;  %v4775_v40 = vld [vmem:[%s6144_s30 + $0x404] ss:$16 sps:$4 sm:$0xff]   ;;  %v4773_v42 = vld [vmem:[%s6144_s30 + $0x400] ss:$16 sps:$4 sm:$0xff]  }
 0x10e   : > { %2895 = vmatpush2.bf16.msra.mxu1 %v4702_v51  ;;  %2855 = vmatprep.subr.bf16.mxu0 %v4703_v52  ;;  %v4778_v41 = vld [vmem:[%s6144_s30 + $0x604] ss:$16 sps:$4 sm:$0xff]   ;;  %v4776_v43 = vld [vmem:[%s6144_s30 + $0x600] ss:$16 sps:$4 sm:$0xff]  }
 0x10f   : > { %2896 = vmatprep.subr.bf16.mxu1 %v4705_v53  ;;  %v4781_v44 = vld [vmem:[%s6144_s30 + $0x5e4] ss:$16 sps:$4 sm:$0xff]   ;;  %v4779_v46 = vld [vmem:[%s6144_s30 + $0x5e0] ss:$16 sps:$4 sm:$0xff]  }
 0x110   : > { %v4784_v45 = vld [vmem:[%s6144_s30 + $0x7e4] ss:$16 sps:$4 sm:$0xff]   ;;  %v4782_v47 = vld [vmem:[%s6144_s30 + $0x7e0] ss:$16 sps:$4 sm:$0xff]  }
 0x111   : > { %2856 = vmatpush2.bf16.msra.mxu0 %v4707_v54  ;;  %v4787_v48 = vld [vmem:[%s6144_s30 + $0x5c4] ss:$16 sps:$4 sm:$0xff]   ;;  %v4785_v50 = vld [vmem:[%s6144_s30 + $0x5c0] ss:$16 sps:$4 sm:$0xff]  }
 0x112   : > { %2897 = vmatpush2.bf16.msra.mxu1 %v4708_v55  ;;  %2857 = vmatprep.subr.bf16.mxu0 %v4709_v56  ;;  %v4790_v49 = vld [vmem:[%s6144_s30 + $0x7c4] ss:$16 sps:$4 sm:$0xff]   ;;  %v4788_v51 = vld [vmem:[%s6144_s30 + $0x7c0] ss:$16 sps:$4 sm:$0xff]  }
 0x113   : > { %2898 = vmatprep.subr.bf16.mxu1 %v4711_v57  ;;  %v4793_v52 = vld [vmem:[%s6144_s30 + $0x5a4] ss:$16 sps:$4 sm:$0xff]   ;;  %v4791_v54 = vld [vmem:[%s6144_s30 + $0x5a0] ss:$16 sps:$4 sm:$0xff]  }
 0x114   : > { %v4796_v53 = vld [vmem:[%s6144_s30 + $0x7a4] ss:$16 sps:$4 sm:$0xff]   ;;  %v4794_v55 = vld [vmem:[%s6144_s30 + $0x7a0] ss:$16 sps:$4 sm:$0xff]  }
 0x115   : > { %2858 = vmatpush2.bf16.msra.mxu0 %v4713_v58  ;;  %v4799_v56 = vld [vmem:[%s6144_s30 + $0x584] ss:$16 sps:$4 sm:$0xff]   ;;  %v4797_v58 = vld [vmem:[%s6144_s30 + $0x580] ss:$16 sps:$4 sm:$0xff]  }
 0x116   : > { %2899 = vmatpush2.bf16.msra.mxu1 %v4714_v59  ;;  %2859 = vmatprep.subr.bf16.mxu0 %v4715_v60  ;;  %v4802_v57 = vld [vmem:[%s6144_s30 + $0x784] ss:$16 sps:$4 sm:$0xff]   ;;  %v4800_v59 = vld [vmem:[%s6144_s30 + $0x780] ss:$16 sps:$4 sm:$0xff]  }
 0x117   : > { %2900 = vmatprep.subr.bf16.mxu1 %v4717_v61  ;;  %v4805_v60 = vld [vmem:[%s6144_s30 + $0x564] ss:$16 sps:$4 sm:$0xff]  }
 0x118   : > { %v4808_v61 = vld [vmem:[%s6144_s30 + $0x764] ss:$16 sps:$4 sm:$0xff]  }
 0x119   : > { %2860 = vmatpush2.bf16.msra.mxu0 %v4719_v62  ;;  %v4803_v62 = vld [vmem:[%s6144_s30 + $0x560] ss:$16 sps:$4 sm:$0xff]  }
 0x11a   : > { %2901 = vmatpush2.bf16.msra.mxu1 %v4720_v63  ;;  %2861 = vmatprep.subr.bf16.mxu0 %v4721_v4  ;;  %v4806_v63 = vld [vmem:[%s6144_s30 + $0x760] ss:$16 sps:$4 sm:$0xff]   ;;  %v4811_v4 = vld [vmem:[%s6144_s30 + $0x544] ss:$16 sps:$4 sm:$0xff]  }
 0x11b   : > { %2902 = vmatprep.subr.bf16.mxu1 %v4723_v5  ;;  %v4814_v5 = vld [vmem:[%s6144_s30 + $0x744] ss:$16 sps:$4 sm:$0xff]  }
 0x11d   : > { %2862 = vmatpush2.bf16.msra.mxu0 %v4725_v6  ;;  %v4809_v6 = vld [vmem:[%s6144_s30 + $0x540] ss:$16 sps:$4 sm:$0xff]  }
 0x11e   : > { %2903 = vmatpush2.bf16.msra.mxu1 %v4726_v7  ;;  %2913 = vmatprep.subr.bf16.mxu0 %v4733_v8  ;;  %v4812_v7 = vld [vmem:[%s6144_s30 + $0x740] ss:$16 sps:$4 sm:$0xff]   ;;  %v4817_v8 = vld [vmem:[%s6144_s30 + $0x524] ss:$16 sps:$4 sm:$0xff]  }
 0x11f   : > { %2954 = vmatprep.subr.bf16.mxu1 %v4736_v9  ;;  %v4820_v9 = vld [vmem:[%s6144_s30 + $0x724] ss:$16 sps:$4 sm:$0xff]  }
 0x120   : > { %2864 = vmatmul.mubr.bf16.vlgmr.msra.gmra.mxu0 %v6226_v12 }
 0x121   : > { %2905 = vmatmul.mubr.bf16.vlgmr.msra.gmra.mxu1 %v6230_v13  ;;  %2914 = vmatpush1.bf16.msra.mxu0 %v4731_v14  ;;  %v4815_v14 = vld [vmem:[%s6144_s30 + $0x520] ss:$16 sps:$4 sm:$0xff]  }
 0x122   : > { %2955 = vmatpush1.bf16.msra.mxu1 %v4734_v15  ;;  %2915 = vmatprep.subr.bf16.mxu0 %v4739_v16  ;;  %v4818_v15 = vld [vmem:[%s6144_s30 + $0x720] ss:$16 sps:$4 sm:$0xff]   ;;  %v4823_v16 = vld [vmem:[%s6144_s30 + $0x504] ss:$16 sps:$4 sm:$0xff]  }
 0x123   : > { %2956 = vmatprep.subr.bf16.mxu1 %v4742_v17  ;;  %2945 = vmatprep.mubr.bf16.mxu0 %v6238_v0  ;;  %v4826_v17 = vld [vmem:[%s6144_s30 + $0x704] ss:$16 sps:$4 sm:$0xff]  }
 0x124   : > { %2986 = vmatprep.mubr.bf16.mxu1 %v6242_v1 }
 0x125   : > { %2916 = vmatpush1.bf16.msra.mxu0 %v4737_v18  ;;  %v4821_v18 = vld [vmem:[%s6144_s30 + $0x500] ss:$16 sps:$4 sm:$0xff]  }
 0x126   : > { %2957 = vmatpush1.bf16.msra.mxu1 %v4740_v19  ;;  %2917 = vmatprep.subr.bf16.mxu0 %v4745_v20  ;;  %v4824_v19 = vld [vmem:[%s6144_s30 + $0x700] ss:$16 sps:$4 sm:$0xff]   ;;  %v4833_v20 = vld [vmem:[%s6144_s30 + $0xec] ss:$16 sps:$4 sm:$0xff]  }
 0x127   : > { %2958 = vmatprep.subr.bf16.mxu1 %v4748_v21  ;;  %v4836_v21 = vld [vmem:[%s6144_s30 + $0x2ec] ss:$16 sps:$4 sm:$0xff]  }
 0x129   : > { %2918 = vmatpush1.bf16.msra.mxu0 %v4743_v22  ;;  %v6310_v22 = vcombine.low %v6217_v10, %v6217_v10  ;;  %v4837_v10 = vld [vmem:[%s6144_s30 + $0xc8] ss:$16 sps:$4 sm:$0xff]  }
 0x12a   : > { %2959 = vmatpush1.bf16.msra.mxu1 %v4746_v23  ;;  %2919 = vmatprep.subr.bf16.mxu0 %v4751_v24  ;;  %v6314_v23 = vcombine.low %v6222_v11, %v6222_v11  ;;  %v4831_v24 = vld [vmem:[%s6144_s30 + $0xe8] ss:$16 sps:$4 sm:$0xff]   ;;  %v4845_v11 = vld [vmem:[%s6144_s30 + $0xac] ss:$16 sps:$4 sm:$0xff]  }
 0x12b   : > { %2960 = vmatprep.subr.bf16.mxu1 %v4754_v25  ;;  %v4834_v25 = vld [vmem:[%s6144_s30 + $0x2e8] ss:$16 sps:$4 sm:$0xff]  }
 0x12d   : > { %2920 = vmatpush1.bf16.msra.mxu0 %v4749_v26  ;;  %v4839_v26 = vld [vmem:[%s6144_s30 + $0xcc] ss:$16 sps:$4 sm:$0xff]  }
 0x12e   : > { %2961 = vmatpush1.bf16.msra.mxu1 %v4752_v27  ;;  %2921 = vmatprep.subr.bf16.mxu0 %v4757_v28  ;;  %v4842_v27 = vld [vmem:[%s6144_s30 + $0x2cc] ss:$16 sps:$4 sm:$0xff]   ;;  %v4840_v28 = vld [vmem:[%s6144_s30 + $0x2c8] ss:$16 sps:$4 sm:$0xff]  }
 0x12f   : > { %2962 = vmatprep.subr.bf16.mxu1 %v4760_v29  ;;  %v4848_v29 = vld [vmem:[%s6144_s30 + $0x2ac] ss:$16 sps:$4 sm:$0xff]  }
 0x131   : > { %2922 = vmatpush1.bf16.msra.mxu0 %v4755_v30  ;;  %v4843_v30 = vld [vmem:[%s6144_s30 + $0xa8] ss:$16 sps:$4 sm:$0xff]  }
 0x132   : > { %2963 = vmatpush1.bf16.msra.mxu1 %v4758_v31  ;;  %2923 = vmatprep.subr.bf16.mxu0 %v4763_v32  ;;  %v4846_v31 = vld [vmem:[%s6144_s30 + $0x2a8] ss:$16 sps:$4 sm:$0xff]   ;;  %v4851_v32 = vld [vmem:[%s6144_s30 + $0x8c] ss:$16 sps:$4 sm:$0xff]  }
 0x133   : > { %2964 = vmatprep.subr.bf16.mxu1 %v4766_v33  ;;  %v4854_v33 = vld [vmem:[%s6144_s30 + $0x28c] ss:$16 sps:$4 sm:$0xff]  }
 0x135   : > { %2924 = vmatpush1.bf16.msra.mxu0 %v4761_v34  ;;  %v4849_v34 = vld [vmem:[%s6144_s30 + $0x88] ss:$16 sps:$4 sm:$0xff]  }
 0x136   : > { %2965 = vmatpush1.bf16.msra.mxu1 %v4764_v35  ;;  %2925 = vmatprep.subr.bf16.mxu0 %v4769_v36  ;;  %v4852_v35 = vld [vmem:[%s6144_s30 + $0x288] ss:$16 sps:$4 sm:$0xff]  }
 0x137   : > { %2966 = vmatprep.subr.bf16.mxu1 %v4772_v37  ;;  %v4855_v36 = vld [vmem:[%s6144_s30 + $0x68] ss:$16 sps:$4 sm:$0xff]  }
 0x138   : > { %v4858_v37 = vld [vmem:[%s6144_s30 + $0x268] ss:$16 sps:$4 sm:$0xff]  }
 0x139   : > { %2926 = vmatpush1.bf16.msra.mxu0 %v4767_v38  ;;  %v4863_v38 = vld [vmem:[%s6144_s30 + $0x4c] ss:$16 sps:$4 sm:$0xff]  }
 0x13a   : > { %2967 = vmatpush1.bf16.msra.mxu1 %v4770_v39  ;;  %2927 = vmatprep.subr.bf16.mxu0 %v4775_v40  ;;  %v4866_v39 = vld [vmem:[%s6144_s30 + $0x24c] ss:$16 sps:$4 sm:$0xff]   ;;  %v4861_v40 = vld [vmem:[%s6144_s30 + $0x48] ss:$16 sps:$4 sm:$0xff]  }
 0x13b   : > { %2968 = vmatprep.subr.bf16.mxu1 %v4778_v41  ;;  %v4864_v41 = vld [vmem:[%s6144_s30 + $0x248] ss:$16 sps:$4 sm:$0xff]  }
 0x13d   : > { %2928 = vmatpush1.bf16.msra.mxu0 %v4773_v42  ;;  %v4869_v42 = vld [vmem:[%s6144_s30 + $0x2c] ss:$16 sps:$4 sm:$0xff]  }
 0x13e   : > { %2969 = vmatpush1.bf16.msra.mxu1 %v4776_v43  ;;  %2929 = vmatprep.subr.bf16.mxu0 %v4781_v44  ;;  %v4872_v43 = vld [vmem:[%s6144_s30 + $0x22c] ss:$16 sps:$4 sm:$0xff]   ;;  %v4867_v44 = vld [vmem:[%s6144_s30 + $0x28] ss:$16 sps:$4 sm:$0xff]  }
 0x13f   : > { %2970 = vmatprep.subr.bf16.mxu1 %v4784_v45  ;;  %v4870_v45 = vld [vmem:[%s6144_s30 + $0x228] ss:$16 sps:$4 sm:$0xff]  }
 0x141   : > { %2930 = vmatpush2.bf16.msra.mxu0 %v4779_v46  ;;  %v4875_v46 = vld [vmem:[%s6144_s30 + $0xc] ss:$16 sps:$4 sm:$0xff]  }
 0x142   : > { %2971 = vmatpush2.bf16.msra.mxu1 %v4782_v47  ;;  %2931 = vmatprep.subr.bf16.mxu0 %v4787_v48  ;;  %v4878_v47 = vld [vmem:[%s6144_s30 + $0x20c] ss:$16 sps:$4 sm:$0xff]   ;;  %v4873_v48 = vld [vmem:[%s6144_s30 + $0x8] ss:$16 sps:$4 sm:$0xff]  }
 0x143   : > { %2972 = vmatprep.subr.bf16.mxu1 %v4790_v49  ;;  %v4876_v49 = vld [vmem:[%s6144_s30 + $0x208] ss:$16 sps:$4 sm:$0xff]  }
 0x145   : > { %2932 = vmatpush2.bf16.msra.mxu0 %v4785_v50  ;;  %v4881_v50 = vld [vmem:[%s6144_s30 + $0x1ec] ss:$16 sps:$4 sm:$0xff]  }
 0x146   : > { %2973 = vmatpush2.bf16.msra.mxu1 %v4788_v51  ;;  %2933 = vmatprep.subr.bf16.mxu0 %v4793_v52  ;;  %v4884_v51 = vld [vmem:[%s6144_s30 + $0x3ec] ss:$16 sps:$4 sm:$0xff]   ;;  %v4879_v52 = vld [vmem:[%s6144_s30 + $0x1e8] ss:$16 sps:$4 sm:$0xff]  }
 0x147   : > { %2974 = vmatprep.subr.bf16.mxu1 %v4796_v53  ;;  %v4882_v53 = vld [vmem:[%s6144_s30 + $0x3e8] ss:$16 sps:$4 sm:$0xff]  }
 0x149   : > { %2934 = vmatpush2.bf16.msra.mxu0 %v4791_v54  ;;  %v4887_v54 = vld [vmem:[%s6144_s30 + $0x1cc] ss:$16 sps:$4 sm:$0xff]  }
 0x14a   : > { %2975 = vmatpush2.bf16.msra.mxu1 %v4794_v55  ;;  %2935 = vmatprep.subr.bf16.mxu0 %v4799_v56  ;;  %v4890_v55 = vld [vmem:[%s6144_s30 + $0x3cc] ss:$16 sps:$4 sm:$0xff]   ;;  %v4885_v56 = vld [vmem:[%s6144_s30 + $0x1c8] ss:$16 sps:$4 sm:$0xff]  }
 0x14b   : > { %2976 = vmatprep.subr.bf16.mxu1 %v4802_v57  ;;  %v4888_v57 = vld [vmem:[%s6144_s30 + $0x3c8] ss:$16 sps:$4 sm:$0xff]  }
 0x14d   : > { %2936 = vmatpush2.bf16.msra.mxu0 %v4797_v58  ;;  %v4893_v58 = vld [vmem:[%s6144_s30 + $0x1ac] ss:$16 sps:$4 sm:$0xff]  }
 0x14e   : > { %2977 = vmatpush2.bf16.msra.mxu1 %v4800_v59  ;;  %2937 = vmatprep.subr.bf16.mxu0 %v4805_v60  ;;  %v4896_v59 = vld [vmem:[%s6144_s30 + $0x3ac] ss:$16 sps:$4 sm:$0xff]   ;;  %v4891_v60 = vld [vmem:[%s6144_s30 + $0x1a8] ss:$16 sps:$4 sm:$0xff]  }
 0x14f   : > { %2978 = vmatprep.subr.bf16.mxu1 %v4808_v61  ;;  %v4894_v61 = vld [vmem:[%s6144_s30 + $0x3a8] ss:$16 sps:$4 sm:$0xff]  }
 0x151   : > { %2938 = vmatpush2.bf16.msra.mxu0 %v4803_v62  ;;  %v4899_v62 = vld [vmem:[%s6144_s30 + $0x18c] ss:$16 sps:$4 sm:$0xff]  }
 0x152   : > { %2979 = vmatpush2.bf16.msra.mxu1 %v4806_v63  ;;  %2939 = vmatprep.subr.bf16.mxu0 %v4811_v4  ;;  %v4902_v63 = vld [vmem:[%s6144_s30 + $0x38c] ss:$16 sps:$4 sm:$0xff]   ;;  %v4897_v4 = vld [vmem:[%s6144_s30 + $0x188] ss:$16 sps:$4 sm:$0xff]  }
 0x153   : > { %2980 = vmatprep.subr.bf16.mxu1 %v4814_v5  ;;  %v4900_v5 = vld [vmem:[%s6144_s30 + $0x388] ss:$16 sps:$4 sm:$0xff]  }
 0x155   : > { %2940 = vmatpush2.bf16.msra.mxu0 %v4809_v6  ;;  %v4905_v6 = vld [vmem:[%s6144_s30 + $0x16c] ss:$16 sps:$4 sm:$0xff]  }
 0x156   : > { %2981 = vmatpush2.bf16.msra.mxu1 %v4812_v7  ;;  %2941 = vmatprep.subr.bf16.mxu0 %v4817_v8  ;;  %v4908_v7 = vld [vmem:[%s6144_s30 + $0x36c] ss:$16 sps:$4 sm:$0xff]   ;;  %v4903_v8 = vld [vmem:[%s6144_s30 + $0x168] ss:$16 sps:$4 sm:$0xff]  }
 0x157   : > { %2982 = vmatprep.subr.bf16.mxu1 %v4820_v9  ;;  %v4906_v9 = vld [vmem:[%s6144_s30 + $0x368] ss:$16 sps:$4 sm:$0xff]  }
 0x159   : > { %2942 = vmatpush2.bf16.msra.mxu0 %v4815_v14  ;;  %v4911_v14 = vld [vmem:[%s6144_s30 + $0x14c] ss:$16 sps:$4 sm:$0xff]  }
 0x15a   : > { %2983 = vmatpush2.bf16.msra.mxu1 %v4818_v15  ;;  %2943 = vmatprep.subr.bf16.mxu0 %v4823_v16  ;;  %v4914_v15 = vld [vmem:[%s6144_s30 + $0x34c] ss:$16 sps:$4 sm:$0xff]   ;;  %v4909_v16 = vld [vmem:[%s6144_s30 + $0x148] ss:$16 sps:$4 sm:$0xff]  }
 0x15b   : > { %2984 = vmatprep.subr.bf16.mxu1 %v4826_v17  ;;  %v4912_v17 = vld [vmem:[%s6144_s30 + $0x348] ss:$16 sps:$4 sm:$0xff]  }
 0x15d   : > { %2944 = vmatpush2.bf16.msra.mxu0 %v4821_v18  ;;  %v4917_v18 = vld [vmem:[%s6144_s30 + $0x12c] ss:$16 sps:$4 sm:$0xff]  }
 0x15e   : > { %2985 = vmatpush2.bf16.msra.mxu1 %v4824_v19  ;;  %2995 = vmatprep.subr.bf16.mxu0 %v4833_v20  ;;  %v4920_v19 = vld [vmem:[%s6144_s30 + $0x32c] ss:$16 sps:$4 sm:$0xff]   ;;  %v4915_v20 = vld [vmem:[%s6144_s30 + $0x128] ss:$16 sps:$4 sm:$0xff]  }
 0x15f   : > { %3036 = vmatprep.subr.bf16.mxu1 %v4836_v21  ;;  %v4918_v21 = vld [vmem:[%s6144_s30 + $0x328] ss:$16 sps:$4 sm:$0xff]  }
 0x160   : > { %2946 = vmatmul.mubr.bf16.vlgmr.msra.gmra.mxu0 %v6310_v22 }
 0x161   : > { %2987 = vmatmul.mubr.bf16.vlgmr.msra.gmra.mxu1 %v6314_v23  ;;  %2996 = vmatpush1.bf16.msra.mxu0 %v4831_v24  ;;  %v4923_v24 = vld [vmem:[%s6144_s30 + $0x10c] ss:$16 sps:$4 sm:$0xff]  }
 0x162   : > { %3037 = vmatpush1.bf16.msra.mxu1 %v4834_v25  ;;  %2997 = vmatprep.subr.bf16.mxu0 %v4839_v26  ;;  %v4926_v25 = vld [vmem:[%s6144_s30 + $0x30c] ss:$16 sps:$4 sm:$0xff]   ;;  %v4921_v26 = vld [vmem:[%s6144_s30 + $0x108] ss:$16 sps:$4 sm:$0xff]  }
 0x163   : > { %3038 = vmatprep.subr.bf16.mxu1 %v4842_v27  ;;  %3027 = vmatprep.mubr.bf16.mxu0 %v6138_v2  ;;  %v4857_v2 = vld [vmem:[%s6144_s30 + $0x6c] ss:$16 sps:$4 sm:$0xff]   ;;  %v4924_v27 = vld [vmem:[%s6144_s30 + $0x308] ss:$16 sps:$4 sm:$0xff]  }
 0x164   : > { %3068 = vmatprep.mubr.bf16.mxu1 %v6142_v3  ;;  %v4860_v3 = vld [vmem:[%s6144_s30 + $0x26c] ss:$16 sps:$4 sm:$0xff]  }
 0x165   : > { %2998 = vmatpush1.bf16.msra.mxu0 %v4837_v10  ;;  %v4929_v10 = vld [vmem:[%s6144_s30 + $0x4ec] ss:$16 sps:$4 sm:$0xff]  }
 0x166   : > { %3039 = vmatpush1.bf16.msra.mxu1 %v4840_v28  ;;  %2999 = vmatprep.subr.bf16.mxu0 %v4845_v11  ;;  %v4932_v28 = vld [vmem:[%s6144_s30 + $0x6ec] ss:$16 sps:$4 sm:$0xff]   ;;  %v4927_v11 = vld [vmem:[%s6144_s30 + $0x4e8] ss:$16 sps:$4 sm:$0xff]  }
 0x167   : > { %3040 = vmatprep.subr.bf16.mxu1 %v4848_v29  ;;  %v4930_v29 = vld [vmem:[%s6144_s30 + $0x6e8] ss:$16 sps:$4 sm:$0xff]  }
 0x169   : > { %3000 = vmatpush1.bf16.msra.mxu0 %v4843_v30  ;;  %v4935_v30 = vld [vmem:[%s6144_s30 + $0x4cc] ss:$16 sps:$4 sm:$0xff]  }
 0x16a   : > { %3041 = vmatpush1.bf16.msra.mxu1 %v4846_v31  ;;  %3001 = vmatprep.subr.bf16.mxu0 %v4851_v32  ;;  %v4938_v31 = vld [vmem:[%s6144_s30 + $0x6cc] ss:$16 sps:$4 sm:$0xff]   ;;  %v4933_v32 = vld [vmem:[%s6144_s30 + $0x4c8] ss:$16 sps:$4 sm:$0xff]  }
 0x16b   : > { %3042 = vmatprep.subr.bf16.mxu1 %v4854_v33  ;;  %v4936_v33 = vld [vmem:[%s6144_s30 + $0x6c8] ss:$16 sps:$4 sm:$0xff]  }
 0x16d   : > { %3002 = vmatpush1.bf16.msra.mxu0 %v4849_v34  ;;  %v4941_v34 = vld [vmem:[%s6144_s30 + $0x4ac] ss:$16 sps:$4 sm:$0xff]  }
 0x16e   : > { %3043 = vmatpush1.bf16.msra.mxu1 %v4852_v35  ;;  %3003 = vmatprep.subr.bf16.mxu0 %v4857_v2  ;;  %v4944_v35 = vld [vmem:[%s6144_s30 + $0x6ac] ss:$16 sps:$4 sm:$0xff]  }
 0x16f   : > { %3044 = vmatprep.subr.bf16.mxu1 %v4860_v3  ;;  %v4947_v2 = vld [vmem:[%s6144_s30 + $0x48c] ss:$16 sps:$4 sm:$0xff]  }
 0x170   : > { %v4950_v3 = vld [vmem:[%s6144_s30 + $0x68c] ss:$16 sps:$4 sm:$0xff]  }
 0x171   : > { %3004 = vmatpush1.bf16.msra.mxu0 %v4855_v36  ;;  %v4945_v36 = vld [vmem:[%s6144_s30 + $0x488] ss:$16 sps:$4 sm:$0xff]  }
 0x172   : > { %3045 = vmatpush1.bf16.msra.mxu1 %v4858_v37  ;;  %3005 = vmatprep.subr.bf16.mxu0 %v4863_v38  ;;  %v4948_v37 = vld [vmem:[%s6144_s30 + $0x688] ss:$16 sps:$4 sm:$0xff]  }
 0x173   : > { %3046 = vmatprep.subr.bf16.mxu1 %v4866_v39  ;;  %v4951_v38 = vld [vmem:[%s6144_s30 + $0x468] ss:$16 sps:$4 sm:$0xff]  }
 0x174   : > { %v4954_v39 = vld [vmem:[%s6144_s30 + $0x668] ss:$16 sps:$4 sm:$0xff]  }
 0x175   : > { %3006 = vmatpush1.bf16.msra.mxu0 %v4861_v40  ;;  %v4959_v40 = vld [vmem:[%s6144_s30 + $0x44c] ss:$16 sps:$4 sm:$0xff]  }
 0x176   : > { %3047 = vmatpush1.bf16.msra.mxu1 %v4864_v41  ;;  %3007 = vmatprep.subr.bf16.mxu0 %v4869_v42  ;;  %v4962_v41 = vld [vmem:[%s6144_s30 + $0x64c] ss:$16 sps:$4 sm:$0xff]   ;;  %v4957_v42 = vld [vmem:[%s6144_s30 + $0x448] ss:$16 sps:$4 sm:$0xff]  }
 0x177   : > { %3048 = vmatprep.subr.bf16.mxu1 %v4872_v43  ;;  %v4960_v43 = vld [vmem:[%s6144_s30 + $0x648] ss:$16 sps:$4 sm:$0xff]  }
 0x179   : > { %3008 = vmatpush1.bf16.msra.mxu0 %v4867_v44  ;;  %v4965_v44 = vld [vmem:[%s6144_s30 + $0x42c] ss:$16 sps:$4 sm:$0xff]  }
 0x17a   : > { %3049 = vmatpush1.bf16.msra.mxu1 %v4870_v45  ;;  %3009 = vmatprep.subr.bf16.mxu0 %v4875_v46  ;;  %v4968_v45 = vld [vmem:[%s6144_s30 + $0x62c] ss:$16 sps:$4 sm:$0xff]   ;;  %v4963_v46 = vld [vmem:[%s6144_s30 + $0x428] ss:$16 sps:$4 sm:$0xff]  }
 0x17b   : > { %3050 = vmatprep.subr.bf16.mxu1 %v4878_v47  ;;  %v4966_v47 = vld [vmem:[%s6144_s30 + $0x628] ss:$16 sps:$4 sm:$0xff]  }
 0x17d   : > { %3010 = vmatpush1.bf16.msra.mxu0 %v4873_v48  ;;  %v4971_v48 = vld [vmem:[%s6144_s30 + $0x40c] ss:$16 sps:$4 sm:$0xff]  }
 0x17e   : > { %3051 = vmatpush1.bf16.msra.mxu1 %v4876_v49  ;;  %3011 = vmatprep.subr.bf16.mxu0 %v4881_v50  ;;  %v4974_v49 = vld [vmem:[%s6144_s30 + $0x60c] ss:$16 sps:$4 sm:$0xff]   ;;  %v4969_v50 = vld [vmem:[%s6144_s30 + $0x408] ss:$16 sps:$4 sm:$0xff]  }
 0x17f   : > { %3052 = vmatprep.subr.bf16.mxu1 %v4884_v51  ;;  %v4972_v51 = vld [vmem:[%s6144_s30 + $0x608] ss:$16 sps:$4 sm:$0xff]  }
 0x181   : > { %3012 = vmatpush2.bf16.msra.mxu0 %v4879_v52  ;;  %v4977_v52 = vld [vmem:[%s6144_s30 + $0x5ec] ss:$16 sps:$4 sm:$0xff]  }
 0x182   : > { %3053 = vmatpush2.bf16.msra.mxu1 %v4882_v53  ;;  %3013 = vmatprep.subr.bf16.mxu0 %v4887_v54  ;;  %v4980_v53 = vld [vmem:[%s6144_s30 + $0x7ec] ss:$16 sps:$4 sm:$0xff]   ;;  %v4975_v54 = vld [vmem:[%s6144_s30 + $0x5e8] ss:$16 sps:$4 sm:$0xff]  }
 0x183   : > { %3054 = vmatprep.subr.bf16.mxu1 %v4890_v55  ;;  %v4978_v55 = vld [vmem:[%s6144_s30 + $0x7e8] ss:$16 sps:$4 sm:$0xff]  }
 0x185   : > { %3014 = vmatpush2.bf16.msra.mxu0 %v4885_v56  ;;  %v4983_v56 = vld [vmem:[%s6144_s30 + $0x5cc] ss:$16 sps:$4 sm:$0xff]  }
 0x186   : > { %3055 = vmatpush2.bf16.msra.mxu1 %v4888_v57  ;;  %3015 = vmatprep.subr.bf16.mxu0 %v4893_v58  ;;  %v4986_v57 = vld [vmem:[%s6144_s30 + $0x7cc] ss:$16 sps:$4 sm:$0xff]   ;;  %v4981_v58 = vld [vmem:[%s6144_s30 + $0x5c8] ss:$16 sps:$4 sm:$0xff]  }
 0x187   : > { %3056 = vmatprep.subr.bf16.mxu1 %v4896_v59  ;;  %v4984_v59 = vld [vmem:[%s6144_s30 + $0x7c8] ss:$16 sps:$4 sm:$0xff]  }
 0x189   : > { %3016 = vmatpush2.bf16.msra.mxu0 %v4891_v60  ;;  %v4989_v60 = vld [vmem:[%s6144_s30 + $0x5ac] ss:$16 sps:$4 sm:$0xff]  }
 0x18a   : > { %3057 = vmatpush2.bf16.msra.mxu1 %v4894_v61  ;;  %3017 = vmatprep.subr.bf16.mxu0 %v4899_v62  ;;  %v4992_v61 = vld [vmem:[%s6144_s30 + $0x7ac] ss:$16 sps:$4 sm:$0xff]   ;;  %v4987_v62 = vld [vmem:[%s6144_s30 + $0x5a8] ss:$16 sps:$4 sm:$0xff]  }
 0x18b   : > { %3058 = vmatprep.subr.bf16.mxu1 %v4902_v63  ;;  %v4990_v63 = vld [vmem:[%s6144_s30 + $0x7a8] ss:$16 sps:$4 sm:$0xff]  }
 0x18d   : > { %3018 = vmatpush2.bf16.msra.mxu0 %v4897_v4  ;;  %v4995_v4 = vld [vmem:[%s6144_s30 + $0x58c] ss:$16 sps:$4 sm:$0xff]  }
 0x18e   : > { %3059 = vmatpush2.bf16.msra.mxu1 %v4900_v5  ;;  %3019 = vmatprep.subr.bf16.mxu0 %v4905_v6  ;;  %v4998_v5 = vld [vmem:[%s6144_s30 + $0x78c] ss:$16 sps:$4 sm:$0xff]   ;;  %v4993_v6 = vld [vmem:[%s6144_s30 + $0x588] ss:$16 sps:$4 sm:$0xff]  }
 0x18f   : > { %3060 = vmatprep.subr.bf16.mxu1 %v4908_v7  ;;  %v4996_v7 = vld [vmem:[%s6144_s30 + $0x788] ss:$16 sps:$4 sm:$0xff]  }
 0x191   : > { %3020 = vmatpush2.bf16.msra.mxu0 %v4903_v8  ;;  %v5001_v8 = vld [vmem:[%s6144_s30 + $0x56c] ss:$16 sps:$4 sm:$0xff]  }
 0x192   : > { %3061 = vmatpush2.bf16.msra.mxu1 %v4906_v9  ;;  %3021 = vmatprep.subr.bf16.mxu0 %v4911_v14  ;;  %v5004_v9 = vld [vmem:[%s6144_s30 + $0x76c] ss:$16 sps:$4 sm:$0xff]   ;;  %v4999_v14 = vld [vmem:[%s6144_s30 + $0x568] ss:$16 sps:$4 sm:$0xff]  }
 0x193   : > { %3062 = vmatprep.subr.bf16.mxu1 %v4914_v15  ;;  %v5002_v15 = vld [vmem:[%s6144_s30 + $0x768] ss:$16 sps:$4 sm:$0xff]  }
 0x195   : > { %3022 = vmatpush2.bf16.msra.mxu0 %v4909_v16  ;;  %v5007_v16 = vld [vmem:[%s6144_s30 + $0x54c] ss:$16 sps:$4 sm:$0xff]  }
 0x196   : > { %3063 = vmatpush2.bf16.msra.mxu1 %v4912_v17  ;;  %3023 = vmatprep.subr.bf16.mxu0 %v4917_v18  ;;  %v5010_v17 = vld [vmem:[%s6144_s30 + $0x74c] ss:$16 sps:$4 sm:$0xff]   ;;  %v5005_v18 = vld [vmem:[%s6144_s30 + $0x548] ss:$16 sps:$4 sm:$0xff]  }
 0x197   : > { %3064 = vmatprep.subr.bf16.mxu1 %v4920_v19  ;;  %v5008_v19 = vld [vmem:[%s6144_s30 + $0x748] ss:$16 sps:$4 sm:$0xff]  }
 0x199   : > { %3024 = vmatpush2.bf16.msra.mxu0 %v4915_v20  ;;  %v5013_v20 = vld [vmem:[%s6144_s30 + $0x52c] ss:$16 sps:$4 sm:$0xff]  }
 0x19a   : > { %3065 = vmatpush2.bf16.msra.mxu1 %v4918_v21  ;;  %3025 = vmatprep.subr.bf16.mxu0 %v4923_v24  ;;  %v5016_v21 = vld [vmem:[%s6144_s30 + $0x72c] ss:$16 sps:$4 sm:$0xff]   ;;  %v5011_v24 = vld [vmem:[%s6144_s30 + $0x528] ss:$16 sps:$4 sm:$0xff]  }
 0x19b   : > { %3066 = vmatprep.subr.bf16.mxu1 %v4926_v25  ;;  %v5014_v25 = vld [vmem:[%s6144_s30 + $0x728] ss:$16 sps:$4 sm:$0xff]  }
 0x19d   : > { %3026 = vmatpush2.bf16.msra.mxu0 %v4921_v26  ;;  %v5019_v26 = vld [vmem:[%s6144_s30 + $0x50c] ss:$16 sps:$4 sm:$0xff]  }
 0x19e   : > { %3067 = vmatpush2.bf16.msra.mxu1 %v4924_v27  ;;  %3077 = vmatprep.subr.bf16.mxu0 %v4929_v10  ;;  %v5022_v27 = vld [vmem:[%s6144_s30 + $0x70c] ss:$16 sps:$4 sm:$0xff]   ;;  %v5017_v10 = vld [vmem:[%s6144_s30 + $0x508] ss:$16 sps:$4 sm:$0xff]  }
 0x19f   : > { %3118 = vmatprep.subr.bf16.mxu1 %v4932_v28  ;;  %v5020_v28 = vld [vmem:[%s6144_s30 + $0x708] ss:$16 sps:$4 sm:$0xff]  }
 0x1a0   : > { %3028 = vmatmul.mubr.bf16.vlgmr.msra.gmra.mxu0 %v6226_v12  ;;  %v4939_v12 = vld [vmem:[%s6144_s30 + $0x4a8] ss:$16 sps:$4 sm:$0xff]  }
 0x1a1   : > { %3069 = vmatmul.mubr.bf16.vlgmr.msra.gmra.mxu1 %v6230_v13  ;;  %3078 = vmatpush1.bf16.msra.mxu0 %v4927_v11  ;;  %v4942_v13 = vld [vmem:[%s6144_s30 + $0x6a8] ss:$16 sps:$4 sm:$0xff]   ;;  %v5025_v11 = vld [vmem:[%s6366_s11 + $0xe4] ss:$16 sps:$4 sm:$0xff]  }
 0x1a2   : > { %3119 = vmatpush1.bf16.msra.mxu1 %v4930_v29  ;;  %3079 = vmatprep.subr.bf16.mxu0 %v4935_v30  ;;  %v5028_v29 = vld [vmem:[%s6366_s11 + $0x2e4] ss:$16 sps:$4 sm:$0xff]  }
 0x1a3   : > { %3120 = vmatprep.subr.bf16.mxu1 %v4938_v31  ;;  %3109 = vmatprep.mubr.bf16.mxu0 %v6238_v0  ;;  %v4953_v0 = vld [vmem:[%s6144_s30 + $0x46c] ss:$16 sps:$4 sm:$0xff]   ;;  %v6459_v30 = vld [vmem:[%s6656_s0] sm:$0xff] }
 0x1a4   : > { %3150 = vmatprep.mubr.bf16.mxu1 %v6242_v1  ;;  %v4956_v1 = vld [vmem:[%s6144_s30 + $0x66c] ss:$16 sps:$4 sm:$0xff]  }
 0x1a5   : > { %3080 = vmatpush1.bf16.msra.mxu0 %v4933_v32  ;;  %v6464_v31 = vld [vmem:[%s6656_s0 + $0x8] sm:$0xff]  ;;  %v5023_v32 = vld [vmem:[%s6366_s11 + $0xe0] ss:$16 sps:$4 sm:$0xff]  }
 0x1a6   : > { %3121 = vmatpush1.bf16.msra.mxu1 %v4936_v33  ;;  %3081 = vmatprep.subr.bf16.mxu0 %v4941_v34  ;;  %v5026_v33 = vld [vmem:[%s6366_s11 + $0x2e0] ss:$16 sps:$4 sm:$0xff]   ;;  %v5031_v34 = vld [vmem:[%s6366_s11 + $0xc4] ss:$16 sps:$4 sm:$0xff]  }
 0x1a7   : > { %3122 = vmatprep.subr.bf16.mxu1 %v4944_v35  ;;  %v5034_v35 = vld [vmem:[%s6366_s11 + $0x2c4] ss:$16 sps:$4 sm:$0xff]  }
 0x1a9   : > { %3082 = vmatpush1.bf16.msra.mxu0 %v4939_v12  ;;  %v6472_v12 = vcombine.high %v6459_v30, %v6459_v30 }
 0x1aa   : > { %3123 = vmatpush1.bf16.msra.mxu1 %v4942_v13  ;;  %3083 = vmatprep.subr.bf16.mxu0 %v4947_v2  ;;  %v6476_v13 = vcombine.high %v6464_v31, %v6464_v31 }
 0x1ab   : > { %3124 = vmatprep.subr.bf16.mxu1 %v4950_v3 }
 0x1ad   : > { %3084 = vmatpush1.bf16.msra.mxu0 %v4945_v36 }
 0x1ae   : > { %3125 = vmatpush1.bf16.msra.mxu1 %v4948_v37  ;;  %3085 = vmatprep.subr.bf16.mxu0 %v4953_v0  ;;  %v5029_v37 = vld [vmem:[%s6366_s11 + $0xc0] ss:$16 sps:$4 sm:$0xff]  }
 0x1af   : > { %3126 = vmatprep.subr.bf16.mxu1 %v4956_v1  ;;  %v5032_v0 = vld [vmem:[%s6366_s11 + $0x2c0] ss:$16 sps:$4 sm:$0xff]  }
 0x1b1   : > { %3086 = vmatpush1.bf16.msra.mxu0 %v4951_v38 }
 0x1b2   : > { %3127 = vmatpush1.bf16.msra.mxu1 %v4954_v39  ;;  %3087 = vmatprep.subr.bf16.mxu0 %v4959_v40  ;;  %v5037_v39 = vld [vmem:[%s6366_s11 + $0xa4] ss:$16 sps:$4 sm:$0xff]  }
 0x1b3   : > { %3128 = vmatprep.subr.bf16.mxu1 %v4962_v41  ;;  %v5040_v40 = vld [vmem:[%s6366_s11 + $0x2a4] ss:$16 sps:$4 sm:$0xff]  }
 0x1b5   : > { %3088 = vmatpush1.bf16.msra.mxu0 %v4957_v42  ;;  %v5035_v42 = vld [vmem:[%s6366_s11 + $0xa0] ss:$16 sps:$4 sm:$0xff]  }
 0x1b6   : > { %3129 = vmatpush1.bf16.msra.mxu1 %v4960_v43  ;;  %3089 = vmatprep.subr.bf16.mxu0 %v4965_v44  ;;  %v5038_v43 = vld [vmem:[%s6366_s11 + $0x2a0] ss:$16 sps:$4 sm:$0xff]  }
 0x1b7   : > { %3130 = vmatprep.subr.bf16.mxu1 %v4968_v45 }
 0x1b9   : > { %3090 = vmatpush1.bf16.msra.mxu0 %v4963_v46  ;;  %v5043_v46 = vld [vmem:[%s6366_s11 + $0x84] ss:$16 sps:$4 sm:$0xff]  }
 0x1ba   : > { %3131 = vmatpush1.bf16.msra.mxu1 %v4966_v47  ;;  %3091 = vmatprep.subr.bf16.mxu0 %v4971_v48  ;;  %v5046_v47 = vld [vmem:[%s6366_s11 + $0x284] ss:$16 sps:$4 sm:$0xff]   ;;  %v5041_v48 = vld [vmem:[%s6366_s11 + $0x80] ss:$16 sps:$4 sm:$0xff]  }
 0x1bb   : > { %3132 = vmatprep.subr.bf16.mxu1 %v4974_v49  ;;  %v5044_v49 = vld [vmem:[%s6366_s11 + $0x280] ss:$16 sps:$4 sm:$0xff]  }
 0x1bd   : > { %3092 = vmatpush1.bf16.msra.mxu0 %v4969_v50  ;;  %v5049_v50 = vld [vmem:[%s6366_s11 + $0x64] ss:$16 sps:$4 sm:$0xff]  }
 0x1be   : > { %3133 = vmatpush1.bf16.msra.mxu1 %v4972_v51  ;;  %3093 = vmatprep.subr.bf16.mxu0 %v4977_v52  ;;  %v5052_v51 = vld [vmem:[%s6366_s11 + $0x264] ss:$16 sps:$4 sm:$0xff]   ;;  %v5047_v52 = vld [vmem:[%s6366_s11 + $0x60] ss:$16 sps:$4 sm:$0xff]  }
 0x1bf   : > { %3134 = vmatprep.subr.bf16.mxu1 %v4980_v53  ;;  %v5050_v53 = vld [vmem:[%s6366_s11 + $0x260] ss:$16 sps:$4 sm:$0xff]  }
 0x1c1   : > { %3094 = vmatpush2.bf16.msra.mxu0 %v4975_v54  ;;  %v5055_v54 = vld [vmem:[%s6366_s11 + $0x44] ss:$16 sps:$4 sm:$0xff]  }
 0x1c2   : > { %3135 = vmatpush2.bf16.msra.mxu1 %v4978_v55  ;;  %3095 = vmatprep.subr.bf16.mxu0 %v4983_v56  ;;  %v5058_v55 = vld [vmem:[%s6366_s11 + $0x244] ss:$16 sps:$4 sm:$0xff]   ;;  %v5053_v56 = vld [vmem:[%s6366_s11 + $0x40] ss:$16 sps:$4 sm:$0xff]  }
 0x1c3   : > { %3136 = vmatprep.subr.bf16.mxu1 %v4986_v57  ;;  %v5056_v57 = vld [vmem:[%s6366_s11 + $0x240] ss:$16 sps:$4 sm:$0xff]  }
 0x1c5   : > { %3096 = vmatpush2.bf16.msra.mxu0 %v4981_v58  ;;  %v5061_v58 = vld [vmem:[%s6366_s11 + $0x24] ss:$16 sps:$4 sm:$0xff]  }
 0x1c6   : > { %3137 = vmatpush2.bf16.msra.mxu1 %v4984_v59  ;;  %3097 = vmatprep.subr.bf16.mxu0 %v4989_v60  ;;  %v5064_v59 = vld [vmem:[%s6366_s11 + $0x224] ss:$16 sps:$4 sm:$0xff]   ;;  %v5059_v60 = vld [vmem:[%s6366_s11 + $0x20] ss:$16 sps:$4 sm:$0xff]  }
 0x1c7   : > { %3138 = vmatprep.subr.bf16.mxu1 %v4992_v61  ;;  %v5062_v61 = vld [vmem:[%s6366_s11 + $0x220] ss:$16 sps:$4 sm:$0xff]  }
 0x1c9   : > { %3098 = vmatpush2.bf16.msra.mxu0 %v4987_v62  ;;  %v5067_v62 = vld [vmem:[%s6366_s11 + $0x4] ss:$16 sps:$4 sm:$0xff]  }
 0x1ca   : > { %3139 = vmatpush2.bf16.msra.mxu1 %v4990_v63  ;;  %3099 = vmatprep.subr.bf16.mxu0 %v4995_v4  ;;  %v5070_v63 = vld [vmem:[%s6366_s11 + $0x204] ss:$16 sps:$4 sm:$0xff]   ;;  %v5065_v4 = vld [vmem:[%s6366_s11] ss:$16 sps:$4 sm:$0xff]  }
 0x1cb   : > { %3140 = vmatprep.subr.bf16.mxu1 %v4998_v5  ;;  %v5068_v5 = vld [vmem:[%s6366_s11 + $0x200] ss:$16 sps:$4 sm:$0xff]  }
 0x1cd   : > { %3100 = vmatpush2.bf16.msra.mxu0 %v4993_v6  ;;  %v5073_v6 = vld [vmem:[%s6366_s11 + $0x1e4] ss:$16 sps:$4 sm:$0xff]  }
 0x1ce   : > { %3141 = vmatpush2.bf16.msra.mxu1 %v4996_v7  ;;  %3101 = vmatprep.subr.bf16.mxu0 %v5001_v8  ;;  %v5076_v7 = vld [vmem:[%s6366_s11 + $0x3e4] ss:$16 sps:$4 sm:$0xff]   ;;  %v5071_v8 = vld [vmem:[%s6366_s11 + $0x1e0] ss:$16 sps:$4 sm:$0xff]  }
 0x1cf   : > { %3142 = vmatprep.subr.bf16.mxu1 %v5004_v9  ;;  %v5074_v9 = vld [vmem:[%s6366_s11 + $0x3e0] ss:$16 sps:$4 sm:$0xff]  }
 0x1d1   : > { %3102 = vmatpush2.bf16.msra.mxu0 %v4999_v14  ;;  %v5079_v14 = vld [vmem:[%s6366_s11 + $0x1c4] ss:$16 sps:$4 sm:$0xff]  }
 0x1d2   : > { %3143 = vmatpush2.bf16.msra.mxu1 %v5002_v15  ;;  %3103 = vmatprep.subr.bf16.mxu0 %v5007_v16  ;;  %v5082_v15 = vld [vmem:[%s6366_s11 + $0x3c4] ss:$16 sps:$4 sm:$0xff]   ;;  %v5077_v16 = vld [vmem:[%s6366_s11 + $0x1c0] ss:$16 sps:$4 sm:$0xff]  }
 0x1d3   : > { %3144 = vmatprep.subr.bf16.mxu1 %v5010_v17  ;;  %v5080_v17 = vld [vmem:[%s6366_s11 + $0x3c0] ss:$16 sps:$4 sm:$0xff]  }
 0x1d5   : > { %3104 = vmatpush2.bf16.msra.mxu0 %v5005_v18  ;;  %v5085_v18 = vld [vmem:[%s6366_s11 + $0x1a4] ss:$16 sps:$4 sm:$0xff]  }
 0x1d6   : > { %3145 = vmatpush2.bf16.msra.mxu1 %v5008_v19  ;;  %3105 = vmatprep.subr.bf16.mxu0 %v5013_v20  ;;  %v5088_v19 = vld [vmem:[%s6366_s11 + $0x3a4] ss:$16 sps:$4 sm:$0xff]   ;;  %v5083_v20 = vld [vmem:[%s6366_s11 + $0x1a0] ss:$16 sps:$4 sm:$0xff]  }
 0x1d7   : > { %3146 = vmatprep.subr.bf16.mxu1 %v5016_v21  ;;  %v5086_v21 = vld [vmem:[%s6366_s11 + $0x3a0] ss:$16 sps:$4 sm:$0xff]  }
 0x1d9   : > { %3106 = vmatpush2.bf16.msra.mxu0 %v5011_v24  ;;  %v5091_v24 = vld [vmem:[%s6366_s11 + $0x184] ss:$16 sps:$4 sm:$0xff]  }
 0x1da   : > { %3147 = vmatpush2.bf16.msra.mxu1 %v5014_v25  ;;  %3107 = vmatprep.subr.bf16.mxu0 %v5019_v26  ;;  %v5094_v25 = vld [vmem:[%s6366_s11 + $0x384] ss:$16 sps:$4 sm:$0xff]   ;;  %v5089_v26 = vld [vmem:[%s6366_s11 + $0x180] ss:$16 sps:$4 sm:$0xff]  }
 0x1db   : > { %3148 = vmatprep.subr.bf16.mxu1 %v5022_v27  ;;  %v5092_v27 = vld [vmem:[%s6366_s11 + $0x380] ss:$16 sps:$4 sm:$0xff]  }
 0x1dd   : > { %3108 = vmatpush2.bf16.msra.mxu0 %v5017_v10  ;;  %v5097_v10 = vld [vmem:[%s6366_s11 + $0x164] ss:$16 sps:$4 sm:$0xff]  }
 0x1de   : > { %3149 = vmatpush2.bf16.msra.mxu1 %v5020_v28  ;;  %3813 = vmatprep.subr.bf16.mxu0 %v5025_v11  ;;  %v5100_v28 = vld [vmem:[%s6366_s11 + $0x364] ss:$16 sps:$4 sm:$0xff]   ;;  %v5095_v11 = vld [vmem:[%s6366_s11 + $0x160] ss:$16 sps:$4 sm:$0xff]  }
 0x1df   : > { %3854 = vmatprep.subr.bf16.mxu1 %v5028_v29  ;;  %v5098_v29 = vld [vmem:[%s6366_s11 + $0x360] ss:$16 sps:$4 sm:$0xff]  }
 0x1e0   : > { %v2865_v2 = vpop.f32.mrf.mxu0  ;;  %3110 = vmatmul.mubr.bf16.vlgmr.msra.gmra.mxu0 %v6310_v22 }
 0x1e1   : > { %v2906_v3 = vpop.f32.mrf.mxu1  ;;  %3151 = vmatmul.mubr.bf16.vlgmr.msra.gmra.mxu1 %v6314_v23  ;;  %3814 = vmatpush1.bf16.msra.mxu0 %v5023_v32  ;;  %v5103_v32 = vld [vmem:[%s6366_s11 + $0x144] ss:$16 sps:$4 sm:$0xff]  }
 0x1e2   : > { %v6480_v36 = vadd.f32 %v2906_v3, %v2865_v2  ;;  %3855 = vmatpush1.bf16.msra.mxu1 %v5026_v33  ;;  %v2867_v1 = vpop.f32.mrf.mxu0  ;;  %3815 = vmatprep.subr.bf16.mxu0 %v5031_v34  ;;  %v5106_v33 = vld [vmem:[%s6366_s11 + $0x344] ss:$16 sps:$4 sm:$0xff]   ;;  %v5101_v34 = vld [vmem:[%s6366_s11 + $0x140] ss:$16 sps:$4 sm:$0xff]  }
 0x1e3   : > { %v2908_v38 = vpop.f32.mrf.mxu1  ;;  %3856 = vmatprep.subr.bf16.mxu1 %v5034_v35  ;;  %3845 = vmatprep.mubr.bf16.mxu0 %v6472_v12  ;;  %v5104_v35 = vld [vmem:[%s6366_s11 + $0x340] ss:$16 sps:$4 sm:$0xff]   ;;  %v5109_v2 = vld [vmem:[%s6366_s11 + $0x124] ss:$16 sps:$4 sm:$0xff]  }
 0x1e4   : > { %v6486_v41 = vadd.f32 %v2908_v38, %v2867_v1  ;;  %3886 = vmatprep.mubr.bf16.mxu1 %v6476_v13  ;;  %v2869_v22 = vpop.f32.mrf.mxu0  ;;  %v5112_v3 = vld [vmem:[%s6366_s11 + $0x324] ss:$16 sps:$4 sm:$0xff]  }
 0x1e5   : > { %v2910_v23 = vpop.f32.mrf.mxu1  ;;  %3816 = vmatpush1.bf16.msra.mxu0 %v5029_v37  ;;  %v5107_v37 = vld [vmem:[%s6366_s11 + $0x120] ss:$16 sps:$4 sm:$0xff]   ;;  %v5115_v1 = vld [vmem:[%s6366_s11 + $0x104] ss:$16 sps:$4 sm:$0xff]   ;;  %v5125_v22 = vld [vmem:[%s6366_s11 + $0xec] ss:$16 sps:$4 sm:$0xff]  }
 0x1e6   : > { %3857 = vmatpush1.bf16.msra.mxu1 %v5032_v0  ;;  %v2870_v44 = vpop.f32.mrf.mxu0  ;;  %3817 = vmatprep.subr.bf16.mxu0 %v5037_v39  ;;  %v5110_v0 = vld [vmem:[%s6366_s11 + $0x320] ss:$16 sps:$4 sm:$0xff]   ;;  %v5118_v38 = vld [vmem:[%s6366_s11 + $0x304] ss:$16 sps:$4 sm:$0xff]   ;;  %v5128_v23 = vld [vmem:[%s6366_s11 + $0x2ec] ss:$16 sps:$4 sm:$0xff]  }
 0x1e7   : > { %v2911_v45 = vpop.f32.mrf.mxu1  ;;  %3858 = vmatprep.subr.bf16.mxu1 %v5040_v40  ;;  %v5113_v39 = vld [vmem:[%s6366_s11 + $0x100] ss:$16 sps:$4 sm:$0xff]   ;;  %v5123_v44 = vld [vmem:[%s6366_s11 + $0xe8] ss:$16 sps:$4 sm:$0xff]  }
 0x1e8   : > { %v5116_v40 = vld [vmem:[%s6366_s11 + $0x300] ss:$16 sps:$4 sm:$0xff]   ;;  %v5126_v45 = vld [vmem:[%s6366_s11 + $0x2e8] ss:$16 sps:$4 sm:$0xff]  }
 0x1e9   : > { %3818 = vmatpush1.bf16.msra.mxu0 %v5035_v42  ;;  %v6548_v42 = vcombine.low %v6459_v30, %v6459_v30 }
 0x1ea   : > { %3859 = vmatpush1.bf16.msra.mxu1 %v5038_v43  ;;  %3819 = vmatprep.subr.bf16.mxu0 %v5043_v46  ;;  %v6552_v43 = vcombine.low %v6464_v31, %v6464_v31  ;;  %v5131_v46 = vld [vmem:[%s6366_s11 + $0xcc] ss:$16 sps:$4 sm:$0xff]   ;;  %v5129_v31 = vld [vmem:[%s6366_s11 + $0xc8] ss:$16 sps:$4 sm:$0xff]  }
 0x1eb   : > { %3860 = vmatprep.subr.bf16.mxu1 %v5046_v47  ;;  %v5134_v47 = vld [vmem:[%s6366_s11 + $0x2cc] ss:$16 sps:$4 sm:$0xff]  }
 0x1ed   : > { %3820 = vmatpush1.bf16.msra.mxu0 %v5041_v48 }
 0x1ee   : > { %3861 = vmatpush1.bf16.msra.mxu1 %v5044_v49  ;;  %3821 = vmatprep.subr.bf16.mxu0 %v5049_v50  ;;  %v5132_v50 = vld [vmem:[%s6366_s11 + $0x2c8] ss:$16 sps:$4 sm:$0xff]  }
 0x1ef   : > { %3862 = vmatprep.subr.bf16.mxu1 %v5052_v51 }
 0x1f1   : > { %3822 = vmatpush1.bf16.msra.mxu0 %v5047_v52 }
 0x1f2   : > { %3863 = vmatpush1.bf16.msra.mxu1 %v5050_v53  ;;  %3823 = vmatprep.subr.bf16.mxu0 %v5055_v54  ;;  %v5137_v53 = vld [vmem:[%s6366_s11 + $0xac] ss:$16 sps:$4 sm:$0xff]  }
 0x1f3   : > { %3864 = vmatprep.subr.bf16.mxu1 %v5058_v55  ;;  %v5140_v54 = vld [vmem:[%s6366_s11 + $0x2ac] ss:$16 sps:$4 sm:$0xff]  }
 0x1f5   : > { %3824 = vmatpush1.bf16.msra.mxu0 %v5053_v56 }
 0x1f6   : > { %3865 = vmatpush1.bf16.msra.mxu1 %v5056_v57  ;;  %3825 = vmatprep.subr.bf16.mxu0 %v5061_v58 }
 0x1f7   : > { %3866 = vmatprep.subr.bf16.mxu1 %v5064_v59  ;;  %v5135_v59 = vld [vmem:[%s6366_s11 + $0xa8] ss:$16 sps:$4 sm:$0xff]  }
 0x1f9   : > { %3826 = vmatpush1.bf16.msra.mxu0 %v5059_v60  ;;  %v5138_v60 = vld [vmem:[%s6366_s11 + $0x2a8] ss:$16 sps:$4 sm:$0xff]  }
 0x1fa   : > { %3867 = vmatpush1.bf16.msra.mxu1 %v5062_v61  ;;  %3827 = vmatprep.subr.bf16.mxu0 %v5067_v62 }
 0x1fb   : > { %3868 = vmatprep.subr.bf16.mxu1 %v5070_v63  ;;  %v5144_v63 = vld [vmem:[%s6366_s11 + $0x288] ss:$16 sps:$4 sm:$0xff]  }
 0x1fd   : > { %3828 = vmatpush1.bf16.msra.mxu0 %v5065_v4  ;;  %v5149_v4 = vld [vmem:[%s6366_s11 + $0x6c] ss:$16 sps:$4 sm:$0xff]  }
 0x1fe   : > { %3869 = vmatpush1.bf16.msra.mxu1 %v5068_v5  ;;  %3829 = vmatprep.subr.bf16.mxu0 %v5073_v6  ;;  %v5152_v5 = vld [vmem:[%s6366_s11 + $0x26c] ss:$16 sps:$4 sm:$0xff]   ;;  %v5147_v6 = vld [vmem:[%s6366_s11 + $0x68] ss:$16 sps:$4 sm:$0xff]  }
 0x1ff   : > { %3870 = vmatprep.subr.bf16.mxu1 %v5076_v7  ;;  %v5150_v7 = vld [vmem:[%s6366_s11 + $0x268] ss:$16 sps:$4 sm:$0xff]  }
 0x201   : > { %3830 = vmatpush2.bf16.msra.mxu0 %v5071_v8  ;;  %v5155_v8 = vld [vmem:[%s6366_s11 + $0x4c] ss:$16 sps:$4 sm:$0xff]  }
 0x202   : > { %3871 = vmatpush2.bf16.msra.mxu1 %v5074_v9  ;;  %3831 = vmatprep.subr.bf16.mxu0 %v5079_v14  ;;  %v5158_v9 = vld [vmem:[%s6366_s11 + $0x24c] ss:$16 sps:$4 sm:$0xff]   ;;  %v5153_v14 = vld [vmem:[%s6366_s11 + $0x48] ss:$16 sps:$4 sm:$0xff]  }
 0x203   : > { %3872 = vmatprep.subr.bf16.mxu1 %v5082_v15  ;;  %v5156_v15 = vld [vmem:[%s6366_s11 + $0x248] ss:$16 sps:$4 sm:$0xff]  }
 0x205   : > { %3832 = vmatpush2.bf16.msra.mxu0 %v5077_v16  ;;  %v5161_v16 = vld [vmem:[%s6366_s11 + $0x2c] ss:$16 sps:$4 sm:$0xff]  }
 0x206   : > { %3873 = vmatpush2.bf16.msra.mxu1 %v5080_v17  ;;  %3833 = vmatprep.subr.bf16.mxu0 %v5085_v18  ;;  %v5164_v17 = vld [vmem:[%s6366_s11 + $0x22c] ss:$16 sps:$4 sm:$0xff]   ;;  %v5159_v18 = vld [vmem:[%s6366_s11 + $0x28] ss:$16 sps:$4 sm:$0xff]  }
 0x207   : > { %3874 = vmatprep.subr.bf16.mxu1 %v5088_v19  ;;  %v5162_v19 = vld [vmem:[%s6366_s11 + $0x228] ss:$16 sps:$4 sm:$0xff]  }
 0x209   : > { %3834 = vmatpush2.bf16.msra.mxu0 %v5083_v20  ;;  %v5167_v20 = vld [vmem:[%s6366_s11 + $0xc] ss:$16 sps:$4 sm:$0xff]  }
 0x20a   : > { %3875 = vmatpush2.bf16.msra.mxu1 %v5086_v21  ;;  %3835 = vmatprep.subr.bf16.mxu0 %v5091_v24  ;;  %v5170_v21 = vld [vmem:[%s6366_s11 + $0x20c] ss:$16 sps:$4 sm:$0xff]   ;;  %v5165_v24 = vld [vmem:[%s6366_s11 + $0x8] ss:$16 sps:$4 sm:$0xff]  }
 0x20b   : > { %3876 = vmatprep.subr.bf16.mxu1 %v5094_v25  ;;  %v5168_v25 = vld [vmem:[%s6366_s11 + $0x208] ss:$16 sps:$4 sm:$0xff]  }
 0x20d   : > { %3836 = vmatpush2.bf16.msra.mxu0 %v5089_v26  ;;  %v5173_v26 = vld [vmem:[%s6366_s11 + $0x1ec] ss:$16 sps:$4 sm:$0xff]  }
 0x20e   : > { %3877 = vmatpush2.bf16.msra.mxu1 %v5092_v27  ;;  %3837 = vmatprep.subr.bf16.mxu0 %v5097_v10  ;;  %v5176_v27 = vld [vmem:[%s6366_s11 + $0x3ec] ss:$16 sps:$4 sm:$0xff]   ;;  %v5171_v10 = vld [vmem:[%s6366_s11 + $0x1e8] ss:$16 sps:$4 sm:$0xff]  }
 0x20f   : > { %3878 = vmatprep.subr.bf16.mxu1 %v5100_v28  ;;  %v5174_v28 = vld [vmem:[%s6366_s11 + $0x3e8] ss:$16 sps:$4 sm:$0xff]  }
 0x211   : > { %3838 = vmatpush2.bf16.msra.mxu0 %v5095_v11  ;;  %v5179_v11 = vld [vmem:[%s6366_s11 + $0x1cc] ss:$16 sps:$4 sm:$0xff]  }
 0x212   : > { %3879 = vmatpush2.bf16.msra.mxu1 %v5098_v29  ;;  %3839 = vmatprep.subr.bf16.mxu0 %v5103_v32  ;;  %v5182_v29 = vld [vmem:[%s6366_s11 + $0x3cc] ss:$16 sps:$4 sm:$0xff]   ;;  %v5177_v32 = vld [vmem:[%s6366_s11 + $0x1c8] ss:$16 sps:$4 sm:$0xff]  }
 0x213   : > { %3880 = vmatprep.subr.bf16.mxu1 %v5106_v33  ;;  %v5180_v33 = vld [vmem:[%s6366_s11 + $0x3c8] ss:$16 sps:$4 sm:$0xff]  }
 0x215   : > { %3840 = vmatpush2.bf16.msra.mxu0 %v5101_v34  ;;  %v5185_v34 = vld [vmem:[%s6366_s11 + $0x1ac] ss:$16 sps:$4 sm:$0xff]  }
 0x216   : > { %3881 = vmatpush2.bf16.msra.mxu1 %v5104_v35  ;;  %3841 = vmatprep.subr.bf16.mxu0 %v5109_v2  ;;  %v5188_v35 = vld [vmem:[%s6366_s11 + $0x3ac] ss:$16 sps:$4 sm:$0xff]   ;;  %v5183_v2 = vld [vmem:[%s6366_s11 + $0x1a8] ss:$16 sps:$4 sm:$0xff]  }
 0x217   : > { %3882 = vmatprep.subr.bf16.mxu1 %v5112_v3  ;;  %v5186_v3 = vld [vmem:[%s6366_s11 + $0x3a8] ss:$16 sps:$4 sm:$0xff]  }
 0x219   : > { %3842 = vmatpush2.bf16.msra.mxu0 %v5107_v37  ;;  %v5191_v37 = vld [vmem:[%s6366_s11 + $0x18c] ss:$16 sps:$4 sm:$0xff]  }
 0x21a   : > { %3883 = vmatpush2.bf16.msra.mxu1 %v5110_v0  ;;  %3843 = vmatprep.subr.bf16.mxu0 %v5115_v1  ;;  %v5194_v0 = vld [vmem:[%s6366_s11 + $0x38c] ss:$16 sps:$4 sm:$0xff]   ;;  %v5189_v1 = vld [vmem:[%s6366_s11 + $0x188] ss:$16 sps:$4 sm:$0xff]  }
 0x21b   : > { %3884 = vmatprep.subr.bf16.mxu1 %v5118_v38  ;;  %v5192_v38 = vld [vmem:[%s6366_s11 + $0x388] ss:$16 sps:$4 sm:$0xff]  }
 0x21d   : > { %3844 = vmatpush2.bf16.msra.mxu0 %v5113_v39  ;;  %v5197_v39 = vld [vmem:[%s6366_s11 + $0x16c] ss:$16 sps:$4 sm:$0xff]  }
 0x21e   : > { %3885 = vmatpush2.bf16.msra.mxu1 %v5116_v40  ;;  %3895 = vmatprep.subr.bf16.mxu0 %v5125_v22  ;;  %v5200_v40 = vld [vmem:[%s6366_s11 + $0x36c] ss:$16 sps:$4 sm:$0xff]   ;;  %v5195_v22 = vld [vmem:[%s6366_s11 + $0x168] ss:$16 sps:$4 sm:$0xff]  }
 0x21f   : > { %3936 = vmatprep.subr.bf16.mxu1 %v5128_v23  ;;  %v5198_v23 = vld [vmem:[%s6366_s11 + $0x368] ss:$16 sps:$4 sm:$0xff]  }
 0x220   : > { %v2947_v48 = vpop.f32.mrf.mxu0  ;;  %3846 = vmatmul.mubr.bf16.vlgmr.msra.gmra.mxu0 %v6548_v42 }
 0x221   : > { %v2988_v49 = vpop.f32.mrf.mxu1  ;;  %3887 = vmatmul.mubr.bf16.vlgmr.msra.gmra.mxu1 %v6552_v43  ;;  %v2948_v30 = vadd.f32 %v2947_v48, %v6480_v36  ;;  %3896 = vmatpush1.bf16.msra.mxu0 %v5123_v44  ;;  %v5203_v44 = vld [vmem:[%s6366_s11 + $0x14c] ss:$16 sps:$4 sm:$0xff]  }
 0x222   : > { %3937 = vmatpush1.bf16.msra.mxu1 %v5126_v45  ;;  %v2949_v51 = vpop.f32.mrf.mxu0  ;;  %3897 = vmatprep.subr.bf16.mxu0 %v5131_v46  ;;  %v5206_v45 = vld [vmem:[%s6366_s11 + $0x34c] ss:$16 sps:$4 sm:$0xff]   ;;  %v5201_v46 = vld [vmem:[%s6366_s11 + $0x148] ss:$16 sps:$4 sm:$0xff]  }
 0x223   : > { %v2990_v52 = vpop.f32.mrf.mxu1  ;;  %3938 = vmatprep.subr.bf16.mxu1 %v5134_v47  ;;  %v6565_v55 = vadd.f32 %v2988_v49, %v2948_v30  ;;  %v2950_v56 = vadd.f32 %v2949_v51, %v6486_v41  ;;  %3927 = vmatprep.mubr.bf16.mxu0 %v6472_v12  ;;  %v5143_v12 = vld [vmem:[%s6366_s11 + $0x8c] ss:$16 sps:$4 sm:$0xff]   ;;  %v5141_v41 = vld [vmem:[%s6366_s11 + $0x88] ss:$16 sps:$4 sm:$0xff]  }
 0x224   : > { %3968 = vmatprep.mubr.bf16.mxu1 %v6476_v13  ;;  %v2951_v36 = vpop.f32.mrf.mxu0  ;;  %v5146_v13 = vld [vmem:[%s6366_s11 + $0x28c] ss:$16 sps:$4 sm:$0xff]   ;;  %v5204_v47 = vld [vmem:[%s6366_s11 + $0x348] ss:$16 sps:$4 sm:$0xff]  }
 0x225   : > { %v2992_v57 = vpop.f32.mrf.mxu1  ;;  %v6570_v58 = vadd.f32 %v2990_v52, %v2950_v56  ;;  %3898 = vmatpush1.bf16.msra.mxu0 %v5129_v31  ;;  %v5209_v48 = vld [vmem:[%s6366_s11 + $0x12c] ss:$16 sps:$4 sm:$0xff]   ;;  %v5207_v30 = vld [vmem:[%s6366_s11 + $0x128] ss:$16 sps:$4 sm:$0xff]  }
 0x226   : > { %3939 = vmatpush1.bf16.msra.mxu1 %v5132_v50  ;;  %v2952_v61 = vpop.f32.mrf.mxu0  ;;  %3899 = vmatprep.subr.bf16.mxu0 %v5137_v53  ;;  %v5212_v49 = vld [vmem:[%s6366_s11 + $0x32c] ss:$16 sps:$4 sm:$0xff]   ;;  %v5210_v31 = vld [vmem:[%s6366_s11 + $0x328] ss:$16 sps:$4 sm:$0xff]  }
 0x227   : > { %v2993_v62 = vpop.f32.mrf.mxu1  ;;  %3940 = vmatprep.subr.bf16.mxu1 %v5140_v54  ;;  %v5215_v50 = vld [vmem:[%s6366_s11 + $0x10c] ss:$16 sps:$4 sm:$0xff]   ;;  %v5213_v52 = vld [vmem:[%s6366_s11 + $0x108] ss:$16 sps:$4 sm:$0xff]  }
 0x228   : > { %v5218_v51 = vld [vmem:[%s6366_s11 + $0x30c] ss:$16 sps:$4 sm:$0xff]   ;;  %v5216_v53 = vld [vmem:[%s6366_s11 + $0x308] ss:$16 sps:$4 sm:$0xff]  }
 0x229   : > { %3900 = vmatpush1.bf16.msra.mxu0 %v5135_v59 }
 0x22a   : > { %3941 = vmatpush1.bf16.msra.mxu1 %v5138_v60  ;;  %3901 = vmatprep.subr.bf16.mxu0 %v5143_v12 }
 0x22b   : > { %3942 = vmatprep.subr.bf16.mxu1 %v5146_v13 }
 0x22d   : > { %3902 = vmatpush1.bf16.msra.mxu0 %v5141_v41  ;;  %v3979_v41 = vlaneseq }
 0x22e   : > { %3943 = vmatpush1.bf16.msra.mxu1 %v5144_v63  ;;  %3903 = vmatprep.subr.bf16.mxu0 %v5149_v4 }
 0x22f   : > { %3944 = vmatprep.subr.bf16.mxu1 %v5152_v5 }
 0x231   : > { %3904 = vmatpush1.bf16.msra.mxu0 %v5147_v6 }
 0x232   : > { %3945 = vmatpush1.bf16.msra.mxu1 %v5150_v7  ;;  %3905 = vmatprep.subr.bf16.mxu0 %v5155_v8  ;;  %v3977_v8 = vld [vmem:[%s1115_s24] sm:$0xf] }
 0x233   : > { %3946 = vmatprep.subr.bf16.mxu1 %v5158_v9 }
 0x235   : > { %3906 = vmatpush1.bf16.msra.mxu0 %v5153_v14 }
 0x236   : > { %3947 = vmatpush1.bf16.msra.mxu1 %v5156_v15  ;;  %3907 = vmatprep.subr.bf16.mxu0 %v5161_v16 }
 0x237   : > { %3948 = vmatprep.subr.bf16.mxu1 %v5164_v17 }
 0x239   : > { %3908 = vmatpush1.bf16.msra.mxu0 %v5159_v18 }
 0x23a   : > { %3949 = vmatpush1.bf16.msra.mxu1 %v5162_v19  ;;  %3909 = vmatprep.subr.bf16.mxu0 %v5167_v20 }
 0x23b   : > { %3950 = vmatprep.subr.bf16.mxu1 %v5170_v21 }
 0x23d   : > { %3910 = vmatpush1.bf16.msra.mxu0 %v5165_v24 }
 0x23e   : > { %3951 = vmatpush1.bf16.msra.mxu1 %v5168_v25  ;;  %3911 = vmatprep.subr.bf16.mxu0 %v5173_v26 }
 0x23f   : > { %3952 = vmatprep.subr.bf16.mxu1 %v5176_v27 }
 0x241   : > { %3912 = vmatpush2.bf16.msra.mxu0 %v5171_v10 }
 0x242   : > { %3953 = vmatpush2.bf16.msra.mxu1 %v5174_v28  ;;  %3913 = vmatprep.subr.bf16.mxu0 %v5179_v11 }
 0x243   : > { %3954 = vmatprep.subr.bf16.mxu1 %v5182_v29 }
 0x245   : > { %3914 = vmatpush2.bf16.msra.mxu0 %v5177_v32 }
 0x246   : > { %3955 = vmatpush2.bf16.msra.mxu1 %v5180_v33  ;;  %3915 = vmatprep.subr.bf16.mxu0 %v5185_v34 }
 0x247   : > { %3956 = vmatprep.subr.bf16.mxu1 %v5188_v35 }
 0x249   : > { %3916 = vmatpush2.bf16.msra.mxu0 %v5183_v2 }
 0x24a   : > { %3957 = vmatpush2.bf16.msra.mxu1 %v5186_v3  ;;  %3917 = vmatprep.subr.bf16.mxu0 %v5191_v37 }
 0x24b   : > { %3958 = vmatprep.subr.bf16.mxu1 %v5194_v0 }
 0x24d   : > { %3918 = vmatpush2.bf16.msra.mxu0 %v5189_v1 }
 0x24e   : > { %3959 = vmatpush2.bf16.msra.mxu1 %v5192_v38  ;;  %3919 = vmatprep.subr.bf16.mxu0 %v5197_v39 }
 0x24f   : > { %3960 = vmatprep.subr.bf16.mxu1 %v5200_v40 }
 0x251   : > { %3920 = vmatpush2.bf16.msra.mxu0 %v5195_v22 }
 0x252   : > { %3961 = vmatpush2.bf16.msra.mxu1 %v5198_v23  ;;  %3921 = vmatprep.subr.bf16.mxu0 %v5203_v44 }
 0x253   : > { %3962 = vmatprep.subr.bf16.mxu1 %v5206_v45 }
 0x255   : > { %3922 = vmatpush2.bf16.msra.mxu0 %v5201_v46 }
 0x256   : > { %3963 = vmatpush2.bf16.msra.mxu1 %v5204_v47  ;;  %3923 = vmatprep.subr.bf16.mxu0 %v5209_v48 }
 0x257   : > { %3964 = vmatprep.subr.bf16.mxu1 %v5212_v49 }
 0x259   : > { %3924 = vmatpush2.bf16.msra.mxu0 %v5207_v30 }
 0x25a   : > { %3965 = vmatpush2.bf16.msra.mxu1 %v5210_v31  ;;  %3925 = vmatprep.subr.bf16.mxu0 %v5215_v50 }
 0x25b   : > { %3966 = vmatprep.subr.bf16.mxu1 %v5218_v51 }
 0x25d   : > { %3926 = vmatpush2.bf16.msra.mxu0 %v5213_v52 }
 0x25e   : > { %3967 = vmatpush2.bf16.msra.mxu1 %v5216_v53 }
 0x260   : > { %v3029_v54 = vpop.f32.mrf.mxu0  ;;  %3928 = vmatmul.mubr.bf16.vlgmr.msra.gmra.mxu0 %v6548_v42  ;;  %v3980_v42 = vshrl.u32 %v3979_v41, 7 }
 0x261   : > { %v3070_v56 = vpop.f32.mrf.mxu1  ;;  %3969 = vmatmul.mubr.bf16.vlgmr.msra.gmra.mxu1 %v6552_v43 }
 0x262   : > { %v3071_v36 = vadd.f32 %v3070_v56, %v3029_v54  ;;  %v3031_v57 = vpop.f32.mrf.mxu0  ;;  %v3989_v5 = vsub.s32 2, %v3980_v42  ;;  %v3993_v16 = vsub.s32 3, %v3980_v42  ;;  %v3981_v25 = vsub.s32 0, %v3980_v42 }
 0x263   : > { %v3072_v59 = vpop.f32.mrf.mxu1  ;;  %v3985_v26 = vsub.s32 1, %v3980_v42 }
 0x264   : > { %v3073_v60 = vadd.f32 %v3072_v59, %v3031_v57  ;;  %v3033_v61 = vpop.f32.mrf.mxu0  ;;  %v3990_v15 = vrot.slane %v3977_v8, %v3989_v5  ;;  %v3994_v20 = vrot.slane %v3977_v8, %v3993_v16  ;;  %v3982_v11 = vrot.slane %v3977_v8, %v3981_v25 }
 0x265   : > { %v3074_v62 = vpop.f32.mrf.mxu1  ;;  %v3986_v35 = vrot.slane %v3977_v8, %v3985_v26 }
 0x266   : > { %v3034_v12 = vpop.f32.mrf.mxu0 }
 0x267   : > { %v3075_v13 = vpop.f32.mrf.mxu1 }
 0x2a0   : > { %v3111_v43 = vpop.f32.mrf.mxu0 }
 0x2a1   : > { %v3152_v63 = vpop.f32.mrf.mxu1  ;;  %v3112_v4 = vadd.f32 %v3111_v43, %v3071_v36 }
 0x2a2   : > { %v3113_v6 = vpop.f32.mrf.mxu0 }
 0x2a3   : > { %v3154_v7 = vpop.f32.mrf.mxu1  ;;  %v3153_v9 = vadd.f32 %v3152_v63, %v3112_v4  ;;  %v3114_v14 = vadd.f32 %v3113_v6, %v3073_v60 }
 0x2a4   : > { %v3115_v17 = vpop.f32.mrf.mxu0 }
 0x2a5   : > { %v3156_v18 = vpop.f32.mrf.mxu1  ;;  %v3155_v19 = vadd.f32 %v3154_v7, %v3114_v14 }
 0x2a6   : > { %v3116_v21 = vpop.f32.mrf.mxu0 }
 0x2a7   : > { %v3157_v24 = vpop.f32.mrf.mxu1 }
 0x2e0   : > { %v3847_v27 = vpop.f32.mrf.mxu0 }
 0x2e1   : > { %v3888_v10 = vpop.f32.mrf.mxu1  ;;  %v3848_v28 = vadd.f32 %v3847_v27, %v6565_v55 }
 0x2e2   : > { %v3849_v29 = vpop.f32.mrf.mxu0 }
 0x2e3   : > { %v3890_v32 = vpop.f32.mrf.mxu1  ;;  %v3889_v33 = vadd.f32 %v3888_v10, %v3848_v28  ;;  %v3850_v34 = vadd.f32 %v3849_v29, %v6570_v58 }
 0x2e4   : > { %v3851_v2 = vpop.f32.mrf.mxu0 }
 0x2e5   : > { %v3892_v3 = vpop.f32.mrf.mxu1  ;;  %v3999_v37 = vadd.f32 %v3982_v11, %v3889_v33  ;;  %v3891_v0 = vadd.f32 %v3890_v32, %v3850_v34 }
 0x2e6   : > { %v3852_v1 = vpop.f32.mrf.mxu0 }
 0x2e7   : > { %v3893_v38 = vpop.f32.mrf.mxu1  ;;  %v4000_v39 = vadd.f32 %v3986_v35, %v3891_v0  ;;  %v4003_v40 = vmax.f32 %v3999_v37, 0.0 }
 0x2e9   : > { %v4004_v22 = vmax.f32 %v4000_v39, 0.0 }
 0x2eb   : > { %v4589_v55 = vpack.c.bf16 %v4004_v22, %v4003_v40 }
 0x2ed   : > { %4023 = vst [vmem:[%s1131_s28] sm:$0xff] %v4589_v55 }
 0x320   : > { %v3929_v23 = vpop.f32.mrf.mxu0 }
 0x321   : > { %v3970_v44 = vpop.f32.mrf.mxu1  ;;  %v3930_v58 = vadd.f32 %v3929_v23, %v3153_v9 }
 0x322   : > { %v3931_v45 = vpop.f32.mrf.mxu0 }
 0x323   : > { %v3972_v46 = vpop.f32.mrf.mxu1  ;;  %v3971_v47 = vadd.f32 %v3970_v44, %v3930_v58  ;;  %v3932_v48 = vadd.f32 %v3931_v45, %v3155_v19 }
 0x324   : > { %v3933_v49 = vpop.f32.mrf.mxu0 }
 0x325   : > { %v3974_v30 = vpop.f32.mrf.mxu1  ;;  %v4001_v31 = vadd.f32 %v3990_v15, %v3971_v47  ;;  %v3973_v50 = vadd.f32 %v3972_v46, %v3932_v48 }
 0x326   : > { %v3934_v51 = vpop.f32.mrf.mxu0 }
 0x327   : > { %v3975_v52 = vpop.f32.mrf.mxu1  ;;  %v4002_v53 = vadd.f32 %v3994_v20, %v3973_v50  ;;  %v4005_v54 = vmax.f32 %v4001_v31, 0.0 }
 0x329   : > { %v4006_v56 = vmax.f32 %v4002_v53, 0.0 }
 0x32b   : > { %v4590_v36 = vpack.c.bf16 %v4006_v56, %v4005_v54 }
 0x32d   : > { %4024 = vst [vmem:[%s1131_s28 + $0x8] sm:$0xff] %v4590_v36 }
 0x32e PF: > { %s15_s22 = sadd.s32 1, %s5257_s22   ;;  %s6663_s18 = smov %s5245_s19 }
 0x32f   : > { %p12_p10 = scmp.ge.s32.totalorder %s15_s22, 6   ;;  %s6664_s19 = smov %s5328_s27 }
 0x330   : > { %s6665_s20 = smov %s5253_s21  ;;  %s6666_s21 = smov %s6668_s23 }
 0x331   :  { %14 = sbr.rel (!%p12_p10) target bundleno = 3 (0x3), region = 138 }

</bundles_post_ra>
